<compile_context>
chip_gen: v6e
topology: v6e:2x2x1
jax: 0.10.0
libtpu: 0.0.40
codegen_flags: <defaults>
</compile_context>

<pallas_src>
import jax
import jax.numpy as jnp
import numpy as np
from jax.experimental import pallas as pl
from jax.experimental.pallas import tpu as pltpu

FEATURE_CH = 512
INPUT_CH = 67
MLP_CH = 1024
EDGE_NUM = 2
L = EDGE_NUM + 1          # conv spatial length (= 3)
OUT_CH = 1                # critic head

CIN_PAD = 128             # INPUT_CH padded to lane width
OUT_PAD = 128             # head padded to lane width (lane-dense store)
TM_MAX = 512              # max batch-tile rows per grid step
ROW_ALIGN = 16            # row quantum: bf16 sublane pack (16) and f32 (8) friendly


def _round_up(a, b):
    return (a + b - 1) // b * b


def _cdiv(a, b):
    return -(-a // b)


def _choose_tile(n):
    """Balanced batch tiles: multiple of ROW_ALIGN, <= TM_MAX, and (for n large
    enough) an even tile count so v7x's two TensorCores both get work."""
    n_al = _round_up(max(n, 1), ROW_ALIGN)
    if n_al <= ROW_ALIGN:
        return ROW_ALIGN, ROW_ALIGN
    num_tiles = max(2, _cdiv(n_al, TM_MAX))
    if num_tiles % 2:
        num_tiles += 1                      # even split across the 2 TCs on v7x
    tm = _round_up(_cdiv(n_al, num_tiles), ROW_ALIGN)
    return tm, tm * num_tiles


# ----------------------------------------------------------------------------
# Pallas kernel: per-batch-tile fused forward (3x conv1x1 + ReLU, 3-layer MLP)
# ----------------------------------------------------------------------------
def critic_kernel(x_ref,                                    # (L, TM, CIN_PAD) bf16
                  wc1_ref, bc1_ref,                         # (128,512) bf16, (1,512) f32
                  wc2_ref, bc2_ref,                         # (512,512) bf16, (1,512) f32
                  wc3_ref, bc3_ref,                         # (512,512) bf16, (1,512) f32
                  w1a_ref, w1b_ref, w1c_ref, b1_ref,        # 3x(512,1024) bf16, (1,1024) f32
                  w2_ref, b2_ref,                           # (1024,1024) bf16, (1,1024) f32
                  w3_ref, b3_ref,                           # (1024,128) bf16, (1,128) f32
                  out_ref):                                 # (TM, 128) f32
    tm = out_ref.shape[0]
    bf16 = jnp.bfloat16

    def mm(a_bf16, w_ref):
        # bf16 x bf16 MXU matmul, f32 accumulation
        return jnp.dot(a_bf16, w_ref[...], preferred_element_type=jnp.float32)

    def act(acc_f32, b_ref):
        # f32 bias + ReLU (portable to v5e: no bf16 VALU), then one cast to bf16
        return jnp.maximum(acc_f32 + b_ref[...], 0.0).astype(bf16)

    # (L, TM, C) -> (L*TM, C); rows ordered (l, n); already bf16
    x = x_ref[...].reshape(L * tm, CIN_PAD)

    # conv blocks 1..3: Conv1d(kernel=1) == per-row matmul, bias+ReLU, bf16 store
    h = act(mm(x, wc1_ref), bc1_ref)
    h = act(mm(h, wc2_ref), bc2_ref)
    h = act(mm(h, wc3_ref), bc3_ref)                          # (L*TM, 512) bf16

    # MLP layer 1 == Linear over PyTorch flatten (index c*L + l), realized as a
    # K-split over l; sequential f32 accumulation keeps one live (TM,1024) temp.
    u = mm(h[0 * tm:1 * tm], w1a_ref)
    u = u + mm(h[1 * tm:2 * tm], w1b_ref)
    u = u + mm(h[2 * tm:3 * tm], w1c_ref)
    u = act(u, b1_ref)                                        # (TM, 1024) bf16

    # MLP layer 2 + ReLU
    z = act(mm(u, w2_ref), b2_ref)                            # (TM, 1024) bf16

    # lane-dense padded head (column 0 holds the critic value)
    out_ref[...] = mm(z, w3_ref) + b3_ref[...]                # (TM, 128) f32


# ----------------------------------------------------------------------------
# Parameter construction (deterministic, PyTorch-default-like uniform init)
# ----------------------------------------------------------------------------
def _uniform(key, shape, fan_in):
    bound = 1.0 / np.sqrt(fan_in)
    return jax.random.uniform(key, shape, jnp.float32, minval=-bound, maxval=bound)


def init_params(seed=0):
    keys = jax.random.split(jax.random.PRNGKey(seed), 12)
    p = {}
    # Conv1d weights stored PyTorch-style (out_ch, in_ch) [kernel size 1 squeezed]
    p["wc1"] = _uniform(keys[0], (FEATURE_CH, INPUT_CH), INPUT_CH)
    p["bc1"] = _uniform(keys[1], (FEATURE_CH,), INPUT_CH)
    p["wc2"] = _uniform(keys[2], (FEATURE_CH, FEATURE_CH), FEATURE_CH)
    p["bc2"] = _uniform(keys[3], (FEATURE_CH,), FEATURE_CH)
    p["wc3"] = _uniform(keys[4], (FEATURE_CH, FEATURE_CH), FEATURE_CH)
    p["bc3"] = _uniform(keys[5], (FEATURE_CH,), FEATURE_CH)
    mlp_in = L * FEATURE_CH
    p["w1"] = _uniform(keys[6], (MLP_CH, mlp_in), mlp_in)    # (1024, 1536)
    p["b1"] = _uniform(keys[7], (MLP_CH,), mlp_in)
    p["w2"] = _uniform(keys[8], (MLP_CH, MLP_CH), MLP_CH)
    p["b2"] = _uniform(keys[9], (MLP_CH,), MLP_CH)
    p["w3"] = _uniform(keys[10], (OUT_CH, MLP_CH), MLP_CH)   # (1, 1024)
    p["b3"] = _uniform(keys[11], (OUT_CH,), MLP_CH)
    return p


def pack_params(params):
    """One-time weight packing (hoisted out of the forward path):
    transposes, fc1 column split by conv position, lane padding, bf16 cast."""
    bf, f32 = jnp.bfloat16, jnp.float32
    packed = {}
    packed["wc1"] = jnp.pad(params["wc1"].T,
                            ((0, CIN_PAD - INPUT_CH), (0, 0))).astype(bf)   # (128, 512)
    packed["bc1"] = params["bc1"].reshape(1, -1).astype(f32)
    packed["wc2"] = params["wc2"].T.astype(bf)                               # (512, 512)
    packed["bc2"] = params["bc2"].reshape(1, -1).astype(f32)
    packed["wc3"] = params["wc3"].T.astype(bf)                               # (512, 512)
    packed["bc3"] = params["bc3"].reshape(1, -1).astype(f32)
    w1 = params["w1"]                                # (1024, 1536), flatten index c*L + l
    packed["w1a"] = w1[:, 0::L].T.astype(bf)         # (512, 1024)
    packed["w1b"] = w1[:, 1::L].T.astype(bf)
    packed["w1c"] = w1[:, 2::L].T.astype(bf)
    packed["b1"] = params["b1"].reshape(1, -1).astype(f32)
    packed["w2"] = params["w2"].T.astype(bf)                                 # (1024, 1024)
    packed["b2"] = params["b2"].reshape(1, -1).astype(f32)
    packed["w3"] = jnp.pad(params["w3"].T,
                           ((0, 0), (0, OUT_PAD - OUT_CH))).astype(bf)       # (1024, 128)
    packed["b3"] = jnp.pad(params["b3"].reshape(1, -1),
                           ((0, 0), (0, OUT_PAD - OUT_CH))).astype(f32)      # (1, 128)
    return packed


# ----------------------------------------------------------------------------
# Wrapper: layout glue + gridded pallas_call
# ----------------------------------------------------------------------------
WEIGHT_KEYS = ("wc1", "bc1", "wc2", "bc2", "wc3", "bc3",
               "w1a", "w1b", "w1c", "b1", "w2", "b2", "w3", "b3")


def critic_forward(obs, packed):
    """obs: (N, INPUT_CH, L) float-castable array (PyTorch NCL). Returns (N, 1) f32."""
    x = jnp.asarray(obs, jnp.float32)        # torch.tensor(state).float()
    n = x.shape[0]

    tm, n_pad = _choose_tile(n)              # balanced tiles, even count for v7x 2-TC
    grid_m = n_pad // tm

    # (N, C, L) -> (L, N, C), zero-pad batch rows + input channels (67 -> 128),
    # cast to bf16 once in the wrapper: halves the per-tile x DMA and kills the
    # in-kernel cast.
    xl = jnp.transpose(x, (2, 0, 1))
    xl = jnp.pad(xl, ((0, 0), (0, n_pad - n),
                      (0, CIN_PAD - INPUT_CH))).astype(jnp.bfloat16)

    weights = [packed[k] for k in WEIGHT_KEYS]

    def weight_spec(arr):
        # Whole-array block, constant index_map -> DMA'd once, stays resident.
        # Single-buffered (never re-fetched) so it doesn't reserve 2x VMEM.
        return pl.BlockSpec(arr.shape, lambda i: (0, 0),
                            pipeline_mode=pl.Buffered(1))

    in_specs = [pl.BlockSpec((L, tm, CIN_PAD), lambda i: (0, i, 0))]   # x batch tile
    in_specs += [weight_spec(w) for w in weights]
    out_specs = pl.BlockSpec((tm, OUT_PAD), lambda i: (i, 0))

    # Advisory cost hint for the XLA scheduler
    macs_per_row = (L * (CIN_PAD * FEATURE_CH + 2 * FEATURE_CH * FEATURE_CH)
                    + L * FEATURE_CH * MLP_CH + MLP_CH * MLP_CH + MLP_CH * OUT_PAD)
    weight_bytes = sum(int(np.prod(w.shape)) * w.dtype.itemsize for w in weights)
    cost = pl.CostEstimate(
        flops=2 * n_pad * macs_per_row,
        transcendentals=0,
        bytes_accessed=int(weight_bytes
                           + int(np.prod(xl.shape)) * 2      # bf16 input stream
                           + n_pad * OUT_PAD * 4),
    )

    out = pl.pallas_call(
        critic_kernel,
        out_shape=jax.ShapeDtypeStruct((n_pad, OUT_PAD), jnp.float32),
        grid_spec=pltpu.PrefetchScalarGridSpec(
            num_scalar_prefetch=0,
            grid=(grid_m,),
            in_specs=in_specs,
            out_specs=out_specs,
        ),
        compiler_params=pltpu.CompilerParams(
            dimension_semantics=("parallel",),   # batch tiles independent; v7x 2-TC shard
            vmem_limit_bytes=48 << 20,           # < v7x 64 MiB physical; real use ~20 MiB
        ),
        cost_estimate=cost,
    )(xl, *weights)

    return out[:n, :OUT_CH]

# TODO(synk): for the tiny-batch repeated-call RL serving regime the kernel is
# weight-DMA-bound (~6.4 MiB of bf16 weights re-fetched per call); amortize by
# batching states per call or a cross-call weight-resident (P10) scheme.


# ----------------------------------------------------------------------------
# Pure-JAX references for validation
# ----------------------------------------------------------------------------
def critic_reference(obs, params):
    """f32 reference mirroring the PyTorch forward exactly."""
    x = jnp.asarray(obs, jnp.float32)                       # (N, 67, 3)
    relu = lambda t: jnp.maximum(t, 0.0)
    h = relu(jnp.einsum("oc,ncl->nol", params["wc1"], x) + params["bc1"][None, :, None])
    h = relu(jnp.einsum("oc,ncl->nol", params["wc2"], h) + params["bc2"][None, :, None])
    h = relu(jnp.einsum("oc,ncl->nol", params["wc3"], h) + params["bc3"][None, :, None])
    flat = h.reshape(h.shape[0], -1)                        # (N, 512*3), index c*L+l
    u = relu(flat @ params["w1"].T + params["b1"])
    z = relu(u @ params["w2"].T + params["b2"])
    return z @ params["w3"].T + params["b3"]                # (N, 1)


def critic_reference_matched(obs, packed):
    """Reference using the same bf16 weights/activations + f32 accumulation as the kernel."""
    x = jnp.asarray(obs, jnp.float32)
    n = x.shape[0]
    xl = jnp.transpose(x, (2, 0, 1))
    xl = jnp.pad(xl, ((0, 0), (0, 0),
                      (0, CIN_PAD - INPUT_CH))).astype(jnp.bfloat16)
    flat = xl.reshape(L * n, CIN_PAD)
    mm = lambda a, w: jnp.dot(a, w, preferred_element_type=jnp.float32)
    act = lambda t, b: jnp.maximum(t + b, 0.0).astype(jnp.bfloat16)
    h = act(mm(flat, packed["wc1"]), packed["bc1"])
    h = act(mm(h, packed["wc2"]), packed["bc2"])
    h = act(mm(h, packed["wc3"]), packed["bc3"])
    u = mm(h[0 * n:1 * n], packed["w1a"])
    u = u + mm(h[1 * n:2 * n], packed["w1b"])
    u = u + mm(h[2 * n:3 * n], packed["w1c"])
    u = act(u, packed["b1"])
    z = act(mm(u, packed["w2"]), packed["b2"])
    return (mm(z, packed["w3"]) + packed["b3"])[:, :OUT_CH]


if __name__ == "__main__":
    batch = 2
    key = jax.random.PRNGKey(0)
    obs = jax.random.normal(key, (batch, INPUT_CH, L), dtype=jnp.float32)

    params = init_params(seed=0)
    packed = pack_params(params)     # one-time packing, hoisted out of the forward path

    v = critic_forward(obs, packed)
    v = jax.block_until_ready(v)
    assert v.shape == (batch, OUT_CH), v.shape

    # Exact-math check vs a bf16-matched pure-JAX reference (same weights/casts).
    v_matched = critic_reference_matched(obs, packed)
    np.testing.assert_allclose(np.asarray(v), np.asarray(v_matched), rtol=2e-3, atol=2e-3)

    # Looser sanity check vs the full-f32 PyTorch-equivalent reference (bf16 drift).
    v_f32 = critic_reference(obs, params)
    np.testing.assert_allclose(np.asarray(v), np.asarray(v_f32), rtol=1e-1, atol=1e-1)

    print("KERNEL_OK")
</pallas_src>

<mosaic_0001>
module attributes {stable_mosaic.version = 11 : i64} {
  func.func @critic_kernel(%arg0: i32, %arg1: memref<3x16x128xbf16, #tpu.memory_space<vmem>>, %arg2: memref<128x512xbf16, #tpu.memory_space<vmem>>, %arg3: memref<1x512xf32, #tpu.memory_space<vmem>>, %arg4: memref<512x512xbf16, #tpu.memory_space<vmem>>, %arg5: memref<1x512xf32, #tpu.memory_space<vmem>>, %arg6: memref<512x512xbf16, #tpu.memory_space<vmem>>, %arg7: memref<1x512xf32, #tpu.memory_space<vmem>>, %arg8: memref<512x1024xbf16, #tpu.memory_space<vmem>>, %arg9: memref<512x1024xbf16, #tpu.memory_space<vmem>>, %arg10: memref<512x1024xbf16, #tpu.memory_space<vmem>>, %arg11: memref<1x1024xf32, #tpu.memory_space<vmem>>, %arg12: memref<1024x1024xbf16, #tpu.memory_space<vmem>>, %arg13: memref<1x1024xf32, #tpu.memory_space<vmem>>, %arg14: memref<1024x128xbf16, #tpu.memory_space<vmem>>, %arg15: memref<1x128xf32, #tpu.memory_space<vmem>>, %arg16: memref<16x128xf32, #tpu.memory_space<vmem>>) attributes {dimension_semantics = [#tpu.dimension_semantics<parallel>], iteration_bounds = array<i64: 1>, scalar_prefetch = 0 : i64, scratch_operands = 0 : i64, tpu.core_type = #tpu.core_type<tc>, window_params = [{transform_indices = @transform_0, window_bounds = array<i64: 3, 16, 128>}, {pipeline_mode = #tpu.pipeline_mode<synchronous>, transform_indices = @transform_1, window_bounds = array<i64: 128, 512>}, {pipeline_mode = #tpu.pipeline_mode<synchronous>, transform_indices = @transform_2, window_bounds = array<i64: 1, 512>}, {pipeline_mode = #tpu.pipeline_mode<synchronous>, transform_indices = @transform_3, window_bounds = array<i64: 512, 512>}, {pipeline_mode = #tpu.pipeline_mode<synchronous>, transform_indices = @transform_4, window_bounds = array<i64: 1, 512>}, {pipeline_mode = #tpu.pipeline_mode<synchronous>, transform_indices = @transform_5, window_bounds = array<i64: 512, 512>}, {pipeline_mode = #tpu.pipeline_mode<synchronous>, transform_indices = @transform_6, window_bounds = array<i64: 1, 512>}, {pipeline_mode = #tpu.pipeline_mode<synchronous>, transform_indices = @transform_7, window_bounds = array<i64: 512, 1024>}, {pipeline_mode = #tpu.pipeline_mode<synchronous>, transform_indices = @transform_8, window_bounds = array<i64: 512, 1024>}, {pipeline_mode = #tpu.pipeline_mode<synchronous>, transform_indices = @transform_9, window_bounds = array<i64: 512, 1024>}, {pipeline_mode = #tpu.pipeline_mode<synchronous>, transform_indices = @transform_10, window_bounds = array<i64: 1, 1024>}, {pipeline_mode = #tpu.pipeline_mode<synchronous>, transform_indices = @transform_11, window_bounds = array<i64: 1024, 1024>}, {pipeline_mode = #tpu.pipeline_mode<synchronous>, transform_indices = @transform_12, window_bounds = array<i64: 1, 1024>}, {pipeline_mode = #tpu.pipeline_mode<synchronous>, transform_indices = @transform_13, window_bounds = array<i64: 1024, 128>}, {pipeline_mode = #tpu.pipeline_mode<synchronous>, transform_indices = @transform_14, window_bounds = array<i64: 1, 128>}, {transform_indices = @transform_15, window_bounds = array<i64: 16, 128>}]} {
    %c0 = arith.constant 0 : index
    %c0_0 = arith.constant 0 : index
    %c0_1 = arith.constant 0 : index
    %0 = vector.load %arg1[%c0, %c0_0, %c0_1] : memref<3x16x128xbf16, #tpu.memory_space<vmem>>, vector<3x16x128xbf16>
    %1 = vector.shape_cast %0 : vector<3x16x128xbf16> to vector<48x128xbf16>
    %c0_2 = arith.constant 0 : index
    %c0_3 = arith.constant 0 : index
    %2 = vector.load %arg2[%c0_2, %c0_3] : memref<128x512xbf16, #tpu.memory_space<vmem>>, vector<128x512xbf16>
    %cst = arith.constant dense<0.000000e+00> : vector<48x512xf32>
    %3 = tpu.matmul %1, %2, %cst {dimension_numbers = #tpu.dot_dimension_numbers<[1], [0], [0], [1], [0, 0, 1, 1], [], []>} : vector<48x128xbf16>, vector<128x512xbf16>, vector<48x512xf32> -> vector<48x512xf32>
    %c0_4 = arith.constant 0 : index
    %c0_5 = arith.constant 0 : index
    %4 = vector.load %arg3[%c0_4, %c0_5] : memref<1x512xf32, #tpu.memory_space<vmem>>, vector<1x512xf32>
    %5 = vector.broadcast %4 : vector<1x512xf32> to vector<48x512xf32>
    %6 = arith.addf %3, %5 : vector<48x512xf32>
    %cst_6 = arith.constant 0.000000e+00 : f32
    %7 = vector.broadcast %cst_6 : f32 to vector<48x512xf32>
    %8 = arith.maximumf %6, %7 : vector<48x512xf32>
    %9 = arith.truncf %8 : vector<48x512xf32> to vector<48x512xbf16>
    %c0_7 = arith.constant 0 : index
    %c0_8 = arith.constant 0 : index
    %10 = vector.load %arg4[%c0_7, %c0_8] : memref<512x512xbf16, #tpu.memory_space<vmem>>, vector<512x512xbf16>
    %cst_9 = arith.constant dense<0.000000e+00> : vector<48x512xf32>
    %11 = tpu.matmul %9, %10, %cst_9 {dimension_numbers = #tpu.dot_dimension_numbers<[1], [0], [0], [1], [0, 0, 1, 1], [], []>} : vector<48x512xbf16>, vector<512x512xbf16>, vector<48x512xf32> -> vector<48x512xf32>
    %c0_10 = arith.constant 0 : index
    %c0_11 = arith.constant 0 : index
    %12 = vector.load %arg5[%c0_10, %c0_11] : memref<1x512xf32, #tpu.memory_space<vmem>>, vector<1x512xf32>
    %13 = vector.broadcast %12 : vector<1x512xf32> to vector<48x512xf32>
    %14 = arith.addf %11, %13 : vector<48x512xf32>
    %cst_12 = arith.constant 0.000000e+00 : f32
    %15 = vector.broadcast %cst_12 : f32 to vector<48x512xf32>
    %16 = arith.maximumf %14, %15 : vector<48x512xf32>
    %17 = arith.truncf %16 : vector<48x512xf32> to vector<48x512xbf16>
    %c0_13 = arith.constant 0 : index
    %c0_14 = arith.constant 0 : index
    %18 = vector.load %arg6[%c0_13, %c0_14] : memref<512x512xbf16, #tpu.memory_space<vmem>>, vector<512x512xbf16>
    %cst_15 = arith.constant dense<0.000000e+00> : vector<48x512xf32>
    %19 = tpu.matmul %17, %18, %cst_15 {dimension_numbers = #tpu.dot_dimension_numbers<[1], [0], [0], [1], [0, 0, 1, 1], [], []>} : vector<48x512xbf16>, vector<512x512xbf16>, vector<48x512xf32> -> vector<48x512xf32>
    %c0_16 = arith.constant 0 : index
    %c0_17 = arith.constant 0 : index
    %20 = vector.load %arg7[%c0_16, %c0_17] : memref<1x512xf32, #tpu.memory_space<vmem>>, vector<1x512xf32>
    %21 = vector.broadcast %20 : vector<1x512xf32> to vector<48x512xf32>
    %22 = arith.addf %19, %21 : vector<48x512xf32>
    %cst_18 = arith.constant 0.000000e+00 : f32
    %23 = vector.broadcast %cst_18 : f32 to vector<48x512xf32>
    %24 = arith.maximumf %22, %23 : vector<48x512xf32>
    %25 = arith.truncf %24 : vector<48x512xf32> to vector<48x512xbf16>
    %26 = vector.extract_strided_slice %25 {offsets = [0, 0], sizes = [16, 512], strides = [1, 1]} : vector<48x512xbf16> to vector<16x512xbf16>
    %c0_19 = arith.constant 0 : index
    %c0_20 = arith.constant 0 : index
    %27 = vector.load %arg8[%c0_19, %c0_20] : memref<512x1024xbf16, #tpu.memory_space<vmem>>, vector<512x1024xbf16>
    %cst_21 = arith.constant dense<0.000000e+00> : vector<16x1024xf32>
    %28 = tpu.matmul %26, %27, %cst_21 {dimension_numbers = #tpu.dot_dimension_numbers<[1], [0], [0], [1], [0, 0, 1, 1], [], []>} : vector<16x512xbf16>, vector<512x1024xbf16>, vector<16x1024xf32> -> vector<16x1024xf32>
    %29 = vector.extract_strided_slice %25 {offsets = [16, 0], sizes = [16, 512], strides = [1, 1]} : vector<48x512xbf16> to vector<16x512xbf16>
    %c0_22 = arith.constant 0 : index
    %c0_23 = arith.constant 0 : index
    %30 = vector.load %arg9[%c0_22, %c0_23] : memref<512x1024xbf16, #tpu.memory_space<vmem>>, vector<512x1024xbf16>
    %cst_24 = arith.constant dense<0.000000e+00> : vector<16x1024xf32>
    %31 = tpu.matmul %29, %30, %cst_24 {dimension_numbers = #tpu.dot_dimension_numbers<[1], [0], [0], [1], [0, 0, 1, 1], [], []>} : vector<16x512xbf16>, vector<512x1024xbf16>, vector<16x1024xf32> -> vector<16x1024xf32>
    %32 = arith.addf %28, %31 : vector<16x1024xf32>
    %33 = vector.extract_strided_slice %25 {offsets = [32, 0], sizes = [16, 512], strides = [1, 1]} : vector<48x512xbf16> to vector<16x512xbf16>
    %c0_25 = arith.constant 0 : index
    %c0_26 = arith.constant 0 : index
    %34 = vector.load %arg10[%c0_25, %c0_26] : memref<512x1024xbf16, #tpu.memory_space<vmem>>, vector<512x1024xbf16>
    %cst_27 = arith.constant dense<0.000000e+00> : vector<16x1024xf32>
    %35 = tpu.matmul %33, %34, %cst_27 {dimension_numbers = #tpu.dot_dimension_numbers<[1], [0], [0], [1], [0, 0, 1, 1], [], []>} : vector<16x512xbf16>, vector<512x1024xbf16>, vector<16x1024xf32> -> vector<16x1024xf32>
    %36 = arith.addf %32, %35 : vector<16x1024xf32>
    %c0_28 = arith.constant 0 : index
    %c0_29 = arith.constant 0 : index
    %37 = vector.load %arg11[%c0_28, %c0_29] : memref<1x1024xf32, #tpu.memory_space<vmem>>, vector<1x1024xf32>
    %38 = vector.broadcast %37 : vector<1x1024xf32> to vector<16x1024xf32>
    %39 = arith.addf %36, %38 : vector<16x1024xf32>
    %cst_30 = arith.constant 0.000000e+00 : f32
    %40 = vector.broadcast %cst_30 : f32 to vector<16x1024xf32>
    %41 = arith.maximumf %39, %40 : vector<16x1024xf32>
    %42 = arith.truncf %41 : vector<16x1024xf32> to vector<16x1024xbf16>
    %c0_31 = arith.constant 0 : index
    %c0_32 = arith.constant 0 : index
    %43 = vector.load %arg12[%c0_31, %c0_32] : memref<1024x1024xbf16, #tpu.memory_space<vmem>>, vector<1024x1024xbf16>
    %cst_33 = arith.constant dense<0.000000e+00> : vector<16x1024xf32>
    %44 = tpu.matmul %42, %43, %cst_33 {dimension_numbers = #tpu.dot_dimension_numbers<[1], [0], [0], [1], [0, 0, 1, 1], [], []>} : vector<16x1024xbf16>, vector<1024x1024xbf16>, vector<16x1024xf32> -> vector<16x1024xf32>
    %c0_34 = arith.constant 0 : index
    %c0_35 = arith.constant 0 : index
    %45 = vector.load %arg13[%c0_34, %c0_35] : memref<1x1024xf32, #tpu.memory_space<vmem>>, vector<1x1024xf32>
    %46 = vector.broadcast %45 : vector<1x1024xf32> to vector<16x1024xf32>
    %47 = arith.addf %44, %46 : vector<16x1024xf32>
    %cst_36 = arith.constant 0.000000e+00 : f32
    %48 = vector.broadcast %cst_36 : f32 to vector<16x1024xf32>
    %49 = arith.maximumf %47, %48 : vector<16x1024xf32>
    %50 = arith.truncf %49 : vector<16x1024xf32> to vector<16x1024xbf16>
    %c0_37 = arith.constant 0 : index
    %c0_38 = arith.constant 0 : index
    %51 = vector.load %arg14[%c0_37, %c0_38] : memref<1024x128xbf16, #tpu.memory_space<vmem>>, vector<1024x128xbf16>
    %cst_39 = arith.constant dense<0.000000e+00> : vector<16x128xf32>
    %52 = tpu.matmul %50, %51, %cst_39 {dimension_numbers = #tpu.dot_dimension_numbers<[1], [0], [0], [1], [0, 0, 1, 1], [], []>} : vector<16x1024xbf16>, vector<1024x128xbf16>, vector<16x128xf32> -> vector<16x128xf32>
    %c0_40 = arith.constant 0 : index
    %c0_41 = arith.constant 0 : index
    %53 = vector.load %arg15[%c0_40, %c0_41] : memref<1x128xf32, #tpu.memory_space<vmem>>, vector<1x128xf32>
    %54 = vector.broadcast %53 : vector<1x128xf32> to vector<16x128xf32>
    %55 = arith.addf %52, %54 : vector<16x128xf32>
    %c0_42 = arith.constant 0 : index
    %c0_43 = arith.constant 0 : index
    %56 = vector.load %arg16[%c0_42, %c0_43] : memref<16x128xf32, #tpu.memory_space<vmem>>, vector<16x128xf32>
    tpu.vector_store %arg16[%c0_42, %c0_43], %55 {strides = array<i32>} : memref<16x128xf32, #tpu.memory_space<vmem>>, vector<16x128xf32>,
    return
  }
  func.func @transform_0(%arg0: i32) -> (i32, i32, i32) {
    %c0_i32 = arith.constant 0 : i32
    %c0_i32_0 = arith.constant 0 : i32
    %c0_i32_1 = arith.constant 0 : i32
    return %c0_i32, %arg0, %c0_i32_0 : i32, i32, i32
  }
  func.func @transform_1(%arg0: i32) -> (i32, i32) {
    %c0_i32 = arith.constant 0 : i32
    %c0_i32_0 = arith.constant 0 : i32
    %c0_i32_1 = arith.constant 0 : i32
    return %c0_i32, %c0_i32_0 : i32, i32
  }
  func.func @transform_2(%arg0: i32) -> (i32, i32) {
    %c0_i32 = arith.constant 0 : i32
    %c0_i32_0 = arith.constant 0 : i32
    %c0_i32_1 = arith.constant 0 : i32
    return %c0_i32, %c0_i32_0 : i32, i32
  }
  func.func @transform_3(%arg0: i32) -> (i32, i32) {
    %c0_i32 = arith.constant 0 : i32
    %c0_i32_0 = arith.constant 0 : i32
    %c0_i32_1 = arith.constant 0 : i32
    return %c0_i32, %c0_i32_0 : i32, i32
  }
  func.func @transform_4(%arg0: i32) -> (i32, i32) {
    %c0_i32 = arith.constant 0 : i32
    %c0_i32_0 = arith.constant 0 : i32
    %c0_i32_1 = arith.constant 0 : i32
    return %c0_i32, %c0_i32_0 : i32, i32
  }
  func.func @transform_5(%arg0: i32) -> (i32, i32) {
    %c0_i32 = arith.constant 0 : i32
    %c0_i32_0 = arith.constant 0 : i32
    %c0_i32_1 = arith.constant 0 : i32
    return %c0_i32, %c0_i32_0 : i32, i32
  }
  func.func @transform_6(%arg0: i32) -> (i32, i32) {
    %c0_i32 = arith.constant 0 : i32
    %c0_i32_0 = arith.constant 0 : i32
    %c0_i32_1 = arith.constant 0 : i32
    return %c0_i32, %c0_i32_0 : i32, i32
  }
  func.func @transform_7(%arg0: i32) -> (i32, i32) {
    %c0_i32 = arith.constant 0 : i32
    %c0_i32_0 = arith.constant 0 : i32
    %c0_i32_1 = arith.constant 0 : i32
    return %c0_i32, %c0_i32_0 : i32, i32
  }
  func.func @transform_8(%arg0: i32) -> (i32, i32) {
    %c0_i32 = arith.constant 0 : i32
    %c0_i32_0 = arith.constant 0 : i32
    %c0_i32_1 = arith.constant 0 : i32
    return %c0_i32, %c0_i32_0 : i32, i32
  }
  func.func @transform_9(%arg0: i32) -> (i32, i32) {
    %c0_i32 = arith.constant 0 : i32
    %c0_i32_0 = arith.constant 0 : i32
    %c0_i32_1 = arith.constant 0 : i32
    return %c0_i32, %c0_i32_0 : i32, i32
  }
  func.func @transform_10(%arg0: i32) -> (i32, i32) {
    %c0_i32 = arith.constant 0 : i32
    %c0_i32_0 = arith.constant 0 : i32
    %c0_i32_1 = arith.constant 0 : i32
    return %c0_i32, %c0_i32_0 : i32, i32
  }
  func.func @transform_11(%arg0: i32) -> (i32, i32) {
    %c0_i32 = arith.constant 0 : i32
    %c0_i32_0 = arith.constant 0 : i32
    %c0_i32_1 = arith.constant 0 : i32
    return %c0_i32, %c0_i32_0 : i32, i32
  }
  func.func @transform_12(%arg0: i32) -> (i32, i32) {
    %c0_i32 = arith.constant 0 : i32
    %c0_i32_0 = arith.constant 0 : i32
    %c0_i32_1 = arith.constant 0 : i32
    return %c0_i32, %c0_i32_0 : i32, i32
  }
  func.func @transform_13(%arg0: i32) -> (i32, i32) {
    %c0_i32 = arith.constant 0 : i32
    %c0_i32_0 = arith.constant 0 : i32
    %c0_i32_1 = arith.constant 0 : i32
    return %c0_i32, %c0_i32_0 : i32, i32
  }
  func.func @transform_14(%arg0: i32) -> (i32, i32) {
    %c0_i32 = arith.constant 0 : i32
    %c0_i32_0 = arith.constant 0 : i32
    %c0_i32_1 = arith.constant 0 : i32
    return %c0_i32, %c0_i32_0 : i32, i32
  }
  func.func @transform_15(%arg0: i32) -> (i32, i32) {
    %c0_i32 = arith.constant 0 : i32
    %c0_i32_0 = arith.constant 0 : i32
    return %arg0, %c0_i32 : i32, i32
  }
}

</mosaic_0001>

<bundles_post_ra>
// kernel: tpu_custom_call.1
= control target key start
LH: loop header
LB: loop body
LE: loop exit
PB: predicated region body
PF: predicated region fallthrough
CT: control target
= control target key end

     0   :  { %20 = vsyncpa [#allocation3], 0  ;;  %s16530_s0 = inlined_call_operand.hbm [shape: bf16[3,16,128], index: 0, kind: input, shape index: {}]   ;;  %s16531_s1 = inlined_call_operand.hbm [shape: bf16[128,512], index: 1, kind: input, shape index: {}]   ;;  %s16532_s2 = inlined_call_operand.hbm [shape: f32[1,512], index: 2, kind: input, shape index: {}]   ;;  %s16533_s3 = inlined_call_operand.hbm [shape: bf16[512,512], index: 3, kind: input, shape index: {}]   ;;  %s16534_s4 = inlined_call_operand.hbm [shape: f32[1,512], index: 4, kind: input, shape index: {}]   ;;  %s16535_s5 = inlined_call_operand.hbm [shape: bf16[512,512], index: 5, kind: input, shape index: {}]   ;;  %s16536_s6 = inlined_call_operand.hbm [shape: f32[1,512], index: 6, kind: input, shape index: {}]   ;;  %s16537_s7 = inlined_call_operand.hbm [shape: bf16[512,1024], index: 7, kind: input, shape index: {}]   ;;  %s16538_s8 = inlined_call_operand.hbm [shape: bf16[512,1024], index: 8, kind: input, shape index: {}]   ;;  %s16539_s9 = inlined_call_operand.hbm [shape: bf16[512,1024], index: 9, kind: input, shape index: {}]   ;;  %s16540_s10 = inlined_call_operand.hbm [shape: f32[1,1024], index: 10, kind: input, shape index: {}]   ;;  %s16541_s11 = inlined_call_operand.hbm [shape: bf16[1024,1024], index: 11, kind: input, shape index: {}]   ;;  %s16542_s12 = inlined_call_operand.hbm [shape: f32[1,1024], index: 12, kind: input, shape index: {}]   ;;  %s16543_s13 = inlined_call_operand.hbm [shape: bf16[1024,128], index: 13, kind: input, shape index: {}]   ;;  %s16544_s14 = inlined_call_operand.hbm [shape: f32[1,128], index: 14, kind: input, shape index: {}]   ;;  %s16545_s15 = inlined_call_operand.hbm [shape: f32[16,128], index: 15, kind: output, shape index: {}]  }
   0x1   :  { %21 = vsyncpa [#allocation6], 0 }
   0x2   :  { %22 = vsyncpa [#allocation9], 0 }
   0x3   :  { %23 = vsyncpa [#allocation12], 0 }
   0x4   :  { %24 = vsyncpa [#allocation15], 0 }
   0x5   :  { %25 = vsyncpa [#allocation18], 0 }
   0x6   :  { %26 = vsyncpa [#allocation21], 0 }
   0x7   :  { %27 = vsyncpa [#allocation24], 0 }
   0x8   :  { %28 = vsyncpa [#allocation4], 0  ;;  %s15658_s18 = smov [#allocation5]  }
   0x9   :  { %s46_s19 = sshll.u32 %s15658_s18, 4  ;;  %s47_s19 = int_to_ptr.vmem [resolvable:$true] %s46_s19 }
   0xa   :  { %s15328_s20 = scalar_lea.vmem %s47_s19, 4096  ;;  %p15333_p1 = scmp.lt.s32.totalorder %s47_s19, %s47_s19 }
   0xb   :  { %p15329_p0 = scmp.ne.s32.totalorder %s47_s19, %s15328_s20  ;;  %p15334_p2 = scmp.lt.s32.totalorder %s15328_s20, %s15328_s20 }
   0xd   :  { %p15335_p3 = por %p15334_p2, %p15333_p1 }
   0xf   :  { %p15336_p4 = pnand %p15335_p3, %p15329_p0 }
  0x11   :  { %15339 = shalt.err (!%p15336_p4)
}
  0x12   :  { %s15659_s21 = smov 256   ;;  %s15660_s22 = smov 16  }
  0x13   :  { %52 = dma.hbm_to_vmem [thread:$0]  %s16531_s1, 4096, %s47_s19, [#allocation6], %s15659_s21, %s15659_s21, %s15660_s22  }
  0x14   :  { %s15661_s25 = smov [#allocation8]   ;;  %s15662_s27 = smov [#allocation11]  }
  0x15   :  { %s68_s26 = sshll.u32 %s15661_s25, 4  ;;  %s90_s28 = sshll.u32 %s15662_s27, 4  ;;  %s69_s26 = int_to_ptr.vmem [resolvable:$true] %s68_s26  ;;  %s91_s28 = int_to_ptr.vmem [resolvable:$true] %s90_s28 }
  0x16   :  { %s15348_s29 = scalar_lea.vmem %s69_s26, 16384  ;;  %p15353_p6 = scmp.lt.s32.totalorder %s69_s26, %s69_s26 }
  0x17   :  { %p15349_p5 = scmp.ne.s32.totalorder %s69_s26, %s15348_s29  ;;  %p15354_p7 = scmp.lt.s32.totalorder %s15348_s29, %s15348_s29 }
  0x19   :  { %p15355_p8 = por %p15354_p7, %p15353_p6 }
  0x1b   :  { %p15356_p9 = pnand %p15355_p8, %p15349_p5 }
  0x1d   :  { %15359 = shalt.err (!%p15356_p9)
}
  0x1e   :  { %74 = dma.hbm_to_vmem [thread:$0]  %s16533_s3, 16384, %s69_s26, [#allocation9], %s15659_s21, %s15659_s21, %s15660_s22  }
  0x1f   :  { %s15368_s17 = scalar_lea.vmem %s91_s28, 16384  ;;  %p15373_p11 = scmp.lt.s32.totalorder %s91_s28, %s91_s28 }
  0x20   :  { %p15369_p10 = scmp.ne.s32.totalorder %s91_s28, %s15368_s17  ;;  %p15374_p12 = scmp.lt.s32.totalorder %s15368_s17, %s15368_s17 }
  0x22   :  { %p15375_p13 = por %p15374_p12, %p15373_p11 }
  0x24   :  { %p15376_p0 = pnand %p15375_p13, %p15369_p10 }
  0x26   :  { %15379 = shalt.err (!%p15376_p0)
}
  0x27   :  { %96 = dma.hbm_to_vmem [thread:$0]  %s16535_s5, 16384, %s91_s28, [#allocation12], %s15659_s21, %s15659_s21, %s15660_s22  }
  0x28   :  { %s15663_s19 = smov [#allocation14]  }
  0x29   :  { %s112_s20 = sshll.u32 %s15663_s19, 4  ;;  %s113_s20 = int_to_ptr.vmem [resolvable:$true] %s112_s20 }
  0x2a   :  { %s15388_s23 = scalar_lea.vmem %s113_s20, 32768  ;;  %p15393_p2 = scmp.lt.s32.totalorder %s113_s20, %s113_s20 }
  0x2b   :  { %p15389_p1 = scmp.ne.s32.totalorder %s113_s20, %s15388_s23  ;;  %p15394_p3 = scmp.lt.s32.totalorder %s15388_s23, %s15388_s23 }
  0x2d   :  { %p15395_p4 = por %p15394_p3, %p15393_p2 }
  0x2f   :  { %p15396_p5 = pnand %p15395_p4, %p15389_p1 }
  0x31   :  { %15399 = shalt.err (!%p15396_p5)
}
  0x32   :  { %s15664_s3 = smov 512   ;;  %s15665_s24 = smov 32  }
  0x33   :  { %118 = dma.hbm_to_vmem [thread:$0]  %s16537_s7, 32768, %s113_s20, [#allocation15], %s15664_s3, %s15664_s3, %s15665_s24  }
  0x34   :  { %s15666_s5 = smov [#allocation17]   ;;  %s15667_s22 = smov [#allocation20]  }
  0x35   :  { %s136_s21 = sshll.u32 %s15666_s5, 4  ;;  %s158_s27 = sshll.u32 %s15667_s22, 4  ;;  %s137_s21 = int_to_ptr.vmem [resolvable:$true] %s136_s21  ;;  %s159_s27 = int_to_ptr.vmem [resolvable:$true] %s158_s27 }
  0x36   :  { %s15408_s28 = scalar_lea.vmem %s137_s21, 32768  ;;  %p15413_p7 = scmp.lt.s32.totalorder %s137_s21, %s137_s21 }
  0x37   :  { %p15409_p6 = scmp.ne.s32.totalorder %s137_s21, %s15408_s28  ;;  %p15414_p8 = scmp.lt.s32.totalorder %s15408_s28, %s15408_s28 }
  0x39   :  { %p15415_p9 = por %p15414_p8, %p15413_p7 }
  0x3b   :  { %p15416_p10 = pnand %p15415_p9, %p15409_p6 }
  0x3d   :  { %15419 = shalt.err (!%p15416_p10)
}
  0x3e   :  { %142 = dma.hbm_to_vmem [thread:$0]  %s16539_s9, 32768, %s137_s21, [#allocation18], %s15664_s3, %s15664_s3, %s15665_s24  }
  0x3f   :  { %s15428_s7 = scalar_lea.vmem %s159_s27, 65536  ;;  %p15433_p12 = scmp.lt.s32.totalorder %s159_s27, %s159_s27 }
  0x40   :  { %p15429_p11 = scmp.ne.s32.totalorder %s159_s27, %s15428_s7  ;;  %p15434_p13 = scmp.lt.s32.totalorder %s15428_s7, %s15428_s7 }
  0x42   :  { %p15435_p0 = por %p15434_p13, %p15433_p12 }
  0x44   :  { %p15436_p1 = pnand %p15435_p0, %p15429_p11 }
  0x46   :  { %15439 = shalt.err (!%p15436_p1)
}
  0x47   :  { %164 = dma.hbm_to_vmem [thread:$0]  %s16541_s11, 65536, %s159_s27, [#allocation21], %s15664_s3, %s15664_s3, %s15665_s24  }
  0x48   :  { %s15668_s1 = smov [#allocation23]   ;;  %s15669_s19 = smov [#allocation2]  }
  0x49   :  { %s180_s18 = sshll.u32 %s15668_s1, 4  ;;  %s34_s20 = sshll.u32 %s15669_s19, 4  ;;  %s181_s18 = int_to_ptr.vmem [resolvable:$true] %s180_s18  ;;  %s35_s20 = int_to_ptr.vmem [resolvable:$true] %s34_s20 }
  0x4a   :  { %s15448_s9 = scalar_lea.vmem %s181_s18, 8192  ;;  %p15453_p3 = scmp.lt.s32.totalorder %s181_s18, %s181_s18 }
  0x4b   :  { %p15449_p2 = scmp.ne.s32.totalorder %s181_s18, %s15448_s9  ;;  %p15454_p4 = scmp.lt.s32.totalorder %s15448_s9, %s15448_s9 }
  0x4d   :  { %p15455_p5 = por %p15454_p4, %p15453_p3 }
  0x4f   :  { %p15456_p6 = pnand %p15455_p5, %p15449_p2 }
  0x51   :  { %15459 = shalt.err (!%p15456_p6)
}
  0x52   :  { %s15670_s23 = smov 64   ;;  %s15671_s25 = smov 4  }
  0x53   :  { %186 = dma.hbm_to_vmem [thread:$0]  %s16543_s13, 8192, %s181_s18, [#allocation24], %s15670_s23, %s15670_s23, %s15671_s25  }
  0x54   :  { %s15468_s11 = scalar_lea.vmem %s35_s20, 384  ;;  %p15473_p8 = scmp.lt.s32.totalorder %s35_s20, %s35_s20 }
  0x55   :  { %p15469_p7 = scmp.ne.s32.totalorder %s35_s20, %s15468_s11  ;;  %p15474_p9 = scmp.lt.s32.totalorder %s15468_s11, %s15468_s11 }
  0x57   :  { %p15475_p10 = por %p15474_p9, %p15473_p8 }
  0x59   :  { %p15476_p11 = pnand %p15475_p10, %p15469_p7 }
  0x5b   :  { %15479 = shalt.err (!%p15476_p11)
}
  0x5c   :  { %40 = dma.hbm_to_vmem [thread:$0]  %s16530_s0, 384, %s35_s20, [#allocation3], %s15670_s23, %s15670_s23, %s15671_s25  }
  0x5d   :  { %s15672_s27 = smov [#allocation7]   ;;  %s15673_s29 = smov [#allocation10]  }
  0x5e   :  { %s59_s28 = sshll.u32 %s15672_s27, 4  ;;  %s81_s30 = sshll.u32 %s15673_s29, 4  ;;  %s60_s28 = int_to_ptr.vmem [resolvable:$true] %s59_s28  ;;  %s82_s30 = int_to_ptr.vmem [resolvable:$true] %s81_s30 }
  0x5f   :  { %s15488_s7 = scalar_lea.vmem %s60_s28, 64  ;;  %p15493_p13 = scmp.lt.s32.totalorder %s60_s28, %s60_s28 }
  0x60   :  { %p15489_p12 = scmp.ne.s32.totalorder %s60_s28, %s15488_s7  ;;  %p15494_p0 = scmp.lt.s32.totalorder %s15488_s7, %s15488_s7 }
  0x62   :  { %p15495_p1 = por %p15494_p0, %p15493_p13 }
  0x64   :  { %p15496_p2 = pnand %p15495_p1, %p15489_p12 }
  0x66   :  { %15499 = shalt.err (!%p15496_p2)
}
  0x67   :  { %62 = dma.hbm_to_vmem [thread:$0]  %s16532_s2, 64, %s60_s28, [#allocation6]  }
  0x68   :  { %s15508_s17 = scalar_lea.vmem %s82_s30, 64  ;;  %p15513_p4 = scmp.lt.s32.totalorder %s82_s30, %s82_s30 }
  0x69   :  { %p15509_p3 = scmp.ne.s32.totalorder %s82_s30, %s15508_s17  ;;  %p15514_p5 = scmp.lt.s32.totalorder %s15508_s17, %s15508_s17 }
  0x6b   :  { %p15515_p6 = por %p15514_p5, %p15513_p4 }
  0x6d   :  { %p15516_p7 = pnand %p15515_p6, %p15509_p3 }
  0x6f   :  { %15519 = shalt.err (!%p15516_p7)
}
  0x70   :  { %84 = dma.hbm_to_vmem [thread:$0]  %s16534_s4, 64, %s82_s30, [#allocation9]  }
  0x71   :  { %s15674_s18 = smov [#allocation13]   ;;  %s15675_s20 = smov [#allocation16]  }
  0x72   :  { %s103_s19 = sshll.u32 %s15674_s18, 4  ;;  %s124_s9 = sshll.u32 %s15675_s20, 4  ;;  %s104_s19 = int_to_ptr.vmem [resolvable:$true] %s103_s19  ;;  %s125_s9 = int_to_ptr.vmem [resolvable:$true] %s124_s9 }
  0x73   :  { %s15528_s23 = scalar_lea.vmem %s104_s19, 64  ;;  %p15533_p9 = scmp.lt.s32.totalorder %s104_s19, %s104_s19 }
  0x74   :  { %p15529_p8 = scmp.ne.s32.totalorder %s104_s19, %s15528_s23  ;;  %p15534_p10 = scmp.lt.s32.totalorder %s15528_s23, %s15528_s23 }
  0x76   :  { %p15535_p11 = por %p15534_p10, %p15533_p9 }
  0x78   :  { %p15536_p12 = pnand %p15535_p11, %p15529_p8 }
  0x7a   :  { %15539 = shalt.err (!%p15536_p12)
}
  0x7b   :  { %106 = dma.hbm_to_vmem [thread:$0]  %s16536_s6, 64, %s104_s19, [#allocation12]  }
  0x7c   :  { %s15548_s26 = scalar_lea.vmem %s125_s9, 32768  ;;  %p15553_p0 = scmp.lt.s32.totalorder %s125_s9, %s125_s9 }
  0x7d   :  { %p15549_p13 = scmp.ne.s32.totalorder %s125_s9, %s15548_s26  ;;  %p15554_p1 = scmp.lt.s32.totalorder %s15548_s26, %s15548_s26 }
  0x7f   :  { %p15555_p2 = por %p15554_p1, %p15553_p0 }
  0x81   :  { %p15556_p3 = pnand %p15555_p2, %p15549_p13 }
  0x83   :  { %15559 = shalt.err (!%p15556_p3)
}
  0x84   :  { %130 = dma.hbm_to_vmem [thread:$0]  %s16538_s8, 32768, %s125_s9, [#allocation15], %s15664_s3, %s15664_s3, %s15665_s24  }
  0x85   :  { %s15676_s11 = smov [#allocation19]   ;;  %s15677_s22 = smov [#allocation22]  }
  0x86   :  { %s149_s21 = sshll.u32 %s15676_s11, 4  ;;  %s171_s27 = sshll.u32 %s15677_s22, 4  ;;  %s150_s21 = int_to_ptr.vmem [resolvable:$true] %s149_s21  ;;  %s172_s27 = int_to_ptr.vmem [resolvable:$true] %s171_s27 }
  0x87   :  { %s15568_s6 = scalar_lea.vmem %s150_s21, 128  ;;  %p15573_p5 = scmp.lt.s32.totalorder %s150_s21, %s150_s21 }
  0x88   :  { %p15569_p4 = scmp.ne.s32.totalorder %s150_s21, %s15568_s6  ;;  %p15574_p6 = scmp.lt.s32.totalorder %s15568_s6, %s15568_s6 }
  0x8a   :  { %p15575_p7 = por %p15574_p6, %p15573_p5 }
  0x8c   :  { %p15576_p8 = pnand %p15575_p7, %p15569_p4 }
  0x8e   :  { %15579 = shalt.err (!%p15576_p8)
}
  0x8f   :  { %152 = dma.hbm_to_vmem [thread:$0]  %s16540_s10, 128, %s150_s21, [#allocation18]  }
  0x90   :  { %s15588_s30 = scalar_lea.vmem %s172_s27, 128  ;;  %p15593_p10 = scmp.lt.s32.totalorder %s172_s27, %s172_s27 }
  0x91   :  { %p15589_p9 = scmp.ne.s32.totalorder %s172_s27, %s15588_s30  ;;  %p15594_p11 = scmp.lt.s32.totalorder %s15588_s30, %s15588_s30 }
  0x93   :  { %p15595_p12 = por %p15594_p11, %p15593_p10 }
  0x95   :  { %p15596_p13 = pnand %p15595_p12, %p15589_p9 }
  0x97   :  { %15599 = shalt.err (!%p15596_p13)
}
  0x98   :  { %174 = dma.hbm_to_vmem [thread:$0]  %s16542_s12, 128, %s172_s27, [#allocation21]  }
  0x99   :  { %s15678_s24 = smov [#allocation25]  }
  0x9a   :  { %s193_s7 = sshll.u32 %s15678_s24, 4  ;;  %s194_s7 = int_to_ptr.vmem [resolvable:$true] %s193_s7 }
  0x9b   :  { %s15608_s13 = scalar_lea.vmem %s194_s7, 16  ;;  %s15612_s16 = scalar_lea.vmem %s194_s7, 32 }
  0x9c   :  { %p15609_p0 = scmp.ne.s32.totalorder %s194_s7, %s15608_s13  ;;  %p15613_p1 = scmp.lt.s32.totalorder %s194_s7, %s194_s7 }
  0x9d   :  { %p15614_p2 = scmp.lt.s32.totalorder %s15612_s16, %s15608_s13 }
  0x9f   :  { %p15615_p3 = por %p15614_p2, %p15613_p1 }
  0xa1   :  { %p15616_p4 = pnand %p15615_p3, %p15609_p0 }
  0xa3   :  { %15619 = shalt.err (!%p15616_p4)
}
  0xa4   :  { %196 = dma.hbm_to_vmem [thread:$0]  %s16544_s14, 16, %s194_s7, [#allocation24]  }
  0xa5   :  { %15640 = dma.done.wait [#allocation3], 384  }
  0xa6   :  { %15641 = vsyncadd [#allocation3], 4294966912 }
  0xa7   :  { %15642 = dma.done.wait [#allocation6], 4160  }
  0xa8   :  { %15643 = vsyncadd [#allocation6], 4294963136 }
  0xa9   :  { %15644 = dma.done.wait [#allocation9], 16448  }
  0xaa   :  { %15645 = vsyncadd [#allocation9], 4294950848 }
  0xab   :  { %15646 = dma.done.wait [#allocation12], 16448  }
  0xac   :  { %15647 = vsyncadd [#allocation12], 4294950848 }
  0xad   :  { %15648 = dma.done.wait [#allocation15], 65536  }
  0xae   :  { %15649 = vsyncadd [#allocation15], 4294901760 }
  0xaf   :  { %15650 = dma.done.wait [#allocation18], 32896  }
  0xb0   :  { %15651 = vsyncadd [#allocation18], 4294934400 }
  0xb1   :  { %15652 = dma.done.wait [#allocation21], 65664  }
  0xb2   :  { %15653 = vsyncadd [#allocation21], 4294901632 }
  0xb3   :  { %15654 = dma.done.wait [#allocation24], 8208  }
  0xb4   :  { %15655 = vsyncadd [#allocation24], 4294959088  ;;  %v15679_v0 = vmov 0   ;;  %v14821_v1 = vld [vmem:[#allocation5 + $0xe4] ss:$16 sps:$4 sm:$0xff]   ;;  %v14869_v35 = vld [vmem:[#allocation2] sm:$0xff]  }
  0xb5   :  { %513 = vmatprep.mubr.bf16.mxu0 %v15679_v0  ;;  %576 = vmatprep.mubr.bf16.mxu1 %v15679_v0  ;;  %v14823_v2 = vld [vmem:[#allocation5 + $0xec] ss:$16 sps:$4 sm:$0xff]   ;;  %v14825_v3 = vld [vmem:[#allocation5 + $0xe0] ss:$16 sps:$4 sm:$0xff]   ;;  %v14826_v4 = vld [vmem:[#allocation5 + $0xe8] ss:$16 sps:$4 sm:$0xff]  }
  0xb6   :  { %481 = vmatprep.subr.bf16.mxu0 %v14821_v1  ;;  %544 = vmatprep.subr.bf16.mxu1 %v14823_v2  ;;  %v14827_v5 = vld [vmem:[#allocation5 + $0xc4] ss:$16 sps:$4 sm:$0xff]   ;;  %v14829_v6 = vld [vmem:[#allocation5 + $0xcc] ss:$16 sps:$4 sm:$0xff]   ;;  %v14831_v7 = vld [vmem:[#allocation5 + $0xc0] ss:$16 sps:$4 sm:$0xff]  }
  0xb7   :  { %482 = vmatpush1.bf16.msra.mxu0 %v14825_v3  ;;  %545 = vmatpush1.bf16.msra.mxu1 %v14826_v4  ;;  %v14832_v8 = vld [vmem:[#allocation5 + $0xc8] ss:$16 sps:$4 sm:$0xff]   ;;  %v14833_v9 = vld [vmem:[#allocation5 + $0xa4] ss:$16 sps:$4 sm:$0xff]   ;;  %v14835_v10 = vld [vmem:[#allocation5 + $0xac] ss:$16 sps:$4 sm:$0xff]  }
  0xb8   :  { %483 = vmatprep.subr.bf16.mxu0 %v14827_v5  ;;  %546 = vmatprep.subr.bf16.mxu1 %v14829_v6  ;;  %v14837_v11 = vld [vmem:[#allocation5 + $0xa0] ss:$16 sps:$4 sm:$0xff]   ;;  %v14838_v12 = vld [vmem:[#allocation5 + $0xa8] ss:$16 sps:$4 sm:$0xff]   ;;  %v14839_v13 = vld [vmem:[#allocation5 + $0x84] ss:$16 sps:$4 sm:$0xff]  }
  0xb9   :  { %v14841_v14 = vld [vmem:[#allocation5 + $0x8c] ss:$16 sps:$4 sm:$0xff]   ;;  %v14843_v15 = vld [vmem:[#allocation5 + $0x80] ss:$16 sps:$4 sm:$0xff]   ;;  %v14844_v16 = vld [vmem:[#allocation5 + $0x88] ss:$16 sps:$4 sm:$0xff]  }
  0xba   :  { %v14845_v17 = vld [vmem:[#allocation5 + $0x64] ss:$16 sps:$4 sm:$0xff]   ;;  %v14847_v18 = vld [vmem:[#allocation5 + $0x6c] ss:$16 sps:$4 sm:$0xff]   ;;  %v14849_v19 = vld [vmem:[#allocation5 + $0x60] ss:$16 sps:$4 sm:$0xff]  }
  0xbb   :  { %484 = vmatpush1.bf16.msra.mxu0 %v14831_v7  ;;  %547 = vmatpush1.bf16.msra.mxu1 %v14832_v8  ;;  %v14850_v20 = vld [vmem:[#allocation5 + $0x68] ss:$16 sps:$4 sm:$0xff]   ;;  %v14851_v21 = vld [vmem:[#allocation5 + $0x44] ss:$16 sps:$4 sm:$0xff]   ;;  %v14853_v22 = vld [vmem:[#allocation5 + $0x4c] ss:$16 sps:$4 sm:$0xff]  }
  0xbc   :  { %485 = vmatprep.subr.bf16.mxu0 %v14833_v9  ;;  %548 = vmatprep.subr.bf16.mxu1 %v14835_v10  ;;  %v14855_v23 = vld [vmem:[#allocation5 + $0x40] ss:$16 sps:$4 sm:$0xff]   ;;  %v14856_v24 = vld [vmem:[#allocation5 + $0x48] ss:$16 sps:$4 sm:$0xff]   ;;  %v14857_v25 = vld [vmem:[#allocation5 + $0x24] ss:$16 sps:$4 sm:$0xff]  }
  0xbd   :  { %v14859_v26 = vld [vmem:[#allocation5 + $0x2c] ss:$16 sps:$4 sm:$0xff]   ;;  %v14861_v27 = vld [vmem:[#allocation5 + $0x20] ss:$16 sps:$4 sm:$0xff]   ;;  %v14862_v28 = vld [vmem:[#allocation5 + $0x28] ss:$16 sps:$4 sm:$0xff]  }
  0xbe   :  { %v14863_v29 = vld [vmem:[#allocation5 + $0x4] ss:$16 sps:$4 sm:$0xff]   ;;  %v14865_v30 = vld [vmem:[#allocation5 + $0xc] ss:$16 sps:$4 sm:$0xff]   ;;  %v14867_v31 = vld [vmem:[#allocation5] ss:$16 sps:$4 sm:$0xff]  }
  0xbf   :  { %486 = vmatpush1.bf16.msra.mxu0 %v14837_v11  ;;  %549 = vmatpush1.bf16.msra.mxu1 %v14838_v12  ;;  %v14868_v32 = vld [vmem:[#allocation5 + $0x8] ss:$16 sps:$4 sm:$0xff]   ;;  %v14872_v36 = vld [vmem:[#allocation8 + $0xe0] ss:$16 sps:$4 sm:$0xff]   ;;  %s15680_s12 = smov [#allocation26]  }
  0xc0   :  { %487 = vmatprep.subr.bf16.mxu0 %v14839_v13  ;;  %550 = vmatprep.subr.bf16.mxu1 %v14841_v14  ;;  %v14874_v33 = vld [vmem:[#allocation8 + $0xe4] ss:$16 sps:$4 sm:$0xff]   ;;  %v14875_v37 = vld [vmem:[#allocation8 + $0x2e0] ss:$16 sps:$4 sm:$0xff]   ;;  %s13053_s14 = sshll.u32 %s15680_s12, 4  ;;  %s13054_s14 = int_to_ptr.vmem [resolvable:$true] %s13053_s14 }
  0xc1   :  { %v14877_v34 = vld [vmem:[#allocation8 + $0x2e4] ss:$16 sps:$4 sm:$0xff]   ;;  %v14878_v40 = vld [vmem:[#allocation8 + $0xc0] ss:$16 sps:$4 sm:$0xff]   ;;  %s15620_s0 = scalar_lea.vmem %s13054_s14, 256  ;;  %p15625_p6 = scmp.lt.s32.totalorder %s13054_s14, %s13054_s14 }
  0xc2   :  { %v14880_v38 = vld [vmem:[#allocation8 + $0xc4] ss:$16 sps:$4 sm:$0xff]   ;;  %v14881_v41 = vld [vmem:[#allocation8 + $0x2c0] ss:$16 sps:$4 sm:$0xff]   ;;  %p15621_p5 = scmp.ne.s32.totalorder %s13054_s14, %s15620_s0  ;;  %p15626_p7 = scmp.lt.s32.totalorder %s15620_s0, %s15620_s0 }
  0xc3   :  { %488 = vmatpush1.bf16.msra.mxu0 %v14843_v15  ;;  %551 = vmatpush1.bf16.msra.mxu1 %v14844_v16  ;;  %v14883_v39 = vld [vmem:[#allocation8 + $0x2c4] ss:$16 sps:$4 sm:$0xff]   ;;  %v14870_v44 = vld [vmem:[#allocation2 + $0x8] sm:$0xff]  }
  0xc4   :  { %489 = vmatprep.subr.bf16.mxu0 %v14845_v17  ;;  %552 = vmatprep.subr.bf16.mxu1 %v14847_v18  ;;  %v14886_v42 = vld [vmem:[#allocation8 + $0xa4] ss:$16 sps:$4 sm:$0xff]   ;;  %v14884_v45 = vld [vmem:[#allocation8 + $0xa0] ss:$16 sps:$4 sm:$0xff]   ;;  %p15627_p8 = por %p15626_p7, %p15625_p6 }
  0xc5   :  { %v14889_v43 = vld [vmem:[#allocation8 + $0x2a4] ss:$16 sps:$4 sm:$0xff]   ;;  %v14887_v46 = vld [vmem:[#allocation8 + $0x2a0] ss:$16 sps:$4 sm:$0xff]  }
  0xc6   :  { %v14892_v47 = vld [vmem:[#allocation8 + $0x84] ss:$16 sps:$4 sm:$0xff]   ;;  %v14890_v49 = vld [vmem:[#allocation8 + $0x80] ss:$16 sps:$4 sm:$0xff]   ;;  %p15628_p9 = pnand %p15627_p8, %p15621_p5 }
  0xc7   :  { %490 = vmatpush1.bf16.msra.mxu0 %v14849_v19  ;;  %553 = vmatpush1.bf16.msra.mxu1 %v14850_v20  ;;  %v14895_v48 = vld [vmem:[#allocation8 + $0x284] ss:$16 sps:$4 sm:$0xff]   ;;  %v14893_v50 = vld [vmem:[#allocation8 + $0x280] ss:$16 sps:$4 sm:$0xff]  }
  0xc8   :  { %491 = vmatprep.subr.bf16.mxu0 %v14851_v21  ;;  %554 = vmatprep.subr.bf16.mxu1 %v14853_v22  ;;  %v14898_v51 = vld [vmem:[#allocation8 + $0x64] ss:$16 sps:$4 sm:$0xff]   ;;  %v14896_v54 = vld [vmem:[#allocation8 + $0x60] ss:$16 sps:$4 sm:$0xff]  }
  0xc9   :  { %v14901_v52 = vld [vmem:[#allocation8 + $0x264] ss:$16 sps:$4 sm:$0xff]   ;;  %v14899_v55 = vld [vmem:[#allocation8 + $0x260] ss:$16 sps:$4 sm:$0xff]  }
  0xca   :  { %v14871_v53 = vld [vmem:[#allocation2 + $0x10] sm:$0xff]   ;;  %v14902_v58 = vld [vmem:[#allocation8 + $0x40] ss:$16 sps:$4 sm:$0xff]  }
  0xcb   :  { %492 = vmatpush1.bf16.msra.mxu0 %v14855_v23  ;;  %555 = vmatpush1.bf16.msra.mxu1 %v14856_v24  ;;  %v14904_v56 = vld [vmem:[#allocation8 + $0x44] ss:$16 sps:$4 sm:$0xff]   ;;  %v14905_v59 = vld [vmem:[#allocation8 + $0x240] ss:$16 sps:$4 sm:$0xff]  }
  0xcc   :  { %493 = vmatprep.subr.bf16.mxu0 %v14857_v25  ;;  %556 = vmatprep.subr.bf16.mxu1 %v14859_v26  ;;  %v14907_v57 = vld [vmem:[#allocation8 + $0x244] ss:$16 sps:$4 sm:$0xff]   ;;  %v14908_v62 = vld [vmem:[#allocation8 + $0x20] ss:$16 sps:$4 sm:$0xff]  }
  0xcd   :  { %v14910_v60 = vld [vmem:[#allocation8 + $0x24] ss:$16 sps:$4 sm:$0xff]   ;;  %v14911_v63 = vld [vmem:[#allocation8 + $0x220] ss:$16 sps:$4 sm:$0xff]  }
  0xce   :  { %v14913_v61 = vld [vmem:[#allocation8 + $0x224] ss:$16 sps:$4 sm:$0xff]   ;;  %v14914_v2 = vld [vmem:[#allocation8] ss:$16 sps:$4 sm:$0xff]  }
  0xcf   :  { %494 = vmatpush1.bf16.msra.mxu0 %v14861_v27  ;;  %557 = vmatpush1.bf16.msra.mxu1 %v14862_v28  ;;  %v14919_v1 = vld [vmem:[#allocation8 + $0x204] ss:$16 sps:$4 sm:$0xff]   ;;  %v14917_v3 = vld [vmem:[#allocation8 + $0x200] ss:$16 sps:$4 sm:$0xff]  }
  0xd0   :  { %495 = vmatprep.subr.bf16.mxu0 %v14863_v29  ;;  %558 = vmatprep.subr.bf16.mxu1 %v14865_v30  ;;  %v14922_v4 = vld [vmem:[#allocation8 + $0x1e4] ss:$16 sps:$4 sm:$0xff]   ;;  %v14920_v6 = vld [vmem:[#allocation8 + $0x1e0] ss:$16 sps:$4 sm:$0xff]  }
  0xd1   :  { %v14925_v5 = vld [vmem:[#allocation8 + $0x3e4] ss:$16 sps:$4 sm:$0xff]   ;;  %v14923_v7 = vld [vmem:[#allocation8 + $0x3e0] ss:$16 sps:$4 sm:$0xff]  }
  0xd2   :  { %v14928_v8 = vld [vmem:[#allocation8 + $0x1c4] ss:$16 sps:$4 sm:$0xff]   ;;  %v14926_v10 = vld [vmem:[#allocation8 + $0x1c0] ss:$16 sps:$4 sm:$0xff]  }
  0xd3   :  { %496 = vmatpush1.bf16.msra.mxu0 %v14867_v31  ;;  %559 = vmatpush1.bf16.msra.mxu1 %v14868_v32  ;;  %v14931_v9 = vld [vmem:[#allocation8 + $0x3c4] ss:$16 sps:$4 sm:$0xff]   ;;  %v14929_v11 = vld [vmem:[#allocation8 + $0x3c0] ss:$16 sps:$4 sm:$0xff]  }
  0xd4   :  { %1433 = vmatprep.subr.bf16.mxu0 %v14874_v33  ;;  %1496 = vmatprep.subr.bf16.mxu1 %v14877_v34  ;;  %v14934_v12 = vld [vmem:[#allocation8 + $0x1a4] ss:$16 sps:$4 sm:$0xff]   ;;  %v14932_v14 = vld [vmem:[#allocation8 + $0x1a0] ss:$16 sps:$4 sm:$0xff]  }
  0xd5   :  { %v14937_v13 = vld [vmem:[#allocation8 + $0x3a4] ss:$16 sps:$4 sm:$0xff]   ;;  %v14935_v15 = vld [vmem:[#allocation8 + $0x3a0] ss:$16 sps:$4 sm:$0xff]  }
  0xd6   :  { %514 = vmatmul.mubr.bf16.vlgmr.msra.gmra.mxu0 %v14869_v35  ;;  %577 = vmatmul.mubr.bf16.vlgmr.msra.gmra.mxu1 %v14869_v35  ;;  %v14940_v16 = vld [vmem:[#allocation8 + $0x184] ss:$16 sps:$4 sm:$0xff]   ;;  %v14938_v18 = vld [vmem:[#allocation8 + $0x180] ss:$16 sps:$4 sm:$0xff]  }
  0xd7   :  { %523 = vmatprep.mubr.bf16.mxu0 %v15679_v0  ;;  %586 = vmatprep.mubr.bf16.mxu1 %v15679_v0  ;;  %v14943_v17 = vld [vmem:[#allocation8 + $0x384] ss:$16 sps:$4 sm:$0xff]   ;;  %v14941_v19 = vld [vmem:[#allocation8 + $0x380] ss:$16 sps:$4 sm:$0xff]  }
  0xd8   :  { %1434 = vmatpush1.bf16.msra.mxu0 %v14872_v36  ;;  %1497 = vmatpush1.bf16.msra.mxu1 %v14875_v37  ;;  %v14946_v20 = vld [vmem:[#allocation8 + $0x164] ss:$16 sps:$4 sm:$0xff]   ;;  %v14944_v22 = vld [vmem:[#allocation8 + $0x160] ss:$16 sps:$4 sm:$0xff]   ;;  %v14970_v36 = vld [vmem:[#allocation8 + $0xec] ss:$16 sps:$4 sm:$0xff]  }
  0xd9   :  { %1435 = vmatprep.subr.bf16.mxu0 %v14880_v38  ;;  %1498 = vmatprep.subr.bf16.mxu1 %v14883_v39  ;;  %v14949_v21 = vld [vmem:[#allocation8 + $0x364] ss:$16 sps:$4 sm:$0xff]   ;;  %v14947_v23 = vld [vmem:[#allocation8 + $0x360] ss:$16 sps:$4 sm:$0xff]   ;;  %v14973_v37 = vld [vmem:[#allocation8 + $0x2ec] ss:$16 sps:$4 sm:$0xff]   ;;  %v283_v38 = vlaneseq }
  0xda   :  { %v14952_v24 = vld [vmem:[#allocation8 + $0x144] ss:$16 sps:$4 sm:$0xff]   ;;  %v14950_v26 = vld [vmem:[#allocation8 + $0x140] ss:$16 sps:$4 sm:$0xff]  }
  0xdb   :  { %v14955_v25 = vld [vmem:[#allocation8 + $0x344] ss:$16 sps:$4 sm:$0xff]   ;;  %v14953_v27 = vld [vmem:[#allocation8 + $0x340] ss:$16 sps:$4 sm:$0xff]   ;;  %v15826_v39 = vshrl.u32 %v283_v38, 7 }
  0xdc   :  { %1436 = vmatpush1.bf16.msra.mxu0 %v14878_v40  ;;  %1499 = vmatpush1.bf16.msra.mxu1 %v14881_v41  ;;  %v14958_v28 = vld [vmem:[#allocation8 + $0x124] ss:$16 sps:$4 sm:$0xff]   ;;  %v14956_v30 = vld [vmem:[#allocation8 + $0x120] ss:$16 sps:$4 sm:$0xff]   ;;  %v14974_v38 = vld [vmem:[#allocation8 + $0xc8] ss:$16 sps:$4 sm:$0xff]  }
  0xdd   :  { %1437 = vmatprep.subr.bf16.mxu0 %v14886_v42  ;;  %1500 = vmatprep.subr.bf16.mxu1 %v14889_v43  ;;  %v14961_v29 = vld [vmem:[#allocation8 + $0x324] ss:$16 sps:$4 sm:$0xff]   ;;  %v14959_v31 = vld [vmem:[#allocation8 + $0x320] ss:$16 sps:$4 sm:$0xff]   ;;  %v15829_v40 = vsub.s32 1, %v15826_v39  ;;  %v15832_v41 = vsub.s32 3, %v15826_v39 }
  0xde   :  { %524 = vmatmul.mubr.bf16.gmra.mxu0 %v14870_v44  ;;  %587 = vmatmul.mubr.bf16.gmra.mxu1 %v14870_v44  ;;  %v14964_v32 = vld [vmem:[#allocation8 + $0x104] ss:$16 sps:$4 sm:$0xff]   ;;  %v14962_v34 = vld [vmem:[#allocation8 + $0x100] ss:$16 sps:$4 sm:$0xff]   ;;  %v15835_v42 = vsub.s32 0, %v15826_v39  ;;  %v15838_v43 = vsub.s32 2, %v15826_v39 }
  0xdf   :  { %533 = vmatprep.mubr.bf16.mxu0 %v15679_v0  ;;  %596 = vmatprep.mubr.bf16.mxu1 %v15679_v0  ;;  %v14916_v0 = vld [vmem:[#allocation8 + $0x4] ss:$16 sps:$4 sm:$0xff]   ;;  %v14965_v35 = vld [vmem:[#allocation8 + $0x300] ss:$16 sps:$4 sm:$0xff]   ;;  %v281_v44 = vld [vmem:[#allocation7] sm:$0xf] }
  0xe0   :  { %1438 = vmatpush1.bf16.msra.mxu0 %v14884_v45  ;;  %1501 = vmatpush1.bf16.msra.mxu1 %v14887_v46  ;;  %v14967_v33 = vld [vmem:[#allocation8 + $0x304] ss:$16 sps:$4 sm:$0xff]  }
  0xe1   :  { %1439 = vmatprep.subr.bf16.mxu0 %v14892_v47  ;;  %1502 = vmatprep.subr.bf16.mxu1 %v14895_v48  ;;  %v15841_v47 = vrot.slane %v281_v44, %v15829_v40  ;;  %v15844_v48 = vrot.slane %v281_v44, %v15832_v41 }
  0xe4   :  { %1440 = vmatpush1.bf16.msra.mxu0 %v14890_v49  ;;  %1503 = vmatpush1.bf16.msra.mxu1 %v14893_v50  ;;  %v15847_v49 = vrot.slane %v281_v44, %v15835_v42  ;;  %v15850_v50 = vrot.slane %v281_v44, %v15838_v43  ;;  %v14977_v44 = vld [vmem:[#allocation8 + $0x2c8] ss:$16 sps:$4 sm:$0xff]  }
  0xe5   :  { %1441 = vmatprep.subr.bf16.mxu0 %v14898_v51  ;;  %1504 = vmatprep.subr.bf16.mxu1 %v14901_v52 }
  0xe6   :  { %534 = vmatmul.mubr.bf16.gmra.mxu0 %v14871_v53  ;;  %597 = vmatmul.mubr.bf16.gmra.mxu1 %v14871_v53 }
  0xe8   :  { %1442 = vmatpush1.bf16.msra.mxu0 %v14896_v54  ;;  %1505 = vmatpush1.bf16.msra.mxu1 %v14899_v55 }
  0xe9   :  { %1443 = vmatprep.subr.bf16.mxu0 %v14904_v56  ;;  %1506 = vmatprep.subr.bf16.mxu1 %v14907_v57 }
  0xec   :  { %1444 = vmatpush1.bf16.msra.mxu0 %v14902_v58  ;;  %1507 = vmatpush1.bf16.msra.mxu1 %v14905_v59 }
  0xed   :  { %1445 = vmatprep.subr.bf16.mxu0 %v14910_v60  ;;  %1508 = vmatprep.subr.bf16.mxu1 %v14913_v61 }
  0xf0   :  { %1446 = vmatpush1.bf16.msra.mxu0 %v14908_v62  ;;  %1509 = vmatpush1.bf16.msra.mxu1 %v14911_v63 }
  0xf1   :  { %1447 = vmatprep.subr.bf16.mxu0 %v14916_v0  ;;  %1510 = vmatprep.subr.bf16.mxu1 %v14919_v1 }
  0xf4   :  { %1448 = vmatpush1.bf16.msra.mxu0 %v14914_v2  ;;  %1511 = vmatpush1.bf16.msra.mxu1 %v14917_v3 }
  0xf5   :  { %1449 = vmatprep.subr.bf16.mxu0 %v14922_v4  ;;  %1512 = vmatprep.subr.bf16.mxu1 %v14925_v5 }
  0xf8   :  { %1450 = vmatpush2.bf16.msra.mxu0 %v14920_v6  ;;  %1513 = vmatpush2.bf16.msra.mxu1 %v14923_v7 }
  0xf9   :  { %1451 = vmatprep.subr.bf16.mxu0 %v14928_v8  ;;  %1514 = vmatprep.subr.bf16.mxu1 %v14931_v9 }
  0xfc   :  { %1452 = vmatpush2.bf16.msra.mxu0 %v14926_v10  ;;  %1515 = vmatpush2.bf16.msra.mxu1 %v14929_v11 }
  0xfd   :  { %1453 = vmatprep.subr.bf16.mxu0 %v14934_v12  ;;  %1516 = vmatprep.subr.bf16.mxu1 %v14937_v13 }
 0x100   :  { %1454 = vmatpush2.bf16.msra.mxu0 %v14932_v14  ;;  %1517 = vmatpush2.bf16.msra.mxu1 %v14935_v15 }
 0x101   :  { %1455 = vmatprep.subr.bf16.mxu0 %v14940_v16  ;;  %1518 = vmatprep.subr.bf16.mxu1 %v14943_v17 }
 0x104   :  { %1456 = vmatpush2.bf16.msra.mxu0 %v14938_v18  ;;  %1519 = vmatpush2.bf16.msra.mxu1 %v14941_v19  ;;  %v14968_v18 = vld [vmem:[#allocation8 + $0xe8] ss:$16 sps:$4 sm:$0xff]  }
 0x105   :  { %1457 = vmatprep.subr.bf16.mxu0 %v14946_v20  ;;  %1520 = vmatprep.subr.bf16.mxu1 %v14949_v21  ;;  %v14971_v19 = vld [vmem:[#allocation8 + $0x2e8] ss:$16 sps:$4 sm:$0xff]  }
 0x108   :  { %1458 = vmatpush2.bf16.msra.mxu0 %v14944_v22  ;;  %1521 = vmatpush2.bf16.msra.mxu1 %v14947_v23 }
 0x109   :  { %1459 = vmatprep.subr.bf16.mxu0 %v14952_v24  ;;  %1522 = vmatprep.subr.bf16.mxu1 %v14955_v25  ;;  %v14976_v25 = vld [vmem:[#allocation8 + $0xcc] ss:$16 sps:$4 sm:$0xff]  }
 0x10c   :  { %1460 = vmatpush2.bf16.msra.mxu0 %v14950_v26  ;;  %1523 = vmatpush2.bf16.msra.mxu1 %v14953_v27  ;;  %v14979_v26 = vld [vmem:[#allocation8 + $0x2cc] ss:$16 sps:$4 sm:$0xff]  }
 0x10d   :  { %1461 = vmatprep.subr.bf16.mxu0 %v14958_v28  ;;  %1524 = vmatprep.subr.bf16.mxu1 %v14961_v29 }
 0x110   :  { %1462 = vmatpush2.bf16.msra.mxu0 %v14956_v30  ;;  %1525 = vmatpush2.bf16.msra.mxu1 %v14959_v31 }
 0x111   :  { %1463 = vmatprep.subr.bf16.mxu0 %v14964_v32  ;;  %1526 = vmatprep.subr.bf16.mxu1 %v14967_v33 }
 0x114   :  { %1464 = vmatpush2.bf16.msra.mxu0 %v14962_v34  ;;  %1527 = vmatpush2.bf16.msra.mxu1 %v14965_v35 }
 0x115   :  { %1559 = vmatprep.subr.bf16.mxu0 %v14970_v36  ;;  %1622 = vmatprep.subr.bf16.mxu1 %v14973_v37 }
 0x196   :  { %v515_v45 = vpop.f32.mrf.mxu0  ;;  %v578_v46 = vpop.f32.mrf.mxu1 }
 0x197   :  { %v516_v59 = vadd.f32 %v515_v45, %v15847_v49  ;;  %v579_v60 = vadd.f32 %v578_v46, %v15850_v50 }
 0x198   :  { %v517_v51 = vpop.f32.mrf.mxu0  ;;  %v580_v52 = vpop.f32.mrf.mxu1 }
 0x199   :  { %v518_v55 = vadd.f32 %v517_v51, %v15841_v47  ;;  %v581_v56 = vadd.f32 %v580_v52, %v15844_v48  ;;  %v607_v9 = vmax.f32 %v516_v59, 0.0  ;;  %v609_v10 = vmax.f32 %v579_v60, 0.0  ;;  %v14982_v52 = vld [vmem:[#allocation8 + $0xac] ss:$16 sps:$4 sm:$0xff]  }
 0x19a   :  { %v519_v53 = vpop.f32.mrf.mxu0  ;;  %v582_v54 = vpop.f32.mrf.mxu1 }
 0x19b   :  { %v520_v57 = vadd.f32 %v519_v53, %v15847_v49  ;;  %v583_v58 = vadd.f32 %v582_v54, %v15850_v50  ;;  %v608_v5 = vmax.f32 %v518_v55, 0.0  ;;  %v610_v6 = vmax.f32 %v581_v56, 0.0  ;;  %v14985_v53 = vld [vmem:[#allocation8 + $0x2ac] ss:$16 sps:$4 sm:$0xff]  }
 0x19c   :  { %v521_v61 = vpop.f32.mrf.mxu0  ;;  %v584_v62 = vpop.f32.mrf.mxu1 }
 0x19d   :  { %v522_v63 = vadd.f32 %v521_v61, %v15841_v47  ;;  %v585_v0 = vadd.f32 %v584_v62, %v15844_v48  ;;  %v611_v1 = vmax.f32 %v520_v57, 0.0  ;;  %v613_v2 = vmax.f32 %v583_v58, 0.0 }
 0x19e   :  { %v525_v3 = vpop.f32.mrf.mxu0  ;;  %v588_v4 = vpop.f32.mrf.mxu1 }
 0x19f   :  { %v612_v7 = vmax.f32 %v522_v63, 0.0  ;;  %v614_v8 = vmax.f32 %v585_v0, 0.0  ;;  %v526_v11 = vadd.f32 %v525_v3, %v15847_v49  ;;  %v589_v12 = vadd.f32 %v588_v4, %v15850_v50 }
 0x1a0   :  { %v527_v13 = vpop.f32.mrf.mxu0  ;;  %v590_v14 = vpop.f32.mrf.mxu1  ;;  %v15867_v20 = vpack.c.bf16 %v611_v1, %v607_v9  ;;  %v15869_v21 = vpack.c.bf16 %v613_v2, %v609_v10  ;;  %v14980_v1 = vld [vmem:[#allocation8 + $0xa8] ss:$16 sps:$4 sm:$0xff]   ;;  %v14991_v9 = vld [vmem:[#allocation8 + $0x28c] ss:$16 sps:$4 sm:$0xff]  }
 0x1a1   :  { %v528_v15 = vadd.f32 %v527_v13, %v15841_v47  ;;  %v15863_v16 = vpack.c.bf16 %v612_v7, %v608_v5  ;;  %v15865_v17 = vpack.c.bf16 %v614_v8, %v610_v6  ;;  %v591_v22 = vadd.f32 %v590_v14, %v15844_v48  ;;  %v14983_v5 = vld [vmem:[#allocation8 + $0x2a8] ss:$16 sps:$4 sm:$0xff]   ;;  %v14988_v6 = vld [vmem:[#allocation8 + $0x8c] ss:$16 sps:$4 sm:$0xff]  }
 0x1a2   :  { %v529_v23 = vpop.f32.mrf.mxu0  ;;  %v592_v24 = vpop.f32.mrf.mxu1  ;;  %v615_v29 = vmax.f32 %v526_v11, 0.0  ;;  %v617_v30 = vmax.f32 %v589_v12, 0.0 }
 0x1a3   :  { %v530_v27 = vadd.f32 %v529_v23, %v15847_v49  ;;  %v593_v28 = vadd.f32 %v592_v24, %v15850_v50  ;;  %1465 = vmatprep.mubr.bf16.mxu0 %v15863_v16  ;;  %1528 = vmatprep.mubr.bf16.mxu1 %v15865_v17  ;;  %v616_v31 = vmax.f32 %v528_v15, 0.0  ;;  %v618_v45 = vmax.f32 %v591_v22, 0.0  ;;  %v14989_v23 = vld [vmem:[#allocation8 + $0x288] ss:$16 sps:$4 sm:$0xff]   ;;  %v14994_v24 = vld [vmem:[#allocation8 + $0x6c] ss:$16 sps:$4 sm:$0xff]  }
 0x1a4   :  { %v531_v32 = vpop.f32.mrf.mxu0  ;;  %v594_v33 = vpop.f32.mrf.mxu1  ;;  %1466 = vmatmul.mubr.bf16.vlgmr.msra.gmra.mxu0 %v15867_v20  ;;  %1529 = vmatmul.mubr.bf16.vlgmr.msra.gmra.mxu1 %v15869_v21 }
 0x1a5   :  { %v619_v34 = vmax.f32 %v530_v27, 0.0  ;;  %v621_v35 = vmax.f32 %v593_v28, 0.0  ;;  %v532_v36 = vadd.f32 %v531_v32, %v15841_v47  ;;  %v595_v37 = vadd.f32 %v594_v33, %v15844_v48  ;;  %1560 = vmatpush1.bf16.msra.mxu0 %v14968_v18  ;;  %1623 = vmatpush1.bf16.msra.mxu1 %v14971_v19  ;;  %v14997_v28 = vld [vmem:[#allocation8 + $0x26c] ss:$16 sps:$4 sm:$0xff]  }
 0x1a6   :  { %v535_v46 = vpop.f32.mrf.mxu0  ;;  %v598_v51 = vpop.f32.mrf.mxu1  ;;  %1561 = vmatprep.subr.bf16.mxu0 %v14976_v25  ;;  %1624 = vmatprep.subr.bf16.mxu1 %v14979_v26  ;;  %v15000_v32 = vld [vmem:[#allocation8 + $0x4c] ss:$16 sps:$4 sm:$0xff]  }
 0x1a7   :  { %v620_v54 = vmax.f32 %v532_v36, 0.0  ;;  %v622_v55 = vmax.f32 %v595_v37, 0.0  ;;  %v15880_v56 = vpack.c.bf16 %v619_v34, %v615_v29  ;;  %v15882_v57 = vpack.c.bf16 %v621_v35, %v617_v30  ;;  %v14992_v30 = vld [vmem:[#allocation8 + $0x68] ss:$16 sps:$4 sm:$0xff]   ;;  %v15003_v33 = vld [vmem:[#allocation8 + $0x24c] ss:$16 sps:$4 sm:$0xff]  }
 0x1a8   :  { %v536_v58 = vadd.f32 %v535_v46, %v15847_v49  ;;  %v599_v59 = vadd.f32 %v598_v51, %v15850_v50  ;;  %v537_v60 = vpop.f32.mrf.mxu0  ;;  %v600_v61 = vpop.f32.mrf.mxu1  ;;  %v14998_v34 = vld [vmem:[#allocation8 + $0x48] ss:$16 sps:$4 sm:$0xff]   ;;  %v15006_v36 = vld [vmem:[#allocation8 + $0x2c] ss:$16 sps:$4 sm:$0xff]  }
 0x1a9   :  { %v538_v62 = vadd.f32 %v537_v60, %v15841_v47  ;;  %v601_v63 = vadd.f32 %v600_v61, %v15844_v48  ;;  %1562 = vmatpush1.bf16.msra.mxu0 %v14974_v38  ;;  %1625 = vmatpush1.bf16.msra.mxu1 %v14977_v44  ;;  %v15888_v0 = vpack.c.bf16 %v620_v54, %v616_v31  ;;  %v14995_v31 = vld [vmem:[#allocation8 + $0x268] ss:$16 sps:$4 sm:$0xff]   ;;  %v15009_v37 = vld [vmem:[#allocation8 + $0x22c] ss:$16 sps:$4 sm:$0xff]  }
 0x1aa   :  { %v539_v2 = vpop.f32.mrf.mxu0  ;;  %v602_v3 = vpop.f32.mrf.mxu1  ;;  %v15890_v4 = vpack.c.bf16 %v622_v55, %v618_v45  ;;  %1563 = vmatprep.subr.bf16.mxu0 %v14982_v52  ;;  %1626 = vmatprep.subr.bf16.mxu1 %v14985_v53  ;;  %v623_v10 = vmax.f32 %v536_v58, 0.0  ;;  %v625_v11 = vmax.f32 %v599_v59, 0.0  ;;  %v15001_v35 = vld [vmem:[#allocation8 + $0x248] ss:$16 sps:$4 sm:$0xff]   ;;  %v15012_v45 = vld [vmem:[#allocation8 + $0xc] ss:$16 sps:$4 sm:$0xff]  }
 0x1ab   :  { %v540_v7 = vadd.f32 %v539_v2, %v15847_v49  ;;  %v603_v8 = vadd.f32 %v602_v3, %v15850_v50  ;;  %1475 = vmatprep.mubr.bf16.mxu0 %v15888_v0  ;;  %v624_v12 = vmax.f32 %v538_v62, 0.0  ;;  %v626_v13 = vmax.f32 %v601_v63, 0.0  ;;  %v14986_v50 = vld [vmem:[#allocation8 + $0x88] ss:$16 sps:$4 sm:$0xff]   ;;  %v15015_v46 = vld [vmem:[#allocation8 + $0x20c] ss:$16 sps:$4 sm:$0xff]  }
 0x1ac   :  { %1538 = vmatprep.mubr.bf16.mxu1 %v15890_v4  ;;  %v541_v14 = vpop.f32.mrf.mxu0  ;;  %v604_v15 = vpop.f32.mrf.mxu1  ;;  %1476 = vmatmul.mubr.bf16.gmra.mxu0 %v15880_v56  ;;  %v15004_v38 = vld [vmem:[#allocation8 + $0x28] ss:$16 sps:$4 sm:$0xff]   ;;  %v15018_v52 = vld [vmem:[#allocation8 + $0x1ec] ss:$16 sps:$4 sm:$0xff]  }
 0x1ad   :  { %v627_v18 = vmax.f32 %v540_v7, 0.0  ;;  %v629_v19 = vmax.f32 %v603_v8, 0.0  ;;  %v542_v22 = vadd.f32 %v541_v14, %v15841_v47  ;;  %v605_v49 = vadd.f32 %v604_v15, %v15844_v48  ;;  %1539 = vmatmul.mubr.bf16.gmra.mxu1 %v15882_v57  ;;  %1564 = vmatpush1.bf16.msra.mxu0 %v14980_v1  ;;  %v15007_v44 = vld [vmem:[#allocation8 + $0x228] ss:$16 sps:$4 sm:$0xff]   ;;  %v15021_v53 = vld [vmem:[#allocation8 + $0x3ec] ss:$16 sps:$4 sm:$0xff]  }
 0x1ae   :  { %1627 = vmatpush1.bf16.msra.mxu1 %v14983_v5  ;;  %1565 = vmatprep.subr.bf16.mxu0 %v14988_v6  ;;  %v15010_v51 = vld [vmem:[#allocation8 + $0x8] ss:$16 sps:$4 sm:$0xff]   ;;  %v15024_v55 = vld [vmem:[#allocation8 + $0x1cc] ss:$16 sps:$4 sm:$0xff]  }
 0x1af   :  { %v628_v25 = vmax.f32 %v542_v22, 0.0  ;;  %v630_v26 = vmax.f32 %v605_v49, 0.0  ;;  %1628 = vmatprep.subr.bf16.mxu1 %v14991_v9  ;;  %v15900_v27 = vpack.c.bf16 %v627_v18, %v623_v10  ;;  %v15902_v29 = vpack.c.bf16 %v629_v19, %v625_v11  ;;  %v15019_v54 = vld [vmem:[#allocation8 + $0x3e8] ss:$16 sps:$4 sm:$0xff]   ;;  %v15027_v58 = vld [vmem:[#allocation8 + $0x3cc] ss:$16 sps:$4 sm:$0xff]  }
 0x1b0   :  { %v15022_v59 = vld [vmem:[#allocation8 + $0x1c8] ss:$16 sps:$4 sm:$0xff]   ;;  %v15030_v61 = vld [vmem:[#allocation8 + $0x1ac] ss:$16 sps:$4 sm:$0xff]  }
 0x1b1   :  { %1566 = vmatpush1.bf16.msra.mxu0 %v14986_v50  ;;  %v15904_v47 = vpack.c.bf16 %v628_v25, %v624_v12  ;;  %v15906_v48 = vpack.c.bf16 %v630_v26, %v626_v13  ;;  %v15025_v60 = vld [vmem:[#allocation8 + $0x3c8] ss:$16 sps:$4 sm:$0xff]   ;;  %v15033_v62 = vld [vmem:[#allocation8 + $0x3ac] ss:$16 sps:$4 sm:$0xff]   ;;  %v15064_v26 = vld [vmem:[#allocation11 + $0xe0] ss:$16 sps:$4 sm:$0xff]  }
 0x1b2   :  { %1629 = vmatpush1.bf16.msra.mxu1 %v14989_v23  ;;  %1567 = vmatprep.subr.bf16.mxu0 %v14994_v24  ;;  %v15028_v63 = vld [vmem:[#allocation8 + $0x1a8] ss:$16 sps:$4 sm:$0xff]   ;;  %v15036_v2 = vld [vmem:[#allocation8 + $0x18c] ss:$16 sps:$4 sm:$0xff]  }
 0x1b3   :  { %1485 = vmatprep.mubr.bf16.mxu0 %v15904_v47  ;;  %1548 = vmatprep.mubr.bf16.mxu1 %v15906_v48  ;;  %v15031_v1 = vld [vmem:[#allocation8 + $0x3a8] ss:$16 sps:$4 sm:$0xff]   ;;  %v15039_v3 = vld [vmem:[#allocation8 + $0x38c] ss:$16 sps:$4 sm:$0xff]  }
 0x1b4   :  { %1630 = vmatprep.subr.bf16.mxu1 %v14997_v28  ;;  %1486 = vmatmul.mubr.bf16.gmra.mxu0 %v15900_v27  ;;  %v15034_v5 = vld [vmem:[#allocation8 + $0x188] ss:$16 sps:$4 sm:$0xff]   ;;  %v15042_v7 = vld [vmem:[#allocation8 + $0x16c] ss:$16 sps:$4 sm:$0xff]  }
 0x1b5   :  { %1549 = vmatmul.mubr.bf16.gmra.mxu1 %v15902_v29  ;;  %1568 = vmatpush1.bf16.msra.mxu0 %v14992_v30  ;;  %v15037_v6 = vld [vmem:[#allocation8 + $0x388] ss:$16 sps:$4 sm:$0xff]   ;;  %v15045_v8 = vld [vmem:[#allocation8 + $0x36c] ss:$16 sps:$4 sm:$0xff]   ;;  %v15067_v30 = vld [vmem:[#allocation11 + $0xc0] ss:$16 sps:$4 sm:$0xff]  }
 0x1b6   :  { %1631 = vmatpush1.bf16.msra.mxu1 %v14995_v31  ;;  %1591 = vmatprep.mubr.bf16.mxu0 %v15863_v16  ;;  %v15013_v16 = vld [vmem:[#allocation8 + $0x208] ss:$16 sps:$4 sm:$0xff]   ;;  %v15048_v11 = vld [vmem:[#allocation8 + $0x14c] ss:$16 sps:$4 sm:$0xff]  }
 0x1b7   :  { %1654 = vmatprep.mubr.bf16.mxu1 %v15865_v17  ;;  %1569 = vmatprep.subr.bf16.mxu0 %v15000_v32  ;;  %v15016_v17 = vld [vmem:[#allocation8 + $0x1e8] ss:$16 sps:$4 sm:$0xff]   ;;  %v15051_v12 = vld [vmem:[#allocation8 + $0x34c] ss:$16 sps:$4 sm:$0xff]   ;;  %v15070_v32 = vld [vmem:[#allocation11 + $0xa0] ss:$16 sps:$4 sm:$0xff]  }
 0x1b8   :  { %1632 = vmatprep.subr.bf16.mxu1 %v15003_v33  ;;  %v15040_v9 = vld [vmem:[#allocation8 + $0x168] ss:$16 sps:$4 sm:$0xff]   ;;  %v15054_v15 = vld [vmem:[#allocation8 + $0x12c] ss:$16 sps:$4 sm:$0xff]  }
 0x1b9   :  { %1570 = vmatpush1.bf16.msra.mxu0 %v14998_v34  ;;  %v15043_v10 = vld [vmem:[#allocation8 + $0x368] ss:$16 sps:$4 sm:$0xff]   ;;  %v15057_v18 = vld [vmem:[#allocation8 + $0x32c] ss:$16 sps:$4 sm:$0xff]  }
 0x1ba   :  { %1633 = vmatpush1.bf16.msra.mxu1 %v15001_v35  ;;  %1571 = vmatprep.subr.bf16.mxu0 %v15006_v36  ;;  %v15046_v13 = vld [vmem:[#allocation8 + $0x148] ss:$16 sps:$4 sm:$0xff]   ;;  %v15060_v49 = vld [vmem:[#allocation8 + $0x10c] ss:$16 sps:$4 sm:$0xff]   ;;  %v15112_v35 = vld [vmem:[#allocation11 + $0x2e0] ss:$16 sps:$4 sm:$0xff]  }
 0x1bb   :  { %1634 = vmatprep.subr.bf16.mxu1 %v15009_v37  ;;  %v15049_v14 = vld [vmem:[#allocation8 + $0x348] ss:$16 sps:$4 sm:$0xff]   ;;  %v15063_v50 = vld [vmem:[#allocation8 + $0x30c] ss:$16 sps:$4 sm:$0xff]   ;;  %v15082_v36 = vld [vmem:[#allocation11 + $0x20] ss:$16 sps:$4 sm:$0xff]  }
 0x1bc   :  { %v15052_v19 = vld [vmem:[#allocation8 + $0x128] ss:$16 sps:$4 sm:$0xff]  }
 0x1bd   :  { %1572 = vmatpush1.bf16.msra.mxu0 %v15004_v38  ;;  %v15055_v22 = vld [vmem:[#allocation8 + $0x328] ss:$16 sps:$4 sm:$0xff]  }
 0x1be   :  { %1635 = vmatpush1.bf16.msra.mxu1 %v15007_v44  ;;  %1573 = vmatprep.subr.bf16.mxu0 %v15012_v45  ;;  %v15058_v23 = vld [vmem:[#allocation8 + $0x108] ss:$16 sps:$4 sm:$0xff]   ;;  %v15124_v44 = vld [vmem:[#allocation11 + $0x2a0] ss:$16 sps:$4 sm:$0xff]  }
 0x1bf   :  { %1636 = vmatprep.subr.bf16.mxu1 %v15015_v46  ;;  %v15061_v24 = vld [vmem:[#allocation8 + $0x308] ss:$16 sps:$4 sm:$0xff]   ;;  %v15130_v46 = vld [vmem:[#allocation11 + $0x280] ss:$16 sps:$4 sm:$0xff]  }
 0x1c0   :  { %v15066_v25 = vld [vmem:[#allocation11 + $0xe4] ss:$16 sps:$4 sm:$0xff]  }
 0x1c1   :  { %1574 = vmatpush1.bf16.msra.mxu0 %v15010_v51  ;;  %v15069_v28 = vld [vmem:[#allocation11 + $0xc4] ss:$16 sps:$4 sm:$0xff]  }
 0x1c2   :  { %1637 = vmatpush1.bf16.msra.mxu1 %v15013_v16  ;;  %1575 = vmatprep.subr.bf16.mxu0 %v15018_v52  ;;  %v15072_v31 = vld [vmem:[#allocation11 + $0xa4] ss:$16 sps:$4 sm:$0xff]   ;;  %v15088_v16 = vld [vmem:[#allocation11 + $0x1e0] ss:$16 sps:$4 sm:$0xff]  }
 0x1c3   :  { %1638 = vmatprep.subr.bf16.mxu1 %v15021_v53  ;;  %v15075_v33 = vld [vmem:[#allocation11 + $0x84] ss:$16 sps:$4 sm:$0xff]   ;;  %v15136_v52 = vld [vmem:[#allocation11 + $0x260] ss:$16 sps:$4 sm:$0xff]  }
 0x1c4   :  { %v15081_v34 = vld [vmem:[#allocation11 + $0x44] ss:$16 sps:$4 sm:$0xff]  }
 0x1c5   :  { %1576 = vmatpush2.bf16.msra.mxu0 %v15016_v17  ;;  %v15126_v37 = vld [vmem:[#allocation11 + $0x2a4] ss:$16 sps:$4 sm:$0xff]  }
 0x1c6   :  { %1639 = vmatpush2.bf16.msra.mxu1 %v15019_v54  ;;  %1577 = vmatprep.subr.bf16.mxu0 %v15024_v55  ;;  %v15087_v38 = vld [vmem:[#allocation11 + $0x4] ss:$16 sps:$4 sm:$0xff]   ;;  %v15091_v54 = vld [vmem:[#allocation11 + $0x1c0] ss:$16 sps:$4 sm:$0xff]  }
 0x1c7   :  { %1640 = vmatprep.subr.bf16.mxu1 %v15027_v58  ;;  %v15090_v45 = vld [vmem:[#allocation11 + $0x1e4] ss:$16 sps:$4 sm:$0xff]   ;;  %v15142_v55 = vld [vmem:[#allocation11 + $0x240] ss:$16 sps:$4 sm:$0xff]  }
 0x1c8   :  { %v15138_v51 = vld [vmem:[#allocation11 + $0x264] ss:$16 sps:$4 sm:$0xff]  }
 0x1c9   :  { %1578 = vmatpush2.bf16.msra.mxu0 %v15022_v59  ;;  %v15093_v53 = vld [vmem:[#allocation11 + $0x1c4] ss:$16 sps:$4 sm:$0xff]  }
 0x1ca   :  { %1641 = vmatpush2.bf16.msra.mxu1 %v15025_v60  ;;  %1579 = vmatprep.subr.bf16.mxu0 %v15030_v61  ;;  %v15144_v17 = vld [vmem:[#allocation11 + $0x244] ss:$16 sps:$4 sm:$0xff]   ;;  %v15094_v60 = vld [vmem:[#allocation11 + $0x1a0] ss:$16 sps:$4 sm:$0xff]  }
 0x1cb   :  { %1642 = vmatprep.subr.bf16.mxu1 %v15033_v62  ;;  %v15096_v58 = vld [vmem:[#allocation11 + $0x1a4] ss:$16 sps:$4 sm:$0xff]   ;;  %v15148_v61 = vld [vmem:[#allocation11 + $0x220] ss:$16 sps:$4 sm:$0xff]  }
 0x1cc   :  { %v15150_v59 = vld [vmem:[#allocation11 + $0x224] ss:$16 sps:$4 sm:$0xff]  }
 0x1cd   :  { %1580 = vmatpush2.bf16.msra.mxu0 %v15028_v63  ;;  %v15099_v62 = vld [vmem:[#allocation11 + $0x184] ss:$16 sps:$4 sm:$0xff]  }
 0x1ce   :  { %1643 = vmatpush2.bf16.msra.mxu1 %v15031_v1  ;;  %1581 = vmatprep.subr.bf16.mxu0 %v15036_v2  ;;  %v15156_v63 = vld [vmem:[#allocation11 + $0x204] ss:$16 sps:$4 sm:$0xff]   ;;  %v15097_v1 = vld [vmem:[#allocation11 + $0x180] ss:$16 sps:$4 sm:$0xff]  }
 0x1cf   :  { %1644 = vmatprep.subr.bf16.mxu1 %v15039_v3  ;;  %v15154_v2 = vld [vmem:[#allocation11 + $0x200] ss:$16 sps:$4 sm:$0xff]   ;;  %v15102_v3 = vld [vmem:[#allocation11 + $0x164] ss:$16 sps:$4 sm:$0xff]  }
 0x1d1   :  { %1582 = vmatpush2.bf16.msra.mxu0 %v15034_v5  ;;  %v15162_v5 = vld [vmem:[#allocation11 + $0x3e4] ss:$16 sps:$4 sm:$0xff]  }
 0x1d2   :  { %1645 = vmatpush2.bf16.msra.mxu1 %v15037_v6  ;;  %1583 = vmatprep.subr.bf16.mxu0 %v15042_v7  ;;  %v15100_v6 = vld [vmem:[#allocation11 + $0x160] ss:$16 sps:$4 sm:$0xff]  }
 0x1d3   :  { %1646 = vmatprep.subr.bf16.mxu1 %v15045_v8  ;;  %v15160_v7 = vld [vmem:[#allocation11 + $0x3e0] ss:$16 sps:$4 sm:$0xff]   ;;  %v15105_v8 = vld [vmem:[#allocation11 + $0x144] ss:$16 sps:$4 sm:$0xff]  }
 0x1d5   :  { %1584 = vmatpush2.bf16.msra.mxu0 %v15040_v9  ;;  %v15168_v9 = vld [vmem:[#allocation11 + $0x3c4] ss:$16 sps:$4 sm:$0xff]  }
 0x1d6   :  { %1647 = vmatpush2.bf16.msra.mxu1 %v15043_v10  ;;  %1585 = vmatprep.subr.bf16.mxu0 %v15048_v11  ;;  %v15103_v10 = vld [vmem:[#allocation11 + $0x140] ss:$16 sps:$4 sm:$0xff]  }
 0x1d7   :  { %1648 = vmatprep.subr.bf16.mxu1 %v15051_v12  ;;  %v15166_v11 = vld [vmem:[#allocation11 + $0x3c0] ss:$16 sps:$4 sm:$0xff]   ;;  %v15108_v12 = vld [vmem:[#allocation11 + $0x124] ss:$16 sps:$4 sm:$0xff]  }
 0x1d9   :  { %1586 = vmatpush2.bf16.msra.mxu0 %v15046_v13  ;;  %v15174_v13 = vld [vmem:[#allocation11 + $0x3a4] ss:$16 sps:$4 sm:$0xff]  }
 0x1da   :  { %1649 = vmatpush2.bf16.msra.mxu1 %v15049_v14  ;;  %1587 = vmatprep.subr.bf16.mxu0 %v15054_v15  ;;  %v15106_v14 = vld [vmem:[#allocation11 + $0x120] ss:$16 sps:$4 sm:$0xff]  }
 0x1db   :  { %1650 = vmatprep.subr.bf16.mxu1 %v15057_v18  ;;  %v15172_v15 = vld [vmem:[#allocation11 + $0x3a0] ss:$16 sps:$4 sm:$0xff]   ;;  %v15111_v18 = vld [vmem:[#allocation11 + $0x104] ss:$16 sps:$4 sm:$0xff]  }
 0x1dd   :  { %1588 = vmatpush2.bf16.msra.mxu0 %v15052_v19  ;;  %v15180_v19 = vld [vmem:[#allocation11 + $0x384] ss:$16 sps:$4 sm:$0xff]  }
 0x1de   :  { %1651 = vmatpush2.bf16.msra.mxu1 %v15055_v22  ;;  %1589 = vmatprep.subr.bf16.mxu0 %v15060_v49  ;;  %v15109_v22 = vld [vmem:[#allocation11 + $0x100] ss:$16 sps:$4 sm:$0xff]  }
 0x1df   :  { %1652 = vmatprep.subr.bf16.mxu1 %v15063_v50  ;;  %v15178_v49 = vld [vmem:[#allocation11 + $0x380] ss:$16 sps:$4 sm:$0xff]   ;;  %v15117_v50 = vld [vmem:[#allocation11 + $0xec] ss:$16 sps:$4 sm:$0xff]  }
 0x1e1   :  { %1590 = vmatpush2.bf16.msra.mxu0 %v15058_v23  ;;  %v15186_v23 = vld [vmem:[#allocation11 + $0x364] ss:$16 sps:$4 sm:$0xff]  }
 0x1e2   :  { %1653 = vmatpush2.bf16.msra.mxu1 %v15061_v24  ;;  %2511 = vmatprep.subr.bf16.mxu0 %v15066_v25  ;;  %v15184_v24 = vld [vmem:[#allocation11 + $0x360] ss:$16 sps:$4 sm:$0xff]   ;;  %v15192_v25 = vld [vmem:[#allocation11 + $0x344] ss:$16 sps:$4 sm:$0xff]  }
 0x1e4   :  { %1592 = vmatmul.mubr.bf16.vlgmr.msra.gmra.mxu0 %v15867_v20  ;;  %v15073_v20 = vld [vmem:[#allocation11 + $0x80] ss:$16 sps:$4 sm:$0xff]  }
 0x1e5   :  { %1655 = vmatmul.mubr.bf16.vlgmr.msra.gmra.mxu1 %v15869_v21  ;;  %1601 = vmatprep.mubr.bf16.mxu0 %v15888_v0  ;;  %v15078_v21 = vld [vmem:[#allocation11 + $0x64] ss:$16 sps:$4 sm:$0xff]   ;;  %v15076_v0 = vld [vmem:[#allocation11 + $0x60] ss:$16 sps:$4 sm:$0xff]  }
 0x1e6   :  { %1664 = vmatprep.mubr.bf16.mxu1 %v15890_v4  ;;  %2512 = vmatpush1.bf16.msra.mxu0 %v15064_v26  ;;  %v15114_v4 = vld [vmem:[#allocation11 + $0x2e4] ss:$16 sps:$4 sm:$0xff]   ;;  %v15190_v26 = vld [vmem:[#allocation11 + $0x340] ss:$16 sps:$4 sm:$0xff]  }
 0x1e7   :  { %2513 = vmatprep.subr.bf16.mxu0 %v15069_v28  ;;  %2574 = vmatprep.subr.bf16.mxu1 %v15114_v4  ;;  %v15198_v28 = vld [vmem:[#allocation11 + $0x324] ss:$16 sps:$4 sm:$0xff]  }
 0x1e8   :  { %2575 = vmatpush1.bf16.msra.mxu1 %v15112_v35 }
 0x1ea   :  { %2514 = vmatpush1.bf16.msra.mxu0 %v15067_v30  ;;  %v15196_v30 = vld [vmem:[#allocation11 + $0x320] ss:$16 sps:$4 sm:$0xff]  }
 0x1eb   :  { %2515 = vmatprep.subr.bf16.mxu0 %v15072_v31  ;;  %v15204_v31 = vld [vmem:[#allocation11 + $0x304] ss:$16 sps:$4 sm:$0xff]  }
 0x1ec   :  { %1602 = vmatmul.mubr.bf16.gmra.mxu0 %v15880_v56  ;;  %v15079_v56 = vld [vmem:[#allocation11 + $0x40] ss:$16 sps:$4 sm:$0xff]  }
 0x1ed   :  { %1665 = vmatmul.mubr.bf16.gmra.mxu1 %v15882_v57  ;;  %1611 = vmatprep.mubr.bf16.mxu0 %v15904_v47  ;;  %v15120_v57 = vld [vmem:[#allocation11 + $0x2c4] ss:$16 sps:$4 sm:$0xff]  }
 0x1ee   :  { %1674 = vmatprep.mubr.bf16.mxu1 %v15906_v48  ;;  %2516 = vmatpush1.bf16.msra.mxu0 %v15070_v32  ;;  %v15084_v47 = vld [vmem:[#allocation11 + $0x24] ss:$16 sps:$4 sm:$0xff]   ;;  %v15118_v48 = vld [vmem:[#allocation11 + $0x2c0] ss:$16 sps:$4 sm:$0xff]  }
 0x1ef   :  { %2517 = vmatprep.subr.bf16.mxu0 %v15075_v33  ;;  %2576 = vmatprep.subr.bf16.mxu1 %v15120_v57  ;;  %v15202_v32 = vld [vmem:[#allocation11 + $0x300] ss:$16 sps:$4 sm:$0xff]   ;;  %v15210_v33 = vld [vmem:[#allocation11 + $0x2ec] ss:$16 sps:$4 sm:$0xff]  }
 0x1f0   :  { %2577 = vmatpush1.bf16.msra.mxu1 %v15118_v48 }
 0x1f1   :  { %2578 = vmatprep.subr.bf16.mxu1 %v15126_v37 }
 0x1f2   :  { %2518 = vmatpush1.bf16.msra.mxu0 %v15073_v20  ;;  %v15924_v20 = vld [vmem:[#allocation10] sm:$0xf] }
 0x1f3   :  { %2519 = vmatprep.subr.bf16.mxu0 %v15078_v21  ;;  %v15928_v21 = vrot.slane %v15924_v20, %v15829_v40 }
 0x1f4   :  { %1612 = vmatmul.mubr.bf16.gmra.mxu0 %v15900_v27  ;;  %v15085_v27 = vld [vmem:[#allocation11] ss:$16 sps:$4 sm:$0xff]   ;;  %2579 = vmatpush1.bf16.msra.mxu1 %v15124_v44 }
 0x1f5   :  { %1675 = vmatmul.mubr.bf16.gmra.mxu1 %v15902_v29  ;;  %v15132_v29 = vld [vmem:[#allocation11 + $0x284] ss:$16 sps:$4 sm:$0xff]  }
 0x1f6   :  { %2520 = vmatpush1.bf16.msra.mxu0 %v15076_v0  ;;  %2580 = vmatprep.subr.bf16.mxu1 %v15132_v29  ;;  %v776_v0 = vrot.slane %v15924_v20, %v15835_v42 }
 0x1f7   :  { %2521 = vmatprep.subr.bf16.mxu0 %v15081_v34 }
 0x1f8   :  { %2581 = vmatpush1.bf16.msra.mxu1 %v15130_v46 }
 0x1f9   :  { %2582 = vmatprep.subr.bf16.mxu1 %v15138_v51 }
 0x1fa   :  { %2522 = vmatpush1.bf16.msra.mxu0 %v15079_v56 }
 0x1fb   :  { %2523 = vmatprep.subr.bf16.mxu0 %v15084_v47 }
 0x1fc   :  { %2583 = vmatpush1.bf16.msra.mxu1 %v15136_v52 }
 0x1fd   :  { %2584 = vmatprep.subr.bf16.mxu1 %v15144_v17 }
 0x1fe   :  { %2524 = vmatpush1.bf16.msra.mxu0 %v15082_v36 }
 0x1ff   :  { %2525 = vmatprep.subr.bf16.mxu0 %v15087_v38 }
 0x200   :  { %2585 = vmatpush1.bf16.msra.mxu1 %v15142_v55 }
 0x201   :  { %2586 = vmatprep.subr.bf16.mxu1 %v15150_v59 }
 0x202   :  { %2526 = vmatpush1.bf16.msra.mxu0 %v15085_v27 }
 0x203   :  { %2527 = vmatprep.subr.bf16.mxu0 %v15090_v45 }
 0x204   :  { %2587 = vmatpush1.bf16.msra.mxu1 %v15148_v61 }
 0x205   :  { %2588 = vmatprep.subr.bf16.mxu1 %v15156_v63 }
 0x206   :  { %2528 = vmatpush2.bf16.msra.mxu0 %v15088_v16 }
 0x207   :  { %2529 = vmatprep.subr.bf16.mxu0 %v15093_v53 }
 0x208   :  { %2589 = vmatpush1.bf16.msra.mxu1 %v15154_v2 }
 0x209   :  { %2590 = vmatprep.subr.bf16.mxu1 %v15162_v5 }
 0x20a   :  { %2530 = vmatpush2.bf16.msra.mxu0 %v15091_v54 }
 0x20b   :  { %2531 = vmatprep.subr.bf16.mxu0 %v15096_v58 }
 0x20c   :  { %2591 = vmatpush2.bf16.msra.mxu1 %v15160_v7 }
 0x20d   :  { %2592 = vmatprep.subr.bf16.mxu1 %v15168_v9  ;;  %v15123_v9 = vld [vmem:[#allocation11 + $0xcc] ss:$16 sps:$4 sm:$0xff]  }
 0x20e   :  { %2532 = vmatpush2.bf16.msra.mxu0 %v15094_v60 }
 0x20f   :  { %2533 = vmatprep.subr.bf16.mxu0 %v15099_v62 }
 0x210   :  { %2593 = vmatpush2.bf16.msra.mxu1 %v15166_v11 }
 0x211   :  { %2594 = vmatprep.subr.bf16.mxu1 %v15174_v13 }
 0x212   :  { %2534 = vmatpush2.bf16.msra.mxu0 %v15097_v1 }
 0x213   :  { %2535 = vmatprep.subr.bf16.mxu0 %v15102_v3 }
 0x214   :  { %2595 = vmatpush2.bf16.msra.mxu1 %v15172_v15 }
 0x215   :  { %2596 = vmatprep.subr.bf16.mxu1 %v15180_v19 }
 0x216   :  { %2536 = vmatpush2.bf16.msra.mxu0 %v15100_v6  ;;  %v15115_v6 = vld [vmem:[#allocation11 + $0xe8] ss:$16 sps:$4 sm:$0xff]  }
 0x217   :  { %2537 = vmatprep.subr.bf16.mxu0 %v15105_v8 }
 0x218   :  { %2597 = vmatpush2.bf16.msra.mxu1 %v15178_v49 }
 0x219   :  { %2598 = vmatprep.subr.bf16.mxu1 %v15186_v23 }
 0x21a   :  { %2538 = vmatpush2.bf16.msra.mxu0 %v15103_v10 }
 0x21b   :  { %2539 = vmatprep.subr.bf16.mxu0 %v15108_v12 }
 0x21c   :  { %2599 = vmatpush2.bf16.msra.mxu1 %v15184_v24  ;;  %v15129_v24 = vld [vmem:[#allocation11 + $0xac] ss:$16 sps:$4 sm:$0xff]  }
 0x21d   :  { %2600 = vmatprep.subr.bf16.mxu1 %v15192_v25 }
 0x21e   :  { %2540 = vmatpush2.bf16.msra.mxu0 %v15106_v14 }
 0x21f   :  { %2541 = vmatprep.subr.bf16.mxu0 %v15111_v18 }
 0x220   :  { %2601 = vmatpush2.bf16.msra.mxu1 %v15190_v26 }
 0x221   :  { %2602 = vmatprep.subr.bf16.mxu1 %v15198_v28 }
 0x222   :  { %2542 = vmatpush2.bf16.msra.mxu0 %v15109_v22 }
 0x223   :  { %2637 = vmatprep.subr.bf16.mxu0 %v15117_v50  ;;  %v15121_v50 = vld [vmem:[#allocation11 + $0xc8] ss:$16 sps:$4 sm:$0xff]  }
 0x224   :  { %2603 = vmatpush2.bf16.msra.mxu1 %v15196_v30 }
 0x225   :  { %2604 = vmatprep.subr.bf16.mxu1 %v15204_v31 }
 0x228   :  { %2605 = vmatpush2.bf16.msra.mxu1 %v15202_v32 }
 0x229   :  { %2700 = vmatprep.subr.bf16.mxu1 %v15210_v33 }
 0x264   :  { %v1467_v4 = vpop.f32.mrf.mxu0  ;;  %v1530_v34 = vpop.f32.mrf.mxu1 }
 0x265   :  { %v1468_v47 = vadd.f32 %v1467_v4, %v776_v0 }
 0x266   :  { %v1469_v35 = vpop.f32.mrf.mxu0  ;;  %v1532_v56 = vpop.f32.mrf.mxu1 }
 0x267   :  { %v1470_v57 = vadd.f32 %v1469_v35, %v15928_v21  ;;  %v1531_v46 = vadd.f32 %v1530_v34, %v1468_v47  ;;  %v15135_v47 = vld [vmem:[#allocation11 + $0x8c] ss:$16 sps:$4 sm:$0xff]  }
 0x268   :  { %v1471_v48 = vpop.f32.mrf.mxu0  ;;  %v1534_v36 = vpop.f32.mrf.mxu1 }
 0x269   :  { %v1472_v37 = vadd.f32 %v1471_v48, %v776_v0  ;;  %v1533_v44 = vadd.f32 %v1532_v56, %v1470_v57  ;;  %v1685_v61 = vmax.f32 %v1531_v46, 0.0  ;;  %v15127_v56 = vld [vmem:[#allocation11 + $0xa8] ss:$16 sps:$4 sm:$0xff]  }
 0x26a   :  { %v1473_v38 = vpop.f32.mrf.mxu0  ;;  %v1536_v45 = vpop.f32.mrf.mxu1 }
 0x26b   :  { %v1535_v27 = vadd.f32 %v1534_v36, %v1472_v37  ;;  %v1474_v29 = vadd.f32 %v1473_v38, %v15928_v21  ;;  %v1686_v55 = vmax.f32 %v1533_v44, 0.0 }
 0x26c   :  { %v1477_v51 = vpop.f32.mrf.mxu0 }
 0x26d   :  { %v1537_v16 = vadd.f32 %v1536_v45, %v1474_v29  ;;  %v1478_v52 = vadd.f32 %v1477_v51, %v776_v0  ;;  %v1540_v53 = vpop.f32.mrf.mxu1  ;;  %v1689_v17 = vmax.f32 %v1535_v27, 0.0  ;;  %v15133_v29 = vld [vmem:[#allocation11 + $0x88] ss:$16 sps:$4 sm:$0xff]   ;;  %v15141_v45 = vld [vmem:[#allocation11 + $0x6c] ss:$16 sps:$4 sm:$0xff]  }
 0x26e   :  { %v1479_v54 = vpop.f32.mrf.mxu0 }
 0x26f   :  { %v1690_v58 = vmax.f32 %v1537_v16, 0.0  ;;  %v1480_v59 = vadd.f32 %v1479_v54, %v15928_v21  ;;  %v1542_v60 = vpop.f32.mrf.mxu1  ;;  %v1541_v62 = vadd.f32 %v1540_v53, %v1478_v52  ;;  %v15935_v7 = vpack.c.bf16 %v1689_v17, %v1685_v61  ;;  %v15147_v52 = vld [vmem:[#allocation11 + $0x4c] ss:$16 sps:$4 sm:$0xff]   ;;  %v15145_v53 = vld [vmem:[#allocation11 + $0x48] ss:$16 sps:$4 sm:$0xff]  }
 0x270   :  { %v1481_v63 = vpop.f32.mrf.mxu0  ;;  %v15153_v17 = vld [vmem:[#allocation11 + $0x2c] ss:$16 sps:$4 sm:$0xff]   ;;  %v15151_v54 = vld [vmem:[#allocation11 + $0x28] ss:$16 sps:$4 sm:$0xff]  }
 0x271   :  { %v1482_v1 = vadd.f32 %v1481_v63, %v776_v0  ;;  %v1543_v2 = vadd.f32 %v1542_v60, %v1480_v59  ;;  %v1544_v3 = vpop.f32.mrf.mxu1  ;;  %v1710_v5 = vpack.c.bf16 %v1690_v58, %v1686_v55  ;;  %v1693_v13 = vmax.f32 %v1541_v62, 0.0  ;;  %v15159_v55 = vld [vmem:[#allocation11 + $0xc] ss:$16 sps:$4 sm:$0xff]   ;;  %v15157_v58 = vld [vmem:[#allocation11 + $0x8] ss:$16 sps:$4 sm:$0xff]  }
 0x272   :  { %v1483_v8 = vpop.f32.mrf.mxu0  ;;  %v15165_v59 = vld [vmem:[#allocation11 + $0x1ec] ss:$16 sps:$4 sm:$0xff]   ;;  %v15163_v60 = vld [vmem:[#allocation11 + $0x1e8] ss:$16 sps:$4 sm:$0xff]  }
 0x273   :  { %v1484_v10 = vadd.f32 %v1483_v8, %v15928_v21  ;;  %v1545_v11 = vadd.f32 %v1544_v3, %v1482_v1  ;;  %2543 = vmatprep.mubr.bf16.mxu0 %v1710_v5  ;;  %v1546_v12 = vpop.f32.mrf.mxu1  ;;  %v1694_v15 = vmax.f32 %v1543_v2, 0.0  ;;  %v15171_v61 = vld [vmem:[#allocation11 + $0x1cc] ss:$16 sps:$4 sm:$0xff]   ;;  %v15169_v62 = vld [vmem:[#allocation11 + $0x1c8] ss:$16 sps:$4 sm:$0xff]  }
 0x274   :  { %v1487_v14 = vpop.f32.mrf.mxu0  ;;  %2544 = vmatmul.mubr.bf16.vlgmr.msra.gmra.mxu0 %v15935_v7  ;;  %v15177_v63 = vld [vmem:[#allocation11 + $0x1ac] ss:$16 sps:$4 sm:$0xff]   ;;  %v15175_v1 = vld [vmem:[#allocation11 + $0x1a8] ss:$16 sps:$4 sm:$0xff]  }
 0x275   :  { %v1697_v18 = vmax.f32 %v1545_v11, 0.0  ;;  %v1488_v19 = vadd.f32 %v1487_v14, %v776_v0  ;;  %v1547_v22 = vadd.f32 %v1546_v12, %v1484_v10  ;;  %2638 = vmatpush1.bf16.msra.mxu0 %v15115_v6  ;;  %v1550_v49 = vpop.f32.mrf.mxu1  ;;  %v15183_v2 = vld [vmem:[#allocation11 + $0x18c] ss:$16 sps:$4 sm:$0xff]   ;;  %v15181_v3 = vld [vmem:[#allocation11 + $0x188] ss:$16 sps:$4 sm:$0xff]   ;;  %v15959_v10 = vrot.slane %v15924_v20, %v15838_v43 }
 0x276   :  { %v1489_v23 = vpop.f32.mrf.mxu0  ;;  %2639 = vmatprep.subr.bf16.mxu0 %v15123_v9  ;;  %v15187_v6 = vld [vmem:[#allocation11 + $0x168] ss:$16 sps:$4 sm:$0xff]   ;;  %v15195_v8 = vld [vmem:[#allocation11 + $0x14c] ss:$16 sps:$4 sm:$0xff]   ;;  %v15955_v9 = vrot.slane %v15924_v20, %v15832_v41 }
 0x277   :  { %v1698_v25 = vmax.f32 %v1547_v22, 0.0  ;;  %v1490_v26 = vadd.f32 %v1489_v23, %v15928_v21  ;;  %v1552_v28 = vpop.f32.mrf.mxu1  ;;  %v15940_v30 = vpack.c.bf16 %v1697_v18, %v1693_v13  ;;  %v1551_v31 = vadd.f32 %v1550_v49, %v1488_v19  ;;  %v15193_v13 = vld [vmem:[#allocation11 + $0x148] ss:$16 sps:$4 sm:$0xff]  }
 0x278   :  { %v1491_v32 = vpop.f32.mrf.mxu0 }
 0x279   :  { %v1492_v33 = vadd.f32 %v1491_v32, %v776_v0  ;;  %v1553_v4 = vadd.f32 %v1552_v28, %v1490_v26  ;;  %2640 = vmatpush1.bf16.msra.mxu0 %v15121_v50  ;;  %v1554_v34 = vpop.f32.mrf.mxu1  ;;  %v15942_v35 = vpack.c.bf16 %v1698_v25, %v1694_v15  ;;  %v1701_v38 = vmax.f32 %v1551_v31, 0.0  ;;  %v15201_v15 = vld [vmem:[#allocation11 + $0x12c] ss:$16 sps:$4 sm:$0xff]  }
 0x27a   :  { %v1493_v57 = vpop.f32.mrf.mxu0  ;;  %2641 = vmatprep.subr.bf16.mxu0 %v15129_v24  ;;  %v15199_v24 = vld [vmem:[#allocation11 + $0x128] ss:$16 sps:$4 sm:$0xff]   ;;  %v15207_v25 = vld [vmem:[#allocation11 + $0x10c] ss:$16 sps:$4 sm:$0xff]  }
 0x27b   :  { %v1494_v48 = vadd.f32 %v1493_v57, %v15928_v21  ;;  %v1555_v36 = vadd.f32 %v1554_v34, %v1492_v33  ;;  %2553 = vmatprep.mubr.bf16.mxu0 %v15942_v35  ;;  %v1556_v37 = vpop.f32.mrf.mxu1  ;;  %v1702_v44 = vmax.f32 %v1553_v4, 0.0  ;;  %v15139_v21 = vld [vmem:[#allocation11 + $0x68] ss:$16 sps:$4 sm:$0xff]  }
 0x27c   :  { %2554 = vmatmul.mubr.bf16.gmra.mxu0 %v15940_v30  ;;  %v15205_v57 = vld [vmem:[#allocation11 + $0x108] ss:$16 sps:$4 sm:$0xff]  }
 0x27d   :  { %v1705_v0 = vmax.f32 %v1555_v36, 0.0  ;;  %v1557_v27 = vadd.f32 %v1556_v37, %v1494_v48  ;;  %2642 = vmatpush1.bf16.msra.mxu0 %v15127_v56 }
 0x27e   :  { %2643 = vmatprep.subr.bf16.mxu0 %v15135_v47 }
 0x27f   :  { %v1706_v46 = vmax.f32 %v1557_v27, 0.0  ;;  %v15947_v51 = vpack.c.bf16 %v1705_v0, %v1701_v38 }
 0x281   :  { %2644 = vmatpush1.bf16.msra.mxu0 %v15133_v29  ;;  %v15949_v16 = vpack.c.bf16 %v1706_v46, %v1702_v44 }
 0x282   :  { %2645 = vmatprep.subr.bf16.mxu0 %v15141_v45 }
 0x283   :  { %2563 = vmatprep.mubr.bf16.mxu0 %v15949_v16 }
 0x284   :  { %2564 = vmatmul.mubr.bf16.gmra.mxu0 %v15947_v51 }
 0x285   :  { %2646 = vmatpush1.bf16.msra.mxu0 %v15139_v21  ;;  %2669 = vmatprep.mubr.bf16.mxu0 %v1710_v5  ;;  %v15189_v5 = vld [vmem:[#allocation11 + $0x16c] ss:$16 sps:$4 sm:$0xff]  }
 0x286   :  { %2647 = vmatprep.subr.bf16.mxu0 %v15147_v52  ;;  %v15208_v52 = vld [vmem:[#allocation11 + $0x2e8] ss:$16 sps:$4 sm:$0xff]  }
 0x289   :  { %2648 = vmatpush1.bf16.msra.mxu0 %v15145_v53 }
 0x28a   :  { %2649 = vmatprep.subr.bf16.mxu0 %v15153_v17 }
 0x28d   :  { %2650 = vmatpush1.bf16.msra.mxu0 %v15151_v54  ;;  %v15213_v54 = vld [vmem:[#allocation11 + $0x2cc] ss:$16 sps:$4 sm:$0xff]  }
 0x28e   :  { %2651 = vmatprep.subr.bf16.mxu0 %v15159_v55 }
 0x291   :  { %2652 = vmatpush1.bf16.msra.mxu0 %v15157_v58 }
 0x292   :  { %2653 = vmatprep.subr.bf16.mxu0 %v15165_v59 }
 0x295   :  { %2654 = vmatpush2.bf16.msra.mxu0 %v15163_v60 }
 0x296   :  { %2655 = vmatprep.subr.bf16.mxu0 %v15171_v61 }
 0x299   :  { %2656 = vmatpush2.bf16.msra.mxu0 %v15169_v62 }
 0x29a   :  { %2657 = vmatprep.subr.bf16.mxu0 %v15177_v63 }
 0x29d   :  { %2658 = vmatpush2.bf16.msra.mxu0 %v15175_v1 }
 0x29e   :  { %2659 = vmatprep.subr.bf16.mxu0 %v15183_v2  ;;  %v15211_v2 = vld [vmem:[#allocation11 + $0x2c8] ss:$16 sps:$4 sm:$0xff]  }
 0x2a1   :  { %2660 = vmatpush2.bf16.msra.mxu0 %v15181_v3 }
 0x2a2   :  { %2661 = vmatprep.subr.bf16.mxu0 %v15189_v5 }
 0x2a4   :  { %v1593_v11 = vpop.f32.mrf.mxu0 }
 0x2a5   :  { %v1656_v12 = vpop.f32.mrf.mxu1  ;;  %2662 = vmatpush2.bf16.msra.mxu0 %v15187_v6  ;;  %v1594_v22 = vadd.f32 %v1593_v11, %v15959_v10  ;;  %v15216_v6 = vld [vmem:[#allocation11 + $0x2ac] ss:$16 sps:$4 sm:$0xff]  }
 0x2a6   :  { %v1595_v14 = vpop.f32.mrf.mxu0  ;;  %2663 = vmatprep.subr.bf16.mxu0 %v15195_v8 }
 0x2a7   :  { %v1596_v18 = vadd.f32 %v1595_v14, %v15955_v9  ;;  %v1658_v19 = vpop.f32.mrf.mxu1  ;;  %v1657_v33 = vadd.f32 %v1656_v12, %v1594_v22 }
 0x2a8   :  { %v1597_v49 = vpop.f32.mrf.mxu0 }
 0x2a9   :  { %v1598_v50 = vadd.f32 %v1597_v49, %v15959_v10  ;;  %v1660_v23 = vpop.f32.mrf.mxu1  ;;  %2664 = vmatpush2.bf16.msra.mxu0 %v15193_v13  ;;  %v1659_v26 = vadd.f32 %v1658_v19, %v1596_v18  ;;  %v1687_v0 = vmax.f32 %v1657_v33, 0.0 }
 0x2aa   :  { %v1599_v20 = vpop.f32.mrf.mxu0  ;;  %2665 = vmatprep.subr.bf16.mxu0 %v15201_v15 }
 0x2ab   :  { %v1661_v28 = vadd.f32 %v1660_v23, %v1598_v50  ;;  %v1600_v31 = vadd.f32 %v1599_v20, %v15955_v9  ;;  %v1662_v32 = vpop.f32.mrf.mxu1  ;;  %v1688_v36 = vmax.f32 %v1659_v26, 0.0  ;;  %v15219_v23 = vld [vmem:[#allocation11 + $0x28c] ss:$16 sps:$4 sm:$0xff]   ;;  %v3111_v26 = vld [vmem:[#allocation16 + $0x1c0] sm:$0xff] }
 0x2ac   :  { %v1603_v4 = vpop.f32.mrf.mxu0 }
 0x2ad   :  { %v1663_v34 = vadd.f32 %v1662_v32, %v1600_v31  ;;  %v1666_v56 = vpop.f32.mrf.mxu1  ;;  %2666 = vmatpush2.bf16.msra.mxu0 %v15199_v24  ;;  %v1691_v47 = vmax.f32 %v1661_v28, 0.0  ;;  %v1604_v27 = vadd.f32 %v1603_v4, %v15959_v10  ;;  %v3115_v28 = vld [vmem:[#allocation16 + $0x1e0] sm:$0xff] }
 0x2ae   :  { %v1605_v48 = vpop.f32.mrf.mxu0  ;;  %2667 = vmatprep.subr.bf16.mxu0 %v15207_v25  ;;  %v3103_v31 = vld [vmem:[#allocation16 + $0x180] sm:$0xff]  ;;  %v13419_v33 = vcombine.low %v3111_v26, %v3115_v28  ;;  %v13420_v4 = vcombine.high %v3111_v26, %v3115_v28 }
 0x2af   :  { %v1692_v37 = vmax.f32 %v1663_v34, 0.0  ;;  %v1606_v38 = vadd.f32 %v1605_v48, %v15955_v9  ;;  %v1668_v44 = vpop.f32.mrf.mxu1  ;;  %v15970_v53 = vpack.c.bf16 %v1691_v47, %v1687_v0  ;;  %v1667_v61 = vadd.f32 %v1666_v56, %v1604_v27  ;;  %v3107_v34 = vld [vmem:[#allocation16 + $0x1a0] sm:$0xff]  ;;  %v15222_v48 = vld [vmem:[#allocation11 + $0x26c] ss:$16 sps:$4 sm:$0xff]  }
 0x2b0   :  { %v1607_v29 = vpop.f32.mrf.mxu0  ;;  %v3099_v0 = vld [vmem:[#allocation16 + $0x160] sm:$0xff] }
 0x2b1   :  { %v1608_v45 = vadd.f32 %v1607_v29, %v15959_v10  ;;  %v1670_v46 = vpop.f32.mrf.mxu1  ;;  %2668 = vmatpush2.bf16.msra.mxu0 %v15205_v57  ;;  %v15968_v21 = vpack.c.bf16 %v1692_v37, %v1688_v36  ;;  %v1669_v55 = vadd.f32 %v1668_v44, %v1606_v38  ;;  %v1695_v14 = vmax.f32 %v1667_v61, 0.0  ;;  %v15217_v57 = vld [vmem:[#allocation11 + $0x288] ss:$16 sps:$4 sm:$0xff]   ;;  %v15228_v61 = vld [vmem:[#allocation11 + $0x22c] ss:$16 sps:$4 sm:$0xff]  }
 0x2b2   :  { %v1609_v17 = vpop.f32.mrf.mxu0  ;;  %4591 = vmatprep.subr.bf16.mxu0 %v13420_v4  ;;  %v13411_v38 = vcombine.low %v3103_v31, %v3107_v34  ;;  %v3095_v44 = vld [vmem:[#allocation16 + $0x140] sm:$0xff] }
 0x2b3   :  { %v1671_v58 = vadd.f32 %v1670_v46, %v1608_v45  ;;  %v1610_v59 = vadd.f32 %v1609_v17, %v15955_v9  ;;  %v1672_v60 = vpop.f32.mrf.mxu1  ;;  %2606 = vmatprep.mubr.bf16.mxu1 %v15968_v21  ;;  %v1696_v8 = vmax.f32 %v1669_v55, 0.0  ;;  %v15220_v29 = vld [vmem:[#allocation11 + $0x268] ss:$16 sps:$4 sm:$0xff]   ;;  %v13404_v17 = vcombine.high %v3095_v44, %v3099_v0 }
 0x2b4   :  { %v1613_v62 = vpop.f32.mrf.mxu0  ;;  %2607 = vmatmul.mubr.bf16.vlgmr.msra.gmra.mxu1 %v15970_v53  ;;  %2670 = vmatmul.mubr.bf16.vlgmr.msra.gmra.mxu0 %v15935_v7  ;;  %v3087_v45 = vld [vmem:[#allocation16 + $0x100] sm:$0xff] }
 0x2b5   :  { %v1673_v63 = vadd.f32 %v1672_v60, %v1610_v59  ;;  %v1676_v1 = vpop.f32.mrf.mxu1  ;;  %2701 = vmatpush1.bf16.msra.mxu1 %v15208_v52  ;;  %2679 = vmatprep.mubr.bf16.mxu0 %v15942_v35  ;;  %v1699_v3 = vmax.f32 %v1671_v58, 0.0  ;;  %v1614_v15 = vadd.f32 %v1613_v62, %v15959_v10  ;;  %v15214_v35 = vld [vmem:[#allocation11 + $0x2a8] ss:$16 sps:$4 sm:$0xff]   ;;  %v15225_v52 = vld [vmem:[#allocation11 + $0x24c] ss:$16 sps:$4 sm:$0xff]  }
 0x2b6   :  { %v1615_v5 = vpop.f32.mrf.mxu0  ;;  %2702 = vmatprep.subr.bf16.mxu1 %v15213_v54  ;;  %4592 = vmatpush1.bf16.msra.mxu0 %v13419_v33  ;;  %v13403_v54 = vcombine.low %v3095_v44, %v3099_v0  ;;  %v15223_v58 = vld [vmem:[#allocation11 + $0x248] ss:$16 sps:$4 sm:$0xff]   ;;  %v15243_v33 = vld [vmem:[#allocation11 + $0x38c] ss:$16 sps:$4 sm:$0xff]  }
 0x2b7   :  { %v1700_v11 = vmax.f32 %v1673_v63, 0.0  ;;  %v1616_v12 = vadd.f32 %v1615_v5, %v15955_v9  ;;  %v1678_v13 = vpop.f32.mrf.mxu1  ;;  %v15982_v49 = vpack.c.bf16 %v1699_v3, %v1695_v14  ;;  %v3079_v59 = vld [vmem:[#allocation16 + $0xc0] sm:$0xff] }
 0x2b8   :  { %v1617_v18 = vpop.f32.mrf.mxu0  ;;  %v3083_v60 = vld [vmem:[#allocation16 + $0xe0] sm:$0xff] }
 0x2b9   :  { %v1618_v7 = vadd.f32 %v1617_v18, %v15959_v10  ;;  %v1680_v19 = vpop.f32.mrf.mxu1  ;;  %2703 = vmatpush1.bf16.msra.mxu1 %v15211_v2  ;;  %v15980_v22 = vpack.c.bf16 %v1700_v11, %v1696_v8  ;;  %v1679_v24 = vadd.f32 %v1678_v13, %v1616_v12  ;;  %v1677_v10 = vadd.f32 %v1676_v1, %v1614_v15  ;;  %v15226_v1 = vld [vmem:[#allocation11 + $0x228] ss:$16 sps:$4 sm:$0xff]   ;;  %v15234_v12 = vld [vmem:[#allocation11 + $0x3ec] ss:$16 sps:$4 sm:$0xff]  }
 0x2ba   :  { %v1619_v50 = vpop.f32.mrf.mxu0  ;;  %2704 = vmatprep.subr.bf16.mxu1 %v15216_v6  ;;  %v13388_v63 = vcombine.high %v3079_v59, %v3083_v60  ;;  %v3071_v2 = vld [vmem:[#allocation16 + $0x80] sm:$0xff]  ;;  %v13387_v5 = vcombine.low %v3079_v59, %v3083_v60 }
 0x2bb   :  { %v1681_v20 = vadd.f32 %v1680_v19, %v1618_v7  ;;  %v1620_v25 = vadd.f32 %v1619_v50, %v15955_v9  ;;  %2616 = vmatprep.mubr.bf16.mxu1 %v15980_v22  ;;  %v1682_v32 = vpop.f32.mrf.mxu1  ;;  %v13412_v9 = vcombine.high %v3103_v31, %v3107_v34  ;;  %v1704_v36 = vmax.f32 %v1679_v24, 0.0  ;;  %v3075_v3 = vld [vmem:[#allocation16 + $0xa0] sm:$0xff]  ;;  %v15237_v19 = vld [vmem:[#allocation11 + $0x3cc] ss:$16 sps:$4 sm:$0xff]  }
 0x2bc   :  { %2617 = vmatmul.mubr.bf16.gmra.mxu1 %v15982_v49  ;;  %2680 = vmatmul.mubr.bf16.gmra.mxu0 %v15940_v30  ;;  %v1703_v30 = vmax.f32 %v1677_v10, 0.0  ;;  %v15229_v6 = vld [vmem:[#allocation11 + $0x208] ss:$16 sps:$4 sm:$0xff]   ;;  %v13379_v13 = vcombine.low %v3071_v2, %v3075_v3 }
 0x2bd   :  { %v1683_v56 = vadd.f32 %v1682_v32, %v1620_v25  ;;  %2705 = vmatpush1.bf16.msra.mxu1 %v15214_v35  ;;  %2689 = vmatprep.mubr.bf16.mxu0 %v15949_v16  ;;  %v1707_v47 = vmax.f32 %v1681_v20, 0.0  ;;  %v3091_v16 = vld [vmem:[#allocation16 + $0x120] sm:$0xff]  ;;  %v15240_v25 = vld [vmem:[#allocation11 + $0x3ac] ss:$16 sps:$4 sm:$0xff]  }
 0x2be   :  { %2706 = vmatprep.subr.bf16.mxu1 %v15219_v23  ;;  %4593 = vmatprep.subr.bf16.mxu0 %v13412_v9  ;;  %v13396_v55 = vcombine.high %v3087_v45, %v3091_v16  ;;  %v13395_v62 = vcombine.low %v3087_v45, %v3091_v16  ;;  %v3063_v8 = vld [vmem:[#allocation16 + $0x40] sm:$0xff]  ;;  %v15255_v45 = vld [vmem:[#allocation11 + $0x30c] ss:$16 sps:$4 sm:$0xff]  }
 0x2bf   :  { %v1708_v37 = vmax.f32 %v1683_v56, 0.0  ;;  %v15991_v46 = vpack.c.bf16 %v1707_v47, %v1703_v30  ;;  %4594 = vmatpush1.bf16.msra.mxu0 %v13411_v38  ;;  %v3067_v11 = vld [vmem:[#allocation16 + $0x60] sm:$0xff]  ;;  %v15246_v47 = vld [vmem:[#allocation11 + $0x36c] ss:$16 sps:$4 sm:$0xff]  }
 0x2c0   :  { %4595 = vmatprep.subr.bf16.mxu0 %v13404_v17  ;;  %v13372_v14 = vcombine.high %v3063_v8, %v3067_v11  ;;  %v15232_v15 = vld [vmem:[#allocation11 + $0x3e8] ss:$16 sps:$4 sm:$0xff]   ;;  %v13371_v35 = vcombine.low %v3063_v8, %v3067_v11  ;;  %v15249_v38 = vld [vmem:[#allocation11 + $0x34c] ss:$16 sps:$4 sm:$0xff]  }
 0x2c1   :  { %2707 = vmatpush1.bf16.msra.mxu1 %v15217_v57  ;;  %v15989_v27 = vpack.c.bf16 %v1708_v37, %v1704_v36  ;;  %v3055_v18 = vld [vmem:[#allocation16] sm:$0xff]  ;;  %v15252_v30 = vld [vmem:[#allocation11 + $0x32c] ss:$16 sps:$4 sm:$0xff]  }
 0x2c2   :  { %2708 = vmatprep.subr.bf16.mxu1 %v15222_v48  ;;  %v3059_v7 = vld [vmem:[#allocation16 + $0x20] sm:$0xff] }
 0x2c3   :  { %2626 = vmatprep.mubr.bf16.mxu1 %v15989_v27  ;;  %4596 = vmatpush1.bf16.msra.mxu0 %v13403_v54  ;;  %v13364_v50 = vcombine.high %v3055_v18, %v3059_v7  ;;  %v15235_v23 = vld [vmem:[#allocation11 + $0x3c8] ss:$16 sps:$4 sm:$0xff]   ;;  %v13363_v26 = vcombine.low %v3055_v18, %v3059_v7 }
 0x2c4   :  { %2627 = vmatmul.mubr.bf16.gmra.mxu1 %v15991_v46  ;;  %2690 = vmatmul.mubr.bf16.gmra.mxu0 %v15947_v51  ;;  %v15231_v51 = vld [vmem:[#allocation11 + $0x20c] ss:$16 sps:$4 sm:$0xff]   ;;  %v3175_v24 = vld [vmem:[#allocation16 + $0x3c0] sm:$0xff] }
 0x2c5   :  { %2709 = vmatpush1.bf16.msra.mxu1 %v15220_v29  ;;  %2732 = vmatprep.mubr.bf16.mxu1 %v15968_v21  ;;  %v13380_v21 = vcombine.high %v3071_v2, %v3075_v3  ;;  %v3179_v20 = vld [vmem:[#allocation16 + $0x3e0] sm:$0xff] }
 0x2c6   :  { %2710 = vmatprep.subr.bf16.mxu1 %v15225_v52  ;;  %4597 = vmatprep.subr.bf16.mxu0 %v13396_v55  ;;  %v13484_v28 = vcombine.high %v3175_v24, %v3179_v20  ;;  %v15238_v31 = vld [vmem:[#allocation11 + $0x3a8] ss:$16 sps:$4 sm:$0xff]   ;;  %v13483_v4 = vcombine.low %v3175_v24, %v3179_v20 }
 0x2c7   :  { %4598 = vmatpush1.bf16.msra.mxu0 %v13395_v62  ;;  %v3167_v10 = vld [vmem:[#allocation16 + $0x380] sm:$0xff] }
 0x2c8   :  { %4599 = vmatprep.subr.bf16.mxu0 %v13388_v63  ;;  %v3171_v32 = vld [vmem:[#allocation16 + $0x3a0] sm:$0xff] }
 0x2c9   :  { %2711 = vmatpush1.bf16.msra.mxu1 %v15223_v58  ;;  %v13476_v34 = vcombine.high %v3167_v10, %v3171_v32  ;;  %v15241_v56 = vld [vmem:[#allocation11 + $0x388] ss:$16 sps:$4 sm:$0xff]   ;;  %v13475_v48 = vcombine.low %v3167_v10, %v3171_v32 }
 0x2ca   :  { %2712 = vmatprep.subr.bf16.mxu1 %v15228_v61  ;;  %v3159_v57 = vld [vmem:[#allocation16 + $0x340] sm:$0xff] }
 0x2cb   :  { %4600 = vmatpush1.bf16.msra.mxu0 %v13387_v5  ;;  %v3163_v9 = vld [vmem:[#allocation16 + $0x360] sm:$0xff] }
 0x2cc   :  { %4601 = vmatprep.subr.bf16.mxu0 %v13380_v21  ;;  %v13468_v36 = vcombine.high %v3159_v57, %v3163_v9  ;;  %v15244_v37 = vld [vmem:[#allocation11 + $0x368] ss:$16 sps:$4 sm:$0xff]   ;;  %v13467_v44 = vcombine.low %v3159_v57, %v3163_v9 }
 0x2cd   :  { %2713 = vmatpush1.bf16.msra.mxu1 %v15226_v1  ;;  %v15247_v0 = vld [vmem:[#allocation11 + $0x348] ss:$16 sps:$4 sm:$0xff]  }
 0x2ce   :  { %2714 = vmatprep.subr.bf16.mxu1 %v15231_v51  ;;  %v15250_v29 = vld [vmem:[#allocation11 + $0x328] ss:$16 sps:$4 sm:$0xff]  }
 0x2cf   :  { %4602 = vmatpush1.bf16.msra.mxu0 %v13379_v13  ;;  %v15253_v16 = vld [vmem:[#allocation11 + $0x308] ss:$16 sps:$4 sm:$0xff]   ;;  %v16004_v13 = vld [vmem:[#allocation16 + $0x1e8] sm:$0xff] }
 0x2d0   :  { %4603 = vmatprep.subr.bf16.mxu0 %v13372_v14  ;;  %v3151_v52 = vld [vmem:[#allocation16 + $0x300] sm:$0xff] }
 0x2d1   :  { %2715 = vmatpush1.bf16.msra.mxu1 %v15229_v6  ;;  %v3155_v17 = vld [vmem:[#allocation16 + $0x320] sm:$0xff] }
 0x2d2   :  { %2716 = vmatprep.subr.bf16.mxu1 %v15234_v12  ;;  %v13460_v54 = vcombine.high %v3151_v52, %v3155_v17  ;;  %v13459_v55 = vcombine.low %v3151_v52, %v3155_v17  ;;  %v3143_v58 = vld [vmem:[#allocation16 + $0x2c0] sm:$0xff]  ;;  %v16002_v12 = vld [vmem:[#allocation16 + $0x1c8] sm:$0xff] }
 0x2d3   :  { %4604 = vmatpush1.bf16.msra.mxu0 %v13371_v35  ;;  %v3147_v59 = vld [vmem:[#allocation16 + $0x2e0] sm:$0xff]  ;;  %v13421_v18 = vcombine.low %v16002_v12, %v16004_v13 }
 0x2d4   :  { %4605 = vmatprep.subr.bf16.mxu0 %v13364_v50  ;;  %v13452_v60 = vcombine.high %v3143_v58, %v3147_v59  ;;  %v13451_v61 = vcombine.low %v3143_v58, %v3147_v59  ;;  %v3135_v62 = vld [vmem:[#allocation16 + $0x280] sm:$0xff]  ;;  %v16010_v59 = vld [vmem:[#allocation13] sm:$0xf] }
 0x2d5   :  { %2717 = vmatpush2.bf16.msra.mxu1 %v15232_v15  ;;  %v3139_v63 = vld [vmem:[#allocation16 + $0x2a0] sm:$0xff]  ;;  %v13422_v15 = vcombine.high %v16002_v12, %v16004_v13  ;;  %v3084_v12 = vld [vmem:[#allocation16 + $0xe8] sm:$0xff] }
 0x2d6   :  { %2718 = vmatprep.subr.bf16.mxu1 %v15237_v19  ;;  %v13444_v1 = vcombine.high %v3135_v62, %v3139_v63  ;;  %v3131_v2 = vld [vmem:[#allocation16 + $0x260] sm:$0xff] }
 0x2d7   :  { %4606 = vmatpush1.bf16.msra.mxu0 %v13363_v26  ;;  %v3119_v5 = vld [vmem:[#allocation16 + $0x200] sm:$0xff] }
 0x2d8   :  { %4607 = vmatprep.subr.bf16.mxu0 %v13484_v28  ;;  %v3123_v21 = vld [vmem:[#allocation16 + $0x220] sm:$0xff] }
 0x2d9   :  { %2719 = vmatpush2.bf16.msra.mxu1 %v15235_v23  ;;  %v13428_v6 = vcombine.high %v3119_v5, %v3123_v21  ;;  %v13427_v8 = vcombine.low %v3119_v5, %v3123_v21  ;;  %v3243_v11 = vld [vmem:[#allocation16 + $0x5e0] sm:$0xff] }
 0x2da   :  { %2720 = vmatprep.subr.bf16.mxu1 %v15240_v25  ;;  %v3235_v7 = vld [vmem:[#allocation16 + $0x5a0] sm:$0xff] }
 0x2db   :  { %4608 = vmatpush2.bf16.msra.mxu0 %v13483_v4  ;;  %v3223_v50 = vld [vmem:[#allocation16 + $0x540] sm:$0xff] }
 0x2dc   :  { %4609 = vmatprep.subr.bf16.mxu0 %v13476_v34  ;;  %v3227_v23 = vld [vmem:[#allocation16 + $0x560] sm:$0xff] }
 0x2dd   :  { %2721 = vmatpush2.bf16.msra.mxu1 %v15238_v31  ;;  %v13531_v24 = vcombine.low %v3223_v50, %v3227_v23  ;;  %v13532_v20 = vcombine.high %v3223_v50, %v3227_v23  ;;  %v3215_v25 = vld [vmem:[#allocation16 + $0x500] sm:$0xff] }
 0x2de   :  { %2722 = vmatprep.subr.bf16.mxu1 %v15243_v33  ;;  %v3219_v26 = vld [vmem:[#allocation16 + $0x520] sm:$0xff] }
 0x2df   :  { %4610 = vmatpush2.bf16.msra.mxu0 %v13475_v48  ;;  %v13523_v28 = vcombine.low %v3215_v25, %v3219_v26  ;;  %v13524_v31 = vcombine.high %v3215_v25, %v3219_v26  ;;  %v3207_v10 = vld [vmem:[#allocation16 + $0x4c0] sm:$0xff] }
 0x2e0   :  { %4611 = vmatprep.subr.bf16.mxu0 %v13468_v36  ;;  %v3211_v32 = vld [vmem:[#allocation16 + $0x4e0] sm:$0xff] }
 0x2e1   :  { %2723 = vmatpush2.bf16.msra.mxu1 %v15241_v56  ;;  %v13515_v33 = vcombine.low %v3207_v10, %v3211_v32  ;;  %v13516_v4 = vcombine.high %v3207_v10, %v3211_v32  ;;  %v3199_v34 = vld [vmem:[#allocation16 + $0x480] sm:$0xff] }
 0x2e2   :  { %2724 = vmatprep.subr.bf16.mxu1 %v15246_v47  ;;  %v3203_v56 = vld [vmem:[#allocation16 + $0x4a0] sm:$0xff] }
 0x2e3   :  { %4612 = vmatpush2.bf16.msra.mxu0 %v13467_v44  ;;  %v13507_v57 = vcombine.low %v3199_v34, %v3203_v56  ;;  %v13508_v9 = vcombine.high %v3199_v34, %v3203_v56  ;;  %v3191_v47 = vld [vmem:[#allocation16 + $0x440] sm:$0xff] }
 0x2e4   :  { %4613 = vmatprep.subr.bf16.mxu0 %v13460_v54  ;;  %v3195_v48 = vld [vmem:[#allocation16 + $0x460] sm:$0xff] }
 0x2e5   :  { %2725 = vmatpush2.bf16.msra.mxu1 %v15244_v37  ;;  %v13499_v36 = vcombine.low %v3191_v47, %v3195_v48  ;;  %v13500_v37 = vcombine.high %v3191_v47, %v3195_v48  ;;  %v3187_v44 = vld [vmem:[#allocation16 + $0x420] sm:$0xff] }
 0x2e6   :  { %2726 = vmatprep.subr.bf16.mxu1 %v15249_v38  ;;  %v3183_v38 = vld [vmem:[#allocation16 + $0x400] sm:$0xff] }
 0x2e7   :  { %4614 = vmatpush2.bf16.msra.mxu0 %v13459_v55  ;;  %v3295_v17 = vld [vmem:[#allocation16 + $0x780] sm:$0xff] }
 0x2e8   :  { %4615 = vmatprep.subr.bf16.mxu0 %v13452_v60  ;;  %v3299_v54 = vld [vmem:[#allocation16 + $0x7a0] sm:$0xff] }
 0x2e9   :  { %2727 = vmatpush2.bf16.msra.mxu1 %v15247_v0  ;;  %v13491_v0 = vcombine.low %v3183_v38, %v3187_v44  ;;  %v13603_v55 = vcombine.low %v3295_v17, %v3299_v54  ;;  %v13604_v58 = vcombine.high %v3295_v17, %v3299_v54  ;;  %v3287_v60 = vld [vmem:[#allocation16 + $0x740] sm:$0xff]  ;;  %v16044_v17 = vrot.slane %v16010_v59, %v15832_v41 }
 0x2ea   :  { %2728 = vmatprep.subr.bf16.mxu1 %v15252_v30  ;;  %v13492_v30 = vcombine.high %v3183_v38, %v3187_v44  ;;  %v3255_v26 = vld [vmem:[#allocation16 + $0x640] sm:$0xff] }
 0x2eb   :  { %4616 = vmatpush2.bf16.msra.mxu0 %v13451_v61  ;;  %v3291_v61 = vld [vmem:[#allocation16 + $0x760] sm:$0xff] }
 0x2ec   :  { %4617 = vmatprep.subr.bf16.mxu0 %v13444_v1  ;;  %v16014_v1 = vrot.slane %v16010_v59, %v15835_v42  ;;  %v3251_v34 = vld [vmem:[#allocation16 + $0x620] sm:$0xff] }
 0x2ed   :  { %2729 = vmatpush2.bf16.msra.mxu1 %v15250_v29  ;;  %v3303_v29 = vld [vmem:[#allocation16 + $0x7c0] sm:$0xff] }
 0x2ee   :  { %2730 = vmatprep.subr.bf16.mxu1 %v15255_v45  ;;  %v3307_v45 = vld [vmem:[#allocation16 + $0x7e0] sm:$0xff] }
 0x2ef   :  { %v13612_v52 = vcombine.high %v3303_v29, %v3307_v45 }
 0x2f1   :  { %2731 = vmatpush2.bf16.msra.mxu1 %v15253_v16  ;;  %v13611_v16 = vcombine.low %v3303_v29, %v3307_v45 }
 0x2f4   :  { %2733 = vmatmul.mubr.bf16.vlgmr.msra.gmra.mxu1 %v15970_v53  ;;  %v13443_v53 = vcombine.low %v3135_v62, %v3139_v63  ;;  %v13595_v62 = vcombine.low %v3287_v60, %v3291_v61  ;;  %v13596_v63 = vcombine.high %v3287_v60, %v3291_v61 }
 0x2f5   :  { %2742 = vmatprep.mubr.bf16.mxu1 %v15980_v22  ;;  %v3127_v22 = vld [vmem:[#allocation16 + $0x240] sm:$0xff] }
 0x2f6   :  { %4618 = vmatpush2.bf16.msra.mxu0 %v13443_v53  ;;  %v13436_v3 = vcombine.high %v3127_v22, %v3131_v2  ;;  %v13435_v51 = vcombine.low %v3127_v22, %v3131_v2  ;;  %v3279_v53 = vld [vmem:[#allocation16 + $0x700] sm:$0xff]  ;;  %v16018_v2 = vrot.slane %v16010_v59, %v15829_v40 }
 0x2f7   :  { %v3283_v22 = vld [vmem:[#allocation16 + $0x720] sm:$0xff] }
 0x2f8   :  { %4619 = vmatprep.subr.bf16.mxu0 %v13436_v3  ;;  %v13588_v3 = vcombine.high %v3279_v53, %v3283_v22  ;;  %v13587_v5 = vcombine.low %v3279_v53, %v3283_v22 }
 0x2fa   :  { %4620 = vmatpush2.bf16.msra.mxu0 %v13435_v51 }
 0x2fb   :  { %4621 = vmatprep.subr.bf16.mxu0 %v13428_v6 }
 0x2fc   :  { %2743 = vmatmul.mubr.bf16.gmra.mxu1 %v15982_v49  ;;  %v3239_v49 = vld [vmem:[#allocation16 + $0x5c0] sm:$0xff] }
 0x2fd   :  { %2752 = vmatprep.mubr.bf16.mxu1 %v15989_v27  ;;  %v13548_v27 = vcombine.high %v3239_v49, %v3243_v11  ;;  %v13547_v14 = vcombine.low %v3239_v49, %v3243_v11  ;;  %v3275_v49 = vld [vmem:[#allocation16 + $0x6e0] sm:$0xff] }
 0x2fe   :  { %4622 = vmatpush2.bf16.msra.mxu0 %v13427_v8  ;;  %v3271_v8 = vld [vmem:[#allocation16 + $0x6c0] sm:$0xff] }
 0x2ff   :  { %4634 = vmatprep.subr.bf16.mxu1 %v13548_v27  ;;  %4677 = vmatprep.subr.bf16.mxu0 %v13422_v15  ;;  %v13580_v27 = vcombine.high %v3271_v8, %v3275_v49  ;;  %v13579_v15 = vcombine.low %v3271_v8, %v3275_v49 }
 0x300   :  { %4635 = vmatpush1.bf16.msra.mxu1 %v13547_v14 }
 0x304   :  { %2753 = vmatmul.mubr.bf16.gmra.mxu1 %v15991_v46  ;;  %v3231_v46 = vld [vmem:[#allocation16 + $0x580] sm:$0xff] }
 0x305   :  { %v13540_v19 = vcombine.high %v3231_v46, %v3235_v7  ;;  %v13539_v35 = vcombine.low %v3231_v46, %v3235_v7 }
 0x307   :  { %4636 = vmatprep.subr.bf16.mxu1 %v13540_v19  ;;  %v3263_v19 = vld [vmem:[#allocation16 + $0x680] sm:$0xff] }
 0x308   :  { %4637 = vmatpush1.bf16.msra.mxu1 %v13539_v35  ;;  %v3267_v35 = vld [vmem:[#allocation16 + $0x6a0] sm:$0xff] }
 0x309   :  { %4638 = vmatprep.subr.bf16.mxu1 %v13532_v20  ;;  %v13572_v23 = vcombine.high %v3263_v19, %v3267_v35  ;;  %v13571_v20 = vcombine.low %v3263_v19, %v3267_v35 }
 0x30c   :  { %4639 = vmatpush1.bf16.msra.mxu1 %v13531_v24 }
 0x30d   :  { %4640 = vmatprep.subr.bf16.mxu1 %v13524_v31 }
 0x310   :  { %4641 = vmatpush1.bf16.msra.mxu1 %v13523_v28  ;;  %v3259_v28 = vld [vmem:[#allocation16 + $0x660] sm:$0xff] }
 0x311   :  { %4642 = vmatprep.subr.bf16.mxu1 %v13516_v4  ;;  %v13564_v31 = vcombine.high %v3255_v26, %v3259_v28  ;;  %v13563_v32 = vcombine.low %v3255_v26, %v3259_v28  ;;  %v3247_v4 = vld [vmem:[#allocation16 + $0x600] sm:$0xff] }
 0x312   :  { %v13556_v56 = vcombine.high %v3247_v4, %v3251_v34 }
 0x314   :  { %4643 = vmatpush1.bf16.msra.mxu1 %v13515_v33 }
 0x315   :  { %4644 = vmatprep.subr.bf16.mxu1 %v13508_v9  ;;  %v13555_v9 = vcombine.low %v3247_v4, %v3251_v34 }
 0x318   :  { %4645 = vmatpush1.bf16.msra.mxu1 %v13507_v57 }
 0x319   :  { %4646 = vmatprep.subr.bf16.mxu1 %v13500_v37  ;;  %v16027_v37 = vld [vmem:[#allocation16 + $0x5e8] sm:$0xff] }
 0x31c   :  { %4647 = vmatpush1.bf16.msra.mxu1 %v13499_v36  ;;  %v16025_v36 = vld [vmem:[#allocation16 + $0x5c8] sm:$0xff] }
 0x31d   :  { %4648 = vmatprep.subr.bf16.mxu1 %v13492_v30  ;;  %v13550_v44 = vcombine.high %v16025_v36, %v16027_v37  ;;  %v13549_v30 = vcombine.low %v16025_v36, %v16027_v37 }
 0x320   :  { %4649 = vmatpush1.bf16.msra.mxu1 %v13491_v0 }
 0x321   :  { %4650 = vmatprep.subr.bf16.mxu1 %v13612_v52  ;;  %v16040_v52 = vrot.slane %v16010_v59, %v15838_v43 }
 0x324   :  { %4651 = vmatpush2.bf16.msra.mxu1 %v13611_v16 }
 0x325   :  { %4652 = vmatprep.subr.bf16.mxu1 %v13604_v58 }
 0x328   :  { %4653 = vmatpush2.bf16.msra.mxu1 %v13603_v55 }
 0x329   :  { %4654 = vmatprep.subr.bf16.mxu1 %v13596_v63 }
 0x32c   :  { %4655 = vmatpush2.bf16.msra.mxu1 %v13595_v62 }
 0x32d   :  { %4656 = vmatprep.subr.bf16.mxu1 %v13588_v3 }
 0x330   :  { %4657 = vmatpush2.bf16.msra.mxu1 %v13587_v5 }
 0x331   :  { %4658 = vmatprep.subr.bf16.mxu1 %v13580_v27 }
 0x334   :  { %v2545_v51 = vpop.f32.mrf.mxu0  ;;  %4659 = vmatpush2.bf16.msra.mxu1 %v13579_v15 }
 0x335   :  { %v2546_v21 = vadd.f32 %v2545_v51, %v16014_v1  ;;  %4660 = vmatprep.subr.bf16.mxu1 %v13572_v23 }
 0x336   :  { %v2547_v6 = vpop.f32.mrf.mxu0 }
 0x337   :  { %v2548_v11 = vadd.f32 %v2547_v6, %v16018_v2 }
 0x338   :  { %v2549_v14 = vpop.f32.mrf.mxu0  ;;  %4661 = vmatpush2.bf16.msra.mxu1 %v13571_v20 }
 0x339   :  { %v2550_v46 = vadd.f32 %v2549_v14, %v16014_v1  ;;  %4662 = vmatprep.subr.bf16.mxu1 %v13564_v31 }
 0x33a   :  { %v2551_v7 = vpop.f32.mrf.mxu0 }
 0x33b   :  { %v2552_v50 = vadd.f32 %v2551_v7, %v16018_v2 }
 0x33c   :  { %v2555_v24 = vpop.f32.mrf.mxu0  ;;  %4663 = vmatpush2.bf16.msra.mxu1 %v13563_v32 }
 0x33d   :  { %4664 = vmatprep.subr.bf16.mxu1 %v13556_v56 }
 0x33e   :  { %v2557_v25 = vpop.f32.mrf.mxu0 }
 0x33f   :  { %v2558_v23 = vadd.f32 %v2557_v25, %v16018_v2 }
 0x340   :  { %v2559_v10 = vpop.f32.mrf.mxu0  ;;  %4665 = vmatpush2.bf16.msra.mxu1 %v13555_v9 }
 0x341   :  { %4720 = vmatprep.subr.bf16.mxu1 %v13550_v44  ;;  %v2560_v20 = vadd.f32 %v2559_v10, %v16014_v1 }
 0x342   :  { %v2561_v33 = vpop.f32.mrf.mxu0 }
 0x343   :  { %v2562_v32 = vadd.f32 %v2561_v33, %v16018_v2 }
 0x344   :  { %v2565_v57 = vpop.f32.mrf.mxu0 }
 0x345   :  { %v2566_v47 = vadd.f32 %v2565_v57, %v16014_v1 }
 0x346   :  { %v2567_v48 = vpop.f32.mrf.mxu0 }
 0x347   :  { %v2568_v38 = vadd.f32 %v2567_v48, %v16018_v2 }
 0x348   :  { %v2569_v0 = vpop.f32.mrf.mxu0 }
 0x349   :  { %v2570_v29 = vadd.f32 %v2569_v0, %v16014_v1 }
 0x34a   :  { %v2571_v45 = vpop.f32.mrf.mxu0 }
 0x34b   :  { %v16036_v16 = vadd.f32 %v2571_v45, %v16018_v2 }
 0x374   :  { %v2608_v54 = vpop.f32.mrf.mxu1  ;;  %v2671_v55 = vpop.f32.mrf.mxu0 }
 0x375   :  { %v2609_v58 = vadd.f32 %v2608_v54, %v2546_v21  ;;  %v16047_v60 = vadd.f32 %v2671_v55, %v16040_v52  ;;  %v3108_v55 = vld [vmem:[#allocation16 + $0x1a8] sm:$0xff] }
 0x376   :  { %v2610_v61 = vpop.f32.mrf.mxu1  ;;  %v2673_v62 = vpop.f32.mrf.mxu0 }
 0x377   :  { %v2611_v63 = vadd.f32 %v2610_v61, %v2548_v11  ;;  %v16050_v53 = vadd.f32 %v2673_v62, %v16044_v17  ;;  %v2763_v8 = vmax.f32 %v2609_v58, 0.0 }
 0x378   :  { %v2612_v22 = vpop.f32.mrf.mxu1  ;;  %v2675_v3 = vpop.f32.mrf.mxu0 }
 0x379   :  { %v2613_v51 = vadd.f32 %v2612_v22, %v2550_v46  ;;  %v16053_v5 = vadd.f32 %v2675_v3, %v16040_v52  ;;  %v2764_v11 = vmax.f32 %v2611_v63, 0.0 }
 0x37a   :  { %v2614_v59 = vpop.f32.mrf.mxu1  ;;  %v2677_v6 = vpop.f32.mrf.mxu0 }
 0x37b   :  { %v2767_v49 = vmax.f32 %v2613_v51, 0.0  ;;  %v2615_v21 = vadd.f32 %v2614_v59, %v2552_v50  ;;  %v16056_v27 = vadd.f32 %v2677_v6, %v16044_v17  ;;  %v2556_v50 = vadd.f32 %v2555_v24, %v16014_v1  ;;  %v3104_v24 = vld [vmem:[#allocation16 + $0x188] sm:$0xff] }
 0x37c   :  { %v2618_v14 = vpop.f32.mrf.mxu1  ;;  %v16058_v15 = vpop.f32.mrf.mxu0  ;;  %v13414_v51 = vcombine.high %v3104_v24, %v3108_v55  ;;  %v3096_v6 = vld [vmem:[#allocation16 + $0x148] sm:$0xff] }
 0x37d   :  { %v16060_v7 = vpack.c.bf16 %v2767_v49, %v2763_v8  ;;  %v2768_v19 = vmax.f32 %v2615_v21, 0.0  ;;  %v2619_v56 = vadd.f32 %v2618_v14, %v2556_v50  ;;  %v3100_v8 = vld [vmem:[#allocation16 + $0x168] sm:$0xff] }
 0x37e   :  { %v2620_v35 = vpop.f32.mrf.mxu1  ;;  %v16062_v46 = vpop.f32.mrf.mxu0  ;;  %v3092_v50 = vld [vmem:[#allocation16 + $0x128] sm:$0xff] }
 0x37f   :  { %v16066_v26 = vpack.c.bf16 %v2768_v19, %v2764_v11  ;;  %v2621_v4 = vadd.f32 %v2620_v35, %v2558_v23  ;;  %v2771_v58 = vmax.f32 %v2619_v56, 0.0  ;;  %v13406_v11 = vcombine.high %v3096_v6, %v3100_v8  ;;  %v3076_v56 = vld [vmem:[#allocation16 + $0xa8] sm:$0xff] }
 0x380   :  { %v2622_v28 = vpop.f32.mrf.mxu1  ;;  %v16069_v31 = vpop.f32.mrf.mxu0 }
 0x381   :  { %v2623_v34 = vadd.f32 %v2622_v28, %v2560_v20  ;;  %v2772_v10 = vmax.f32 %v2621_v4, 0.0  ;;  %v3088_v20 = vld [vmem:[#allocation16 + $0x108] sm:$0xff] }
 0x382   :  { %v2624_v57 = vpop.f32.mrf.mxu1  ;;  %v16072_v9 = vpop.f32.mrf.mxu0  ;;  %v3080_v4 = vld [vmem:[#allocation16 + $0xc8] sm:$0xff]  ;;  %v13397_v13 = vcombine.low %v3088_v20, %v3092_v50 }
 0x383   :  { %v2625_v48 = vadd.f32 %v2624_v57, %v2562_v32  ;;  %v2775_v44 = vmax.f32 %v2623_v34, 0.0  ;;  %v13405_v32 = vcombine.low %v3096_v6, %v3100_v8  ;;  %v3072_v34 = vld [vmem:[#allocation16 + $0x88] sm:$0xff]  ;;  %v13389_v57 = vcombine.low %v3080_v4, %v3084_v12 }
 0x384   :  { %v2628_v25 = vpop.f32.mrf.mxu1  ;;  %v2691_v0 = vpop.f32.mrf.mxu0  ;;  %v3160_v8 = vld [vmem:[#allocation16 + $0x348] sm:$0xff] }
 0x385   :  { %v2776_v45 = vmax.f32 %v2625_v48, 0.0  ;;  %v2629_v54 = vadd.f32 %v2628_v25, %v2566_v47  ;;  %v16075_v1 = vadd.f32 %v2691_v0, %v16040_v52  ;;  %v16081_v63 = vpack.c.bf16 %v2775_v44, %v2771_v58  ;;  %v3064_v44 = vld [vmem:[#allocation16 + $0x48] sm:$0xff] }
 0x386   :  { %v2630_v2 = vpop.f32.mrf.mxu1  ;;  %v16077_v33 = vpop.f32.mrf.mxu0  ;;  %v13382_v48 = vcombine.high %v3072_v34, %v3076_v56  ;;  %v3068_v25 = vld [vmem:[#allocation16 + $0x68] sm:$0xff]  ;;  %v13381_v0 = vcombine.low %v3072_v34, %v3076_v56 }
 0x387   :  { %v16079_v61 = vpack.c.bf16 %v2776_v45, %v2772_v10  ;;  %v2631_v62 = vadd.f32 %v2630_v2, %v2568_v38  ;;  %v2779_v21 = vmax.f32 %v2629_v54, 0.0  ;;  %v13374_v10 = vcombine.high %v3064_v44, %v3068_v25  ;;  %v3056_v45 = vld [vmem:[#allocation16 + $0x8] sm:$0xff] }
 0x388   :  { %v2632_v22 = vpop.f32.mrf.mxu1  ;;  %v2695_v3 = vpop.f32.mrf.mxu0  ;;  %v3060_v54 = vld [vmem:[#allocation16 + $0x28] sm:$0xff] }
 0x389   :  { %v2633_v59 = vadd.f32 %v2632_v22, %v2570_v29  ;;  %v16084_v47 = vadd.f32 %v2695_v3, %v16040_v52  ;;  %4623 = vmatprep.mubr.bf16.mxu0 %v16079_v61  ;;  %v13413_v29 = vcombine.low %v3104_v24, %v3108_v55  ;;  %v2780_v19 = vmax.f32 %v2631_v62, 0.0  ;;  %v3176_v58 = vld [vmem:[#allocation16 + $0x3c8] sm:$0xff] }
 0x38a   :  { %v2634_v49 = vpop.f32.mrf.mxu1  ;;  %4624 = vmatmul.mubr.bf16.vlgmr.msra.gmra.mxu0 %v16081_v63  ;;  %v13373_v24 = vcombine.low %v3064_v44, %v3068_v25  ;;  %v13366_v55 = vcombine.high %v3056_v45, %v3060_v54  ;;  %v3180_v2 = vld [vmem:[#allocation16 + $0x3e8] sm:$0xff]  ;;  %v13365_v62 = vcombine.low %v3056_v45, %v3060_v54 }
 0x38b   :  { %v2783_v14 = vmax.f32 %v2633_v59, 0.0  ;;  %v2635_v38 = vadd.f32 %v2634_v49, %v16036_v16  ;;  %4678 = vmatpush1.bf16.msra.mxu0 %v13421_v18  ;;  %4709 = vmatprep.mubr.bf16.mxu0 %v16079_v61  ;;  %v13398_v16 = vcombine.high %v3088_v20, %v3092_v50  ;;  %v13390_v18 = vcombine.high %v3080_v4, %v3084_v12  ;;  %v3168_v3 = vld [vmem:[#allocation16 + $0x388] sm:$0xff] }
 0x38c   :  { %4679 = vmatprep.subr.bf16.mxu0 %v13414_v51  ;;  %v13486_v22 = vcombine.high %v3176_v58, %v3180_v2  ;;  %v3172_v51 = vld [vmem:[#allocation16 + $0x3a8] sm:$0xff]  ;;  %v13485_v59 = vcombine.low %v3176_v58, %v3180_v2 }
 0x38d   :  { %v16093_v35 = vpack.c.bf16 %v2783_v14, %v2779_v21  ;;  %v2784_v23 = vmax.f32 %v2635_v38, 0.0  ;;  %v13478_v6 = vcombine.high %v3168_v3, %v3172_v51  ;;  %v3164_v49 = vld [vmem:[#allocation16 + $0x368] sm:$0xff]  ;;  %v13477_v21 = vcombine.low %v3168_v3, %v3172_v51 }
 0x38e   :  { %v13470_v14 = vcombine.high %v3160_v8, %v3164_v49  ;;  %v3152_v38 = vld [vmem:[#allocation16 + $0x308] sm:$0xff] }
 0x38f   :  { %v16095_v28 = vpack.c.bf16 %v2784_v23, %v2780_v19  ;;  %4680 = vmatpush1.bf16.msra.mxu0 %v13413_v29  ;;  %v3156_v29 = vld [vmem:[#allocation16 + $0x328] sm:$0xff] }
 0x390   :  { %4681 = vmatprep.subr.bf16.mxu0 %v13406_v11  ;;  %v13469_v11 = vcombine.low %v3160_v8, %v3164_v49  ;;  %v13462_v19 = vcombine.high %v3152_v38, %v3156_v29  ;;  %v3144_v23 = vld [vmem:[#allocation16 + $0x2c8] sm:$0xff]  ;;  %v13461_v50 = vcombine.low %v3152_v38, %v3156_v29  ;;  %v2682_v8 = vadd.f32 %v16058_v15, %v16040_v52 }
 0x391   :  { %v3148_v20 = vld [vmem:[#allocation16 + $0x2e8] sm:$0xff] }
 0x392   :  { %v3136_v12 = vld [vmem:[#allocation16 + $0x288] sm:$0xff]  ;;  %v13453_v56 = vcombine.low %v3144_v23, %v3148_v20 }
 0x393   :  { %4682 = vmatpush1.bf16.msra.mxu0 %v13405_v32  ;;  %v3128_v25 = vld [vmem:[#allocation16 + $0x248] sm:$0xff] }
 0x394   :  { %4683 = vmatprep.subr.bf16.mxu0 %v13398_v16  ;;  %v13454_v16 = vcombine.high %v3144_v23, %v3148_v20  ;;  %v3124_v3 = vld [vmem:[#allocation16 + $0x228] sm:$0xff] }
 0x397   :  { %4684 = vmatpush1.bf16.msra.mxu0 %v13397_v13  ;;  %v3140_v13 = vld [vmem:[#allocation16 + $0x2a8] sm:$0xff] }
 0x398   :  { %4685 = vmatprep.subr.bf16.mxu0 %v13390_v18 }
 0x39b   :  { %4686 = vmatpush1.bf16.msra.mxu0 %v13389_v57 }
 0x39c   :  { %4687 = vmatprep.subr.bf16.mxu0 %v13382_v48  ;;  %v13446_v48 = vcombine.high %v3136_v12, %v3140_v13 }
 0x39f   :  { %4688 = vmatpush1.bf16.msra.mxu0 %v13381_v0  ;;  %v3132_v0 = vld [vmem:[#allocation16 + $0x268] sm:$0xff] }
 0x3a0   :  { %4689 = vmatprep.subr.bf16.mxu0 %v13374_v10  ;;  %v13438_v58 = vcombine.high %v3128_v25, %v3132_v0 }
 0x3a3   :  { %4690 = vmatpush1.bf16.msra.mxu0 %v13373_v24 }
 0x3a4   :  { %4691 = vmatprep.subr.bf16.mxu0 %v13366_v55 }
 0x3a7   :  { %4692 = vmatpush1.bf16.msra.mxu0 %v13365_v62 }
 0x3a8   :  { %4693 = vmatprep.subr.bf16.mxu0 %v13486_v22  ;;  %v3120_v22 = vld [vmem:[#allocation16 + $0x208] sm:$0xff] }
 0x3a9   :  { %v13429_v20 = vcombine.low %v3120_v22, %v3124_v3 }
 0x3ab   :  { %4694 = vmatpush2.bf16.msra.mxu0 %v13485_v59  ;;  %v2686_v59 = vadd.f32 %v16069_v31, %v16040_v52 }
 0x3ac   :  { %4695 = vmatprep.subr.bf16.mxu0 %v13478_v6 }
 0x3af   :  { %4696 = vmatpush2.bf16.msra.mxu0 %v13477_v21  ;;  %v13430_v21 = vcombine.high %v3120_v22, %v3124_v3 }
 0x3b0   :  { %4697 = vmatprep.subr.bf16.mxu0 %v13470_v14  ;;  %v2688_v14 = vadd.f32 %v16072_v9, %v16044_v17 }
 0x3b3   :  { %4698 = vmatpush2.bf16.msra.mxu0 %v13469_v11  ;;  %v3113_v11 = vld [vmem:[#allocation16 + $0x1d0] sm:$0xff] }
 0x3b4   :  { %v2734_v32 = vpop.f32.mrf.mxu1  ;;  %4699 = vmatprep.subr.bf16.mxu0 %v13462_v19 }
 0x3b5   :  { %v2735_v4 = vadd.f32 %v2734_v32, %v16047_v60  ;;  %v13445_v60 = vcombine.low %v3136_v12, %v3140_v13  ;;  %v3232_v12 = vld [vmem:[#allocation16 + $0x588] sm:$0xff] }
 0x3b6   :  { %v2736_v18 = vpop.f32.mrf.mxu1 }
 0x3b7   :  { %v2737_v34 = vadd.f32 %v2736_v18, %v16050_v53  ;;  %4700 = vmatpush2.bf16.msra.mxu0 %v13461_v50  ;;  %v2765_v45 = vmax.f32 %v2735_v4, 0.0  ;;  %v3236_v18 = vld [vmem:[#allocation16 + $0x5a8] sm:$0xff] }
 0x3b8   :  { %v2738_v57 = vpop.f32.mrf.mxu1  ;;  %4701 = vmatprep.subr.bf16.mxu0 %v13454_v16 }
 0x3b9   :  { %v2739_v44 = vadd.f32 %v2738_v57, %v16053_v5  ;;  %v2766_v53 = vmax.f32 %v2737_v34, 0.0  ;;  %v2684_v5 = vadd.f32 %v16062_v46, %v16044_v17  ;;  %v3117_v46 = vld [vmem:[#allocation16 + $0x1f0] sm:$0xff] }
 0x3ba   :  { %v2740_v10 = vpop.f32.mrf.mxu1  ;;  %v13424_v16 = vcombine.high %v3113_v11, %v3117_v46  ;;  %v3105_v34 = vld [vmem:[#allocation16 + $0x190] sm:$0xff] }
 0x3bb   :  { %v2769_v54 = vmax.f32 %v2739_v44, 0.0  ;;  %v2741_v24 = vadd.f32 %v2740_v10, %v16056_v27  ;;  %4702 = vmatpush2.bf16.msra.mxu0 %v13453_v56  ;;  %v13437_v27 = vcombine.low %v3128_v25, %v3132_v0  ;;  %v3109_v56 = vld [vmem:[#allocation16 + $0x1b0] sm:$0xff]  ;;  %v13423_v25 = vcombine.low %v3113_v11, %v3117_v46 }
 0x3bc   :  { %v2744_v55 = vpop.f32.mrf.mxu1  ;;  %4703 = vmatprep.subr.bf16.mxu0 %v13446_v48  ;;  %v13416_v10 = vcombine.high %v3105_v34, %v3109_v56 }
 0x3bd   :  { %v16101_v2 = vpack.c.bf16 %v2769_v54, %v2765_v45  ;;  %v2770_v62 = vmax.f32 %v2741_v24, 0.0  ;;  %v2745_v19 = vadd.f32 %v2744_v55, %v2682_v8  ;;  %v3224_v45 = vld [vmem:[#allocation16 + $0x548] sm:$0xff]  ;;  %v3097_v24 = vld [vmem:[#allocation16 + $0x150] sm:$0xff] }
 0x3be   :  { %v2746_v51 = vpop.f32.mrf.mxu1  ;;  %v3228_v54 = vld [vmem:[#allocation16 + $0x568] sm:$0xff] }
 0x3bf   :  { %v16107_v6 = vpack.c.bf16 %v2770_v62, %v2766_v53  ;;  %4704 = vmatpush2.bf16.msra.mxu0 %v13445_v60  ;;  %v2747_v38 = vadd.f32 %v2746_v51, %v2684_v5  ;;  %v2773_v13 = vmax.f32 %v2745_v19, 0.0  ;;  %v3101_v60 = vld [vmem:[#allocation16 + $0x170] sm:$0xff]  ;;  %v13415_v53 = vcombine.low %v3105_v34, %v3109_v56  ;;  %v3216_v51 = vld [vmem:[#allocation16 + $0x508] sm:$0xff] }
 0x3c0   :  { %v2748_v49 = vpop.f32.mrf.mxu1  ;;  %4705 = vmatprep.subr.bf16.mxu0 %v13438_v58  ;;  %v13534_v62 = vcombine.high %v3224_v45, %v3228_v54  ;;  %v13408_v3 = vcombine.high %v3097_v24, %v3101_v60  ;;  %v3220_v5 = vld [vmem:[#allocation16 + $0x528] sm:$0xff]  ;;  %v13533_v36 = vcombine.low %v3224_v45, %v3228_v54  ;;  %v13407_v37 = vcombine.low %v3097_v24, %v3101_v60  ;;  %v3061_v45 = vld [vmem:[#allocation16 + $0x30] sm:$0xff] }
 0x3c1   :  { %v2749_v29 = vadd.f32 %v2748_v49, %v2686_v59  ;;  %v2774_v52 = vmax.f32 %v2747_v38, 0.0  ;;  %v3089_v59 = vld [vmem:[#allocation16 + $0x110] sm:$0xff]  ;;  %v3208_v49 = vld [vmem:[#allocation16 + $0x4c8] sm:$0xff] }
 0x3c2   :  { %v2750_v23 = vpop.f32.mrf.mxu1  ;;  %v3085_v38 = vld [vmem:[#allocation16 + $0xf0] sm:$0xff] }
 0x3c3   :  { %v2751_v31 = vadd.f32 %v2750_v23, %v2688_v14  ;;  %4706 = vmatpush2.bf16.msra.mxu0 %v13437_v27  ;;  %v2777_v50 = vmax.f32 %v2749_v29, 0.0  ;;  %v3093_v27 = vld [vmem:[#allocation16 + $0x130] sm:$0xff]  ;;  %v13525_v29 = vcombine.low %v3216_v51, %v3220_v5  ;;  %v3200_v23 = vld [vmem:[#allocation16 + $0x488] sm:$0xff] }
 0x3c4   :  { %v2754_v32 = vpop.f32.mrf.mxu1  ;;  %4707 = vmatprep.subr.bf16.mxu0 %v13430_v21  ;;  %v13400_v8 = vcombine.high %v3089_v59, %v3093_v27  ;;  %v3212_v21 = vld [vmem:[#allocation16 + $0x4e8] sm:$0xff]  ;;  %v3081_v14 = vld [vmem:[#allocation16 + $0xd0] sm:$0xff]  ;;  %v13399_v11 = vcombine.low %v3089_v59, %v3093_v27 }
 0x3c5   :  { %v2778_v15 = vmax.f32 %v2751_v31, 0.0  ;;  %v2755_v4 = vadd.f32 %v2754_v32, %v16075_v1  ;;  %v16118_v48 = vpack.c.bf16 %v2777_v50, %v2773_v13  ;;  %v13542_v1 = vcombine.high %v3232_v12, %v3236_v18  ;;  %v3204_v31 = vld [vmem:[#allocation16 + $0x4a8] sm:$0xff]  ;;  %v3077_v50 = vld [vmem:[#allocation16 + $0xb0] sm:$0xff] }
 0x3c6   :  { %v16114_v9 = vpop.f32.mrf.mxu1  ;;  %v13518_v46 = vcombine.high %v3208_v49, %v3212_v21  ;;  %v13392_v19 = vcombine.high %v3081_v14, %v3085_v38  ;;  %v13517_v32 = vcombine.low %v3208_v49, %v3212_v21  ;;  %v3065_v13 = vld [vmem:[#allocation16 + $0x50] sm:$0xff]  ;;  %v13509_v34 = vcombine.low %v3200_v23, %v3204_v31  ;;  %v3296_v27 = vld [vmem:[#allocation16 + $0x788] sm:$0xff] }
 0x3c7   :  { %v16116_v57 = vpack.c.bf16 %v2778_v15, %v2774_v52  ;;  %4708 = vmatpush2.bf16.msra.mxu0 %v13429_v20  ;;  %v2781_v55 = vmax.f32 %v2755_v4, 0.0  ;;  %v3073_v20 = vld [vmem:[#allocation16 + $0x90] sm:$0xff]  ;;  %v13510_v52 = vcombine.high %v3200_v23, %v3204_v31  ;;  %v3192_v4 = vld [vmem:[#allocation16 + $0x448] sm:$0xff] }
 0x3c8   :  { %v2758_v44 = vpop.f32.mrf.mxu1  ;;  %4763 = vmatprep.subr.bf16.mxu0 %v13424_v16  ;;  %v13391_v16 = vcombine.low %v3081_v14, %v3085_v38  ;;  %v13384_v15 = vcombine.high %v3073_v20, %v3077_v50  ;;  %v13383_v56 = vcombine.low %v3073_v20, %v3077_v50  ;;  %v3288_v38 = vld [vmem:[#allocation16 + $0x748] sm:$0xff] }
 0x3c9   :  { %v2759_v0 = vadd.f32 %v2758_v44, %v16084_v47  ;;  %4666 = vmatprep.mubr.bf16.mxu1 %v16116_v57  ;;  %v13541_v47 = vcombine.low %v3232_v12, %v3236_v18  ;;  %v3196_v12 = vld [vmem:[#allocation16 + $0x468] sm:$0xff]  ;;  %v3069_v18 = vld [vmem:[#allocation16 + $0x70] sm:$0xff] }
 0x3ca   :  { %4667 = vmatmul.mubr.bf16.vlgmr.msra.gmra.mxu1 %v16118_v48  ;;  %4710 = vmatmul.mubr.bf16.vlgmr.msra.gmra.mxu0 %v16081_v63  ;;  %v13502_v44 = vcombine.high %v3192_v4, %v3196_v12  ;;  %v13501_v54 = vcombine.low %v3192_v4, %v3196_v12  ;;  %v13375_v24 = vcombine.low %v3065_v13, %v3069_v18  ;;  %v3280_v50 = vld [vmem:[#allocation16 + $0x708] sm:$0xff] }
 0x3cb   :  { %v2785_v58 = vmax.f32 %v2759_v0, 0.0  ;;  %4721 = vmatpush1.bf16.msra.mxu1 %v13549_v30  ;;  %4752 = vmatprep.mubr.bf16.mxu1 %v16116_v57  ;;  %v13526_v30 = vcombine.high %v3216_v51, %v3220_v5  ;;  %v3184_v0 = vld [vmem:[#allocation16 + $0x408] sm:$0xff] }
 0x3cc   :  { %4764 = vmatpush1.bf16.msra.mxu0 %v13423_v25  ;;  %4795 = vmatprep.mubr.bf16.mxu0 %v16079_v61  ;;  %v13376_v25 = vcombine.high %v3065_v13, %v3069_v18  ;;  %v3272_v18 = vld [vmem:[#allocation16 + $0x6c8] sm:$0xff] }
 0x3cd   :  { %v16129_v22 = vpack.c.bf16 %v2785_v58, %v2781_v55  ;;  %4722 = vmatprep.subr.bf16.mxu1 %v13542_v1  ;;  %4765 = vmatprep.subr.bf16.mxu0 %v13416_v10  ;;  %v3188_v1 = vld [vmem:[#allocation16 + $0x428] sm:$0xff]  ;;  %v3057_v10 = vld [vmem:[#allocation16 + $0x10] sm:$0xff] }
 0x3ce   :  { %v13494_v60 = vcombine.high %v3184_v0, %v3188_v1  ;;  %v13368_v55 = vcombine.high %v3057_v10, %v3061_v45  ;;  %v3304_v58 = vld [vmem:[#allocation16 + $0x7c8] sm:$0xff]  ;;  %v13367_v51 = vcombine.low %v3057_v10, %v3061_v45 }
 0x3cf   :  { %4723 = vmatpush1.bf16.msra.mxu1 %v13541_v47  ;;  %v3308_v47 = vld [vmem:[#allocation16 + $0x7e8] sm:$0xff] }
 0x3d0   :  { %4766 = vmatpush1.bf16.msra.mxu0 %v13415_v53  ;;  %4724 = vmatprep.subr.bf16.mxu1 %v13534_v62  ;;  %v3177_v53 = vld [vmem:[#allocation16 + $0x3d0] sm:$0xff]  ;;  %v13614_v5 = vcombine.high %v3304_v58, %v3308_v47  ;;  %v3264_v45 = vld [vmem:[#allocation16 + $0x688] sm:$0xff] }
 0x3d1   :  { %4767 = vmatprep.subr.bf16.mxu0 %v13408_v3  ;;  %v3181_v62 = vld [vmem:[#allocation16 + $0x3f0] sm:$0xff]  ;;  %v13493_v3 = vcombine.low %v3184_v0, %v3188_v1 }
 0x3d2   :  { %v13488_v59 = vcombine.high %v3177_v53, %v3181_v62  ;;  %v13487_v49 = vcombine.low %v3177_v53, %v3181_v62  ;;  %v3256_v62 = vld [vmem:[#allocation16 + $0x648] sm:$0xff] }
 0x3d3   :  { %4725 = vmatpush1.bf16.msra.mxu1 %v13533_v36  ;;  %v3300_v36 = vld [vmem:[#allocation16 + $0x7a8] sm:$0xff] }
 0x3d4   :  { %4768 = vmatpush1.bf16.msra.mxu0 %v13407_v37  ;;  %4726 = vmatprep.subr.bf16.mxu1 %v13526_v30  ;;  %v3169_v37 = vld [vmem:[#allocation16 + $0x390] sm:$0xff]  ;;  %v13606_v21 = vcombine.high %v3296_v27, %v3300_v36 }
 0x3d5   :  { %4769 = vmatprep.subr.bf16.mxu0 %v13400_v8  ;;  %v3173_v30 = vld [vmem:[#allocation16 + $0x3b0] sm:$0xff]  ;;  %v13613_v8 = vcombine.low %v3304_v58, %v3308_v47 }
 0x3d6   :  { %v13480_v14 = vcombine.high %v3169_v37, %v3173_v30  ;;  %v13479_v23 = vcombine.low %v3169_v37, %v3173_v30  ;;  %v3248_v30 = vld [vmem:[#allocation16 + $0x608] sm:$0xff] }
 0x3d7   :  { %4727 = vmatpush1.bf16.msra.mxu1 %v13525_v29  ;;  %v3292_v29 = vld [vmem:[#allocation16 + $0x768] sm:$0xff] }
 0x3d8   :  { %4770 = vmatpush1.bf16.msra.mxu0 %v13399_v11  ;;  %4728 = vmatprep.subr.bf16.mxu1 %v13518_v46  ;;  %v3161_v11 = vld [vmem:[#allocation16 + $0x350] sm:$0xff]  ;;  %v13598_v31 = vcombine.high %v3288_v38, %v3292_v29 }
 0x3d9   :  { %4771 = vmatprep.subr.bf16.mxu0 %v13392_v19  ;;  %v3165_v46 = vld [vmem:[#allocation16 + $0x370] sm:$0xff]  ;;  %v13605_v19 = vcombine.low %v3296_v27, %v3300_v36 }
 0x3da   :  { %v13472_v20 = vcombine.high %v3161_v11, %v3165_v46  ;;  %v13471_v4 = vcombine.low %v3161_v11, %v3165_v46  ;;  %v3241_v46 = vld [vmem:[#allocation16 + $0x5d0] sm:$0xff] }
 0x3db   :  { %4729 = vmatpush1.bf16.msra.mxu1 %v13517_v32  ;;  %v3284_v32 = vld [vmem:[#allocation16 + $0x728] sm:$0xff] }
 0x3dc   :  { %4772 = vmatpush1.bf16.msra.mxu0 %v13391_v16  ;;  %4730 = vmatprep.subr.bf16.mxu1 %v13510_v52  ;;  %v3153_v16 = vld [vmem:[#allocation16 + $0x310] sm:$0xff]  ;;  %v13590_v12 = vcombine.high %v3280_v50, %v3284_v32 }
 0x3dd   :  { %4773 = vmatprep.subr.bf16.mxu0 %v13384_v15  ;;  %v3157_v52 = vld [vmem:[#allocation16 + $0x330] sm:$0xff]  ;;  %v13597_v15 = vcombine.low %v3288_v38, %v3292_v29 }
 0x3de   :  { %v13464_v13 = vcombine.high %v3153_v16, %v3157_v52  ;;  %v13463_v0 = vcombine.low %v3153_v16, %v3157_v52  ;;  %v3233_v52 = vld [vmem:[#allocation16 + $0x590] sm:$0xff] }
 0x3df   :  { %4731 = vmatpush1.bf16.msra.mxu1 %v13509_v34  ;;  %v3276_v34 = vld [vmem:[#allocation16 + $0x6e8] sm:$0xff] }
 0x3e0   :  { %4774 = vmatpush1.bf16.msra.mxu0 %v13383_v56  ;;  %4732 = vmatprep.subr.bf16.mxu1 %v13502_v44  ;;  %v3145_v56 = vld [vmem:[#allocation16 + $0x2d0] sm:$0xff]  ;;  %v13582_v1 = vcombine.high %v3272_v18, %v3276_v34 }
 0x3e1   :  { %4775 = vmatprep.subr.bf16.mxu0 %v13376_v25  ;;  %v3149_v44 = vld [vmem:[#allocation16 + $0x2f0] sm:$0xff]  ;;  %v13589_v25 = vcombine.low %v3280_v50, %v3284_v32 }
 0x3e2   :  { %v13456_v10 = vcombine.high %v3145_v56, %v3149_v44  ;;  %v13455_v58 = vcombine.low %v3145_v56, %v3149_v44  ;;  %v3225_v56 = vld [vmem:[#allocation16 + $0x550] sm:$0xff] }
 0x3e3   :  { %4733 = vmatpush1.bf16.msra.mxu1 %v13501_v54  ;;  %v3268_v54 = vld [vmem:[#allocation16 + $0x6a8] sm:$0xff]  ;;  %v3229_v44 = vld [vmem:[#allocation16 + $0x570] sm:$0xff] }
 0x3e4   :  { %4776 = vmatpush1.bf16.msra.mxu0 %v13375_v24  ;;  %4734 = vmatprep.subr.bf16.mxu1 %v13494_v60  ;;  %v3137_v24 = vld [vmem:[#allocation16 + $0x290] sm:$0xff]  ;;  %v13574_v47 = vcombine.high %v3264_v45, %v3268_v54 }
 0x3e5   :  { %4777 = vmatprep.subr.bf16.mxu0 %v13368_v55  ;;  %v3141_v60 = vld [vmem:[#allocation16 + $0x2b0] sm:$0xff]  ;;  %v13581_v55 = vcombine.low %v3272_v18, %v3276_v34 }
 0x3e6   :  { %v13448_v53 = vcombine.high %v3137_v24, %v3141_v60  ;;  %v13447_v27 = vcombine.low %v3137_v24, %v3141_v60  ;;  %v3217_v60 = vld [vmem:[#allocation16 + $0x510] sm:$0xff] }
 0x3e7   :  { %4735 = vmatpush1.bf16.msra.mxu1 %v13493_v3  ;;  %v3260_v3 = vld [vmem:[#allocation16 + $0x668] sm:$0xff] }
 0x3e8   :  { %4778 = vmatpush1.bf16.msra.mxu0 %v13367_v51  ;;  %4736 = vmatprep.subr.bf16.mxu1 %v13614_v5  ;;  %v3129_v51 = vld [vmem:[#allocation16 + $0x250] sm:$0xff]  ;;  %v13566_v36 = vcombine.high %v3256_v62, %v3260_v3 }
 0x3e9   :  { %4779 = vmatprep.subr.bf16.mxu0 %v13488_v59  ;;  %v3133_v5 = vld [vmem:[#allocation16 + $0x270] sm:$0xff]  ;;  %v13573_v59 = vcombine.low %v3264_v45, %v3268_v54  ;;  %v13536_v54 = vcombine.high %v3225_v56, %v3229_v44 }
 0x3ea   :  { %v13440_v37 = vcombine.high %v3129_v51, %v3133_v5  ;;  %v13439_v38 = vcombine.low %v3129_v51, %v3133_v5  ;;  %v3209_v5 = vld [vmem:[#allocation16 + $0x4d0] sm:$0xff] }
 0x3eb   :  { %4737 = vmatpush2.bf16.msra.mxu1 %v13613_v8  ;;  %v3252_v8 = vld [vmem:[#allocation16 + $0x628] sm:$0xff] }
 0x3ec   :  { %4780 = vmatpush2.bf16.msra.mxu0 %v13487_v49  ;;  %4738 = vmatprep.subr.bf16.mxu1 %v13606_v21  ;;  %v3121_v49 = vld [vmem:[#allocation16 + $0x210] sm:$0xff]  ;;  %v13558_v29 = vcombine.high %v3248_v30, %v3252_v8 }
 0x3ed   :  { %4781 = vmatprep.subr.bf16.mxu0 %v13480_v14  ;;  %v3125_v21 = vld [vmem:[#allocation16 + $0x230] sm:$0xff]  ;;  %v13565_v14 = vcombine.low %v3256_v62, %v3260_v3 }
 0x3ee   :  { %v13432_v11 = vcombine.high %v3121_v49, %v3125_v21  ;;  %v13431_v50 = vcombine.low %v3121_v49, %v3125_v21  ;;  %v3201_v49 = vld [vmem:[#allocation16 + $0x490] sm:$0xff] }
 0x3ef   :  { %4739 = vmatpush2.bf16.msra.mxu1 %v13605_v19  ;;  %v3245_v19 = vld [vmem:[#allocation16 + $0x5f0] sm:$0xff] }
 0x3f0   :  { %4782 = vmatpush2.bf16.msra.mxu0 %v13479_v23  ;;  %4740 = vmatprep.subr.bf16.mxu1 %v13598_v31  ;;  %v3114_v23 = vld [vmem:[#allocation16 + $0x1d8] sm:$0xff]  ;;  %v13552_v32 = vcombine.high %v3241_v46, %v3245_v19  ;;  %v3205_v21 = vld [vmem:[#allocation16 + $0x4b0] sm:$0xff] }
 0x3f1   :  { %4783 = vmatprep.subr.bf16.mxu0 %v13472_v20  ;;  %v3118_v31 = vld [vmem:[#allocation16 + $0x1f8] sm:$0xff]  ;;  %v13557_v20 = vcombine.low %v3248_v30, %v3252_v8 }
 0x3f2   :  { %v13426_v16 = vcombine.high %v3114_v23, %v3118_v31  ;;  %v13425_v18 = vcombine.low %v3114_v23, %v3118_v31  ;;  %v3193_v23 = vld [vmem:[#allocation16 + $0x450] sm:$0xff] }
 0x3f3   :  { %4741 = vmatpush2.bf16.msra.mxu1 %v13597_v15  ;;  %v3237_v15 = vld [vmem:[#allocation16 + $0x5b0] sm:$0xff] }
 0x3f4   :  { %4784 = vmatpush2.bf16.msra.mxu0 %v13471_v4  ;;  %4742 = vmatprep.subr.bf16.mxu1 %v13590_v12  ;;  %v13551_v4 = vcombine.low %v3241_v46, %v3245_v19  ;;  %v3106_v12 = vld [vmem:[#allocation16 + $0x198] sm:$0xff]  ;;  %v13544_v34 = vcombine.high %v3233_v52, %v3237_v15  ;;  %v13512_v46 = vcombine.high %v3201_v49, %v3205_v21  ;;  %v3197_v31 = vld [vmem:[#allocation16 + $0x470] sm:$0xff] }
 0x3f5   :  { %4785 = vmatprep.subr.bf16.mxu0 %v13464_v13  ;;  %v3110_v13 = vld [vmem:[#allocation16 + $0x1b8] sm:$0xff] }
 0x3f6   :  { %v13417_v45 = vcombine.low %v3106_v12, %v3110_v13 }
 0x3f7   :  { %4743 = vmatpush2.bf16.msra.mxu1 %v13589_v25  ;;  %v13418_v25 = vcombine.high %v3106_v12, %v3110_v13  ;;  %v3189_v12 = vld [vmem:[#allocation16 + $0x430] sm:$0xff]  ;;  %v3058_v13 = vld [vmem:[#allocation16 + $0x18] sm:$0xff] }
 0x3f8   :  { %4786 = vmatpush2.bf16.msra.mxu0 %v13463_v0  ;;  %4744 = vmatprep.subr.bf16.mxu1 %v13582_v1  ;;  %v3098_v0 = vld [vmem:[#allocation16 + $0x158] sm:$0xff] }
 0x3f9   :  { %4787 = vmatprep.subr.bf16.mxu0 %v13456_v10  ;;  %v3102_v1 = vld [vmem:[#allocation16 + $0x178] sm:$0xff]  ;;  %v13543_v10 = vcombine.low %v3233_v52, %v3237_v15  ;;  %v13504_v52 = vcombine.high %v3193_v23, %v3197_v31 }
 0x3fa   :  { %v13410_v24 = vcombine.high %v3098_v0, %v3102_v1  ;;  %v13409_v62 = vcombine.low %v3098_v0, %v3102_v1  ;;  %v3305_v0 = vld [vmem:[#allocation16 + $0x7d0] sm:$0xff] }
 0x3fb   :  { %4745 = vmatpush2.bf16.msra.mxu1 %v13581_v55  ;;  %v3221_v55 = vld [vmem:[#allocation16 + $0x530] sm:$0xff] }
 0x3fc   :  { %4788 = vmatpush2.bf16.msra.mxu0 %v13455_v58  ;;  %4746 = vmatprep.subr.bf16.mxu1 %v13574_v47  ;;  %v3090_v58 = vld [vmem:[#allocation16 + $0x118] sm:$0xff]  ;;  %v13528_v3 = vcombine.high %v3217_v60, %v3221_v55  ;;  %v3309_v1 = vld [vmem:[#allocation16 + $0x7f0] sm:$0xff] }
 0x3fd   :  { %4789 = vmatprep.subr.bf16.mxu0 %v13448_v53  ;;  %v3094_v47 = vld [vmem:[#allocation16 + $0x138] sm:$0xff]  ;;  %v13535_v53 = vcombine.low %v3225_v56, %v3229_v44 }
 0x3fe   :  { %v13402_v51 = vcombine.high %v3090_v58, %v3094_v47 }
 0x3ff   :  { %4747 = vmatpush2.bf16.msra.mxu1 %v13573_v59  ;;  %v3213_v59 = vld [vmem:[#allocation16 + $0x4f0] sm:$0xff] }
 0x400   :  { %4790 = vmatpush2.bf16.msra.mxu0 %v13447_v27  ;;  %4748 = vmatprep.subr.bf16.mxu1 %v13566_v36  ;;  %v3082_v27 = vld [vmem:[#allocation16 + $0xd8] sm:$0xff]  ;;  %v13520_v30 = vcombine.high %v3209_v5, %v3213_v59 }
 0x401   :  { %4791 = vmatprep.subr.bf16.mxu0 %v13440_v37  ;;  %v3086_v36 = vld [vmem:[#allocation16 + $0xf8] sm:$0xff]  ;;  %v13401_v37 = vcombine.low %v3090_v58, %v3094_v47  ;;  %v3297_v58 = vld [vmem:[#allocation16 + $0x790] sm:$0xff] }
 0x402   :  { %v13394_v8 = vcombine.high %v3082_v27, %v3086_v36  ;;  %v3301_v47 = vld [vmem:[#allocation16 + $0x7b0] sm:$0xff] }
 0x403   :  { %4749 = vmatpush2.bf16.msra.mxu1 %v13565_v14  ;;  %v3074_v14 = vld [vmem:[#allocation16 + $0x98] sm:$0xff] }
 0x404   :  { %4792 = vmatpush2.bf16.msra.mxu0 %v13439_v38  ;;  %4750 = vmatprep.subr.bf16.mxu1 %v13558_v29  ;;  %v3078_v38 = vld [vmem:[#allocation16 + $0xb8] sm:$0xff]  ;;  %v13519_v29 = vcombine.low %v3209_v5, %v3213_v59  ;;  %v13608_v5 = vcombine.high %v3297_v58, %v3301_v47 }
 0x405   :  { %4793 = vmatprep.subr.bf16.mxu0 %v13432_v11  ;;  %v13393_v11 = vcombine.low %v3082_v27, %v3086_v36  ;;  %v13386_v19 = vcombine.high %v3074_v14, %v3078_v38  ;;  %v3289_v27 = vld [vmem:[#allocation16 + $0x750] sm:$0xff] }
 0x406   :  { %v3293_v36 = vld [vmem:[#allocation16 + $0x770] sm:$0xff] }
 0x407   :  { %4751 = vmatpush2.bf16.msra.mxu1 %v13557_v20  ;;  %v3066_v20 = vld [vmem:[#allocation16 + $0x58] sm:$0xff] }
 0x408   :  { %4794 = vmatpush2.bf16.msra.mxu0 %v13431_v50  ;;  %4806 = vmatprep.subr.bf16.mxu1 %v13552_v32  ;;  %v3070_v50 = vld [vmem:[#allocation16 + $0x78] sm:$0xff]  ;;  %v13511_v32 = vcombine.low %v3201_v49, %v3205_v21  ;;  %v13600_v49 = vcombine.high %v3289_v27, %v3293_v36 }
 0x409   :  { %4849 = vmatprep.subr.bf16.mxu0 %v13426_v16  ;;  %v13385_v16 = vcombine.low %v3074_v14, %v3078_v38  ;;  %v13378_v15 = vcombine.high %v3066_v20, %v3070_v50  ;;  %v13377_v56 = vcombine.low %v3066_v20, %v3070_v50  ;;  %v3281_v14 = vld [vmem:[#allocation16 + $0x710] sm:$0xff] }
 0x40a   :  { %4753 = vmatmul.mubr.bf16.vlgmr.msra.gmra.mxu1 %v16118_v48  ;;  %v3285_v38 = vld [vmem:[#allocation16 + $0x730] sm:$0xff] }
 0x40b   :  { %4796 = vmatmul.mubr.bf16.vlgmr.msra.gmra.mxu0 %v16081_v63  ;;  %4807 = vmatpush1.bf16.msra.mxu1 %v13551_v4  ;;  %v3185_v4 = vld [vmem:[#allocation16 + $0x410] sm:$0xff] }
 0x40c   :  { %4838 = vmatprep.mubr.bf16.mxu1 %v16116_v57  ;;  %4850 = vmatpush1.bf16.msra.mxu0 %v13425_v18  ;;  %v3062_v18 = vld [vmem:[#allocation16 + $0x38] sm:$0xff]  ;;  %v13496_v44 = vcombine.high %v3185_v4, %v3189_v12  ;;  %v3273_v20 = vld [vmem:[#allocation16 + $0x6d0] sm:$0xff] }
 0x40d   :  { %4881 = vmatprep.mubr.bf16.mxu0 %v16079_v61  ;;  %4808 = vmatprep.subr.bf16.mxu1 %v13544_v34  ;;  %v13527_v61 = vcombine.low %v3217_v60, %v3221_v55  ;;  %v13503_v34 = vcombine.low %v3193_v23, %v3197_v31  ;;  %v13616_v60 = vcombine.high %v3305_v0, %v3309_v1  ;;  %v3277_v50 = vld [vmem:[#allocation16 + $0x6f0] sm:$0xff] }
 0x40e   :  { %4851 = vmatprep.subr.bf16.mxu0 %v13418_v25  ;;  %v13370_v25 = vcombine.high %v3058_v13, %v3062_v18  ;;  %v13592_v23 = vcombine.high %v3281_v14, %v3285_v38 }
 0x40f   :  { %4809 = vmatpush1.bf16.msra.mxu1 %v13543_v10  ;;  %v3178_v10 = vld [vmem:[#allocation16 + $0x3d8] sm:$0xff] }
 0x410   :  { %4852 = vmatpush1.bf16.msra.mxu0 %v13417_v45  ;;  %4810 = vmatprep.subr.bf16.mxu1 %v13536_v54  ;;  %v3182_v45 = vld [vmem:[#allocation16 + $0x3f8] sm:$0xff]  ;;  %v13495_v54 = vcombine.low %v3185_v4, %v3189_v12  ;;  %v13584_v4 = vcombine.high %v3273_v20, %v3277_v50 }
 0x411   :  { %4853 = vmatprep.subr.bf16.mxu0 %v13410_v24  ;;  %v13369_v24 = vcombine.low %v3058_v13, %v3062_v18  ;;  %v13490_v55 = vcombine.high %v3178_v10, %v3182_v45  ;;  %v3265_v13 = vld [vmem:[#allocation16 + $0x690] sm:$0xff] }
 0x412   :  { %v3269_v18 = vld [vmem:[#allocation16 + $0x6b0] sm:$0xff] }
 0x413   :  { %4811 = vmatpush1.bf16.msra.mxu1 %v13535_v53  ;;  %v3170_v53 = vld [vmem:[#allocation16 + $0x398] sm:$0xff] }
 0x414   :  { %4854 = vmatpush1.bf16.msra.mxu0 %v13409_v62  ;;  %4812 = vmatprep.subr.bf16.mxu1 %v13528_v3  ;;  %v3174_v62 = vld [vmem:[#allocation16 + $0x3b8] sm:$0xff]  ;;  %v13615_v3 = vcombine.low %v3305_v0, %v3309_v1  ;;  %v13576_v0 = vcombine.high %v3265_v13, %v3269_v18 }
 0x415   :  { %4855 = vmatprep.subr.bf16.mxu0 %v13402_v51  ;;  %v13489_v51 = vcombine.low %v3178_v10, %v3182_v45  ;;  %v13482_v59 = vcombine.high %v3170_v53, %v3174_v62  ;;  %v3257_v10 = vld [vmem:[#allocation16 + $0x650] sm:$0xff] }
 0x416   :  { %v3261_v45 = vld [vmem:[#allocation16 + $0x670] sm:$0xff] }
 0x417   :  { %4813 = vmatpush1.bf16.msra.mxu1 %v13527_v61  ;;  %v3162_v61 = vld [vmem:[#allocation16 + $0x358] sm:$0xff] }
 0x418   :  { %4856 = vmatpush1.bf16.msra.mxu0 %v13401_v37  ;;  %4814 = vmatprep.subr.bf16.mxu1 %v13520_v30  ;;  %v3166_v37 = vld [vmem:[#allocation16 + $0x378] sm:$0xff]  ;;  %v13607_v30 = vcombine.low %v3297_v58, %v3301_v47  ;;  %v13568_v58 = vcombine.high %v3257_v10, %v3261_v45 }
 0x419   :  { %4857 = vmatprep.subr.bf16.mxu0 %v13394_v8  ;;  %v13481_v8 = vcombine.low %v3170_v53, %v3174_v62  ;;  %v13474_v21 = vcombine.high %v3162_v61, %v3166_v37  ;;  %v3249_v53 = vld [vmem:[#allocation16 + $0x610] sm:$0xff] }
 0x41a   :  { %v3253_v62 = vld [vmem:[#allocation16 + $0x630] sm:$0xff] }
 0x41b   :  { %4815 = vmatpush1.bf16.msra.mxu1 %v13519_v29  ;;  %v3154_v29 = vld [vmem:[#allocation16 + $0x318] sm:$0xff] }
 0x41c   :  { %4858 = vmatpush1.bf16.msra.mxu0 %v13393_v11  ;;  %4816 = vmatprep.subr.bf16.mxu1 %v13512_v46  ;;  %v3158_v11 = vld [vmem:[#allocation16 + $0x338] sm:$0xff]  ;;  %v13599_v46 = vcombine.low %v3289_v27, %v3293_v36  ;;  %v13560_v27 = vcombine.high %v3249_v53, %v3253_v62 }
 0x41d   :  { %4859 = vmatprep.subr.bf16.mxu0 %v13386_v19  ;;  %v13473_v19 = vcombine.low %v3162_v61, %v3166_v37  ;;  %v13466_v31 = vcombine.high %v3154_v29, %v3158_v11  ;;  %v3242_v61 = vld [vmem:[#allocation16 + $0x5d8] sm:$0xff] }
 0x41e   :  { %v3246_v37 = vld [vmem:[#allocation16 + $0x5f8] sm:$0xff] }
 0x41f   :  { %4817 = vmatpush1.bf16.msra.mxu1 %v13511_v32  ;;  %v3146_v32 = vld [vmem:[#allocation16 + $0x2d8] sm:$0xff] }
 0x420   :  { %4860 = vmatpush1.bf16.msra.mxu0 %v13385_v16  ;;  %4818 = vmatprep.subr.bf16.mxu1 %v13504_v52  ;;  %v3150_v16 = vld [vmem:[#allocation16 + $0x2f8] sm:$0xff]  ;;  %v13591_v52 = vcombine.low %v3281_v14, %v3285_v38  ;;  %v13554_v14 = vcombine.high %v3242_v61, %v3246_v37 }
 0x421   :  { %4861 = vmatprep.subr.bf16.mxu0 %v13378_v15  ;;  %v13465_v15 = vcombine.low %v3154_v29, %v3158_v11  ;;  %v13458_v12 = vcombine.high %v3146_v32, %v3150_v16  ;;  %v3234_v29 = vld [vmem:[#allocation16 + $0x598] sm:$0xff] }
 0x422   :  { %v3238_v11 = vld [vmem:[#allocation16 + $0x5b8] sm:$0xff] }
 0x423   :  { %4819 = vmatpush1.bf16.msra.mxu1 %v13503_v34  ;;  %v3138_v34 = vld [vmem:[#allocation16 + $0x298] sm:$0xff] }
 0x424   :  { %4862 = vmatpush1.bf16.msra.mxu0 %v13377_v56  ;;  %4820 = vmatprep.subr.bf16.mxu1 %v13496_v44  ;;  %v3142_v56 = vld [vmem:[#allocation16 + $0x2b8] sm:$0xff]  ;;  %v13583_v44 = vcombine.low %v3273_v20, %v3277_v50  ;;  %v13546_v20 = vcombine.high %v3234_v29, %v3238_v11 }
 0x425   :  { %4863 = vmatprep.subr.bf16.mxu0 %v13370_v25  ;;  %v13457_v25 = vcombine.low %v3146_v32, %v3150_v16  ;;  %v13450_v1 = vcombine.high %v3138_v34, %v3142_v56  ;;  %v3226_v50 = vld [vmem:[#allocation16 + $0x558] sm:$0xff] }
 0x426   :  { %v3230_v32 = vld [vmem:[#allocation16 + $0x578] sm:$0xff] }
 0x427   :  { %4821 = vmatpush1.bf16.msra.mxu1 %v13495_v54  ;;  %v3130_v54 = vld [vmem:[#allocation16 + $0x258] sm:$0xff] }
 0x428   :  { %4864 = vmatpush1.bf16.msra.mxu0 %v13369_v24  ;;  %4822 = vmatprep.subr.bf16.mxu1 %v13616_v60  ;;  %v3134_v24 = vld [vmem:[#allocation16 + $0x278] sm:$0xff]  ;;  %v13575_v60 = vcombine.low %v3265_v13, %v3269_v18  ;;  %v13538_v13 = vcombine.high %v3226_v50, %v3230_v32 }
 0x429   :  { %4865 = vmatprep.subr.bf16.mxu0 %v13490_v55  ;;  %v13449_v55 = vcombine.low %v3138_v34, %v3142_v56  ;;  %v13442_v47 = vcombine.high %v3130_v54, %v3134_v24  ;;  %v3218_v34 = vld [vmem:[#allocation16 + $0x518] sm:$0xff] }
 0x42a   :  { %v3222_v56 = vld [vmem:[#allocation16 + $0x538] sm:$0xff] }
 0x42b   :  { %4823 = vmatpush2.bf16.msra.mxu1 %v13615_v3  ;;  %v3122_v3 = vld [vmem:[#allocation16 + $0x218] sm:$0xff] }
 0x42c   :  { %4866 = vmatpush2.bf16.msra.mxu0 %v13489_v51  ;;  %4824 = vmatprep.subr.bf16.mxu1 %v13608_v5  ;;  %v3126_v51 = vld [vmem:[#allocation16 + $0x238] sm:$0xff]  ;;  %v13567_v5 = vcombine.low %v3257_v10, %v3261_v45 }
 0x42d   :  { %4867 = vmatprep.subr.bf16.mxu0 %v13482_v59  ;;  %v13441_v59 = vcombine.low %v3130_v54, %v3134_v24  ;;  %v13434_v36 = vcombine.high %v3122_v3, %v3126_v51  ;;  %v3210_v10 = vld [vmem:[#allocation16 + $0x4d8] sm:$0xff]  ;;  %v2823_v54 = vld [vmem:[#allocation14 + $0xc0] sm:$0xff] }
 0x42e   :  { %v3214_v45 = vld [vmem:[#allocation16 + $0x4f8] sm:$0xff]  ;;  %v2827_v24 = vld [vmem:[#allocation14 + $0xe0] sm:$0xff] }
 0x42f   :  { %4825 = vmatpush2.bf16.msra.mxu1 %v13607_v30  ;;  %v2855_v30 = vld [vmem:[#allocation14 + $0x1c0] sm:$0xff] }
 0x430   :  { %4868 = vmatpush2.bf16.msra.mxu0 %v13481_v8  ;;  %4826 = vmatprep.subr.bf16.mxu1 %v13600_v49  ;;  %v2859_v8 = vld [vmem:[#allocation14 + $0x1e0] sm:$0xff]  ;;  %v13559_v49 = vcombine.low %v3249_v53, %v3253_v62  ;;  %v3202_v53 = vld [vmem:[#allocation16 + $0x498] sm:$0xff] }
 0x431   :  { %4869 = vmatprep.subr.bf16.mxu0 %v13474_v21  ;;  %v13433_v21 = vcombine.low %v3122_v3, %v3126_v51  ;;  %v13676_v38 = vcombine.high %v2855_v30, %v2859_v8  ;;  %v3206_v62 = vld [vmem:[#allocation16 + $0x4b8] sm:$0xff]  ;;  %v2815_v3 = vld [vmem:[#allocation14 + $0x80] sm:$0xff] }
 0x432   :  { %v2819_v51 = vld [vmem:[#allocation14 + $0xa0] sm:$0xff] }
 0x433   :  { %4827 = vmatpush2.bf16.msra.mxu1 %v13599_v46  ;;  %v13553_v46 = vcombine.low %v3242_v61, %v3246_v37  ;;  %v3194_v61 = vld [vmem:[#allocation16 + $0x458] sm:$0xff] }
 0x434   :  { %4870 = vmatpush2.bf16.msra.mxu0 %v13473_v19  ;;  %4828 = vmatprep.subr.bf16.mxu1 %v13592_v23  ;;  %v2847_v19 = vld [vmem:[#allocation14 + $0x180] sm:$0xff]  ;;  %v3198_v37 = vld [vmem:[#allocation16 + $0x478] sm:$0xff] }
 0x435   :  { %4871 = vmatprep.subr.bf16.mxu0 %v13466_v31  ;;  %v2851_v23 = vld [vmem:[#allocation14 + $0x1a0] sm:$0xff]  ;;  %v13675_v31 = vcombine.low %v2855_v30, %v2859_v8 }
 0x436   :  { %v13668_v16 = vcombine.high %v2847_v19, %v2851_v23  ;;  %v2807_v30 = vld [vmem:[#allocation14 + $0x40] sm:$0xff] }
 0x437   :  { %4829 = vmatpush2.bf16.msra.mxu1 %v13591_v52  ;;  %v2839_v52 = vld [vmem:[#allocation14 + $0x140] sm:$0xff] }
 0x438   :  { %4872 = vmatpush2.bf16.msra.mxu0 %v13465_v15  ;;  %4830 = vmatprep.subr.bf16.mxu1 %v13584_v4  ;;  %v2843_v15 = vld [vmem:[#allocation14 + $0x160] sm:$0xff]  ;;  %v13545_v4 = vcombine.low %v3234_v29, %v3238_v11  ;;  %v3186_v29 = vld [vmem:[#allocation16 + $0x418] sm:$0xff] }
 0x439   :  { %4873 = vmatprep.subr.bf16.mxu0 %v13458_v12  ;;  %v13667_v12 = vcombine.low %v2847_v19, %v2851_v23  ;;  %v13660_v18 = vcombine.high %v2839_v52, %v2843_v15  ;;  %v2811_v8 = vld [vmem:[#allocation14 + $0x60] sm:$0xff]  ;;  %v3190_v11 = vld [vmem:[#allocation16 + $0x438] sm:$0xff]  ;;  %v13505_v23 = vcombine.low %v3194_v61, %v3198_v37 }
 0x43a   :  { %v2803_v19 = vld [vmem:[#allocation14 + $0x20] sm:$0xff] }
 0x43b   :  { %4831 = vmatpush2.bf16.msra.mxu1 %v13583_v44  ;;  %v2831_v44 = vld [vmem:[#allocation14 + $0x100] sm:$0xff] }
 0x43c   :  { %4874 = vmatpush2.bf16.msra.mxu0 %v13457_v25  ;;  %4832 = vmatprep.subr.bf16.mxu1 %v13576_v0  ;;  %v2835_v25 = vld [vmem:[#allocation14 + $0x120] sm:$0xff]  ;;  %v13537_v0 = vcombine.low %v3226_v50, %v3230_v32  ;;  %v3306_v32 = vld [vmem:[#allocation16 + $0x7d8] sm:$0xff] }
 0x43d   :  { %4875 = vmatprep.subr.bf16.mxu0 %v13450_v1  ;;  %v13530_v1 = vcombine.high %v3218_v34, %v3222_v56 }
 0x43f   :  { %4833 = vmatpush2.bf16.msra.mxu1 %v13575_v60  ;;  %v13529_v60 = vcombine.low %v3218_v34, %v3222_v56  ;;  %v3298_v34 = vld [vmem:[#allocation16 + $0x798] sm:$0xff] }
 0x440   :  { %4876 = vmatpush2.bf16.msra.mxu0 %v13449_v55  ;;  %4834 = vmatprep.subr.bf16.mxu1 %v13568_v58  ;;  %v13651_v55 = vcombine.low %v2831_v44, %v2835_v25  ;;  %v13522_v58 = vcombine.high %v3210_v10, %v3214_v45  ;;  %v3302_v56 = vld [vmem:[#allocation16 + $0x7b8] sm:$0xff] }
 0x441   :  { %4877 = vmatprep.subr.bf16.mxu0 %v13442_v47  ;;  %v13644_v47 = vcombine.high %v2823_v54, %v2827_v24 }
 0x443   :  { %4835 = vmatpush2.bf16.msra.mxu1 %v13567_v5  ;;  %v13521_v5 = vcombine.low %v3210_v10, %v3214_v45  ;;  %v3290_v10 = vld [vmem:[#allocation16 + $0x758] sm:$0xff] }
 0x444   :  { %4878 = vmatpush2.bf16.msra.mxu0 %v13441_v59  ;;  %4836 = vmatprep.subr.bf16.mxu1 %v13560_v27  ;;  %v13643_v59 = vcombine.low %v2823_v54, %v2827_v24  ;;  %v13514_v27 = vcombine.high %v3202_v53, %v3206_v62  ;;  %v3294_v45 = vld [vmem:[#allocation16 + $0x778] sm:$0xff]  ;;  %v2903_v54 = vld [vmem:[#allocation14 + $0x340] sm:$0xff] }
 0x445   :  { %4879 = vmatprep.subr.bf16.mxu0 %v13434_v36  ;;  %v13636_v36 = vcombine.high %v2815_v3, %v2819_v51  ;;  %v2907_v24 = vld [vmem:[#allocation14 + $0x360] sm:$0xff] }
 0x447   :  { %4837 = vmatpush2.bf16.msra.mxu1 %v13559_v49  ;;  %v13513_v49 = vcombine.low %v3202_v53, %v3206_v62  ;;  %v3282_v53 = vld [vmem:[#allocation16 + $0x718] sm:$0xff] }
 0x448   :  { %4880 = vmatpush2.bf16.msra.mxu0 %v13433_v21  ;;  %4892 = vmatprep.subr.bf16.mxu1 %v13554_v14  ;;  %v13635_v21 = vcombine.low %v2815_v3, %v2819_v51  ;;  %v13506_v14 = vcombine.high %v3194_v61, %v3198_v37  ;;  %v3286_v62 = vld [vmem:[#allocation16 + $0x738] sm:$0xff]  ;;  %v2895_v3 = vld [vmem:[#allocation14 + $0x300] sm:$0xff] }
 0x449   :  { %6215 = vmatprep.subr.bf16.mxu0 %v13676_v38  ;;  %v13628_v38 = vcombine.high %v2807_v30, %v2811_v8  ;;  %v2899_v51 = vld [vmem:[#allocation14 + $0x320] sm:$0xff]  ;;  %v3274_v61 = vld [vmem:[#allocation16 + $0x6d8] sm:$0xff] }
 0x44a   :  { %4839 = vmatmul.mubr.bf16.vlgmr.msra.gmra.mxu1 %v16118_v48  ;;  %v3278_v37 = vld [vmem:[#allocation16 + $0x6f8] sm:$0xff] }
 0x44b   :  { %4882 = vmatmul.mubr.bf16.vlgmr.msra.gmra.mxu0 %v16081_v63  ;;  %4893 = vmatpush1.bf16.msra.mxu1 %v13553_v46  ;;  %v13659_v63 = vcombine.low %v2839_v52, %v2843_v15  ;;  %v2799_v46 = vld [vmem:[#allocation14] sm:$0xff] }
 0x44c   :  { %4924 = vmatprep.mubr.bf16.mxu1 %v16116_v57  ;;  %6216 = vmatpush1.bf16.msra.mxu0 %v13675_v31  ;;  %v13652_v57 = vcombine.high %v2831_v44, %v2835_v25  ;;  %v13627_v31 = vcombine.low %v2807_v30, %v2811_v8  ;;  %v13620_v50 = vcombine.high %v2799_v46, %v2803_v19  ;;  %v2919_v52 = vld [vmem:[#allocation14 + $0x3c0] sm:$0xff] }
 0x44d   :  { %6247 = vmatprep.mubr.bf16.mxu0 %v16066_v26  ;;  %4894 = vmatprep.subr.bf16.mxu1 %v13546_v20  ;;  %v13498_v20 = vcombine.high %v3186_v29, %v3190_v11  ;;  %v2923_v15 = vld [vmem:[#allocation14 + $0x3e0] sm:$0xff] }
 0x44e   :  { %6217 = vmatprep.subr.bf16.mxu0 %v13668_v16  ;;  %v3310_v16 = vld [vmem:[#allocation16 + $0x7f8] sm:$0xff]  ;;  %v2911_v44 = vld [vmem:[#allocation14 + $0x380] sm:$0xff] }
 0x44f   :  { %4895 = vmatpush1.bf16.msra.mxu1 %v13545_v4  ;;  %v13497_v4 = vcombine.low %v3186_v29, %v3190_v11  ;;  %v2915_v25 = vld [vmem:[#allocation14 + $0x3a0] sm:$0xff]  ;;  %v3266_v29 = vld [vmem:[#allocation16 + $0x698] sm:$0xff] }
 0x450   :  { %6218 = vmatpush1.bf16.msra.mxu0 %v13667_v12  ;;  %4896 = vmatprep.subr.bf16.mxu1 %v13538_v13  ;;  %v13619_v12 = vcombine.low %v2799_v46, %v2803_v19  ;;  %v13618_v13 = vcombine.high %v3306_v32, %v3310_v16  ;;  %v2887_v30 = vld [vmem:[#allocation14 + $0x2c0] sm:$0xff]  ;;  %v3270_v11 = vld [vmem:[#allocation16 + $0x6b8] sm:$0xff] }
 0x451   :  { %6219 = vmatprep.subr.bf16.mxu0 %v13660_v18  ;;  %v13740_v18 = vcombine.high %v2919_v52, %v2923_v15  ;;  %v2891_v8 = vld [vmem:[#allocation14 + $0x2e0] sm:$0xff] }
 0x452   :  { %v2879_v46 = vld [vmem:[#allocation14 + $0x280] sm:$0xff] }
 0x453   :  { %4897 = vmatpush1.bf16.msra.mxu1 %v13537_v0  ;;  %v13617_v0 = vcombine.low %v3306_v32, %v3310_v16  ;;  %v2883_v19 = vld [vmem:[#allocation14 + $0x2a0] sm:$0xff]  ;;  %v3258_v32 = vld [vmem:[#allocation16 + $0x658] sm:$0xff] }
 0x454   :  { %6220 = vmatpush1.bf16.msra.mxu0 %v13659_v63  ;;  %4898 = vmatprep.subr.bf16.mxu1 %v13530_v1  ;;  %v13739_v63 = vcombine.low %v2919_v52, %v2923_v15  ;;  %v13610_v1 = vcombine.high %v3298_v34, %v3302_v56  ;;  %v3262_v16 = vld [vmem:[#allocation16 + $0x678] sm:$0xff]  ;;  %v2871_v52 = vld [vmem:[#allocation14 + $0x240] sm:$0xff] }
 0x455   :  { %6221 = vmatprep.subr.bf16.mxu0 %v13652_v57  ;;  %v13732_v57 = vcombine.high %v2911_v44, %v2915_v25  ;;  %v2875_v15 = vld [vmem:[#allocation14 + $0x260] sm:$0xff] }
 0x457   :  { %4899 = vmatpush1.bf16.msra.mxu1 %v13529_v60  ;;  %v13609_v60 = vcombine.low %v3298_v34, %v3302_v56  ;;  %v3250_v34 = vld [vmem:[#allocation16 + $0x618] sm:$0xff] }
 0x458   :  { %6222 = vmatpush1.bf16.msra.mxu0 %v13651_v55  ;;  %4900 = vmatprep.subr.bf16.mxu1 %v13522_v58  ;;  %v13731_v55 = vcombine.low %v2911_v44, %v2915_v25  ;;  %v13602_v58 = vcombine.high %v3290_v10, %v3294_v45  ;;  %v3254_v56 = vld [vmem:[#allocation16 + $0x638] sm:$0xff]  ;;  %v2863_v44 = vld [vmem:[#allocation14 + $0x200] sm:$0xff] }
 0x459   :  { %6223 = vmatprep.subr.bf16.mxu0 %v13644_v47  ;;  %v13724_v47 = vcombine.high %v2903_v54, %v2907_v24  ;;  %v2867_v25 = vld [vmem:[#allocation14 + $0x220] sm:$0xff] }
 0x45b   :  { %4901 = vmatpush1.bf16.msra.mxu1 %v13521_v5  ;;  %v13601_v5 = vcombine.low %v3290_v10, %v3294_v45  ;;  %v2983_v10 = vld [vmem:[#allocation14 + $0x5c0] sm:$0xff] }
 0x45c   :  { %6224 = vmatpush1.bf16.msra.mxu0 %v13643_v59  ;;  %4902 = vmatprep.subr.bf16.mxu1 %v13514_v27  ;;  %v13723_v59 = vcombine.low %v2903_v54, %v2907_v24  ;;  %v13594_v27 = vcombine.high %v3282_v53, %v3286_v62  ;;  %v2987_v45 = vld [vmem:[#allocation14 + $0x5e0] sm:$0xff]  ;;  %v2856_v54 = vld [vmem:[#allocation14 + $0x1c8] sm:$0xff] }
 0x45d   :  { %6225 = vmatprep.subr.bf16.mxu0 %v13636_v36  ;;  %v13716_v36 = vcombine.high %v2895_v3, %v2899_v51  ;;  %v2860_v24 = vld [vmem:[#allocation14 + $0x1e8] sm:$0xff] }
 0x45f   :  { %4903 = vmatpush1.bf16.msra.mxu1 %v13513_v49  ;;  %v13593_v49 = vcombine.low %v3282_v53, %v3286_v62  ;;  %v16139_v53 = vpop.f32.mrf.mxu0  ;;  %v2975_v62 = vld [vmem:[#allocation14 + $0x580] sm:$0xff] }
 0x460   :  { %6226 = vmatpush1.bf16.msra.mxu0 %v13635_v21  ;;  %4904 = vmatprep.subr.bf16.mxu1 %v13506_v14  ;;  %v13715_v21 = vcombine.low %v2895_v3, %v2899_v51  ;;  %v13586_v14 = vcombine.high %v3274_v61, %v3278_v37  ;;  %v2979_v3 = vld [vmem:[#allocation14 + $0x5a0] sm:$0xff]  ;;  %v13803_v51 = vcombine.low %v2983_v10, %v2987_v45 }
 0x461   :  { %6227 = vmatprep.subr.bf16.mxu0 %v13628_v38  ;;  %v13708_v38 = vcombine.high %v2887_v30, %v2891_v8 }
 0x463   :  { %4905 = vmatpush1.bf16.msra.mxu1 %v13505_v23  ;;  %v13585_v23 = vcombine.low %v3274_v61, %v3278_v37  ;;  %v13677_v61 = vcombine.low %v2856_v54, %v2860_v24  ;;  %v13796_v37 = vcombine.high %v2975_v62, %v2979_v3 }
 0x464   :  { %6228 = vmatpush1.bf16.msra.mxu0 %v13627_v31  ;;  %4906 = vmatprep.subr.bf16.mxu1 %v13498_v20  ;;  %v13707_v31 = vcombine.low %v2887_v30, %v2891_v8  ;;  %v13578_v20 = vcombine.high %v3266_v29, %v3270_v11  ;;  %v2967_v30 = vld [vmem:[#allocation14 + $0x540] sm:$0xff] }
 0x465   :  { %6229 = vmatprep.subr.bf16.mxu0 %v13620_v50  ;;  %v13700_v50 = vcombine.high %v2879_v46, %v2883_v19  ;;  %v2971_v8 = vld [vmem:[#allocation14 + $0x560] sm:$0xff] }
 0x467   :  { %4907 = vmatpush1.bf16.msra.mxu1 %v13497_v4  ;;  %v13577_v4 = vcombine.low %v3266_v29, %v3270_v11  ;;  %v13795_v11 = vcombine.low %v2975_v62, %v2979_v3  ;;  %v2939_v62 = vld [vmem:[#allocation14 + $0x460] sm:$0xff]  ;;  %v2808_v3 = vld [vmem:[#allocation14 + $0x48] sm:$0xff] }
 0x468   :  { %6230 = vmatpush1.bf16.msra.mxu0 %v13619_v12  ;;  %4908 = vmatprep.subr.bf16.mxu1 %v13618_v13  ;;  %v13699_v12 = vcombine.low %v2879_v46, %v2883_v19  ;;  %v13570_v13 = vcombine.high %v3258_v32, %v3262_v16 }
 0x469   :  { %6231 = vmatprep.subr.bf16.mxu0 %v13740_v18  ;;  %v13692_v18 = vcombine.high %v2871_v52, %v2875_v15 }
 0x46b   :  { %4909 = vmatpush2.bf16.msra.mxu1 %v13617_v0  ;;  %v13569_v0 = vcombine.low %v3258_v32, %v3262_v16  ;;  %v2963_v32 = vld [vmem:[#allocation14 + $0x520] sm:$0xff]  ;;  %v2832_v16 = vld [vmem:[#allocation14 + $0x108] sm:$0xff] }
 0x46c   :  { %6232 = vmatpush2.bf16.msra.mxu0 %v13739_v63  ;;  %4910 = vmatprep.subr.bf16.mxu1 %v13610_v1  ;;  %v13691_v63 = vcombine.low %v2871_v52, %v2875_v15  ;;  %v13562_v1 = vcombine.high %v3250_v34, %v3254_v56  ;;  %v2836_v52 = vld [vmem:[#allocation14 + $0x128] sm:$0xff]  ;;  %v13787_v15 = vcombine.low %v2967_v30, %v2971_v8 }
 0x46d   :  { %6233 = vmatprep.subr.bf16.mxu0 %v13732_v57  ;;  %v13684_v57 = vcombine.high %v2863_v44, %v2867_v25 }
 0x46f   :  { %4911 = vmatpush2.bf16.msra.mxu1 %v13609_v60  ;;  %v13561_v60 = vcombine.low %v3250_v34, %v3254_v56  ;;  %v2955_v34 = vld [vmem:[#allocation14 + $0x4e0] sm:$0xff]  ;;  %v2824_v56 = vld [vmem:[#allocation14 + $0xc8] sm:$0xff] }
 0x470   :  { %6234 = vmatpush2.bf16.msra.mxu0 %v13731_v55  ;;  %4912 = vmatprep.subr.bf16.mxu1 %v13602_v58  ;;  %v13683_v55 = vcombine.low %v2863_v44, %v2867_v25  ;;  %v13804_v58 = vcombine.high %v2983_v10, %v2987_v45  ;;  %v2828_v44 = vld [vmem:[#allocation14 + $0xe8] sm:$0xff]  ;;  %v2947_v10 = vld [vmem:[#allocation14 + $0x4a0] sm:$0xff] }
 0x471   :  { %6235 = vmatprep.subr.bf16.mxu0 %v13724_v47  ;;  %v13678_v47 = vcombine.high %v2856_v54, %v2860_v24  ;;  %v2816_v45 = vld [vmem:[#allocation14 + $0x88] sm:$0xff] }
 0x472   :  { %v2820_v54 = vld [vmem:[#allocation14 + $0xa8] sm:$0xff] }
 0x473   :  { %4913 = vmatpush2.bf16.msra.mxu1 %v13601_v5  ;;  %v2848_v5 = vld [vmem:[#allocation14 + $0x188] sm:$0xff] }
 0x474   :  { %6236 = vmatpush2.bf16.msra.mxu0 %v13723_v59  ;;  %4914 = vmatprep.subr.bf16.mxu1 %v13594_v27  ;;  %v2852_v59 = vld [vmem:[#allocation14 + $0x1a8] sm:$0xff]  ;;  %v16141_v27 = vpop.f32.mrf.mxu1 }
 0x475   :  { %6237 = vmatprep.subr.bf16.mxu0 %v13716_v36  ;;  %v4625_v36 = vpop.f32.mrf.mxu0 }
 0x477   :  { %4915 = vmatpush2.bf16.msra.mxu1 %v13593_v49  ;;  %v4627_v46 = vpop.f32.mrf.mxu0 }
 0x478   :  { %6238 = vmatpush2.bf16.msra.mxu0 %v13715_v21  ;;  %4916 = vmatprep.subr.bf16.mxu1 %v13586_v14  ;;  %v13670_v21 = vcombine.high %v2848_v5, %v2852_v59  ;;  %v2840_v14 = vld [vmem:[#allocation14 + $0x148] sm:$0xff] }
 0x479   :  { %6239 = vmatprep.subr.bf16.mxu0 %v13708_v38  ;;  %v2844_v38 = vld [vmem:[#allocation14 + $0x168] sm:$0xff] }
 0x47b   :  { %4917 = vmatpush2.bf16.msra.mxu1 %v13585_v23  ;;  %v13669_v23 = vcombine.low %v2848_v5, %v2852_v59  ;;  %v13637_v59 = vcombine.low %v2816_v45, %v2820_v54 }
 0x47c   :  { %6240 = vmatpush2.bf16.msra.mxu0 %v13707_v31  ;;  %4918 = vmatprep.subr.bf16.mxu1 %v13578_v20  ;;  %v13788_v31 = vcombine.high %v2967_v30, %v2971_v8  ;;  %v13662_v20 = vcombine.high %v2840_v14, %v2844_v38  ;;  %v2931_v30 = vld [vmem:[#allocation14 + $0x420] sm:$0xff]  ;;  %v2800_v8 = vld [vmem:[#allocation14 + $0x8] sm:$0xff] }
 0x47d   :  { %6241 = vmatprep.subr.bf16.mxu0 %v13700_v50  ;;  %v2959_v50 = vld [vmem:[#allocation14 + $0x500] sm:$0xff] }
 0x47e   :  { %v13779_v25 = vcombine.low %v2959_v50, %v2963_v32 }
 0x47f   :  { %4919 = vmatpush2.bf16.msra.mxu1 %v13577_v4  ;;  %v13661_v4 = vcombine.low %v2840_v14, %v2844_v38 }
 0x480   :  { %6242 = vmatpush2.bf16.msra.mxu0 %v13699_v12  ;;  %4920 = vmatprep.subr.bf16.mxu1 %v13570_v13  ;;  %v13780_v12 = vcombine.high %v2959_v50, %v2963_v32  ;;  %v13654_v13 = vcombine.high %v2832_v16, %v2836_v52 }
 0x481   :  { %6243 = vmatprep.subr.bf16.mxu0 %v13692_v18  ;;  %v2951_v18 = vld [vmem:[#allocation14 + $0x4c0] sm:$0xff] }
 0x482   :  { %v13771_v24 = vcombine.low %v2951_v18, %v2955_v34 }
 0x483   :  { %4921 = vmatpush2.bf16.msra.mxu1 %v13569_v0  ;;  %v13653_v0 = vcombine.low %v2832_v16, %v2836_v52  ;;  %v3039_v52 = vld [vmem:[#allocation14 + $0x780] sm:$0xff] }
 0x484   :  { %6244 = vmatpush2.bf16.msra.mxu0 %v13691_v63  ;;  %4922 = vmatprep.subr.bf16.mxu1 %v13562_v1  ;;  %v13772_v63 = vcombine.high %v2951_v18, %v2955_v34  ;;  %v13646_v1 = vcombine.high %v2824_v56, %v2828_v44 }
 0x485   :  { %6245 = vmatprep.subr.bf16.mxu0 %v13684_v57  ;;  %v2943_v57 = vld [vmem:[#allocation14 + $0x480] sm:$0xff] }
 0x486   :  { %v13763_v5 = vcombine.low %v2943_v57, %v2947_v10 }
 0x487   :  { %4923 = vmatpush2.bf16.msra.mxu1 %v13561_v60  ;;  %v13645_v60 = vcombine.low %v2824_v56, %v2828_v44  ;;  %v3031_v44 = vld [vmem:[#allocation14 + $0x740] sm:$0xff] }
 0x488   :  { %6246 = vmatpush2.bf16.msra.mxu0 %v13683_v55  ;;  %6258 = vmatprep.subr.bf16.mxu1 %v13804_v58  ;;  %v13764_v55 = vcombine.high %v2943_v57, %v2947_v10  ;;  %v13638_v58 = vcombine.high %v2816_v45, %v2820_v54  ;;  %v3023_v54 = vld [vmem:[#allocation14 + $0x700] sm:$0xff] }
 0x489   :  { %6301 = vmatprep.subr.bf16.mxu0 %v13678_v47  ;;  %v2935_v47 = vld [vmem:[#allocation14 + $0x440] sm:$0xff] }
 0x48a   :  { %4925 = vmatmul.mubr.bf16.vlgmr.msra.gmra.mxu1 %v16118_v48  ;;  %v4668_v49 = vpop.f32.mrf.mxu1 }
 0x48b   :  { %v16144_v29 = vadd.f32 %v4668_v49, %v4625_v36  ;;  %6248 = vmatmul.mubr.bf16.vlgmr.msra.gmra.mxu0 %v16060_v7  ;;  %6259 = vmatpush1.bf16.msra.mxu1 %v13803_v51  ;;  %v2812_v51 = vld [vmem:[#allocation14 + $0x68] sm:$0xff]  ;;  %v13756_v36 = vcombine.high %v2935_v47, %v2939_v62 }
 0x48c   :  { %6290 = vmatprep.mubr.bf16.mxu1 %v16107_v6  ;;  %6302 = vmatpush1.bf16.msra.mxu0 %v13677_v61  ;;  %v4670_v19 = vpop.f32.mrf.mxu1  ;;  %v13630_v61 = vcombine.high %v2808_v3, %v2812_v51  ;;  %v2804_v49 = vld [vmem:[#allocation14 + $0x28] sm:$0xff]  ;;  %v13629_v14 = vcombine.low %v2808_v3, %v2812_v51  ;;  %v3015_v51 = vld [vmem:[#allocation14 + $0x6c0] sm:$0xff] }
 0x48d   :  { %6333 = vmatprep.mubr.bf16.mxu0 %v16066_v26  ;;  %v16149_v48 = vadd.f32 %v4670_v19, %v4627_v46  ;;  %6260 = vmatprep.subr.bf16.mxu1 %v13796_v37  ;;  %v2927_v37 = vld [vmem:[#allocation14 + $0x400] sm:$0xff]  ;;  %v13621_v50 = vcombine.low %v2800_v8, %v2804_v49 }
 0x48e   :  { %6303 = vmatprep.subr.bf16.mxu0 %v13670_v21  ;;  %v13755_v21 = vcombine.low %v2935_v47, %v2939_v62  ;;  %v13748_v38 = vcombine.high %v2927_v37, %v2931_v30  ;;  %v3047_v46 = vld [vmem:[#allocation14 + $0x7c0] sm:$0xff] }
 0x48f   :  { %6261 = vmatpush1.bf16.msra.mxu1 %v13795_v11  ;;  %v13622_v11 = vcombine.high %v2800_v8, %v2804_v49  ;;  %v3051_v19 = vld [vmem:[#allocation14 + $0x7e0] sm:$0xff] }
 0x490   :  { %6304 = vmatpush1.bf16.msra.mxu0 %v13669_v23  ;;  %6262 = vmatprep.subr.bf16.mxu1 %v13788_v31  ;;  %v2920_v23 = vld [vmem:[#allocation14 + $0x3c8] sm:$0xff]  ;;  %v13868_v32 = vcombine.high %v3047_v46, %v3051_v19  ;;  %v3007_v49 = vld [vmem:[#allocation14 + $0x680] sm:$0xff] }
 0x491   :  { %6305 = vmatprep.subr.bf16.mxu0 %v13662_v20  ;;  %v2924_v31 = vld [vmem:[#allocation14 + $0x3e8] sm:$0xff]  ;;  %v13747_v20 = vcombine.low %v2927_v37, %v2931_v30 }
 0x492   :  { %v13742_v16 = vcombine.high %v2920_v23, %v2924_v31  ;;  %v13741_v18 = vcombine.low %v2920_v23, %v2924_v31  ;;  %v2999_v31 = vld [vmem:[#allocation14 + $0x640] sm:$0xff] }
 0x493   :  { %6263 = vmatpush1.bf16.msra.mxu1 %v13787_v15  ;;  %v3043_v15 = vld [vmem:[#allocation14 + $0x7a0] sm:$0xff] }
 0x494   :  { %6306 = vmatpush1.bf16.msra.mxu0 %v13661_v4  ;;  %6264 = vmatprep.subr.bf16.mxu1 %v13780_v12  ;;  %v2912_v4 = vld [vmem:[#allocation14 + $0x388] sm:$0xff]  ;;  %v13860_v34 = vcombine.high %v3039_v52, %v3043_v15 }
 0x495   :  { %6307 = vmatprep.subr.bf16.mxu0 %v13654_v13  ;;  %v2916_v12 = vld [vmem:[#allocation14 + $0x3a8] sm:$0xff]  ;;  %v13867_v13 = vcombine.low %v3047_v46, %v3051_v19 }
 0x496   :  { %v13734_v56 = vcombine.high %v2912_v4, %v2916_v12  ;;  %v13733_v57 = vcombine.low %v2912_v4, %v2916_v12  ;;  %v2991_v12 = vld [vmem:[#allocation14 + $0x600] sm:$0xff] }
 0x497   :  { %6265 = vmatpush1.bf16.msra.mxu1 %v13779_v25  ;;  %v3035_v25 = vld [vmem:[#allocation14 + $0x760] sm:$0xff] }
 0x498   :  { %6308 = vmatpush1.bf16.msra.mxu0 %v13653_v0  ;;  %6266 = vmatprep.subr.bf16.mxu1 %v13772_v63  ;;  %v2904_v0 = vld [vmem:[#allocation14 + $0x348] sm:$0xff]  ;;  %v13852_v10 = vcombine.high %v3031_v44, %v3035_v25 }
 0x499   :  { %6309 = vmatprep.subr.bf16.mxu0 %v13646_v1  ;;  %v2908_v63 = vld [vmem:[#allocation14 + $0x368] sm:$0xff]  ;;  %v13859_v1 = vcombine.low %v3039_v52, %v3043_v15 }
 0x49a   :  { %v13726_v45 = vcombine.high %v2904_v0, %v2908_v63  ;;  %v13725_v47 = vcombine.low %v2904_v0, %v2908_v63 }
 0x49b   :  { %6267 = vmatpush1.bf16.msra.mxu1 %v13771_v24  ;;  %v3027_v24 = vld [vmem:[#allocation14 + $0x720] sm:$0xff] }
 0x49c   :  { %6310 = vmatpush1.bf16.msra.mxu0 %v13645_v60  ;;  %6268 = vmatprep.subr.bf16.mxu1 %v13764_v55  ;;  %v2896_v60 = vld [vmem:[#allocation14 + $0x308] sm:$0xff]  ;;  %v13844_v62 = vcombine.high %v3023_v54, %v3027_v24 }
 0x49d   :  { %6311 = vmatprep.subr.bf16.mxu0 %v13638_v58  ;;  %v2900_v55 = vld [vmem:[#allocation14 + $0x328] sm:$0xff]  ;;  %v13851_v58 = vcombine.low %v3031_v44, %v3035_v25 }
 0x49e   :  { %v13718_v3 = vcombine.high %v2896_v60, %v2900_v55  ;;  %v13717_v37 = vcombine.low %v2896_v60, %v2900_v55  ;;  %v16155_v55 = vpop.f32.mrf.mxu1 }
 0x49f   :  { %6269 = vmatpush1.bf16.msra.mxu1 %v13763_v5  ;;  %v3019_v5 = vld [vmem:[#allocation14 + $0x6e0] sm:$0xff] }
 0x4a0   :  { %6312 = vmatpush1.bf16.msra.mxu0 %v13637_v59  ;;  %6270 = vmatprep.subr.bf16.mxu1 %v13756_v36  ;;  %v2888_v59 = vld [vmem:[#allocation14 + $0x2c8] sm:$0xff]  ;;  %v13836_v30 = vcombine.high %v3015_v51, %v3019_v5 }
 0x4a1   :  { %6313 = vmatprep.subr.bf16.mxu0 %v13630_v61  ;;  %v2892_v36 = vld [vmem:[#allocation14 + $0x2e8] sm:$0xff]  ;;  %v13843_v61 = vcombine.low %v3023_v54, %v3027_v24  ;;  %v2861_v54 = vld [vmem:[#allocation14 + $0x1f0] sm:$0xff] }
 0x4a2   :  { %v13710_v8 = vcombine.high %v2888_v59, %v2892_v36  ;;  %v13709_v46 = vcombine.low %v2888_v59, %v2892_v36  ;;  %v2849_v59 = vld [vmem:[#allocation14 + $0x190] sm:$0xff] }
 0x4a3   :  { %6271 = vmatpush1.bf16.msra.mxu1 %v13755_v21  ;;  %v3011_v21 = vld [vmem:[#allocation14 + $0x6a0] sm:$0xff]  ;;  %v2853_v36 = vld [vmem:[#allocation14 + $0x1b0] sm:$0xff] }
 0x4a4   :  { %6314 = vmatpush1.bf16.msra.mxu0 %v13629_v14  ;;  %6272 = vmatprep.subr.bf16.mxu1 %v13748_v38  ;;  %v2880_v14 = vld [vmem:[#allocation14 + $0x288] sm:$0xff]  ;;  %v13828_v19 = vcombine.high %v3007_v49, %v3011_v21 }
 0x4a5   :  { %6315 = vmatprep.subr.bf16.mxu0 %v13622_v11  ;;  %v2884_v38 = vld [vmem:[#allocation14 + $0x2a8] sm:$0xff]  ;;  %v13835_v11 = vcombine.low %v3015_v51, %v3019_v5 }
 0x4a6   :  { %v13702_v23 = vcombine.high %v2880_v14, %v2884_v38  ;;  %v13701_v52 = vcombine.low %v2880_v14, %v2884_v38  ;;  %v2980_v51 = vld [vmem:[#allocation14 + $0x5a8] sm:$0xff]  ;;  %v13672_v38 = vcombine.high %v2849_v59, %v2853_v36 }
 0x4a7   :  { %6273 = vmatpush1.bf16.msra.mxu1 %v13747_v20  ;;  %v3003_v20 = vld [vmem:[#allocation14 + $0x660] sm:$0xff] }
 0x4a8   :  { %6316 = vmatpush1.bf16.msra.mxu0 %v13621_v50  ;;  %6274 = vmatprep.subr.bf16.mxu1 %v13868_v32  ;;  %v2872_v50 = vld [vmem:[#allocation14 + $0x248] sm:$0xff]  ;;  %v13820_v15 = vcombine.high %v2999_v31, %v3003_v20  ;;  %v13819_v44 = vcombine.low %v2999_v31, %v3003_v20 }
 0x4a9   :  { %6317 = vmatprep.subr.bf16.mxu0 %v13742_v16  ;;  %v2876_v32 = vld [vmem:[#allocation14 + $0x268] sm:$0xff]  ;;  %v13827_v16 = vcombine.low %v3007_v49, %v3011_v21 }
 0x4aa   :  { %v13694_v4 = vcombine.high %v2872_v50, %v2876_v32  ;;  %v13693_v25 = vcombine.low %v2872_v50, %v2876_v32  ;;  %v2968_v49 = vld [vmem:[#allocation14 + $0x548] sm:$0xff]  ;;  %v13671_v50 = vcombine.low %v2849_v59, %v2853_v36  ;;  %v2817_v36 = vld [vmem:[#allocation14 + $0x90] sm:$0xff] }
 0x4ab   :  { %6275 = vmatpush2.bf16.msra.mxu1 %v13867_v13  ;;  %v2995_v13 = vld [vmem:[#allocation14 + $0x620] sm:$0xff]  ;;  %v2972_v21 = vld [vmem:[#allocation14 + $0x568] sm:$0xff] }
 0x4ac   :  { %6318 = vmatpush2.bf16.msra.mxu0 %v13741_v18  ;;  %6276 = vmatprep.subr.bf16.mxu1 %v13860_v34  ;;  %v16151_v18 = vpop.f32.mrf.mxu0  ;;  %v2864_v34 = vld [vmem:[#allocation14 + $0x208] sm:$0xff]  ;;  %v13812_v0 = vcombine.high %v2991_v12, %v2995_v13  ;;  %v13811_v24 = vcombine.low %v2991_v12, %v2995_v13  ;;  %v13790_v32 = vcombine.high %v2968_v49, %v2972_v21  ;;  %v2833_v13 = vld [vmem:[#allocation14 + $0x110] sm:$0xff] }
 0x4ad   :  { %6319 = vmatprep.subr.bf16.mxu0 %v13734_v56  ;;  %v2868_v56 = vld [vmem:[#allocation14 + $0x228] sm:$0xff] }
 0x4ae   :  { %v13686_v63 = vcombine.high %v2864_v34, %v2868_v56  ;;  %v2948_v59 = vld [vmem:[#allocation14 + $0x4a8] sm:$0xff] }
 0x4af   :  { %6277 = vmatpush2.bf16.msra.mxu1 %v13859_v1  ;;  %v2984_v1 = vld [vmem:[#allocation14 + $0x5c8] sm:$0xff] }
 0x4b0   :  { %6320 = vmatpush2.bf16.msra.mxu0 %v13733_v57  ;;  %6278 = vmatprep.subr.bf16.mxu1 %v13852_v10  ;;  %v2988_v57 = vld [vmem:[#allocation14 + $0x5e8] sm:$0xff]  ;;  %v16153_v10 = vpop.f32.mrf.mxu0 }
 0x4b1   :  { %6321 = vmatprep.subr.bf16.mxu0 %v13726_v45  ;;  %v2857_v45 = vld [vmem:[#allocation14 + $0x1d0] sm:$0xff]  ;;  %v13805_v5 = vcombine.low %v2984_v1, %v2988_v57 }
 0x4b2   :  { %v4711_v60 = vpop.f32.mrf.mxu0 }
 0x4b3   :  { %6279 = vmatpush2.bf16.msra.mxu1 %v13851_v58  ;;  %v13685_v58 = vcombine.low %v2864_v34, %v2868_v56  ;;  %v2837_v34 = vld [vmem:[#allocation14 + $0x130] sm:$0xff] }
 0x4b4   :  { %6322 = vmatpush2.bf16.msra.mxu0 %v13725_v47  ;;  %6280 = vmatprep.subr.bf16.mxu1 %v13844_v62  ;;  %v13806_v47 = vcombine.high %v2984_v1, %v2988_v57  ;;  %v13680_v62 = vcombine.high %v2857_v45, %v2861_v54 }
 0x4b5   :  { %6323 = vmatprep.subr.bf16.mxu0 %v13718_v3  ;;  %v2976_v3 = vld [vmem:[#allocation14 + $0x588] sm:$0xff] }
 0x4b7   :  { %6281 = vmatpush2.bf16.msra.mxu1 %v13843_v61  ;;  %v4713_v61 = vpop.f32.mrf.mxu0 }
 0x4b8   :  { %6324 = vmatpush2.bf16.msra.mxu0 %v13717_v37  ;;  %6282 = vmatprep.subr.bf16.mxu1 %v13836_v30  ;;  %v16157_v37 = vpop.f32.mrf.mxu1  ;;  %v13679_v30 = vcombine.low %v2857_v45, %v2861_v54  ;;  %v13656_v45 = vcombine.high %v2833_v13, %v2837_v34  ;;  %v2952_v54 = vld [vmem:[#allocation14 + $0x4c8] sm:$0xff] }
 0x4b9   :  { %6325 = vmatprep.subr.bf16.mxu0 %v13710_v8  ;;  %v13798_v8 = vcombine.high %v2976_v3, %v2980_v51  ;;  %v4715_v31 = vpop.f32.mrf.mxu0 }
 0x4bb   :  { %6283 = vmatpush2.bf16.msra.mxu1 %v13835_v11  ;;  %v2841_v11 = vld [vmem:[#allocation14 + $0x150] sm:$0xff] }
 0x4bc   :  { %6326 = vmatpush2.bf16.msra.mxu0 %v13709_v46  ;;  %6284 = vmatprep.subr.bf16.mxu1 %v13828_v19  ;;  %v2845_v46 = vld [vmem:[#allocation14 + $0x170] sm:$0xff] }
 0x4bd   :  { %6327 = vmatprep.subr.bf16.mxu0 %v13702_v23  ;;  %v13797_v23 = vcombine.low %v2976_v3, %v2980_v51 }
 0x4bf   :  { %6285 = vmatpush2.bf16.msra.mxu1 %v13827_v16 }
 0x4c0   :  { %6328 = vmatpush2.bf16.msra.mxu0 %v13701_v52  ;;  %6286 = vmatprep.subr.bf16.mxu1 %v13820_v15  ;;  %v13664_v52 = vcombine.high %v2841_v11, %v2845_v46  ;;  %v2960_v15 = vld [vmem:[#allocation14 + $0x508] sm:$0xff] }
 0x4c1   :  { %6329 = vmatprep.subr.bf16.mxu0 %v13694_v4  ;;  %v2964_v4 = vld [vmem:[#allocation14 + $0x528] sm:$0xff] }
 0x4c2   :  { %v13782_v1 = vcombine.high %v2960_v15, %v2964_v4 }
 0x4c3   :  { %6287 = vmatpush2.bf16.msra.mxu1 %v13819_v44  ;;  %v13789_v44 = vcombine.low %v2968_v49, %v2972_v21 }
 0x4c4   :  { %6330 = vmatpush2.bf16.msra.mxu0 %v13693_v25  ;;  %6288 = vmatprep.subr.bf16.mxu1 %v13812_v0  ;;  %v4717_v25 = vpop.f32.mrf.mxu0 }
 0x4c5   :  { %6331 = vmatprep.subr.bf16.mxu0 %v13686_v63  ;;  %v13663_v63 = vcombine.low %v2841_v11, %v2845_v46  ;;  %v2809_v11 = vld [vmem:[#allocation14 + $0x50] sm:$0xff] }
 0x4c6   :  { %v2813_v46 = vld [vmem:[#allocation14 + $0x70] sm:$0xff] }
 0x4c7   :  { %6289 = vmatpush2.bf16.msra.mxu1 %v13811_v24  ;;  %v2956_v24 = vld [vmem:[#allocation14 + $0x4e8] sm:$0xff] }
 0x4c8   :  { %6332 = vmatpush2.bf16.msra.mxu0 %v13685_v58  ;;  %6344 = vmatprep.subr.bf16.mxu1 %v13806_v47  ;;  %v2829_v58 = vld [vmem:[#allocation14 + $0xf0] sm:$0xff]  ;;  %v13781_v47 = vcombine.low %v2960_v15, %v2964_v4  ;;  %v13774_v3 = vcombine.high %v2952_v54, %v2956_v24 }
 0x4c9   :  { %6387 = vmatprep.subr.bf16.mxu0 %v13680_v62  ;;  %v13655_v62 = vcombine.low %v2833_v13, %v2837_v34  ;;  %v2801_v15 = vld [vmem:[#allocation14 + $0x10] sm:$0xff]  ;;  %v13631_v13 = vcombine.low %v2809_v11, %v2813_v46 }
 0x4ca   :  { %v4754_v14 = vpop.f32.mrf.mxu1  ;;  %6291 = vmatmul.mubr.bf16.vlgmr.msra.gmra.mxu1 %v16101_v2  ;;  %v2805_v4 = vld [vmem:[#allocation14 + $0x30] sm:$0xff] }
 0x4cb   :  { %v16160_v19 = vadd.f32 %v4754_v14, %v4711_v60  ;;  %6334 = vmatmul.mubr.bf16.vlgmr.msra.gmra.mxu0 %v16060_v7  ;;  %6345 = vmatpush1.bf16.msra.mxu1 %v13805_v5  ;;  %v2825_v60 = vld [vmem:[#allocation14 + $0xd0] sm:$0xff]  ;;  %v2944_v5 = vld [vmem:[#allocation14 + $0x488] sm:$0xff] }
 0x4cc   :  { %6376 = vmatprep.mubr.bf16.mxu1 %v16107_v6  ;;  %v4756_v20 = vpop.f32.mrf.mxu1  ;;  %6388 = vmatpush1.bf16.msra.mxu0 %v13679_v30  ;;  %v13648_v51 = vcombine.high %v2825_v60, %v2829_v58  ;;  %v13773_v30 = vcombine.low %v2952_v54, %v2956_v24  ;;  %v13766_v49 = vcombine.high %v2944_v5, %v2948_v59  ;;  %v2936_v14 = vld [vmem:[#allocation14 + $0x448] sm:$0xff] }
 0x4cd   :  { %v16164_v16 = vadd.f32 %v4756_v20, %v4713_v61  ;;  %6419 = vmatprep.mubr.bf16.mxu0 %v16066_v26  ;;  %6346 = vmatprep.subr.bf16.mxu1 %v13798_v8  ;;  %v2821_v61 = vld [vmem:[#allocation14 + $0xb0] sm:$0xff]  ;;  %v13647_v8 = vcombine.low %v2825_v60, %v2829_v58  ;;  %v13623_v54 = vcombine.low %v2801_v15, %v2805_v4  ;;  %v3040_v58 = vld [vmem:[#allocation14 + $0x788] sm:$0xff] }
 0x4ce   :  { %v4758_v12 = vpop.f32.mrf.mxu1  ;;  %6389 = vmatprep.subr.bf16.mxu0 %v13672_v38  ;;  %v13640_v21 = vcombine.high %v2817_v36, %v2821_v61  ;;  %v2940_v38 = vld [vmem:[#allocation14 + $0x468] sm:$0xff] }
 0x4cf   :  { %v16167_v56 = vadd.f32 %v4758_v12, %v4715_v31  ;;  %6347 = vmatpush1.bf16.msra.mxu1 %v13797_v23  ;;  %v13765_v23 = vcombine.low %v2944_v5, %v2948_v59  ;;  %v13639_v31 = vcombine.low %v2817_v36, %v2821_v61  ;;  %v13758_v20 = vcombine.high %v2936_v14, %v2940_v38  ;;  %v3032_v61 = vld [vmem:[#allocation14 + $0x748] sm:$0xff] }
 0x4d0   :  { %v4760_v0 = vpop.f32.mrf.mxu1  ;;  %6390 = vmatpush1.bf16.msra.mxu0 %v13671_v50  ;;  %6348 = vmatprep.subr.bf16.mxu1 %v13790_v32  ;;  %v13632_v50 = vcombine.high %v2809_v11, %v2813_v46  ;;  %v2928_v32 = vld [vmem:[#allocation14 + $0x408] sm:$0xff]  ;;  %v13757_v12 = vcombine.low %v2936_v14, %v2940_v38 }
 0x4d1   :  { %v16169_v57 = vadd.f32 %v4760_v0, %v4717_v25  ;;  %6391 = vmatprep.subr.bf16.mxu0 %v13664_v52  ;;  %v2932_v52 = vld [vmem:[#allocation14 + $0x428] sm:$0xff] }
 0x4d2   :  { %v13750_v34 = vcombine.high %v2928_v32, %v2932_v52  ;;  %v3048_v25 = vld [vmem:[#allocation14 + $0x7c8] sm:$0xff] }
 0x4d3   :  { %6349 = vmatpush1.bf16.msra.mxu1 %v13789_v44  ;;  %v13624_v44 = vcombine.high %v2801_v15, %v2805_v4  ;;  %v3052_v0 = vld [vmem:[#allocation14 + $0x7e8] sm:$0xff] }
 0x4d4   :  { %6392 = vmatpush1.bf16.msra.mxu0 %v13663_v63  ;;  %6350 = vmatprep.subr.bf16.mxu1 %v13782_v1  ;;  %v2921_v63 = vld [vmem:[#allocation14 + $0x3d0] sm:$0xff]  ;;  %v13870_v24 = vcombine.high %v3048_v25, %v3052_v0  ;;  %v3024_v46 = vld [vmem:[#allocation14 + $0x708] sm:$0xff] }
 0x4d5   :  { %6393 = vmatprep.subr.bf16.mxu0 %v13656_v45  ;;  %v2925_v1 = vld [vmem:[#allocation14 + $0x3f0] sm:$0xff]  ;;  %v13749_v45 = vcombine.low %v2928_v32, %v2932_v52  ;;  %v3016_v4 = vld [vmem:[#allocation14 + $0x6c8] sm:$0xff] }
 0x4d6   :  { %v13744_v60 = vcombine.high %v2921_v63, %v2925_v1  ;;  %v13743_v5 = vcombine.low %v2921_v63, %v2925_v1  ;;  %v3008_v1 = vld [vmem:[#allocation14 + $0x688] sm:$0xff] }
 0x4d7   :  { %6351 = vmatpush1.bf16.msra.mxu1 %v13781_v47  ;;  %v3044_v47 = vld [vmem:[#allocation14 + $0x7a8] sm:$0xff] }
 0x4d8   :  { %6394 = vmatpush1.bf16.msra.mxu0 %v13655_v62  ;;  %6352 = vmatprep.subr.bf16.mxu1 %v13774_v3  ;;  %v2913_v62 = vld [vmem:[#allocation14 + $0x390] sm:$0xff]  ;;  %v13862_v59 = vcombine.high %v3040_v58, %v3044_v47 }
 0x4d9   :  { %6395 = vmatprep.subr.bf16.mxu0 %v13648_v51  ;;  %v2917_v3 = vld [vmem:[#allocation14 + $0x3b0] sm:$0xff]  ;;  %v13869_v51 = vcombine.low %v3048_v25, %v3052_v0 }
 0x4da   :  { %v13736_v36 = vcombine.high %v2913_v62, %v2917_v3  ;;  %v13735_v14 = vcombine.low %v2913_v62, %v2917_v3  ;;  %v3000_v3 = vld [vmem:[#allocation14 + $0x648] sm:$0xff] }
 0x4db   :  { %6353 = vmatpush1.bf16.msra.mxu1 %v13773_v30  ;;  %v3036_v30 = vld [vmem:[#allocation14 + $0x768] sm:$0xff] }
 0x4dc   :  { %6396 = vmatpush1.bf16.msra.mxu0 %v13647_v8  ;;  %6354 = vmatprep.subr.bf16.mxu1 %v13766_v49  ;;  %v2905_v8 = vld [vmem:[#allocation14 + $0x350] sm:$0xff]  ;;  %v13854_v38 = vcombine.high %v3032_v61, %v3036_v30 }
 0x4dd   :  { %6397 = vmatprep.subr.bf16.mxu0 %v13640_v21  ;;  %v2909_v49 = vld [vmem:[#allocation14 + $0x370] sm:$0xff]  ;;  %v13861_v21 = vcombine.low %v3040_v58, %v3044_v47 }
 0x4de   :  { %v13728_v11 = vcombine.high %v2905_v8, %v2909_v49  ;;  %v13727_v32 = vcombine.low %v2905_v8, %v2909_v49  ;;  %v2992_v49 = vld [vmem:[#allocation14 + $0x608] sm:$0xff] }
 0x4df   :  { %6355 = vmatpush1.bf16.msra.mxu1 %v13765_v23  ;;  %v3028_v23 = vld [vmem:[#allocation14 + $0x728] sm:$0xff] }
 0x4e0   :  { %6398 = vmatpush1.bf16.msra.mxu0 %v13639_v31  ;;  %6356 = vmatprep.subr.bf16.mxu1 %v13758_v20  ;;  %v2897_v31 = vld [vmem:[#allocation14 + $0x310] sm:$0xff]  ;;  %v13846_v52 = vcombine.high %v3024_v46, %v3028_v23 }
 0x4e1   :  { %6399 = vmatprep.subr.bf16.mxu0 %v13632_v50  ;;  %v2901_v20 = vld [vmem:[#allocation14 + $0x330] sm:$0xff]  ;;  %v13853_v50 = vcombine.low %v3032_v61, %v3036_v30 }
 0x4e2   :  { %v13720_v15 = vcombine.high %v2897_v31, %v2901_v20  ;;  %v13719_v25 = vcombine.low %v2897_v31, %v2901_v20  ;;  %v2985_v20 = vld [vmem:[#allocation14 + $0x5d0] sm:$0xff] }
 0x4e3   :  { %6357 = vmatpush1.bf16.msra.mxu1 %v13757_v12  ;;  %v3020_v12 = vld [vmem:[#allocation14 + $0x6e8] sm:$0xff] }
 0x4e4   :  { %6400 = vmatpush1.bf16.msra.mxu0 %v13631_v13  ;;  %6358 = vmatprep.subr.bf16.mxu1 %v13750_v34  ;;  %v2889_v13 = vld [vmem:[#allocation14 + $0x2d0] sm:$0xff]  ;;  %v13838_v0 = vcombine.high %v3016_v4, %v3020_v12 }
 0x4e5   :  { %6401 = vmatprep.subr.bf16.mxu0 %v13624_v44  ;;  %v2893_v34 = vld [vmem:[#allocation14 + $0x2f0] sm:$0xff]  ;;  %v13845_v44 = vcombine.low %v3024_v46, %v3028_v23 }
 0x4e6   :  { %v13712_v63 = vcombine.high %v2889_v13, %v2893_v34  ;;  %v13711_v58 = vcombine.low %v2889_v13, %v2893_v34 }
 0x4e7   :  { %6359 = vmatpush1.bf16.msra.mxu1 %v13749_v45  ;;  %v3012_v45 = vld [vmem:[#allocation14 + $0x6a8] sm:$0xff] }
 0x4e8   :  { %6402 = vmatpush1.bf16.msra.mxu0 %v13623_v54  ;;  %6360 = vmatprep.subr.bf16.mxu1 %v13870_v24  ;;  %v2881_v54 = vld [vmem:[#allocation14 + $0x290] sm:$0xff]  ;;  %v13830_v47 = vcombine.high %v3008_v1, %v3012_v45 }
 0x4e9   :  { %6403 = vmatprep.subr.bf16.mxu0 %v13744_v60  ;;  %v2885_v24 = vld [vmem:[#allocation14 + $0x2b0] sm:$0xff]  ;;  %v13837_v60 = vcombine.low %v3016_v4, %v3020_v12  ;;  %v4797_v4 = vpop.f32.mrf.mxu0 }
 0x4ea   :  { %v13704_v62 = vcombine.high %v2881_v54, %v2885_v24  ;;  %v13703_v61 = vcombine.low %v2881_v54, %v2885_v24 }
 0x4eb   :  { %6361 = vmatpush2.bf16.msra.mxu1 %v13869_v51  ;;  %v3004_v51 = vld [vmem:[#allocation14 + $0x668] sm:$0xff] }
 0x4ec   :  { %6404 = vmatpush2.bf16.msra.mxu0 %v13743_v5  ;;  %6362 = vmatprep.subr.bf16.mxu1 %v13862_v59  ;;  %v2873_v5 = vld [vmem:[#allocation14 + $0x250] sm:$0xff]  ;;  %v13822_v30 = vcombine.high %v3000_v3, %v3004_v51 }
 0x4ed   :  { %6405 = vmatprep.subr.bf16.mxu0 %v13736_v36  ;;  %v2877_v59 = vld [vmem:[#allocation14 + $0x270] sm:$0xff]  ;;  %v13829_v36 = vcombine.low %v3008_v1, %v3012_v45  ;;  %v2854_v1 = vld [vmem:[#allocation14 + $0x1b8] sm:$0xff]  ;;  %v4799_v45 = vpop.f32.mrf.mxu0 }
 0x4ee   :  { %v13696_v8 = vcombine.high %v2873_v5, %v2877_v59  ;;  %v13695_v46 = vcombine.low %v2873_v5, %v2877_v59 }
 0x4ef   :  { %6363 = vmatpush2.bf16.msra.mxu1 %v13861_v21  ;;  %v2996_v21 = vld [vmem:[#allocation14 + $0x628] sm:$0xff] }
 0x4f0   :  { %6406 = vmatpush2.bf16.msra.mxu0 %v13735_v14  ;;  %6364 = vmatprep.subr.bf16.mxu1 %v13854_v38  ;;  %v2865_v14 = vld [vmem:[#allocation14 + $0x210] sm:$0xff]  ;;  %v13814_v23 = vcombine.high %v2992_v49, %v2996_v21 }
 0x4f1   :  { %6407 = vmatprep.subr.bf16.mxu0 %v13728_v11  ;;  %v2869_v38 = vld [vmem:[#allocation14 + $0x230] sm:$0xff]  ;;  %v13821_v11 = vcombine.low %v3000_v3, %v3004_v51  ;;  %v2842_v3 = vld [vmem:[#allocation14 + $0x158] sm:$0xff] }
 0x4f2   :  { %v13688_v31 = vcombine.high %v2865_v14, %v2869_v38  ;;  %v13687_v12 = vcombine.low %v2865_v14, %v2869_v38  ;;  %v2846_v51 = vld [vmem:[#allocation14 + $0x178] sm:$0xff]  ;;  %v2961_v14 = vld [vmem:[#allocation14 + $0x510] sm:$0xff] }
 0x4f3   :  { %6365 = vmatpush2.bf16.msra.mxu1 %v13853_v50  ;;  %v2989_v50 = vld [vmem:[#allocation14 + $0x5f0] sm:$0xff] }
 0x4f4   :  { %6408 = vmatpush2.bf16.msra.mxu0 %v13727_v32  ;;  %6366 = vmatprep.subr.bf16.mxu1 %v13846_v52  ;;  %v2858_v32 = vld [vmem:[#allocation14 + $0x1d8] sm:$0xff]  ;;  %v13808_v13 = vcombine.high %v2985_v20, %v2989_v50  ;;  %v2965_v38 = vld [vmem:[#allocation14 + $0x530] sm:$0xff] }
 0x4f5   :  { %6409 = vmatprep.subr.bf16.mxu0 %v13720_v15  ;;  %v2862_v52 = vld [vmem:[#allocation14 + $0x1f8] sm:$0xff]  ;;  %v13813_v15 = vcombine.low %v2992_v49, %v2996_v21  ;;  %v13666_v21 = vcombine.high %v2842_v3, %v2846_v51 }
 0x4f6   :  { %v13682_v34 = vcombine.high %v2858_v32, %v2862_v52  ;;  %v13681_v54 = vcombine.low %v2858_v32, %v2862_v52  ;;  %v13665_v52 = vcombine.low %v2842_v3, %v2846_v51  ;;  %v2937_v51 = vld [vmem:[#allocation14 + $0x450] sm:$0xff] }
 0x4f7   :  { %6367 = vmatpush2.bf16.msra.mxu1 %v13845_v44  ;;  %v2977_v44 = vld [vmem:[#allocation14 + $0x590] sm:$0xff] }
 0x4f8   :  { %6410 = vmatpush2.bf16.msra.mxu0 %v13719_v25  ;;  %6368 = vmatprep.subr.bf16.mxu1 %v13838_v0  ;;  %v2981_v25 = vld [vmem:[#allocation14 + $0x5b0] sm:$0xff]  ;;  %v13807_v0 = vcombine.low %v2985_v20, %v2989_v50 }
 0x4f9   :  { %6411 = vmatprep.subr.bf16.mxu0 %v13712_v63  ;;  %v2850_v63 = vld [vmem:[#allocation14 + $0x198] sm:$0xff]  ;;  %v13800_v24 = vcombine.high %v2977_v44, %v2981_v25  ;;  %v13799_v59 = vcombine.low %v2977_v44, %v2981_v25  ;;  %v13783_v25 = vcombine.low %v2961_v14, %v2965_v38 }
 0x4fa   :  { %v2830_v44 = vld [vmem:[#allocation14 + $0xf8] sm:$0xff] }
 0x4fb   :  { %6369 = vmatpush2.bf16.msra.mxu1 %v13837_v60  ;;  %v2969_v60 = vld [vmem:[#allocation14 + $0x550] sm:$0xff] }
 0x4fc   :  { %6412 = vmatpush2.bf16.msra.mxu0 %v13711_v58  ;;  %6370 = vmatprep.subr.bf16.mxu1 %v13830_v47  ;;  %v2973_v58 = vld [vmem:[#allocation14 + $0x570] sm:$0xff] }
 0x4fd   :  { %6413 = vmatprep.subr.bf16.mxu0 %v13704_v62  ;;  %v13674_v62 = vcombine.high %v2850_v63, %v2854_v1  ;;  %v13791_v20 = vcombine.low %v2969_v60, %v2973_v58 }
 0x4ff   :  { %6371 = vmatpush2.bf16.msra.mxu1 %v13829_v36  ;;  %v4801_v36 = vpop.f32.mrf.mxu0 }
 0x500   :  { %6414 = vmatpush2.bf16.msra.mxu0 %v13703_v61  ;;  %6372 = vmatprep.subr.bf16.mxu1 %v13822_v30  ;;  %v13673_v30 = vcombine.low %v2850_v63, %v2854_v1 }
 0x501   :  { %6415 = vmatprep.subr.bf16.mxu0 %v13696_v8  ;;  %v13792_v8 = vcombine.high %v2969_v60, %v2973_v58  ;;  %v4803_v50 = vpop.f32.mrf.mxu0  ;;  %v2822_v60 = vld [vmem:[#allocation14 + $0xb8] sm:$0xff] }
 0x503   :  { %6373 = vmatpush2.bf16.msra.mxu1 %v13821_v11 }
 0x504   :  { %6416 = vmatpush2.bf16.msra.mxu0 %v13695_v46  ;;  %6374 = vmatprep.subr.bf16.mxu1 %v13814_v23  ;;  %v2834_v46 = vld [vmem:[#allocation14 + $0x118] sm:$0xff] }
 0x505   :  { %6417 = vmatprep.subr.bf16.mxu0 %v13688_v31  ;;  %v2838_v23 = vld [vmem:[#allocation14 + $0x138] sm:$0xff] }
 0x507   :  { %6375 = vmatpush2.bf16.msra.mxu1 %v13813_v15  ;;  %v13784_v15 = vcombine.high %v2961_v14, %v2965_v38  ;;  %v2929_v38 = vld [vmem:[#allocation14 + $0x410] sm:$0xff] }
 0x508   :  { %6418 = vmatpush2.bf16.msra.mxu0 %v13687_v12  ;;  %6430 = vmatprep.subr.bf16.mxu1 %v13808_v13  ;;  %v2953_v12 = vld [vmem:[#allocation14 + $0x4d0] sm:$0xff] }
 0x509   :  { %6473 = vmatprep.subr.bf16.mxu0 %v13682_v34  ;;  %v2957_v13 = vld [vmem:[#allocation14 + $0x4f0] sm:$0xff]  ;;  %v2826_v34 = vld [vmem:[#allocation14 + $0xd8] sm:$0xff] }
 0x50a   :  { %v4840_v47 = vpop.f32.mrf.mxu1  ;;  %6377 = vmatmul.mubr.bf16.vlgmr.msra.gmra.mxu1 %v16101_v2  ;;  %v13776_v63 = vcombine.high %v2953_v12, %v2957_v13  ;;  %v13650_v1 = vcombine.high %v2826_v34, %v2830_v44  ;;  %v13775_v58 = vcombine.low %v2953_v12, %v2957_v13  ;;  %v2922_v12 = vld [vmem:[#allocation14 + $0x3d8] sm:$0xff] }
 0x50b   :  { %v16172_v5 = vadd.f32 %v4840_v47, %v4797_v4  ;;  %6420 = vmatmul.mubr.bf16.vlgmr.msra.gmra.mxu0 %v16060_v7  ;;  %6431 = vmatpush1.bf16.msra.mxu1 %v13807_v0  ;;  %v13657_v0 = vcombine.low %v2834_v46, %v2838_v23  ;;  %v13649_v47 = vcombine.low %v2826_v34, %v2830_v44  ;;  %v2926_v13 = vld [vmem:[#allocation14 + $0x3f8] sm:$0xff] }
 0x50c   :  { %6462 = vmatprep.mubr.bf16.mxu1 %v16107_v6  ;;  %v4842_v61 = vpop.f32.mrf.mxu1  ;;  %6474 = vmatpush1.bf16.msra.mxu0 %v13681_v54  ;;  %v2949_v54 = vld [vmem:[#allocation14 + $0x4b0] sm:$0xff] }
 0x50d   :  { %v16176_v49 = vadd.f32 %v4842_v61, %v4799_v45  ;;  %6505 = vmatprep.mubr.bf16.mxu0 %v16066_v26  ;;  %6432 = vmatprep.subr.bf16.mxu1 %v13800_v24  ;;  %v13658_v26 = vcombine.high %v2834_v46, %v2838_v23  ;;  %v2945_v45 = vld [vmem:[#allocation14 + $0x490] sm:$0xff]  ;;  %v2818_v24 = vld [vmem:[#allocation14 + $0x98] sm:$0xff] }
 0x50e   :  { %v4844_v11 = vpop.f32.mrf.mxu1  ;;  %6475 = vmatprep.subr.bf16.mxu0 %v13674_v62  ;;  %v13768_v62 = vcombine.high %v2945_v45, %v2949_v54  ;;  %v13642_v3 = vcombine.high %v2818_v24, %v2822_v60  ;;  %v2814_v61 = vld [vmem:[#allocation14 + $0x78] sm:$0xff] }
 0x50f   :  { %v16179_v31 = vadd.f32 %v4844_v11, %v4801_v36  ;;  %6433 = vmatpush1.bf16.msra.mxu1 %v13799_v59  ;;  %v2941_v59 = vld [vmem:[#allocation14 + $0x470] sm:$0xff]  ;;  %v2810_v36 = vld [vmem:[#allocation14 + $0x58] sm:$0xff] }
 0x510   :  { %v4846_v32 = vpop.f32.mrf.mxu1  ;;  %6476 = vmatpush1.bf16.msra.mxu0 %v13673_v30  ;;  %6434 = vmatprep.subr.bf16.mxu1 %v13792_v8  ;;  %v13767_v30 = vcombine.low %v2945_v45, %v2949_v54  ;;  %v13641_v8 = vcombine.low %v2818_v24, %v2822_v60  ;;  %v13634_v14 = vcombine.high %v2810_v36, %v2814_v61  ;;  %v2933_v11 = vld [vmem:[#allocation14 + $0x430] sm:$0xff]  ;;  %v2802_v46 = vld [vmem:[#allocation14 + $0x18] sm:$0xff] }
 0x511   :  { %v16181_v4 = vadd.f32 %v4846_v32, %v4803_v50  ;;  %6477 = vmatprep.subr.bf16.mxu0 %v13666_v21  ;;  %v13760_v21 = vcombine.high %v2937_v51, %v2941_v59  ;;  %v2806_v23 = vld [vmem:[#allocation14 + $0x38] sm:$0xff]  ;;  %v13633_v50 = vcombine.low %v2810_v36, %v2814_v61  ;;  %v13752_v32 = vcombine.high %v2929_v38, %v2933_v11 }
 0x512   :  { %v13751_v34 = vcombine.low %v2929_v38, %v2933_v11  ;;  %v13625_v44 = vcombine.low %v2802_v46, %v2806_v23  ;;  %v2914_v45 = vld [vmem:[#allocation14 + $0x398] sm:$0xff]  ;;  %v13745_v60 = vcombine.low %v2922_v12, %v2926_v13 }
 0x513   :  { %6435 = vmatpush1.bf16.msra.mxu1 %v13791_v20  ;;  %v13759_v20 = vcombine.low %v2937_v51, %v2941_v59  ;;  %v2918_v54 = vld [vmem:[#allocation14 + $0x3b8] sm:$0xff] }
 0x514   :  { %6478 = vmatpush1.bf16.msra.mxu0 %v13665_v52  ;;  %6436 = vmatprep.subr.bf16.mxu1 %v13784_v15  ;;  %v13626_v52 = vcombine.high %v2802_v46, %v2806_v23  ;;  %v3049_v15 = vld [vmem:[#allocation14 + $0x7d0] sm:$0xff]  ;;  %v2906_v51 = vld [vmem:[#allocation14 + $0x358] sm:$0xff]  ;;  %v13737_v61 = vcombine.low %v2914_v45, %v2918_v54 }
 0x515   :  { %6479 = vmatprep.subr.bf16.mxu0 %v13658_v26  ;;  %v3053_v26 = vld [vmem:[#allocation14 + $0x7f0] sm:$0xff]  ;;  %v2910_v59 = vld [vmem:[#allocation14 + $0x378] sm:$0xff] }
 0x516   :  { %v13871_v24 = vcombine.low %v3049_v15, %v3053_v26  ;;  %v2898_v38 = vld [vmem:[#allocation14 + $0x318] sm:$0xff]  ;;  %v13729_v23 = vcombine.low %v2906_v51, %v2910_v59 }
 0x517   :  { %6437 = vmatpush1.bf16.msra.mxu1 %v13783_v25  ;;  %v13872_v25 = vcombine.high %v3049_v15, %v3053_v26  ;;  %v2902_v11 = vld [vmem:[#allocation14 + $0x338] sm:$0xff] }
 0x518   :  { %6480 = vmatpush1.bf16.msra.mxu0 %v13657_v0  ;;  %6438 = vmatprep.subr.bf16.mxu1 %v13776_v63  ;;  %v13746_v0 = vcombine.high %v2922_v12, %v2926_v13  ;;  %v3041_v63 = vld [vmem:[#allocation14 + $0x790] sm:$0xff]  ;;  %v2890_v15 = vld [vmem:[#allocation14 + $0x2d8] sm:$0xff]  ;;  %v13721_v13 = vcombine.low %v2898_v38, %v2902_v11 }
 0x519   :  { %6481 = vmatprep.subr.bf16.mxu0 %v13650_v1  ;;  %v3045_v1 = vld [vmem:[#allocation14 + $0x7b0] sm:$0xff]  ;;  %v2894_v26 = vld [vmem:[#allocation14 + $0x2f8] sm:$0xff] }
 0x51a   :  { %v13863_v36 = vcombine.low %v3041_v63, %v3045_v1 }
 0x51b   :  { %6439 = vmatpush1.bf16.msra.mxu1 %v13775_v58  ;;  %v13864_v58 = vcombine.high %v3041_v63, %v3045_v1  ;;  %v2882_v63 = vld [vmem:[#allocation14 + $0x298] sm:$0xff] }
 0x51c   :  { %6482 = vmatpush1.bf16.msra.mxu0 %v13649_v47  ;;  %6440 = vmatprep.subr.bf16.mxu1 %v13768_v62  ;;  %v13738_v47 = vcombine.high %v2914_v45, %v2918_v54  ;;  %v3033_v62 = vld [vmem:[#allocation14 + $0x750] sm:$0xff]  ;;  %v2886_v1 = vld [vmem:[#allocation14 + $0x2b8] sm:$0xff]  ;;  %v13713_v54 = vcombine.low %v2890_v15, %v2894_v26 }
 0x51d   :  { %6483 = vmatprep.subr.bf16.mxu0 %v13642_v3  ;;  %v3037_v3 = vld [vmem:[#allocation14 + $0x770] sm:$0xff] }
 0x51e   :  { %v13855_v46 = vcombine.low %v3033_v62, %v3037_v3 }
 0x51f   :  { %6441 = vmatpush1.bf16.msra.mxu1 %v13767_v30  ;;  %v13856_v30 = vcombine.high %v3033_v62, %v3037_v3  ;;  %v2874_v62 = vld [vmem:[#allocation14 + $0x258] sm:$0xff] }
 0x520   :  { %6484 = vmatpush1.bf16.msra.mxu0 %v13641_v8  ;;  %6442 = vmatprep.subr.bf16.mxu1 %v13760_v21  ;;  %v13730_v8 = vcombine.high %v2906_v51, %v2910_v59  ;;  %v3025_v21 = vld [vmem:[#allocation14 + $0x710] sm:$0xff]  ;;  %v2878_v3 = vld [vmem:[#allocation14 + $0x278] sm:$0xff]  ;;  %v13705_v59 = vcombine.low %v2882_v63, %v2886_v1 }
 0x521   :  { %6485 = vmatprep.subr.bf16.mxu0 %v13634_v14  ;;  %v3029_v14 = vld [vmem:[#allocation14 + $0x730] sm:$0xff] }
 0x522   :  { %v13847_v12 = vcombine.low %v3025_v21, %v3029_v14 }
 0x523   :  { %6443 = vmatpush1.bf16.msra.mxu1 %v13759_v20  ;;  %v13848_v20 = vcombine.high %v3025_v21, %v3029_v14  ;;  %v2866_v21 = vld [vmem:[#allocation14 + $0x218] sm:$0xff] }
 0x524   :  { %6486 = vmatpush1.bf16.msra.mxu0 %v13633_v50  ;;  %6444 = vmatprep.subr.bf16.mxu1 %v13752_v32  ;;  %v13722_v50 = vcombine.high %v2898_v38, %v2902_v11  ;;  %v3017_v32 = vld [vmem:[#allocation14 + $0x6d0] sm:$0xff]  ;;  %v2870_v14 = vld [vmem:[#allocation14 + $0x238] sm:$0xff]  ;;  %v13697_v11 = vcombine.low %v2874_v62, %v2878_v3 }
 0x525   :  { %6487 = vmatprep.subr.bf16.mxu0 %v13626_v52  ;;  %v3021_v52 = vld [vmem:[#allocation14 + $0x6f0] sm:$0xff] }
 0x526   :  { %v13839_v45 = vcombine.low %v3017_v32, %v3021_v52 }
 0x527   :  { %6445 = vmatpush1.bf16.msra.mxu1 %v13751_v34  ;;  %v13840_v34 = vcombine.high %v3017_v32, %v3021_v52  ;;  %v6615_v32 = vld [vmem:[#allocation17 + $0x1c0] sm:$0xff] }
 0x528   :  { %6488 = vmatpush1.bf16.msra.mxu0 %v13625_v44  ;;  %6446 = vmatprep.subr.bf16.mxu1 %v13872_v25  ;;  %v13714_v44 = vcombine.high %v2890_v15, %v2894_v26  ;;  %v3009_v25 = vld [vmem:[#allocation14 + $0x690] sm:$0xff]  ;;  %v6619_v52 = vld [vmem:[#allocation17 + $0x1e0] sm:$0xff]  ;;  %v4883_v26 = vpop.f32.mrf.mxu0 }
 0x529   :  { %6489 = vmatprep.subr.bf16.mxu0 %v13746_v0  ;;  %v3013_v0 = vld [vmem:[#allocation14 + $0x6b0] sm:$0xff] }
 0x52a   :  { %v13831_v51 = vcombine.low %v3009_v25, %v3013_v0 }
 0x52b   :  { %6447 = vmatpush2.bf16.msra.mxu1 %v13871_v24  ;;  %v13832_v24 = vcombine.high %v3009_v25, %v3013_v0  ;;  %v2982_v25 = vld [vmem:[#allocation14 + $0x5b8] sm:$0xff] }
 0x52c   :  { %6490 = vmatpush2.bf16.msra.mxu0 %v13745_v60  ;;  %6448 = vmatprep.subr.bf16.mxu1 %v13864_v58  ;;  %v13706_v60 = vcombine.high %v2882_v63, %v2886_v1  ;;  %v3001_v58 = vld [vmem:[#allocation14 + $0x650] sm:$0xff]  ;;  %v6607_v63 = vld [vmem:[#allocation17 + $0x180] sm:$0xff] }
 0x52d   :  { %6491 = vmatprep.subr.bf16.mxu0 %v13738_v47  ;;  %v3005_v47 = vld [vmem:[#allocation14 + $0x670] sm:$0xff]  ;;  %v6611_v1 = vld [vmem:[#allocation17 + $0x1a0] sm:$0xff] }
 0x52e   :  { %v13823_v38 = vcombine.low %v3001_v58, %v3005_v47 }
 0x52f   :  { %6449 = vmatpush2.bf16.msra.mxu1 %v13863_v36  ;;  %v13824_v36 = vcombine.high %v3001_v58, %v3005_v47  ;;  %v2974_v58 = vld [vmem:[#allocation14 + $0x578] sm:$0xff] }
 0x530   :  { %6492 = vmatpush2.bf16.msra.mxu0 %v13737_v61  ;;  %6450 = vmatprep.subr.bf16.mxu1 %v13856_v30  ;;  %v13698_v61 = vcombine.high %v2874_v62, %v2878_v3  ;;  %v2993_v30 = vld [vmem:[#allocation14 + $0x610] sm:$0xff]  ;;  %v13924_v62 = vcombine.high %v6607_v63, %v6611_v1  ;;  %v6599_v3 = vld [vmem:[#allocation17 + $0x140] sm:$0xff] }
 0x531   :  { %6493 = vmatprep.subr.bf16.mxu0 %v13730_v8  ;;  %v2997_v8 = vld [vmem:[#allocation14 + $0x630] sm:$0xff] }
 0x532   :  { %v13815_v15 = vcombine.low %v2993_v30, %v2997_v8 }
 0x533   :  { %6451 = vmatpush2.bf16.msra.mxu1 %v13855_v46  ;;  %v13816_v46 = vcombine.high %v2993_v30, %v2997_v8  ;;  %v13923_v8 = vcombine.low %v6607_v63, %v6611_v1 }
 0x534   :  { %6494 = vmatpush2.bf16.msra.mxu0 %v13729_v23  ;;  %6452 = vmatprep.subr.bf16.mxu1 %v13848_v20  ;;  %v13690_v23 = vcombine.high %v2866_v21, %v2870_v14  ;;  %v2986_v20 = vld [vmem:[#allocation14 + $0x5d8] sm:$0xff] }
 0x535   :  { %6495 = vmatprep.subr.bf16.mxu0 %v13722_v50  ;;  %v2990_v50 = vld [vmem:[#allocation14 + $0x5f8] sm:$0xff] }
 0x536   :  { %v13809_v0 = vcombine.low %v2986_v20, %v2990_v50 }
 0x537   :  { %6453 = vmatpush2.bf16.msra.mxu1 %v13847_v12  ;;  %v13689_v12 = vcombine.low %v2866_v21, %v2870_v14 }
 0x538   :  { %6496 = vmatpush2.bf16.msra.mxu0 %v13721_v13  ;;  %6454 = vmatprep.subr.bf16.mxu1 %v13840_v34  ;;  %v13810_v13 = vcombine.high %v2986_v20, %v2990_v50  ;;  %v13932_v34 = vcombine.high %v6615_v32, %v6619_v52  ;;  %v6595_v20 = vld [vmem:[#allocation17 + $0x120] sm:$0xff] }
 0x539   :  { %6497 = vmatprep.subr.bf16.mxu0 %v13714_v44  ;;  %v2978_v44 = vld [vmem:[#allocation14 + $0x598] sm:$0xff] }
 0x53b   :  { %6455 = vmatpush2.bf16.msra.mxu1 %v13839_v45  ;;  %v4885_v45 = vpop.f32.mrf.mxu0 }
 0x53c   :  { %6498 = vmatpush2.bf16.msra.mxu0 %v13713_v54  ;;  %6456 = vmatprep.subr.bf16.mxu1 %v13832_v24  ;;  %v13931_v54 = vcombine.low %v6615_v32, %v6619_v52  ;;  %v13802_v24 = vcombine.high %v2978_v44, %v2982_v25 }
 0x53d   :  { %6499 = vmatprep.subr.bf16.mxu0 %v13706_v60  ;;  %v2970_v60 = vld [vmem:[#allocation14 + $0x558] sm:$0xff] }
 0x53e   :  { %v13794_v21 = vcombine.high %v2970_v60, %v2974_v58 }
 0x53f   :  { %6457 = vmatpush2.bf16.msra.mxu1 %v13831_v51  ;;  %v6603_v51 = vld [vmem:[#allocation17 + $0x160] sm:$0xff] }
 0x540   :  { %6500 = vmatpush2.bf16.msra.mxu0 %v13705_v59  ;;  %6458 = vmatprep.subr.bf16.mxu1 %v13824_v36  ;;  %v13801_v36 = vcombine.low %v2978_v44, %v2982_v25  ;;  %v2958_v44 = vld [vmem:[#allocation14 + $0x4f8] sm:$0xff]  ;;  %v6583_v25 = vld [vmem:[#allocation17 + $0xc0] sm:$0xff] }
 0x541   :  { %6501 = vmatprep.subr.bf16.mxu0 %v13698_v61  ;;  %v4887_v61 = vpop.f32.mrf.mxu0 }
 0x543   :  { %6459 = vmatpush2.bf16.msra.mxu1 %v13823_v38  ;;  %v13916_v38 = vcombine.high %v6599_v3, %v6603_v51  ;;  %v4889_v32 = vpop.f32.mrf.mxu0 }
 0x544   :  { %6502 = vmatpush2.bf16.msra.mxu0 %v13697_v11  ;;  %6460 = vmatprep.subr.bf16.mxu1 %v13816_v46  ;;  %v2962_v11 = vld [vmem:[#allocation14 + $0x518] sm:$0xff] }
 0x545   :  { %6503 = vmatprep.subr.bf16.mxu0 %v13690_v23  ;;  %v2966_v46 = vld [vmem:[#allocation14 + $0x538] sm:$0xff] }
 0x546   :  { %v13785_v63 = vcombine.low %v2962_v11, %v2966_v46 }
 0x547   :  { %6461 = vmatpush2.bf16.msra.mxu1 %v13815_v15  ;;  %v13915_v15 = vcombine.low %v6599_v3, %v6603_v51 }
 0x548   :  { %6504 = vmatpush2.bf16.msra.mxu0 %v13689_v12  ;;  %6516 = vmatprep.subr.bf16.mxu1 %v13810_v13 }
 0x549   :  { %8095 = vmatprep.subr.bf16.mxu0 %v13932_v34  ;;  %v2954_v34 = vld [vmem:[#allocation14 + $0x4d8] sm:$0xff] }
 0x54a   :  { %v4926_v47 = vpop.f32.mrf.mxu1  ;;  %6463 = vmatmul.mubr.bf16.vlgmr.msra.gmra.mxu1 %v16101_v2 }
 0x54b   :  { %v16184_v59 = vadd.f32 %v4926_v47, %v4883_v26  ;;  %6506 = vmatmul.mubr.bf16.vlgmr.msra.gmra.mxu0 %v16060_v7  ;;  %6517 = vmatpush1.bf16.msra.mxu1 %v13809_v0  ;;  %v6591_v7 = vld [vmem:[#allocation17 + $0x100] sm:$0xff]  ;;  %v13786_v26 = vcombine.high %v2962_v11, %v2966_v46 }
 0x54c   :  { %6548 = vmatprep.mubr.bf16.mxu1 %v16107_v6  ;;  %v4928_v30 = vpop.f32.mrf.mxu1  ;;  %8096 = vmatpush1.bf16.msra.mxu0 %v13931_v54  ;;  %v13793_v6 = vcombine.low %v2970_v60, %v2974_v58  ;;  %v13908_v13 = vcombine.high %v6591_v7, %v6595_v20  ;;  %v6587_v0 = vld [vmem:[#allocation17 + $0xe0] sm:$0xff]  ;;  %v13907_v1 = vcombine.low %v6591_v7, %v6595_v20  ;;  %v2950_v60 = vld [vmem:[#allocation14 + $0x4b8] sm:$0xff] }
 0x54d   :  { %v16188_v14 = vadd.f32 %v4928_v30, %v4885_v45  ;;  %8127 = vmatprep.mubr.bf16.mxu0 %v16095_v28  ;;  %6518 = vmatprep.subr.bf16.mxu1 %v13802_v24  ;;  %v13778_v45 = vcombine.high %v2954_v34, %v2958_v44  ;;  %v13900_v54 = vcombine.high %v6583_v25, %v6587_v0  ;;  %v2946_v24 = vld [vmem:[#allocation14 + $0x498] sm:$0xff]  ;;  %v6575_v58 = vld [vmem:[#allocation17 + $0x80] sm:$0xff] }
 0x54e   :  { %v4930_v23 = vpop.f32.mrf.mxu1  ;;  %8097 = vmatprep.subr.bf16.mxu0 %v13924_v62  ;;  %v6579_v47 = vld [vmem:[#allocation17 + $0xa0] sm:$0xff]  ;;  %v13777_v62 = vcombine.low %v2954_v34, %v2958_v44  ;;  %v13899_v3 = vcombine.low %v6583_v25, %v6587_v0  ;;  %v13770_v51 = vcombine.high %v2946_v24, %v2950_v60  ;;  %v2942_v30 = vld [vmem:[#allocation14 + $0x478] sm:$0xff] }
 0x54f   :  { %v16191_v50 = vadd.f32 %v4930_v23, %v4887_v61  ;;  %6519 = vmatpush1.bf16.msra.mxu1 %v13801_v36  ;;  %v13892_v36 = vcombine.high %v6575_v58, %v6579_v47  ;;  %v2938_v61 = vld [vmem:[#allocation14 + $0x458] sm:$0xff]  ;;  %v13891_v11 = vcombine.low %v6575_v58, %v6579_v47  ;;  %v6679_v25 = vld [vmem:[#allocation17 + $0x3c0] sm:$0xff] }
 0x550   :  { %v4932_v52 = vpop.f32.mrf.mxu1  ;;  %8098 = vmatpush1.bf16.msra.mxu0 %v13923_v8  ;;  %6520 = vmatprep.subr.bf16.mxu1 %v13794_v21  ;;  %v6567_v8 = vld [vmem:[#allocation17 + $0x40] sm:$0xff]  ;;  %v13762_v46 = vcombine.high %v2938_v61, %v2942_v30  ;;  %v2930_v7 = vld [vmem:[#allocation14 + $0x418] sm:$0xff] }
 0x551   :  { %v16193_v12 = vadd.f32 %v4932_v52, %v4889_v32  ;;  %8099 = vmatprep.subr.bf16.mxu0 %v13916_v38  ;;  %v6571_v21 = vld [vmem:[#allocation17 + $0x60] sm:$0xff]  ;;  %v13769_v38 = vcombine.low %v2946_v24, %v2950_v60  ;;  %v2934_v20 = vld [vmem:[#allocation14 + $0x438] sm:$0xff]  ;;  %v13761_v52 = vcombine.low %v2938_v61, %v2942_v30 }
 0x552   :  { %v13884_v23 = vcombine.high %v6567_v8, %v6571_v21  ;;  %v6563_v32 = vld [vmem:[#allocation17 + $0x20] sm:$0xff]  ;;  %v3050_v34 = vld [vmem:[#allocation14 + $0x7d8] sm:$0xff] }
 0x553   :  { %6521 = vmatpush1.bf16.msra.mxu1 %v13793_v6  ;;  %v6559_v6 = vld [vmem:[#allocation17] sm:$0xff]  ;;  %v3054_v44 = vld [vmem:[#allocation14 + $0x7f8] sm:$0xff] }
 0x554   :  { %8100 = vmatpush1.bf16.msra.mxu0 %v13915_v15  ;;  %6522 = vmatprep.subr.bf16.mxu1 %v13786_v26  ;;  %v13883_v15 = vcombine.low %v6567_v8, %v6571_v21  ;;  %v13754_v26 = vcombine.high %v2930_v7, %v2934_v20  ;;  %v6683_v0 = vld [vmem:[#allocation17 + $0x3e0] sm:$0xff]  ;;  %v3042_v24 = vld [vmem:[#allocation14 + $0x798] sm:$0xff] }
 0x555   :  { %8101 = vmatprep.subr.bf16.mxu0 %v13908_v13  ;;  %v13876_v13 = vcombine.high %v6559_v6, %v6563_v32  ;;  %v3046_v60 = vld [vmem:[#allocation14 + $0x7b8] sm:$0xff]  ;;  %v6671_v58 = vld [vmem:[#allocation17 + $0x380] sm:$0xff] }
 0x556   :  { %v6675_v47 = vld [vmem:[#allocation17 + $0x3a0] sm:$0xff]  ;;  %v3034_v61 = vld [vmem:[#allocation14 + $0x758] sm:$0xff] }
 0x557   :  { %6523 = vmatpush1.bf16.msra.mxu1 %v13785_v63  ;;  %v13753_v63 = vcombine.low %v2930_v7, %v2934_v20  ;;  %v3038_v30 = vld [vmem:[#allocation14 + $0x778] sm:$0xff]  ;;  %v6663_v8 = vld [vmem:[#allocation17 + $0x340] sm:$0xff] }
 0x558   :  { %8102 = vmatpush1.bf16.msra.mxu0 %v13907_v1  ;;  %6524 = vmatprep.subr.bf16.mxu1 %v13778_v45  ;;  %v13875_v1 = vcombine.low %v6559_v6, %v6563_v32  ;;  %v13874_v45 = vcombine.high %v3050_v34, %v3054_v44  ;;  %v6667_v21 = vld [vmem:[#allocation17 + $0x360] sm:$0xff]  ;;  %v3026_v7 = vld [vmem:[#allocation14 + $0x718] sm:$0xff] }
 0x559   :  { %8103 = vmatprep.subr.bf16.mxu0 %v13900_v54  ;;  %v13996_v54 = vcombine.high %v6679_v25, %v6683_v0  ;;  %v3030_v20 = vld [vmem:[#allocation14 + $0x738] sm:$0xff]  ;;  %v6655_v6 = vld [vmem:[#allocation17 + $0x300] sm:$0xff] }
 0x55a   :  { %v6659_v32 = vld [vmem:[#allocation17 + $0x320] sm:$0xff] }
 0x55b   :  { %6525 = vmatpush1.bf16.msra.mxu1 %v13777_v62  ;;  %v13873_v62 = vcombine.low %v3050_v34, %v3054_v44  ;;  %v3018_v34 = vld [vmem:[#allocation14 + $0x6d8] sm:$0xff] }
 0x55c   :  { %8104 = vmatpush1.bf16.msra.mxu0 %v13899_v3  ;;  %6526 = vmatprep.subr.bf16.mxu1 %v13770_v51  ;;  %v13995_v3 = vcombine.low %v6679_v25, %v6683_v0  ;;  %v13866_v51 = vcombine.high %v3042_v24, %v3046_v60  ;;  %v3022_v44 = vld [vmem:[#allocation14 + $0x6f8] sm:$0xff]  ;;  %v6647_v25 = vld [vmem:[#allocation17 + $0x2c0] sm:$0xff] }
 0x55d   :  { %8105 = vmatprep.subr.bf16.mxu0 %v13892_v36  ;;  %v13988_v36 = vcombine.high %v6671_v58, %v6675_v47  ;;  %v6651_v0 = vld [vmem:[#allocation17 + $0x2e0] sm:$0xff] }
 0x55f   :  { %6527 = vmatpush1.bf16.msra.mxu1 %v13769_v38  ;;  %v13865_v38 = vcombine.low %v3042_v24, %v3046_v60  ;;  %v3010_v24 = vld [vmem:[#allocation14 + $0x698] sm:$0xff] }
 0x560   :  { %8106 = vmatpush1.bf16.msra.mxu0 %v13891_v11  ;;  %6528 = vmatprep.subr.bf16.mxu1 %v13762_v46  ;;  %v13987_v11 = vcombine.low %v6671_v58, %v6675_v47  ;;  %v13858_v46 = vcombine.high %v3034_v61, %v3038_v30  ;;  %v3014_v60 = vld [vmem:[#allocation14 + $0x6b8] sm:$0xff]  ;;  %v6639_v58 = vld [vmem:[#allocation17 + $0x280] sm:$0xff] }
 0x561   :  { %8107 = vmatprep.subr.bf16.mxu0 %v13884_v23  ;;  %v13980_v23 = vcombine.high %v6663_v8, %v6667_v21  ;;  %v6643_v47 = vld [vmem:[#allocation17 + $0x2a0] sm:$0xff] }
 0x563   :  { %6529 = vmatpush1.bf16.msra.mxu1 %v13761_v52  ;;  %v13857_v52 = vcombine.low %v3034_v61, %v3038_v30  ;;  %v3002_v61 = vld [vmem:[#allocation14 + $0x658] sm:$0xff] }
 0x564   :  { %8108 = vmatpush1.bf16.msra.mxu0 %v13883_v15  ;;  %6530 = vmatprep.subr.bf16.mxu1 %v13754_v26  ;;  %v13979_v15 = vcombine.low %v6663_v8, %v6667_v21  ;;  %v13850_v26 = vcombine.high %v3026_v7, %v3030_v20  ;;  %v3006_v30 = vld [vmem:[#allocation14 + $0x678] sm:$0xff]  ;;  %v6631_v8 = vld [vmem:[#allocation17 + $0x240] sm:$0xff] }
 0x565   :  { %8109 = vmatprep.subr.bf16.mxu0 %v13876_v13  ;;  %v13972_v13 = vcombine.high %v6655_v6, %v6659_v32  ;;  %v6635_v21 = vld [vmem:[#allocation17 + $0x260] sm:$0xff] }
 0x567   :  { %6531 = vmatpush1.bf16.msra.mxu1 %v13753_v63  ;;  %v13849_v63 = vcombine.low %v3026_v7, %v3030_v20  ;;  %v13948_v7 = vcombine.high %v6631_v8, %v6635_v21  ;;  %v2994_v20 = vld [vmem:[#allocation14 + $0x618] sm:$0xff] }
 0x568   :  { %8110 = vmatpush1.bf16.msra.mxu0 %v13875_v1  ;;  %6532 = vmatprep.subr.bf16.mxu1 %v13874_v45  ;;  %v13971_v1 = vcombine.low %v6655_v6, %v6659_v32  ;;  %v13842_v45 = vcombine.high %v3018_v34, %v3022_v44  ;;  %v2998_v6 = vld [vmem:[#allocation14 + $0x638] sm:$0xff]  ;;  %v6623_v32 = vld [vmem:[#allocation17 + $0x200] sm:$0xff] }
 0x569   :  { %8111 = vmatprep.subr.bf16.mxu0 %v13996_v54  ;;  %v13964_v54 = vcombine.high %v6647_v25, %v6651_v0 }
 0x56b   :  { %6533 = vmatpush2.bf16.msra.mxu1 %v13873_v62  ;;  %v13841_v62 = vcombine.low %v3018_v34, %v3022_v44  ;;  %v13818_v34 = vcombine.high %v2994_v20, %v2998_v6 }
 0x56c   :  { %8112 = vmatpush2.bf16.msra.mxu0 %v13995_v3  ;;  %6534 = vmatprep.subr.bf16.mxu1 %v13866_v51  ;;  %v13963_v3 = vcombine.low %v6647_v25, %v6651_v0  ;;  %v13834_v51 = vcombine.high %v3010_v24, %v3014_v60  ;;  %v6743_v0 = vld [vmem:[#allocation17 + $0x5c0] sm:$0xff] }
 0x56d   :  { %8113 = vmatprep.subr.bf16.mxu0 %v13988_v36  ;;  %v13956_v36 = vcombine.high %v6639_v58, %v6643_v47 }
 0x56f   :  { %6535 = vmatpush2.bf16.msra.mxu1 %v13865_v38  ;;  %v13833_v38 = vcombine.low %v3010_v24, %v3014_v60  ;;  %v6620_v24 = vld [vmem:[#allocation17 + $0x1e8] sm:$0xff]  ;;  %v13817_v60 = vcombine.low %v2994_v20, %v2998_v6 }
 0x570   :  { %8114 = vmatpush2.bf16.msra.mxu0 %v13987_v11  ;;  %6536 = vmatprep.subr.bf16.mxu1 %v13858_v46  ;;  %v13955_v11 = vcombine.low %v6639_v58, %v6643_v47  ;;  %v13826_v46 = vcombine.high %v3002_v61, %v3006_v30  ;;  %v6600_v20 = vld [vmem:[#allocation17 + $0x148] sm:$0xff] }
 0x571   :  { %8115 = vmatprep.subr.bf16.mxu0 %v13980_v23  ;;  %v16195_v23 = vpop.f32.mrf.mxu0  ;;  %v6604_v6 = vld [vmem:[#allocation17 + $0x168] sm:$0xff] }
 0x573   :  { %6537 = vmatpush2.bf16.msra.mxu1 %v13857_v52  ;;  %v6627_v52 = vld [vmem:[#allocation17 + $0x220] sm:$0xff]  ;;  %v16199_v44 = vpop.f32.mrf.mxu0 }
 0x574   :  { %8116 = vmatpush2.bf16.msra.mxu0 %v13979_v15  ;;  %6538 = vmatprep.subr.bf16.mxu1 %v13850_v26  ;;  %v13825_v15 = vcombine.low %v3002_v61, %v3006_v30  ;;  %v2698_v26 = vadd.f32 %v16139_v53, %v16044_v17  ;;  %v13940_v25 = vcombine.high %v6623_v32, %v6627_v52  ;;  %v6739_v61 = vld [vmem:[#allocation17 + $0x5a0] sm:$0xff] }
 0x575   :  { %8117 = vmatprep.subr.bf16.mxu0 %v13972_v13  ;;  %v13947_v13 = vcombine.low %v6631_v8, %v6635_v21  ;;  %v13939_v58 = vcombine.low %v6623_v32, %v6627_v52 }
 0x577   :  { %6539 = vmatpush2.bf16.msra.mxu1 %v13849_v63  ;;  %v6747_v63 = vld [vmem:[#allocation17 + $0x5e0] sm:$0xff] }
 0x578   :  { %8118 = vmatpush2.bf16.msra.mxu0 %v13971_v1  ;;  %6540 = vmatprep.subr.bf16.mxu1 %v13842_v45  ;;  %v2694_v1 = vadd.f32 %v16077_v33, %v16044_v17  ;;  %v2761_v45 = vadd.f32 %v16141_v27, %v2698_v26  ;;  %v14060_v47 = vcombine.high %v6743_v0, %v6747_v63  ;;  %v6608_v33 = vld [vmem:[#allocation17 + $0x188] sm:$0xff] }
 0x579   :  { %8119 = vmatprep.subr.bf16.mxu0 %v13964_v54  ;;  %v6616_v54 = vld [vmem:[#allocation17 + $0x1c8] sm:$0xff]  ;;  %v14059_v17 = vcombine.low %v6743_v0, %v6747_v63  ;;  %v6723_v0 = vld [vmem:[#allocation17 + $0x520] sm:$0xff] }
 0x57a   :  { %v2757_v53 = vadd.f32 %v16114_v9, %v2694_v1  ;;  %v6612_v27 = vld [vmem:[#allocation17 + $0x1a8] sm:$0xff]  ;;  %v13933_v8 = vcombine.low %v6616_v54, %v6620_v24 }
 0x57b   :  { %6541 = vmatpush2.bf16.msra.mxu1 %v13841_v62  ;;  %v16205_v62 = vpop.f32.mrf.mxu0  ;;  %v13925_v26 = vcombine.low %v6608_v33, %v6612_v27  ;;  %v6592_v1 = vld [vmem:[#allocation17 + $0x108] sm:$0xff] }
 0x57c   :  { %8120 = vmatpush2.bf16.msra.mxu0 %v13963_v3  ;;  %6542 = vmatprep.subr.bf16.mxu1 %v13834_v51  ;;  %v13934_v3 = vcombine.high %v6616_v54, %v6620_v24  ;;  %v2786_v51 = vmax.f32 %v2761_v45, 0.0  ;;  %v2782_v30 = vmax.f32 %v2757_v53, 0.0  ;;  %v6596_v45 = vld [vmem:[#allocation17 + $0x128] sm:$0xff] }
 0x57d   :  { %8121 = vmatprep.subr.bf16.mxu0 %v13956_v36  ;;  %v6735_v36 = vld [vmem:[#allocation17 + $0x580] sm:$0xff]  ;;  %v16207_v9 = vpop.f32.mrf.mxu0 }
 0x57e   :  { %v14052_v21 = vcombine.high %v6735_v36, %v6739_v61  ;;  %v14051_v52 = vcombine.low %v6735_v36, %v6739_v61  ;;  %v6584_v36 = vld [vmem:[#allocation17 + $0xc8] sm:$0xff] }
 0x57f   :  { %6543 = vmatpush2.bf16.msra.mxu1 %v13833_v38  ;;  %v6727_v38 = vld [vmem:[#allocation17 + $0x540] sm:$0xff]  ;;  %v6588_v61 = vld [vmem:[#allocation17 + $0xe8] sm:$0xff] }
 0x580   :  { %8122 = vmatpush2.bf16.msra.mxu0 %v13955_v11  ;;  %6544 = vmatprep.subr.bf16.mxu1 %v13826_v46  ;;  %v6731_v11 = vld [vmem:[#allocation17 + $0x560] sm:$0xff]  ;;  %v16209_v46 = vpack.c.bf16 %v2786_v51, %v2782_v30 }
 0x581   :  { %8123 = vmatprep.subr.bf16.mxu0 %v13948_v7  ;;  %v13926_v7 = vcombine.high %v6608_v33, %v6612_v27  ;;  %v14043_v54 = vcombine.low %v6727_v38, %v6731_v11  ;;  %v6715_v51 = vld [vmem:[#allocation17 + $0x4e0] sm:$0xff]  ;;  %v13902_v27 = vcombine.high %v6584_v36, %v6588_v61 }
 0x582   :  { %v6703_v30 = vld [vmem:[#allocation17 + $0x480] sm:$0xff] }
 0x583   :  { %6545 = vmatpush2.bf16.msra.mxu1 %v13825_v15 }
 0x584   :  { %8124 = vmatpush2.bf16.msra.mxu0 %v13947_v13  ;;  %6546 = vmatprep.subr.bf16.mxu1 %v13818_v34  ;;  %v14044_v13 = vcombine.high %v6727_v38, %v6731_v11  ;;  %v6580_v38 = vld [vmem:[#allocation17 + $0xa8] sm:$0xff] }
 0x585   :  { %8125 = vmatprep.subr.bf16.mxu0 %v13940_v25  ;;  %v6719_v25 = vld [vmem:[#allocation17 + $0x500] sm:$0xff] }
 0x586   :  { %v14036_v53 = vcombine.high %v6719_v25, %v6723_v0 }
 0x587   :  { %6547 = vmatpush2.bf16.msra.mxu1 %v13817_v60  ;;  %v13917_v60 = vcombine.low %v6600_v20, %v6604_v6 }
 0x588   :  { %8126 = vmatpush2.bf16.msra.mxu0 %v13939_v58  ;;  %8138 = vmatprep.subr.bf16.mxu1 %v14060_v47  ;;  %v13910_v47 = vcombine.high %v6592_v1, %v6596_v45 }
 0x589   :  { %8181 = vmatprep.subr.bf16.mxu0 %v13934_v3  ;;  %v6711_v3 = vld [vmem:[#allocation17 + $0x4c0] sm:$0xff] }
 0x58a   :  { %6549 = vmatmul.mubr.bf16.vlgmr.msra.gmra.mxu1 %v16101_v2  ;;  %v13918_v2 = vcombine.high %v6600_v20, %v6604_v6  ;;  %v14028_v33 = vcombine.high %v6711_v3, %v6715_v51  ;;  %v14027_v11 = vcombine.low %v6711_v3, %v6715_v51  ;;  %v6695_v6 = vld [vmem:[#allocation17 + $0x440] sm:$0xff]  ;;  %v6680_v51 = vld [vmem:[#allocation17 + $0x3c8] sm:$0xff] }
 0x58b   :  { %v6335_v32 = vpop.f32.mrf.mxu0  ;;  %8128 = vmatmul.mubr.bf16.vlgmr.msra.gmra.mxu0 %v16093_v35  ;;  %8139 = vmatpush1.bf16.msra.mxu1 %v14059_v17  ;;  %v14035_v17 = vcombine.low %v6719_v25, %v6723_v0  ;;  %v6687_v0 = vld [vmem:[#allocation17 + $0x400] sm:$0xff] }
 0x58c   :  { %v16214_v15 = vadd.f32 %v6335_v32, %v16160_v19  ;;  %8170 = vmatprep.mubr.bf16.mxu1 %v16209_v46  ;;  %8182 = vmatpush1.bf16.msra.mxu0 %v13933_v8  ;;  %v6707_v8 = vld [vmem:[#allocation17 + $0x4a0] sm:$0xff] }
 0x58d   :  { %8213 = vmatprep.mubr.bf16.mxu0 %v16095_v28  ;;  %v6337_v34 = vpop.f32.mrf.mxu0  ;;  %8140 = vmatprep.subr.bf16.mxu1 %v14052_v21  ;;  %v6576_v21 = vld [vmem:[#allocation17 + $0x88] sm:$0xff]  ;;  %v6699_v32 = vld [vmem:[#allocation17 + $0x460] sm:$0xff] }
 0x58e   :  { %v16219_v63 = vadd.f32 %v6337_v34, %v16164_v16  ;;  %8183 = vmatprep.subr.bf16.mxu0 %v13926_v7  ;;  %v14020_v7 = vcombine.high %v6703_v30, %v6707_v8  ;;  %v13894_v20 = vcombine.high %v6576_v21, %v6580_v38  ;;  %v13893_v34 = vcombine.low %v6576_v21, %v6580_v38  ;;  %v6811_v3 = vld [vmem:[#allocation17 + $0x7e0] sm:$0xff]  ;;  %v6676_v21 = vld [vmem:[#allocation17 + $0x3a8] sm:$0xff] }
 0x58f   :  { %v6339_v19 = vpop.f32.mrf.mxu0  ;;  %8141 = vmatpush1.bf16.msra.mxu1 %v14051_v52  ;;  %v6568_v52 = vld [vmem:[#allocation17 + $0x48] sm:$0xff] }
 0x590   :  { %v16222_v24 = vadd.f32 %v6339_v19, %v16167_v56  ;;  %8184 = vmatpush1.bf16.msra.mxu0 %v13925_v26  ;;  %8142 = vmatprep.subr.bf16.mxu1 %v14044_v13  ;;  %v13909_v56 = vcombine.low %v6592_v1, %v6596_v45  ;;  %v6572_v26 = vld [vmem:[#allocation17 + $0x68] sm:$0xff]  ;;  %v14019_v13 = vcombine.low %v6703_v30, %v6707_v8  ;;  %v6691_v1 = vld [vmem:[#allocation17 + $0x420] sm:$0xff] }
 0x591   :  { %v6341_v58 = vpop.f32.mrf.mxu0  ;;  %8185 = vmatprep.subr.bf16.mxu0 %v13918_v2  ;;  %v14012_v2 = vcombine.high %v6695_v6, %v6699_v32  ;;  %v13886_v25 = vcombine.high %v6568_v52, %v6572_v26  ;;  %v6560_v45 = vld [vmem:[#allocation17 + $0x8] sm:$0xff]  ;;  %v6803_v30 = vld [vmem:[#allocation17 + $0x7a0] sm:$0xff] }
 0x592   :  { %v16225_v16 = vadd.f32 %v6341_v58, %v16169_v57  ;;  %v13901_v57 = vcombine.low %v6584_v36, %v6588_v61  ;;  %v6564_v19 = vld [vmem:[#allocation17 + $0x28] sm:$0xff]  ;;  %v14003_v61 = vcombine.low %v6687_v0, %v6691_v1 }
 0x593   :  { %8143 = vmatpush1.bf16.msra.mxu1 %v14043_v54  ;;  %v14011_v54 = vcombine.low %v6695_v6, %v6699_v32  ;;  %v13878_v58 = vcombine.high %v6560_v45, %v6564_v19  ;;  %v6684_v36 = vld [vmem:[#allocation17 + $0x3e8] sm:$0xff]  ;;  %v6795_v6 = vld [vmem:[#allocation17 + $0x760] sm:$0xff] }
 0x594   :  { %8186 = vmatpush1.bf16.msra.mxu0 %v13917_v60  ;;  %8144 = vmatprep.subr.bf16.mxu1 %v14036_v53  ;;  %v13885_v60 = vcombine.low %v6568_v52, %v6572_v26  ;;  %v14004_v53 = vcombine.high %v6687_v0, %v6691_v1  ;;  %v6672_v8 = vld [vmem:[#allocation17 + $0x388] sm:$0xff]  ;;  %v6787_v0 = vld [vmem:[#allocation17 + $0x720] sm:$0xff] }
 0x595   :  { %8187 = vmatprep.subr.bf16.mxu0 %v13910_v47  ;;  %v6807_v47 = vld [vmem:[#allocation17 + $0x7c0] sm:$0xff]  ;;  %v6664_v32 = vld [vmem:[#allocation17 + $0x348] sm:$0xff] }
 0x596   :  { %v14123_v38 = vcombine.low %v6807_v47, %v6811_v3  ;;  %v6668_v52 = vld [vmem:[#allocation17 + $0x368] sm:$0xff] }
 0x597   :  { %8145 = vmatpush1.bf16.msra.mxu1 %v14035_v17  ;;  %v13877_v17 = vcombine.low %v6560_v45, %v6564_v19  ;;  %v6656_v1 = vld [vmem:[#allocation17 + $0x308] sm:$0xff] }
 0x598   :  { %8188 = vmatpush1.bf16.msra.mxu0 %v13909_v56  ;;  %8146 = vmatprep.subr.bf16.mxu1 %v14028_v33  ;;  %v14124_v56 = vcombine.high %v6807_v47, %v6811_v3  ;;  %v13998_v33 = vcombine.high %v6680_v51, %v6684_v36  ;;  %v6660_v45 = vld [vmem:[#allocation17 + $0x328] sm:$0xff]  ;;  %v6779_v47 = vld [vmem:[#allocation17 + $0x6e0] sm:$0xff] }
 0x599   :  { %8189 = vmatprep.subr.bf16.mxu0 %v13902_v27  ;;  %v6799_v27 = vld [vmem:[#allocation17 + $0x780] sm:$0xff]  ;;  %v6648_v3 = vld [vmem:[#allocation17 + $0x2c8] sm:$0xff] }
 0x59a   :  { %v14115_v26 = vcombine.low %v6799_v27, %v6803_v30 }
 0x59b   :  { %8147 = vmatpush1.bf16.msra.mxu1 %v14027_v11  ;;  %v13997_v11 = vcombine.low %v6680_v51, %v6684_v36  ;;  %v6652_v51 = vld [vmem:[#allocation17 + $0x2e8] sm:$0xff] }
 0x59c   :  { %8190 = vmatpush1.bf16.msra.mxu0 %v13901_v57  ;;  %8148 = vmatprep.subr.bf16.mxu1 %v14020_v7  ;;  %v14116_v57 = vcombine.high %v6799_v27, %v6803_v30  ;;  %v13990_v7 = vcombine.high %v6672_v8, %v6676_v21  ;;  %v6771_v27 = vld [vmem:[#allocation17 + $0x6a0] sm:$0xff]  ;;  %v6640_v30 = vld [vmem:[#allocation17 + $0x288] sm:$0xff] }
 0x59d   :  { %8191 = vmatprep.subr.bf16.mxu0 %v13894_v20  ;;  %v6791_v20 = vld [vmem:[#allocation17 + $0x740] sm:$0xff] }
 0x59e   :  { %v14107_v19 = vcombine.low %v6791_v20, %v6795_v6 }
 0x59f   :  { %8149 = vmatpush1.bf16.msra.mxu1 %v14019_v13  ;;  %v13989_v13 = vcombine.low %v6672_v8, %v6676_v21  ;;  %v6644_v8 = vld [vmem:[#allocation17 + $0x2a8] sm:$0xff] }
 0x5a0   :  { %8192 = vmatpush1.bf16.msra.mxu0 %v13893_v34  ;;  %8150 = vmatprep.subr.bf16.mxu1 %v14012_v2  ;;  %v14108_v34 = vcombine.high %v6791_v20, %v6795_v6  ;;  %v13982_v2 = vcombine.high %v6664_v32, %v6668_v52  ;;  %v6763_v20 = vld [vmem:[#allocation17 + $0x660] sm:$0xff]  ;;  %v6632_v6 = vld [vmem:[#allocation17 + $0x248] sm:$0xff] }
 0x5a1   :  { %8193 = vmatprep.subr.bf16.mxu0 %v13886_v25  ;;  %v6783_v25 = vld [vmem:[#allocation17 + $0x700] sm:$0xff] }
 0x5a2   :  { %v14099_v36 = vcombine.low %v6783_v25, %v6787_v0 }
 0x5a3   :  { %8151 = vmatpush1.bf16.msra.mxu1 %v14011_v54  ;;  %v13981_v54 = vcombine.low %v6664_v32, %v6668_v52  ;;  %v6636_v32 = vld [vmem:[#allocation17 + $0x268] sm:$0xff] }
 0x5a4   :  { %8194 = vmatpush1.bf16.msra.mxu0 %v13885_v60  ;;  %8152 = vmatprep.subr.bf16.mxu1 %v14004_v53  ;;  %v14100_v60 = vcombine.high %v6783_v25, %v6787_v0  ;;  %v13974_v53 = vcombine.high %v6656_v1, %v6660_v45  ;;  %v6751_v25 = vld [vmem:[#allocation17 + $0x600] sm:$0xff] }
 0x5a5   :  { %8195 = vmatprep.subr.bf16.mxu0 %v13878_v58  ;;  %v6775_v58 = vld [vmem:[#allocation17 + $0x6c0] sm:$0xff] }
 0x5a6   :  { %v14091_v21 = vcombine.low %v6775_v58, %v6779_v47  ;;  %v6755_v0 = vld [vmem:[#allocation17 + $0x620] sm:$0xff] }
 0x5a7   :  { %8153 = vmatpush1.bf16.msra.mxu1 %v14003_v61  ;;  %v13973_v61 = vcombine.low %v6656_v1, %v6660_v45  ;;  %v6624_v1 = vld [vmem:[#allocation17 + $0x208] sm:$0xff] }
 0x5a8   :  { %8196 = vmatpush1.bf16.msra.mxu0 %v13877_v17  ;;  %8154 = vmatprep.subr.bf16.mxu1 %v14124_v56  ;;  %v14092_v17 = vcombine.high %v6775_v58, %v6779_v47  ;;  %v13966_v56 = vcombine.high %v6648_v3, %v6652_v51  ;;  %v6628_v45 = vld [vmem:[#allocation17 + $0x228] sm:$0xff] }
 0x5a9   :  { %8197 = vmatprep.subr.bf16.mxu0 %v13998_v33  ;;  %v6767_v33 = vld [vmem:[#allocation17 + $0x680] sm:$0xff]  ;;  %v13942_v58 = vcombine.high %v6624_v1, %v6628_v45  ;;  %v6744_v47 = vld [vmem:[#allocation17 + $0x5c8] sm:$0xff] }
 0x5aa   :  { %v14083_v52 = vcombine.low %v6767_v33, %v6771_v27 }
 0x5ab   :  { %8155 = vmatpush2.bf16.msra.mxu1 %v14123_v38  ;;  %v13965_v38 = vcombine.low %v6648_v3, %v6652_v51  ;;  %v6748_v3 = vld [vmem:[#allocation17 + $0x5e8] sm:$0xff]  ;;  %v6617_v51 = vld [vmem:[#allocation17 + $0x1d0] sm:$0xff] }
 0x5ac   :  { %8198 = vmatpush2.bf16.msra.mxu0 %v13997_v11  ;;  %8156 = vmatprep.subr.bf16.mxu1 %v14116_v57  ;;  %v14084_v11 = vcombine.high %v6767_v33, %v6771_v27  ;;  %v13958_v57 = vcombine.high %v6640_v30, %v6644_v8  ;;  %v14062_v33 = vcombine.high %v6744_v47, %v6748_v3 }
 0x5ad   :  { %8199 = vmatprep.subr.bf16.mxu0 %v13990_v7  ;;  %v6759_v7 = vld [vmem:[#allocation17 + $0x640] sm:$0xff] }
 0x5af   :  { %8157 = vmatpush2.bf16.msra.mxu1 %v14115_v26  ;;  %v16227_v26 = vpop.f32.mrf.mxu1 }
 0x5b0   :  { %8200 = vmatpush2.bf16.msra.mxu0 %v13989_v13  ;;  %8158 = vmatprep.subr.bf16.mxu1 %v14108_v34  ;;  %v13957_v13 = vcombine.low %v6640_v30, %v6644_v8  ;;  %v14076_v34 = vcombine.high %v6759_v7, %v6763_v20  ;;  %v6736_v30 = vld [vmem:[#allocation17 + $0x588] sm:$0xff] }
 0x5b1   :  { %8201 = vmatprep.subr.bf16.mxu0 %v13982_v2  ;;  %v13950_v2 = vcombine.high %v6632_v6, %v6636_v32  ;;  %v6740_v8 = vld [vmem:[#allocation17 + $0x5a8] sm:$0xff] }
 0x5b3   :  { %8159 = vmatpush2.bf16.msra.mxu1 %v14107_v19  ;;  %v14075_v19 = vcombine.low %v6759_v7, %v6763_v20  ;;  %v14054_v20 = vcombine.high %v6736_v30, %v6740_v8 }
 0x5b4   :  { %8202 = vmatpush2.bf16.msra.mxu0 %v13981_v54  ;;  %8160 = vmatprep.subr.bf16.mxu1 %v14100_v60  ;;  %v16229_v54 = vpop.f32.mrf.mxu1  ;;  %v13949_v60 = vcombine.low %v6632_v6, %v6636_v32  ;;  %v6728_v6 = vld [vmem:[#allocation17 + $0x548] sm:$0xff] }
 0x5b5   :  { %8203 = vmatprep.subr.bf16.mxu0 %v13974_v53  ;;  %v14068_v53 = vcombine.high %v6751_v25, %v6755_v0  ;;  %v6732_v32 = vld [vmem:[#allocation17 + $0x568] sm:$0xff] }
 0x5b7   :  { %8161 = vmatpush2.bf16.msra.mxu1 %v14099_v36  ;;  %v6621_v36 = vld [vmem:[#allocation17 + $0x1f0] sm:$0xff] }
 0x5b8   :  { %8204 = vmatpush2.bf16.msra.mxu0 %v13973_v61  ;;  %8162 = vmatprep.subr.bf16.mxu1 %v14092_v17  ;;  %v14067_v61 = vcombine.low %v6751_v25, %v6755_v0  ;;  %v16231_v17 = vpop.f32.mrf.mxu1  ;;  %v13936_v27 = vcombine.high %v6617_v51, %v6621_v36  ;;  %v13935_v7 = vcombine.low %v6617_v51, %v6621_v36  ;;  %v6724_v51 = vld [vmem:[#allocation17 + $0x528] sm:$0xff] }
 0x5b9   :  { %8205 = vmatprep.subr.bf16.mxu0 %v13966_v56  ;;  %v13941_v56 = vcombine.low %v6624_v1, %v6628_v45  ;;  %v14053_v1 = vcombine.low %v6736_v30, %v6740_v8 }
 0x5bb   :  { %8163 = vmatpush2.bf16.msra.mxu1 %v14091_v21  ;;  %v14061_v21 = vcombine.low %v6744_v47, %v6748_v3  ;;  %v6720_v3 = vld [vmem:[#allocation17 + $0x508] sm:$0xff] }
 0x5bc   :  { %8206 = vmatpush2.bf16.msra.mxu0 %v13965_v38  ;;  %8164 = vmatprep.subr.bf16.mxu1 %v14084_v11  ;;  %v6609_v38 = vld [vmem:[#allocation17 + $0x190] sm:$0xff] }
 0x5bd   :  { %8207 = vmatprep.subr.bf16.mxu0 %v13958_v57  ;;  %v6613_v11 = vld [vmem:[#allocation17 + $0x1b0] sm:$0xff]  ;;  %v16233_v57 = vpop.f32.mrf.mxu1 }
 0x5bf   :  { %8165 = vmatpush2.bf16.msra.mxu1 %v14083_v52 }
 0x5c0   :  { %8208 = vmatpush2.bf16.msra.mxu0 %v13957_v13  ;;  %8166 = vmatprep.subr.bf16.mxu1 %v14076_v34  ;;  %v13928_v13 = vcombine.high %v6609_v38, %v6613_v11  ;;  %v6601_v34 = vld [vmem:[#allocation17 + $0x150] sm:$0xff] }
 0x5c1   :  { %8209 = vmatprep.subr.bf16.mxu0 %v13950_v2  ;;  %v6605_v2 = vld [vmem:[#allocation17 + $0x170] sm:$0xff] }
 0x5c2   :  { %v13920_v47 = vcombine.high %v6601_v34, %v6605_v2 }
 0x5c3   :  { %8167 = vmatpush2.bf16.msra.mxu1 %v14075_v19 }
 0x5c4   :  { %8210 = vmatpush2.bf16.msra.mxu0 %v13949_v60  ;;  %8168 = vmatprep.subr.bf16.mxu1 %v14068_v53  ;;  %v13927_v60 = vcombine.low %v6609_v38, %v6613_v11  ;;  %v14046_v53 = vcombine.high %v6728_v6, %v6732_v32  ;;  %v14038_v38 = vcombine.high %v6720_v3, %v6724_v51 }
 0x5c5   :  { %8211 = vmatprep.subr.bf16.mxu0 %v13942_v58 }
 0x5c7   :  { %8169 = vmatpush2.bf16.msra.mxu1 %v14067_v61  ;;  %v6593_v61 = vld [vmem:[#allocation17 + $0x110] sm:$0xff] }
 0x5c8   :  { %8212 = vmatpush2.bf16.msra.mxu0 %v13941_v56  ;;  %8224 = vmatprep.subr.bf16.mxu1 %v14062_v33  ;;  %v6597_v56 = vld [vmem:[#allocation17 + $0x130] sm:$0xff] }
 0x5c9   :  { %8267 = vmatprep.subr.bf16.mxu0 %v13936_v27 }
 0x5ca   :  { %v6378_v52 = vpop.f32.mrf.mxu1  ;;  %8171 = vmatmul.mubr.bf16.vlgmr.msra.gmra.mxu1 %v16129_v22 }
 0x5cb   :  { %v16237_v25 = vadd.f32 %v6378_v52, %v16214_v15  ;;  %v6421_v0 = vpop.f32.mrf.mxu0  ;;  %8214 = vmatmul.mubr.bf16.vlgmr.msra.gmra.mxu0 %v16093_v35  ;;  %8225 = vmatpush1.bf16.msra.mxu1 %v14061_v21  ;;  %v13919_v21 = vcombine.low %v6601_v34, %v6605_v2 }
 0x5cc   :  { %v16241_v45 = vadd.f32 %v6421_v0, %v16172_v5  ;;  %8256 = vmatprep.mubr.bf16.mxu1 %v16209_v46  ;;  %v6380_v19 = vpop.f32.mrf.mxu1  ;;  %8268 = vmatpush1.bf16.msra.mxu0 %v13935_v7  ;;  %v13912_v7 = vcombine.high %v6593_v61, %v6597_v56  ;;  %v6708_v0 = vld [vmem:[#allocation17 + $0x4a8] sm:$0xff] }
 0x5cd   :  { %v16245_v58 = vadd.f32 %v6380_v19, %v16219_v63  ;;  %8299 = vmatprep.mubr.bf16.mxu0 %v16095_v28  ;;  %v6423_v15 = vpop.f32.mrf.mxu0  ;;  %8226 = vmatprep.subr.bf16.mxu1 %v14054_v20  ;;  %v14045_v63 = vcombine.low %v6728_v6, %v6732_v32  ;;  %v6712_v20 = vld [vmem:[#allocation17 + $0x4c8] sm:$0xff]  ;;  %v6585_v6 = vld [vmem:[#allocation17 + $0xd0] sm:$0xff] }
 0x5ce   :  { %v16249_v36 = vadd.f32 %v6423_v15, %v16176_v49  ;;  %v6382_v5 = vpop.f32.mrf.mxu1  ;;  %8269 = vmatprep.subr.bf16.mxu0 %v13928_v13  ;;  %v6589_v32 = vld [vmem:[#allocation17 + $0xf0] sm:$0xff]  ;;  %v13911_v13 = vcombine.low %v6593_v61, %v6597_v56 }
 0x5cf   :  { %v16252_v33 = vadd.f32 %v6382_v5, %v16222_v24  ;;  %v6425_v27 = vpop.f32.mrf.mxu0  ;;  %8227 = vmatpush1.bf16.msra.mxu1 %v14053_v1  ;;  %v6716_v24 = vld [vmem:[#allocation17 + $0x4e8] sm:$0xff]  ;;  %v13904_v2 = vcombine.high %v6585_v6, %v6589_v32  ;;  %v6577_v1 = vld [vmem:[#allocation17 + $0x90] sm:$0xff] }
 0x5d0   :  { %v16255_v30 = vadd.f32 %v6425_v27, %v16179_v31  ;;  %v6384_v8 = vpop.f32.mrf.mxu1  ;;  %8270 = vmatpush1.bf16.msra.mxu0 %v13927_v60  ;;  %8228 = vmatprep.subr.bf16.mxu1 %v14046_v53  ;;  %v14037_v31 = vcombine.low %v6720_v3, %v6724_v51  ;;  %v14030_v34 = vcombine.high %v6712_v20, %v6716_v24  ;;  %v6581_v19 = vld [vmem:[#allocation17 + $0xb0] sm:$0xff]  ;;  %v6700_v3 = vld [vmem:[#allocation17 + $0x468] sm:$0xff] }
 0x5d1   :  { %v16258_v49 = vadd.f32 %v6384_v8, %v16225_v16  ;;  %v6427_v11 = vpop.f32.mrf.mxu0  ;;  %8271 = vmatprep.subr.bf16.mxu0 %v13920_v47  ;;  %v6704_v16 = vld [vmem:[#allocation17 + $0x488] sm:$0xff]  ;;  %v14029_v60 = vcombine.low %v6712_v20, %v6716_v24  ;;  %v13896_v15 = vcombine.high %v6577_v1, %v6581_v19  ;;  %v6569_v51 = vld [vmem:[#allocation17 + $0x50] sm:$0xff]  ;;  %v13895_v56 = vcombine.low %v6577_v1, %v6581_v19 }
 0x5d2   :  { %v16261_v52 = vadd.f32 %v6427_v11, %v16181_v4  ;;  %v13903_v4 = vcombine.low %v6585_v6, %v6589_v32  ;;  %v14022_v53 = vcombine.high %v6704_v16, %v6708_v0  ;;  %v6696_v47 = vld [vmem:[#allocation17 + $0x448] sm:$0xff]  ;;  %v6573_v5 = vld [vmem:[#allocation17 + $0x70] sm:$0xff]  ;;  %v14021_v61 = vcombine.low %v6704_v16, %v6708_v0 }
 0x5d3   :  { %8229 = vmatpush1.bf16.msra.mxu1 %v14045_v63  ;;  %v14014_v27 = vcombine.high %v6696_v47, %v6700_v3  ;;  %v13888_v63 = vcombine.high %v6569_v51, %v6573_v5  ;;  %v6688_v8 = vld [vmem:[#allocation17 + $0x408] sm:$0xff]  ;;  %v6565_v11 = vld [vmem:[#allocation17 + $0x30] sm:$0xff]  ;;  %v13887_v20 = vcombine.low %v6569_v51, %v6573_v5 }
 0x5d4   :  { %8272 = vmatpush1.bf16.msra.mxu0 %v13919_v21  ;;  %8230 = vmatprep.subr.bf16.mxu1 %v14038_v38  ;;  %v6692_v21 = vld [vmem:[#allocation17 + $0x428] sm:$0xff]  ;;  %v6561_v38 = vld [vmem:[#allocation17 + $0x10] sm:$0xff] }
 0x5d5   :  { %8273 = vmatprep.subr.bf16.mxu0 %v13912_v7  ;;  %v14013_v7 = vcombine.low %v6696_v47, %v6700_v3  ;;  %v14006_v24 = vcombine.high %v6688_v8, %v6692_v21  ;;  %v13880_v6 = vcombine.high %v6561_v38, %v6565_v11  ;;  %v6808_v32 = vld [vmem:[#allocation17 + $0x7c8] sm:$0xff]  ;;  %v13879_v16 = vcombine.low %v6561_v38, %v6565_v11 }
 0x5d6   :  { %v6800_v19 = vld [vmem:[#allocation17 + $0x788] sm:$0xff] }
 0x5d7   :  { %8231 = vmatpush1.bf16.msra.mxu1 %v14037_v31  ;;  %v6812_v31 = vld [vmem:[#allocation17 + $0x7e8] sm:$0xff] }
 0x5d8   :  { %8274 = vmatpush1.bf16.msra.mxu0 %v13911_v13  ;;  %8232 = vmatprep.subr.bf16.mxu1 %v14030_v34  ;;  %v6681_v13 = vld [vmem:[#allocation17 + $0x3d0] sm:$0xff]  ;;  %v14126_v0 = vcombine.high %v6808_v32, %v6812_v31  ;;  %v6792_v5 = vld [vmem:[#allocation17 + $0x748] sm:$0xff] }
 0x5d9   :  { %8275 = vmatprep.subr.bf16.mxu0 %v13904_v2  ;;  %v6685_v34 = vld [vmem:[#allocation17 + $0x3f0] sm:$0xff]  ;;  %v14005_v2 = vcombine.low %v6688_v8, %v6692_v21  ;;  %v6784_v11 = vld [vmem:[#allocation17 + $0x708] sm:$0xff] }
 0x5da   :  { %v14000_v1 = vcombine.high %v6681_v13, %v6685_v34  ;;  %v13999_v47 = vcombine.low %v6681_v13, %v6685_v34  ;;  %v6776_v34 = vld [vmem:[#allocation17 + $0x6c8] sm:$0xff] }
 0x5db   :  { %8233 = vmatpush1.bf16.msra.mxu1 %v14029_v60  ;;  %v6804_v60 = vld [vmem:[#allocation17 + $0x7a8] sm:$0xff] }
 0x5dc   :  { %8276 = vmatpush1.bf16.msra.mxu0 %v13903_v4  ;;  %8234 = vmatprep.subr.bf16.mxu1 %v14022_v53  ;;  %v6673_v4 = vld [vmem:[#allocation17 + $0x390] sm:$0xff]  ;;  %v14118_v3 = vcombine.high %v6800_v19, %v6804_v60 }
 0x5dd   :  { %8277 = vmatprep.subr.bf16.mxu0 %v13896_v15  ;;  %v6677_v53 = vld [vmem:[#allocation17 + $0x3b0] sm:$0xff]  ;;  %v14125_v15 = vcombine.low %v6808_v32, %v6812_v31 }
 0x5de   :  { %v13992_v51 = vcombine.high %v6673_v4, %v6677_v53  ;;  %v13991_v8 = vcombine.low %v6673_v4, %v6677_v53  ;;  %v6768_v53 = vld [vmem:[#allocation17 + $0x688] sm:$0xff] }
 0x5df   :  { %8235 = vmatpush1.bf16.msra.mxu1 %v14021_v61  ;;  %v6796_v61 = vld [vmem:[#allocation17 + $0x768] sm:$0xff] }
 0x5e0   :  { %8278 = vmatpush1.bf16.msra.mxu0 %v13895_v56  ;;  %8236 = vmatprep.subr.bf16.mxu1 %v14014_v27  ;;  %v6665_v56 = vld [vmem:[#allocation17 + $0x350] sm:$0xff]  ;;  %v14110_v21 = vcombine.high %v6792_v5, %v6796_v61 }
 0x5e1   :  { %8279 = vmatprep.subr.bf16.mxu0 %v13888_v63  ;;  %v6669_v27 = vld [vmem:[#allocation17 + $0x370] sm:$0xff]  ;;  %v14117_v63 = vcombine.low %v6800_v19, %v6804_v60 }
 0x5e2   :  { %v13984_v38 = vcombine.high %v6665_v56, %v6669_v27  ;;  %v13983_v32 = vcombine.low %v6665_v56, %v6669_v27  ;;  %v6760_v27 = vld [vmem:[#allocation17 + $0x648] sm:$0xff] }
 0x5e3   :  { %8237 = vmatpush1.bf16.msra.mxu1 %v14013_v7  ;;  %v6788_v7 = vld [vmem:[#allocation17 + $0x728] sm:$0xff] }
 0x5e4   :  { %8280 = vmatpush1.bf16.msra.mxu0 %v13887_v20  ;;  %8238 = vmatprep.subr.bf16.mxu1 %v14006_v24  ;;  %v6657_v20 = vld [vmem:[#allocation17 + $0x310] sm:$0xff]  ;;  %v14102_v31 = vcombine.high %v6784_v11, %v6788_v7 }
 0x5e5   :  { %8281 = vmatprep.subr.bf16.mxu0 %v13880_v6  ;;  %v6661_v24 = vld [vmem:[#allocation17 + $0x330] sm:$0xff]  ;;  %v14109_v6 = vcombine.low %v6792_v5, %v6796_v61 }
 0x5e6   :  { %v13976_v13 = vcombine.high %v6657_v20, %v6661_v24  ;;  %v13975_v19 = vcombine.low %v6657_v20, %v6661_v24  ;;  %v6752_v24 = vld [vmem:[#allocation17 + $0x608] sm:$0xff] }
 0x5e7   :  { %8239 = vmatpush1.bf16.msra.mxu1 %v14005_v2  ;;  %v6780_v2 = vld [vmem:[#allocation17 + $0x6e8] sm:$0xff] }
 0x5e8   :  { %8282 = vmatpush1.bf16.msra.mxu0 %v13879_v16  ;;  %8240 = vmatprep.subr.bf16.mxu1 %v14126_v0  ;;  %v6649_v16 = vld [vmem:[#allocation17 + $0x2d0] sm:$0xff]  ;;  %v14094_v60 = vcombine.high %v6776_v34, %v6780_v2 }
 0x5e9   :  { %8283 = vmatprep.subr.bf16.mxu0 %v14000_v1  ;;  %v6653_v0 = vld [vmem:[#allocation17 + $0x2f0] sm:$0xff]  ;;  %v14101_v1 = vcombine.low %v6784_v11, %v6788_v7 }
 0x5ea   :  { %v13968_v4 = vcombine.high %v6649_v16, %v6653_v0  ;;  %v13967_v5 = vcombine.low %v6649_v16, %v6653_v0  ;;  %v6745_v0 = vld [vmem:[#allocation17 + $0x5d0] sm:$0xff] }
 0x5eb   :  { %8241 = vmatpush2.bf16.msra.mxu1 %v14125_v15  ;;  %v6772_v15 = vld [vmem:[#allocation17 + $0x6a8] sm:$0xff] }
 0x5ec   :  { %8284 = vmatpush2.bf16.msra.mxu0 %v13999_v47  ;;  %8242 = vmatprep.subr.bf16.mxu1 %v14118_v3  ;;  %v6641_v47 = vld [vmem:[#allocation17 + $0x290] sm:$0xff]  ;;  %v14086_v61 = vcombine.high %v6768_v53, %v6772_v15 }
 0x5ed   :  { %8285 = vmatprep.subr.bf16.mxu0 %v13992_v51  ;;  %v6645_v3 = vld [vmem:[#allocation17 + $0x2b0] sm:$0xff]  ;;  %v14093_v51 = vcombine.low %v6776_v34, %v6780_v2 }
 0x5ee   :  { %v13960_v56 = vcombine.high %v6641_v47, %v6645_v3  ;;  %v13959_v11 = vcombine.low %v6641_v47, %v6645_v3  ;;  %v6737_v3 = vld [vmem:[#allocation17 + $0x590] sm:$0xff] }
 0x5ef   :  { %8243 = vmatpush2.bf16.msra.mxu1 %v14117_v63  ;;  %v6764_v63 = vld [vmem:[#allocation17 + $0x668] sm:$0xff] }
 0x5f0   :  { %8286 = vmatpush2.bf16.msra.mxu0 %v13991_v8  ;;  %8244 = vmatprep.subr.bf16.mxu1 %v14110_v21  ;;  %v6633_v8 = vld [vmem:[#allocation17 + $0x250] sm:$0xff]  ;;  %v14078_v7 = vcombine.high %v6760_v27, %v6764_v63 }
 0x5f1   :  { %8287 = vmatprep.subr.bf16.mxu0 %v13984_v38  ;;  %v6637_v21 = vld [vmem:[#allocation17 + $0x270] sm:$0xff]  ;;  %v14085_v38 = vcombine.low %v6768_v53, %v6772_v15 }
 0x5f2   :  { %v13952_v20 = vcombine.high %v6633_v8, %v6637_v21  ;;  %v13951_v34 = vcombine.low %v6633_v8, %v6637_v21  ;;  %v6729_v8 = vld [vmem:[#allocation17 + $0x550] sm:$0xff] }
 0x5f3   :  { %8245 = vmatpush2.bf16.msra.mxu1 %v14109_v6  ;;  %v6756_v6 = vld [vmem:[#allocation17 + $0x628] sm:$0xff]  ;;  %v6733_v21 = vld [vmem:[#allocation17 + $0x570] sm:$0xff] }
 0x5f4   :  { %8288 = vmatpush2.bf16.msra.mxu0 %v13983_v32  ;;  %8246 = vmatprep.subr.bf16.mxu1 %v14102_v31  ;;  %v6625_v32 = vld [vmem:[#allocation17 + $0x210] sm:$0xff]  ;;  %v14070_v2 = vcombine.high %v6752_v24, %v6756_v6 }
 0x5f5   :  { %8289 = vmatprep.subr.bf16.mxu0 %v13976_v13  ;;  %v6629_v31 = vld [vmem:[#allocation17 + $0x230] sm:$0xff]  ;;  %v14077_v13 = vcombine.low %v6760_v27, %v6764_v63 }
 0x5f6   :  { %v13944_v16 = vcombine.high %v6625_v32, %v6629_v31  ;;  %v13943_v53 = vcombine.low %v6625_v32, %v6629_v31 }
 0x5f7   :  { %8247 = vmatpush2.bf16.msra.mxu1 %v14101_v1  ;;  %v6749_v1 = vld [vmem:[#allocation17 + $0x5f0] sm:$0xff] }
 0x5f8   :  { %8290 = vmatpush2.bf16.msra.mxu0 %v13975_v19  ;;  %8248 = vmatprep.subr.bf16.mxu1 %v14094_v60  ;;  %v6618_v19 = vld [vmem:[#allocation17 + $0x1d8] sm:$0xff]  ;;  %v14064_v15 = vcombine.high %v6745_v0, %v6749_v1 }
 0x5f9   :  { %8291 = vmatprep.subr.bf16.mxu0 %v13968_v4  ;;  %v6622_v60 = vld [vmem:[#allocation17 + $0x1f8] sm:$0xff]  ;;  %v14069_v4 = vcombine.low %v6752_v24, %v6756_v6 }
 0x5fa   :  { %v13938_v47 = vcombine.high %v6618_v19, %v6622_v60  ;;  %v13937_v27 = vcombine.low %v6618_v19, %v6622_v60  ;;  %v6725_v19 = vld [vmem:[#allocation17 + $0x530] sm:$0xff] }
 0x5fb   :  { %8249 = vmatpush2.bf16.msra.mxu1 %v14093_v51  ;;  %v6741_v51 = vld [vmem:[#allocation17 + $0x5b0] sm:$0xff] }
 0x5fc   :  { %8292 = vmatpush2.bf16.msra.mxu0 %v13967_v5  ;;  %8250 = vmatprep.subr.bf16.mxu1 %v14086_v61  ;;  %v14063_v5 = vcombine.low %v6745_v0, %v6749_v1  ;;  %v6610_v61 = vld [vmem:[#allocation17 + $0x198] sm:$0xff]  ;;  %v14056_v63 = vcombine.high %v6737_v3, %v6741_v51  ;;  %v14055_v32 = vcombine.low %v6737_v3, %v6741_v51  ;;  %v6721_v1 = vld [vmem:[#allocation17 + $0x510] sm:$0xff] }
 0x5fd   :  { %8293 = vmatprep.subr.bf16.mxu0 %v13960_v56  ;;  %v6614_v56 = vld [vmem:[#allocation17 + $0x1b8] sm:$0xff] }
 0x5ff   :  { %8251 = vmatpush2.bf16.msra.mxu1 %v14085_v38 }
 0x600   :  { %8294 = vmatpush2.bf16.msra.mxu0 %v13959_v11  ;;  %8252 = vmatprep.subr.bf16.mxu1 %v14078_v7  ;;  %v13930_v11 = vcombine.high %v6610_v61, %v6614_v56  ;;  %v6602_v7 = vld [vmem:[#allocation17 + $0x158] sm:$0xff] }
 0x601   :  { %8295 = vmatprep.subr.bf16.mxu0 %v13952_v20  ;;  %v6606_v20 = vld [vmem:[#allocation17 + $0x178] sm:$0xff] }
 0x602   :  { %v13922_v0 = vcombine.high %v6602_v7, %v6606_v20  ;;  %v13921_v51 = vcombine.low %v6602_v7, %v6606_v20  ;;  %v6709_v20 = vld [vmem:[#allocation17 + $0x4b0] sm:$0xff] }
 0x603   :  { %8253 = vmatpush2.bf16.msra.mxu1 %v14077_v13 }
 0x604   :  { %8296 = vmatpush2.bf16.msra.mxu0 %v13951_v34  ;;  %8254 = vmatprep.subr.bf16.mxu1 %v14070_v2  ;;  %v13929_v34 = vcombine.low %v6610_v61, %v6614_v56  ;;  %v14048_v2 = vcombine.high %v6729_v8, %v6733_v21 }
 0x605   :  { %8297 = vmatprep.subr.bf16.mxu0 %v13944_v16 }
 0x607   :  { %8255 = vmatpush2.bf16.msra.mxu1 %v14069_v4  ;;  %v6594_v4 = vld [vmem:[#allocation17 + $0x118] sm:$0xff] }
 0x608   :  { %8298 = vmatpush2.bf16.msra.mxu0 %v13943_v53  ;;  %8310 = vmatprep.subr.bf16.mxu1 %v14064_v15  ;;  %v6598_v53 = vld [vmem:[#allocation17 + $0x138] sm:$0xff] }
 0x609   :  { %8353 = vmatprep.subr.bf16.mxu0 %v13938_v47  ;;  %v13914_v56 = vcombine.high %v6594_v4, %v6598_v53 }
 0x60a   :  { %v6464_v38 = vpop.f32.mrf.mxu1  ;;  %8257 = vmatmul.mubr.bf16.vlgmr.msra.gmra.mxu1 %v16129_v22 }
 0x60b   :  { %v16265_v24 = vadd.f32 %v6464_v38, %v16241_v45  ;;  %v6507_v6 = vpop.f32.mrf.mxu0  ;;  %8300 = vmatmul.mubr.bf16.vlgmr.msra.gmra.mxu0 %v16093_v35  ;;  %8311 = vmatpush1.bf16.msra.mxu1 %v14063_v5  ;;  %v14040_v5 = vcombine.high %v6721_v1, %v6725_v19  ;;  %v13913_v38 = vcombine.low %v6594_v4, %v6598_v53 }
 0x60c   :  { %v16269_v31 = vadd.f32 %v6507_v6, %v16184_v59  ;;  %8342 = vmatprep.mubr.bf16.mxu1 %v16209_v46  ;;  %v6466_v13 = vpop.f32.mrf.mxu1  ;;  %8354 = vmatpush1.bf16.msra.mxu0 %v13937_v27  ;;  %v6713_v27 = vld [vmem:[#allocation17 + $0x4d0] sm:$0xff]  ;;  %v6578_v6 = vld [vmem:[#allocation17 + $0x98] sm:$0xff] }
 0x60d   :  { %v16273_v16 = vadd.f32 %v6466_v13, %v16249_v36  ;;  %8385 = vmatprep.mubr.bf16.mxu0 %v16095_v28  ;;  %v6509_v45 = vpop.f32.mrf.mxu0  ;;  %8312 = vmatprep.subr.bf16.mxu1 %v14056_v63  ;;  %v14047_v36 = vcombine.low %v6729_v8, %v6733_v21  ;;  %v6586_v8 = vld [vmem:[#allocation17 + $0xd8] sm:$0xff] }
 0x60e   :  { %v16277_v60 = vadd.f32 %v6509_v45, %v16188_v14  ;;  %v6468_v59 = vpop.f32.mrf.mxu1  ;;  %8355 = vmatprep.subr.bf16.mxu0 %v13930_v11  ;;  %v6590_v21 = vld [vmem:[#allocation17 + $0xf8] sm:$0xff]  ;;  %v6697_v45 = vld [vmem:[#allocation17 + $0x450] sm:$0xff] }
 0x60f   :  { %v16280_v15 = vadd.f32 %v6468_v59, %v16255_v30  ;;  %v6511_v47 = vpop.f32.mrf.mxu0  ;;  %8313 = vmatpush1.bf16.msra.mxu1 %v14055_v32  ;;  %v6717_v30 = vld [vmem:[#allocation17 + $0x4f0] sm:$0xff]  ;;  %v13906_v7 = vcombine.high %v6586_v8, %v6590_v21  ;;  %v6582_v32 = vld [vmem:[#allocation17 + $0xb8] sm:$0xff] }
 0x610   :  { %v16283_v28 = vadd.f32 %v6511_v47, %v16191_v50  ;;  %v6470_v3 = vpop.f32.mrf.mxu1  ;;  %8356 = vmatpush1.bf16.msra.mxu0 %v13929_v34  ;;  %8314 = vmatprep.subr.bf16.mxu1 %v14048_v2  ;;  %v14039_v50 = vcombine.low %v6721_v1, %v6725_v19  ;;  %v14032_v11 = vcombine.high %v6713_v27, %v6717_v30  ;;  %v6570_v1 = vld [vmem:[#allocation17 + $0x58] sm:$0xff] }
 0x611   :  { %v16286_v14 = vadd.f32 %v6470_v3, %v16261_v52  ;;  %v6513_v61 = vpop.f32.mrf.mxu0  ;;  %8357 = vmatprep.subr.bf16.mxu0 %v13922_v0  ;;  %v6705_v52 = vld [vmem:[#allocation17 + $0x490] sm:$0xff]  ;;  %v14031_v13 = vcombine.low %v6713_v27, %v6717_v30  ;;  %v13898_v2 = vcombine.high %v6578_v6, %v6582_v32  ;;  %v6574_v19 = vld [vmem:[#allocation17 + $0x78] sm:$0xff]  ;;  %v13897_v4 = vcombine.low %v6578_v6, %v6582_v32 }
 0x612   :  { %v16289_v63 = vadd.f32 %v6513_v61, %v16193_v12  ;;  %v13905_v12 = vcombine.low %v6586_v8, %v6590_v21  ;;  %v14024_v34 = vcombine.high %v6705_v52, %v6709_v20  ;;  %v6701_v0 = vld [vmem:[#allocation17 + $0x470] sm:$0xff]  ;;  %v14023_v59 = vcombine.low %v6705_v52, %v6709_v20 }
 0x613   :  { %8315 = vmatpush1.bf16.msra.mxu1 %v14047_v36  ;;  %v14016_v53 = vcombine.high %v6697_v45, %v6701_v0  ;;  %v13890_v47 = vcombine.high %v6570_v1, %v6574_v19  ;;  %v6689_v36 = vld [vmem:[#allocation17 + $0x410] sm:$0xff]  ;;  %v14015_v61 = vcombine.low %v6697_v45, %v6701_v0 }
 0x614   :  { %8358 = vmatpush1.bf16.msra.mxu0 %v13921_v51  ;;  %8316 = vmatprep.subr.bf16.mxu1 %v14040_v5  ;;  %v6693_v3 = vld [vmem:[#allocation17 + $0x430] sm:$0xff]  ;;  %v6562_v51 = vld [vmem:[#allocation17 + $0x18] sm:$0xff] }
 0x615   :  { %8359 = vmatprep.subr.bf16.mxu0 %v13914_v56  ;;  %v6566_v5 = vld [vmem:[#allocation17 + $0x38] sm:$0xff]  ;;  %v13889_v56 = vcombine.low %v6570_v1, %v6574_v19  ;;  %v14008_v27 = vcombine.high %v6689_v36, %v6693_v3  ;;  %v6809_v8 = vld [vmem:[#allocation17 + $0x7d0] sm:$0xff] }
 0x616   :  { %v13882_v30 = vcombine.high %v6562_v51, %v6566_v5  ;;  %v6813_v21 = vld [vmem:[#allocation17 + $0x7f0] sm:$0xff] }
 0x617   :  { %8317 = vmatpush1.bf16.msra.mxu1 %v14039_v50  ;;  %v6682_v50 = vld [vmem:[#allocation17 + $0x3d8] sm:$0xff]  ;;  %v14128_v52 = vcombine.high %v6809_v8, %v6813_v21  ;;  %v6801_v6 = vld [vmem:[#allocation17 + $0x790] sm:$0xff] }
 0x618   :  { %8360 = vmatpush1.bf16.msra.mxu0 %v13913_v38  ;;  %8318 = vmatprep.subr.bf16.mxu1 %v14032_v11  ;;  %v6686_v38 = vld [vmem:[#allocation17 + $0x3f8] sm:$0xff]  ;;  %v14007_v11 = vcombine.low %v6689_v36, %v6693_v3  ;;  %v6805_v32 = vld [vmem:[#allocation17 + $0x7b0] sm:$0xff] }
 0x619   :  { %8361 = vmatprep.subr.bf16.mxu0 %v13906_v7  ;;  %v13881_v7 = vcombine.low %v6562_v51, %v6566_v5  ;;  %v14002_v20 = vcombine.high %v6682_v50, %v6686_v38  ;;  %v14120_v45 = vcombine.high %v6801_v6, %v6805_v32  ;;  %v6793_v1 = vld [vmem:[#allocation17 + $0x750] sm:$0xff] }
 0x61a   :  { %v6797_v19 = vld [vmem:[#allocation17 + $0x770] sm:$0xff] }
 0x61b   :  { %8319 = vmatpush1.bf16.msra.mxu1 %v14031_v13  ;;  %v6674_v13 = vld [vmem:[#allocation17 + $0x398] sm:$0xff]  ;;  %v14112_v36 = vcombine.high %v6793_v1, %v6797_v19  ;;  %v6785_v51 = vld [vmem:[#allocation17 + $0x710] sm:$0xff] }
 0x61c   :  { %8362 = vmatpush1.bf16.msra.mxu0 %v13905_v12  ;;  %8320 = vmatprep.subr.bf16.mxu1 %v14024_v34  ;;  %v6678_v12 = vld [vmem:[#allocation17 + $0x3b8] sm:$0xff]  ;;  %v14127_v34 = vcombine.low %v6809_v8, %v6813_v21  ;;  %v6789_v5 = vld [vmem:[#allocation17 + $0x730] sm:$0xff] }
 0x61d   :  { %8363 = vmatprep.subr.bf16.mxu0 %v13898_v2  ;;  %v14001_v2 = vcombine.low %v6682_v50, %v6686_v38  ;;  %v13994_v0 = vcombine.high %v6674_v13, %v6678_v12  ;;  %v14104_v8 = vcombine.high %v6785_v51, %v6789_v5  ;;  %v6777_v50 = vld [vmem:[#allocation17 + $0x6d0] sm:$0xff] }
 0x61e   :  { %v6781_v38 = vld [vmem:[#allocation17 + $0x6f0] sm:$0xff] }
 0x61f   :  { %8321 = vmatpush1.bf16.msra.mxu1 %v14023_v59  ;;  %v6666_v59 = vld [vmem:[#allocation17 + $0x358] sm:$0xff] }
 0x620   :  { %8364 = vmatpush1.bf16.msra.mxu0 %v13897_v4  ;;  %8322 = vmatprep.subr.bf16.mxu1 %v14016_v53  ;;  %v6670_v4 = vld [vmem:[#allocation17 + $0x378] sm:$0xff]  ;;  %v14119_v53 = vcombine.low %v6801_v6, %v6805_v32  ;;  %v14096_v6 = vcombine.high %v6777_v50, %v6781_v38 }
 0x621   :  { %8365 = vmatprep.subr.bf16.mxu0 %v13890_v47  ;;  %v13993_v47 = vcombine.low %v6674_v13, %v6678_v12  ;;  %v13986_v3 = vcombine.high %v6666_v59, %v6670_v4  ;;  %v6769_v13 = vld [vmem:[#allocation17 + $0x690] sm:$0xff] }
 0x622   :  { %v6773_v12 = vld [vmem:[#allocation17 + $0x6b0] sm:$0xff] }
 0x623   :  { %8323 = vmatpush1.bf16.msra.mxu1 %v14015_v61  ;;  %v6658_v61 = vld [vmem:[#allocation17 + $0x318] sm:$0xff] }
 0x624   :  { %8366 = vmatpush1.bf16.msra.mxu0 %v13889_v56  ;;  %8324 = vmatprep.subr.bf16.mxu1 %v14008_v27  ;;  %v6662_v56 = vld [vmem:[#allocation17 + $0x338] sm:$0xff]  ;;  %v14111_v27 = vcombine.low %v6793_v1, %v6797_v19  ;;  %v14088_v1 = vcombine.high %v6769_v13, %v6773_v12 }
 0x625   :  { %8367 = vmatprep.subr.bf16.mxu0 %v13882_v30  ;;  %v13985_v30 = vcombine.low %v6666_v59, %v6670_v4  ;;  %v13978_v21 = vcombine.high %v6658_v61, %v6662_v56  ;;  %v6761_v59 = vld [vmem:[#allocation17 + $0x650] sm:$0xff] }
 0x626   :  { %v6765_v4 = vld [vmem:[#allocation17 + $0x670] sm:$0xff] }
 0x627   :  { %8325 = vmatpush1.bf16.msra.mxu1 %v14007_v11  ;;  %v6650_v11 = vld [vmem:[#allocation17 + $0x2d8] sm:$0xff] }
 0x628   :  { %8368 = vmatpush1.bf16.msra.mxu0 %v13881_v7  ;;  %8326 = vmatprep.subr.bf16.mxu1 %v14128_v52  ;;  %v6654_v7 = vld [vmem:[#allocation17 + $0x2f8] sm:$0xff]  ;;  %v14103_v52 = vcombine.low %v6785_v51, %v6789_v5  ;;  %v14080_v51 = vcombine.high %v6761_v59, %v6765_v4 }
 0x629   :  { %8369 = vmatprep.subr.bf16.mxu0 %v14002_v20  ;;  %v13977_v20 = vcombine.low %v6658_v61, %v6662_v56  ;;  %v13970_v32 = vcombine.high %v6650_v11, %v6654_v7  ;;  %v6753_v61 = vld [vmem:[#allocation17 + $0x610] sm:$0xff] }
 0x62a   :  { %v6757_v56 = vld [vmem:[#allocation17 + $0x630] sm:$0xff] }
 0x62b   :  { %8327 = vmatpush2.bf16.msra.mxu1 %v14127_v34  ;;  %v6642_v34 = vld [vmem:[#allocation17 + $0x298] sm:$0xff] }
 0x62c   :  { %8370 = vmatpush2.bf16.msra.mxu0 %v14001_v2  ;;  %8328 = vmatprep.subr.bf16.mxu1 %v14120_v45  ;;  %v6646_v2 = vld [vmem:[#allocation17 + $0x2b8] sm:$0xff]  ;;  %v14095_v45 = vcombine.low %v6777_v50, %v6781_v38  ;;  %v14072_v50 = vcombine.high %v6753_v61, %v6757_v56 }
 0x62d   :  { %8371 = vmatprep.subr.bf16.mxu0 %v13994_v0  ;;  %v13969_v0 = vcombine.low %v6650_v11, %v6654_v7  ;;  %v13962_v19 = vcombine.high %v6642_v34, %v6646_v2  ;;  %v6746_v11 = vld [vmem:[#allocation17 + $0x5d8] sm:$0xff] }
 0x62e   :  { %v6750_v7 = vld [vmem:[#allocation17 + $0x5f8] sm:$0xff] }
 0x62f   :  { %8329 = vmatpush2.bf16.msra.mxu1 %v14119_v53  ;;  %v6634_v53 = vld [vmem:[#allocation17 + $0x258] sm:$0xff] }
 0x630   :  { %8372 = vmatpush2.bf16.msra.mxu0 %v13993_v47  ;;  %8330 = vmatprep.subr.bf16.mxu1 %v14112_v36  ;;  %v6638_v47 = vld [vmem:[#allocation17 + $0x278] sm:$0xff]  ;;  %v14087_v36 = vcombine.low %v6769_v13, %v6773_v12  ;;  %v14066_v13 = vcombine.high %v6746_v11, %v6750_v7 }
 0x631   :  { %8373 = vmatprep.subr.bf16.mxu0 %v13986_v3  ;;  %v13961_v3 = vcombine.low %v6642_v34, %v6646_v2  ;;  %v13954_v5 = vcombine.high %v6634_v53, %v6638_v47  ;;  %v6738_v12 = vld [vmem:[#allocation17 + $0x598] sm:$0xff] }
 0x632   :  { %v6742_v34 = vld [vmem:[#allocation17 + $0x5b8] sm:$0xff] }
 0x633   :  { %8331 = vmatpush2.bf16.msra.mxu1 %v14111_v27  ;;  %v6626_v27 = vld [vmem:[#allocation17 + $0x218] sm:$0xff] }
 0x634   :  { %8374 = vmatpush2.bf16.msra.mxu0 %v13985_v30  ;;  %8332 = vmatprep.subr.bf16.mxu1 %v14104_v8  ;;  %v6630_v30 = vld [vmem:[#allocation17 + $0x238] sm:$0xff]  ;;  %v14079_v8 = vcombine.low %v6761_v59, %v6765_v4 }
 0x635   :  { %8375 = vmatprep.subr.bf16.mxu0 %v13978_v21  ;;  %v13953_v21 = vcombine.low %v6634_v53, %v6638_v47  ;;  %v13946_v38 = vcombine.high %v6626_v27, %v6630_v30  ;;  %v6730_v59 = vld [vmem:[#allocation17 + $0x558] sm:$0xff] }
 0x636   :  { %v6734_v4 = vld [vmem:[#allocation17 + $0x578] sm:$0xff] }
 0x637   :  { %8333 = vmatpush2.bf16.msra.mxu1 %v14103_v52  ;;  %v8593_v52 = vld [vmem:[#allocation20 + $0x1c0] sm:$0xff] }
 0x638   :  { %8376 = vmatpush2.bf16.msra.mxu0 %v13977_v20  ;;  %8334 = vmatprep.subr.bf16.mxu1 %v14096_v6  ;;  %v8597_v20 = vld [vmem:[#allocation20 + $0x1e0] sm:$0xff]  ;;  %v14071_v6 = vcombine.low %v6753_v61, %v6757_v56 }
 0x639   :  { %8377 = vmatprep.subr.bf16.mxu0 %v13970_v32  ;;  %v13945_v32 = vcombine.low %v6626_v27, %v6630_v30  ;;  %v14188_v2 = vcombine.high %v8593_v52, %v8597_v20  ;;  %v14187_v53 = vcombine.low %v8593_v52, %v8597_v20  ;;  %v8581_v61 = vld [vmem:[#allocation20 + $0x160] sm:$0xff]  ;;  %v14050_v27 = vcombine.high %v6730_v59, %v6734_v4 }
 0x63b   :  { %8335 = vmatpush2.bf16.msra.mxu1 %v14095_v45  ;;  %v14065_v45 = vcombine.low %v6746_v11, %v6750_v7  ;;  %v14049_v11 = vcombine.low %v6730_v59, %v6734_v4  ;;  %v8569_v7 = vld [vmem:[#allocation20 + $0x100] sm:$0xff] }
 0x63c   :  { %8378 = vmatpush2.bf16.msra.mxu0 %v13969_v0  ;;  %8336 = vmatprep.subr.bf16.mxu1 %v14088_v1  ;;  %v8585_v0 = vld [vmem:[#allocation20 + $0x180] sm:$0xff] }
 0x63d   :  { %8379 = vmatprep.subr.bf16.mxu0 %v13962_v19  ;;  %v8589_v1 = vld [vmem:[#allocation20 + $0x1a0] sm:$0xff]  ;;  %v14058_v19 = vcombine.high %v6738_v12, %v6742_v34 }
 0x63e   :  { %v8553_v4 = vld [vmem:[#allocation20 + $0x80] sm:$0xff] }
 0x63f   :  { %8337 = vmatpush2.bf16.msra.mxu1 %v14087_v36  ;;  %v14180_v36 = vcombine.high %v8585_v0, %v8589_v1 }
 0x640   :  { %8380 = vmatpush2.bf16.msra.mxu0 %v13961_v3  ;;  %8338 = vmatprep.subr.bf16.mxu1 %v14080_v51  ;;  %v14057_v51 = vcombine.low %v6738_v12, %v6742_v34 }
 0x641   :  { %8381 = vmatprep.subr.bf16.mxu0 %v13954_v5  ;;  %v8577_v5 = vld [vmem:[#allocation20 + $0x140] sm:$0xff] }
 0x643   :  { %8339 = vmatpush2.bf16.msra.mxu1 %v14079_v8  ;;  %v6722_v8 = vld [vmem:[#allocation17 + $0x518] sm:$0xff] }
 0x644   :  { %8382 = vmatpush2.bf16.msra.mxu0 %v13953_v21  ;;  %8340 = vmatprep.subr.bf16.mxu1 %v14072_v50  ;;  %v6726_v21 = vld [vmem:[#allocation17 + $0x538] sm:$0xff]  ;;  %v14179_v50 = vcombine.low %v8585_v0, %v8589_v1 }
 0x645   :  { %8383 = vmatprep.subr.bf16.mxu0 %v13946_v38  ;;  %v14172_v38 = vcombine.high %v8577_v5, %v8581_v61  ;;  %v14042_v20 = vcombine.high %v6722_v8, %v6726_v21  ;;  %v14041_v34 = vcombine.low %v6722_v8, %v6726_v21  ;;  %v6706_v0 = vld [vmem:[#allocation17 + $0x498] sm:$0xff]  ;;  %v8549_v8 = vld [vmem:[#allocation20 + $0x60] sm:$0xff] }
 0x646   :  { %v6710_v1 = vld [vmem:[#allocation17 + $0x4b8] sm:$0xff] }
 0x647   :  { %8341 = vmatpush2.bf16.msra.mxu1 %v14071_v6  ;;  %v6714_v6 = vld [vmem:[#allocation17 + $0x4d8] sm:$0xff] }
 0x648   :  { %8384 = vmatpush2.bf16.msra.mxu0 %v13945_v32  ;;  %8396 = vmatprep.subr.bf16.mxu1 %v14066_v13  ;;  %v6718_v32 = vld [vmem:[#allocation17 + $0x4f8] sm:$0xff]  ;;  %v14171_v13 = vcombine.low %v8577_v5, %v8581_v61 }
 0x649   :  { %11651 = vmatprep.subr.bf16.mxu0 %v14188_v2  ;;  %v8565_v2 = vld [vmem:[#allocation20 + $0xe0] sm:$0xff] }
 0x64a   :  { %v6550_v47 = vpop.f32.mrf.mxu1  ;;  %8343 = vmatmul.mubr.bf16.vlgmr.msra.gmra.mxu1 %v16129_v22 }
 0x64b   :  { %v16293_v3 = vadd.f32 %v6550_v47, %v16269_v31  ;;  %8386 = vmatmul.mubr.bf16.vlgmr.msra.gmra.mxu0 %v16093_v35  ;;  %8397 = vmatpush1.bf16.msra.mxu1 %v14065_v45  ;;  %v14034_v45 = vcombine.high %v6714_v6, %v6718_v32  ;;  %v14026_v47 = vcombine.high %v6706_v0, %v6710_v1 }
 0x64c   :  { %8428 = vmatprep.mubr.bf16.mxu1 %v16209_v46  ;;  %v6552_v56 = vpop.f32.mrf.mxu1  ;;  %8398 = vmatprep.subr.bf16.mxu1 %v14058_v19  ;;  %v8573_v46 = vld [vmem:[#allocation20 + $0x120] sm:$0xff] }
 0x64d   :  { %v16298_v30 = vadd.f32 %v6552_v56, %v16277_v60  ;;  %11652 = vmatpush1.bf16.msra.mxu0 %v14187_v53  ;;  %v14164_v12 = vcombine.high %v8569_v7, %v8573_v46  ;;  %v14163_v19 = vcombine.low %v8569_v7, %v8573_v46  ;;  %v8557_v53 = vld [vmem:[#allocation20 + $0xa0] sm:$0xff]  ;;  %v14025_v56 = vcombine.low %v6706_v0, %v6710_v1  ;;  %v6802_v0 = vld [vmem:[#allocation17 + $0x798] sm:$0xff] }
 0x64e   :  { %v6554_v31 = vpop.f32.mrf.mxu1  ;;  %11653 = vmatprep.subr.bf16.mxu0 %v14180_v36  ;;  %v6698_v36 = vld [vmem:[#allocation17 + $0x458] sm:$0xff]  ;;  %v14148_v61 = vcombine.high %v8553_v4, %v8557_v53  ;;  %v8537_v46 = vld [vmem:[#allocation20] sm:$0xff] }
 0x64f   :  { %v16301_v35 = vadd.f32 %v6554_v31, %v16283_v28  ;;  %8399 = vmatpush1.bf16.msra.mxu1 %v14057_v51  ;;  %v8561_v28 = vld [vmem:[#allocation20 + $0xc0] sm:$0xff]  ;;  %v6702_v51 = vld [vmem:[#allocation17 + $0x478] sm:$0xff] }
 0x650   :  { %v6556_v52 = vpop.f32.mrf.mxu1  ;;  %8400 = vmatprep.subr.bf16.mxu1 %v14050_v27  ;;  %v14156_v59 = vcombine.high %v8561_v28, %v8565_v2  ;;  %v14155_v5 = vcombine.low %v8561_v28, %v8565_v2  ;;  %v8545_v27 = vld [vmem:[#allocation20 + $0x40] sm:$0xff]  ;;  %v14018_v21 = vcombine.high %v6698_v36, %v6702_v51  ;;  %v6694_v31 = vld [vmem:[#allocation17 + $0x438] sm:$0xff]  ;;  %v14017_v7 = vcombine.low %v6698_v36, %v6702_v51 }
 0x651   :  { %v16304_v60 = vadd.f32 %v6556_v52, %v16289_v63  ;;  %11654 = vmatpush1.bf16.msra.mxu0 %v14179_v50  ;;  %v14033_v63 = vcombine.low %v6714_v6, %v6718_v32  ;;  %v6690_v50 = vld [vmem:[#allocation17 + $0x418] sm:$0xff]  ;;  %v8541_v52 = vld [vmem:[#allocation20 + $0x20] sm:$0xff] }
 0x652   :  { %11655 = vmatprep.subr.bf16.mxu0 %v14172_v38  ;;  %v14147_v38 = vcombine.low %v8553_v4, %v8557_v53  ;;  %v6810_v6 = vld [vmem:[#allocation17 + $0x7d8] sm:$0xff]  ;;  %v8657_v28 = vld [vmem:[#allocation20 + $0x3c0] sm:$0xff] }
 0x653   :  { %8401 = vmatpush1.bf16.msra.mxu1 %v14049_v11  ;;  %v14140_v11 = vcombine.high %v8545_v27, %v8549_v8  ;;  %v6814_v32 = vld [vmem:[#allocation17 + $0x7f8] sm:$0xff]  ;;  %v8661_v2 = vld [vmem:[#allocation20 + $0x3e0] sm:$0xff] }
 0x654   :  { %8402 = vmatprep.subr.bf16.mxu1 %v14042_v20  ;;  %v14010_v20 = vcombine.high %v6690_v50, %v6694_v31  ;;  %v6806_v1 = vld [vmem:[#allocation17 + $0x7b8] sm:$0xff]  ;;  %v8649_v4 = vld [vmem:[#allocation20 + $0x380] sm:$0xff] }
 0x655   :  { %11656 = vmatpush1.bf16.msra.mxu0 %v14171_v13  ;;  %v14139_v13 = vcombine.low %v8545_v27, %v8549_v8  ;;  %v8653_v53 = vld [vmem:[#allocation20 + $0x3a0] sm:$0xff]  ;;  %v6794_v36 = vld [vmem:[#allocation17 + $0x758] sm:$0xff] }
 0x656   :  { %11657 = vmatprep.subr.bf16.mxu0 %v14164_v12  ;;  %v14132_v12 = vcombine.high %v8537_v46, %v8541_v52  ;;  %v6798_v51 = vld [vmem:[#allocation17 + $0x778] sm:$0xff]  ;;  %v8641_v27 = vld [vmem:[#allocation20 + $0x340] sm:$0xff] }
 0x657   :  { %8403 = vmatpush1.bf16.msra.mxu1 %v14041_v34  ;;  %v14009_v34 = vcombine.low %v6690_v50, %v6694_v31  ;;  %v8645_v8 = vld [vmem:[#allocation20 + $0x360] sm:$0xff]  ;;  %v6786_v50 = vld [vmem:[#allocation17 + $0x718] sm:$0xff] }
 0x658   :  { %8404 = vmatprep.subr.bf16.mxu1 %v14034_v45  ;;  %v14130_v45 = vcombine.high %v6810_v6, %v6814_v32  ;;  %v6790_v31 = vld [vmem:[#allocation17 + $0x738] sm:$0xff] }
 0x659   :  { %11658 = vmatpush1.bf16.msra.mxu0 %v14163_v19  ;;  %v14131_v19 = vcombine.low %v8537_v46, %v8541_v52  ;;  %v8633_v46 = vld [vmem:[#allocation20 + $0x300] sm:$0xff] }
 0x65a   :  { %11659 = vmatprep.subr.bf16.mxu0 %v14156_v59  ;;  %v14252_v59 = vcombine.high %v8657_v28, %v8661_v2  ;;  %v8637_v52 = vld [vmem:[#allocation20 + $0x320] sm:$0xff] }
 0x65b   :  { %8405 = vmatpush1.bf16.msra.mxu1 %v14033_v63  ;;  %v14129_v63 = vcombine.low %v6810_v6, %v6814_v32  ;;  %v6778_v6 = vld [vmem:[#allocation17 + $0x6d8] sm:$0xff] }
 0x65c   :  { %8406 = vmatprep.subr.bf16.mxu1 %v14026_v47  ;;  %v14122_v47 = vcombine.high %v6802_v0, %v6806_v1  ;;  %v6782_v32 = vld [vmem:[#allocation17 + $0x6f8] sm:$0xff] }
 0x65d   :  { %11660 = vmatpush1.bf16.msra.mxu0 %v14155_v5  ;;  %v14251_v5 = vcombine.low %v8657_v28, %v8661_v2  ;;  %v8625_v28 = vld [vmem:[#allocation20 + $0x2c0] sm:$0xff] }
 0x65e   :  { %11661 = vmatprep.subr.bf16.mxu0 %v14148_v61  ;;  %v14244_v61 = vcombine.high %v8649_v4, %v8653_v53  ;;  %v8629_v2 = vld [vmem:[#allocation20 + $0x2e0] sm:$0xff] }
 0x65f   :  { %8407 = vmatpush1.bf16.msra.mxu1 %v14025_v56  ;;  %v14121_v56 = vcombine.low %v6802_v0, %v6806_v1  ;;  %v6770_v0 = vld [vmem:[#allocation17 + $0x698] sm:$0xff] }
 0x660   :  { %8408 = vmatprep.subr.bf16.mxu1 %v14018_v21  ;;  %v14114_v21 = vcombine.high %v6794_v36, %v6798_v51  ;;  %v6774_v1 = vld [vmem:[#allocation17 + $0x6b8] sm:$0xff] }
 0x661   :  { %11662 = vmatpush1.bf16.msra.mxu0 %v14147_v38  ;;  %v14243_v38 = vcombine.low %v8649_v4, %v8653_v53  ;;  %v8617_v4 = vld [vmem:[#allocation20 + $0x280] sm:$0xff] }
 0x662   :  { %11663 = vmatprep.subr.bf16.mxu0 %v14140_v11  ;;  %v14236_v11 = vcombine.high %v8641_v27, %v8645_v8  ;;  %v8621_v53 = vld [vmem:[#allocation20 + $0x2a0] sm:$0xff] }
 0x663   :  { %8409 = vmatpush1.bf16.msra.mxu1 %v14017_v7  ;;  %v14113_v7 = vcombine.low %v6794_v36, %v6798_v51  ;;  %v6762_v36 = vld [vmem:[#allocation17 + $0x658] sm:$0xff] }
 0x664   :  { %8410 = vmatprep.subr.bf16.mxu1 %v14010_v20  ;;  %v14106_v20 = vcombine.high %v6786_v50, %v6790_v31  ;;  %v6766_v51 = vld [vmem:[#allocation17 + $0x678] sm:$0xff] }
 0x665   :  { %11664 = vmatpush1.bf16.msra.mxu0 %v14139_v13  ;;  %v14235_v13 = vcombine.low %v8641_v27, %v8645_v8  ;;  %v8609_v27 = vld [vmem:[#allocation20 + $0x240] sm:$0xff] }
 0x666   :  { %11665 = vmatprep.subr.bf16.mxu0 %v14132_v12  ;;  %v14228_v12 = vcombine.high %v8633_v46, %v8637_v52  ;;  %v8613_v8 = vld [vmem:[#allocation20 + $0x260] sm:$0xff] }
 0x667   :  { %8411 = vmatpush1.bf16.msra.mxu1 %v14009_v34  ;;  %v14105_v34 = vcombine.low %v6786_v50, %v6790_v31  ;;  %v6754_v50 = vld [vmem:[#allocation17 + $0x618] sm:$0xff] }
 0x668   :  { %8412 = vmatprep.subr.bf16.mxu1 %v14130_v45  ;;  %v14098_v45 = vcombine.high %v6778_v6, %v6782_v32  ;;  %v6758_v31 = vld [vmem:[#allocation17 + $0x638] sm:$0xff] }
 0x669   :  { %11666 = vmatpush1.bf16.msra.mxu0 %v14131_v19  ;;  %v14227_v19 = vcombine.low %v8633_v46, %v8637_v52  ;;  %v8601_v46 = vld [vmem:[#allocation20 + $0x200] sm:$0xff] }
 0x66a   :  { %11667 = vmatprep.subr.bf16.mxu0 %v14252_v59  ;;  %v14220_v59 = vcombine.high %v8625_v28, %v8629_v2  ;;  %v8605_v52 = vld [vmem:[#allocation20 + $0x220] sm:$0xff] }
 0x66b   :  { %8413 = vmatpush2.bf16.msra.mxu1 %v14129_v63  ;;  %v14097_v63 = vcombine.low %v6778_v6, %v6782_v32  ;;  %v14203_v6 = vcombine.low %v8609_v27, %v8613_v8  ;;  %v8721_v32 = vld [vmem:[#allocation20 + $0x5c0] sm:$0xff] }
 0x66c   :  { %8414 = vmatprep.subr.bf16.mxu1 %v14122_v47  ;;  %v14090_v47 = vcombine.high %v6770_v0, %v6774_v1 }
 0x66d   :  { %11668 = vmatpush2.bf16.msra.mxu0 %v14251_v5  ;;  %v14219_v5 = vcombine.low %v8625_v28, %v8629_v2  ;;  %v16306_v28 = vld [vmem:[#allocation20 + $0x9c0] sm:$0xff] }
 0x66e   :  { %11669 = vmatprep.subr.bf16.mxu0 %v14244_v61  ;;  %v14212_v61 = vcombine.high %v8617_v4, %v8621_v53  ;;  %v16308_v2 = vld [vmem:[#allocation20 + $0x9e0] sm:$0xff] }
 0x66f   :  { %8415 = vmatpush2.bf16.msra.mxu1 %v14121_v56  ;;  %v14089_v56 = vcombine.low %v6770_v0, %v6774_v1  ;;  %v14195_v1 = vcombine.low %v8601_v46, %v8605_v52 }
 0x670   :  { %8416 = vmatprep.subr.bf16.mxu1 %v14114_v21  ;;  %v14082_v21 = vcombine.high %v6762_v36, %v6766_v51 }
 0x671   :  { %11670 = vmatpush2.bf16.msra.mxu0 %v14243_v38  ;;  %v14211_v38 = vcombine.low %v8617_v4, %v8621_v53 }
 0x672   :  { %11671 = vmatprep.subr.bf16.mxu0 %v14236_v11  ;;  %v14204_v11 = vcombine.high %v8609_v27, %v8613_v8  ;;  %v6252_v27 = vadd.f32 %v16199_v44, %v16149_v48 }
 0x673   :  { %8417 = vmatpush2.bf16.msra.mxu1 %v14113_v7  ;;  %v14081_v7 = vcombine.low %v6762_v36, %v6766_v51  ;;  %v8705_v36 = vld [vmem:[#allocation20 + $0x540] sm:$0xff] }
 0x674   :  { %8418 = vmatprep.subr.bf16.mxu1 %v14106_v20  ;;  %v14074_v20 = vcombine.high %v6754_v50, %v6758_v31  ;;  %v8709_v51 = vld [vmem:[#allocation20 + $0x560] sm:$0xff] }
 0x675   :  { %11672 = vmatpush2.bf16.msra.mxu0 %v14235_v13  ;;  %v8725_v13 = vld [vmem:[#allocation20 + $0x5e0] sm:$0xff] }
 0x676   :  { %11673 = vmatprep.subr.bf16.mxu0 %v14228_v12  ;;  %v14196_v12 = vcombine.high %v8601_v46, %v8605_v52  ;;  %v14316_v0 = vcombine.high %v8721_v32, %v8725_v13  ;;  %v14315_v4 = vcombine.low %v8721_v32, %v8725_v13 }
 0x677   :  { %8419 = vmatpush2.bf16.msra.mxu1 %v14105_v34  ;;  %v14073_v34 = vcombine.low %v6754_v50, %v6758_v31 }
 0x678   :  { %8420 = vmatprep.subr.bf16.mxu1 %v14098_v45  ;;  %v8129_v45 = vpop.f32.mrf.mxu0 }
 0x679   :  { %11674 = vmatpush2.bf16.msra.mxu0 %v14227_v19  ;;  %v8713_v19 = vld [vmem:[#allocation20 + $0x580] sm:$0xff] }
 0x67a   :  { %11675 = vmatprep.subr.bf16.mxu0 %v14220_v59  ;;  %v8717_v59 = vld [vmem:[#allocation20 + $0x5a0] sm:$0xff]  ;;  %v8131_v53 = vpop.f32.mrf.mxu0 }
 0x67b   :  { %8421 = vmatpush2.bf16.msra.mxu1 %v14097_v63  ;;  %v14444_v63 = vcombine.high %v16306_v28, %v16308_v2  ;;  %v14307_v8 = vcombine.low %v8713_v19, %v8717_v59 }
 0x67c   :  { %8422 = vmatprep.subr.bf16.mxu1 %v14090_v47  ;;  %v14308_v47 = vcombine.high %v8713_v19, %v8717_v59  ;;  %v8133_v31 = vpop.f32.mrf.mxu0 }
 0x67d   :  { %11676 = vmatpush2.bf16.msra.mxu0 %v14219_v5  ;;  %v4673_v5 = vadd.f32 %v16155_v55, %v16151_v18  ;;  %v14300_v55 = vcombine.high %v8705_v36, %v8709_v51 }
 0x67e   :  { %11677 = vmatprep.subr.bf16.mxu0 %v14212_v61 }
 0x67f   :  { %8423 = vmatpush2.bf16.msra.mxu1 %v14089_v56  ;;  %v4675_v56 = vadd.f32 %v16157_v37, %v16153_v10  ;;  %v6254_v50 = vadd.f32 %v16205_v62, %v4673_v5  ;;  %v8697_v37 = vld [vmem:[#allocation20 + $0x500] sm:$0xff] }
 0x680   :  { %8424 = vmatprep.subr.bf16.mxu1 %v14082_v21  ;;  %v6250_v21 = vadd.f32 %v16195_v23, %v16144_v29 }
 0x681   :  { %11678 = vmatpush2.bf16.msra.mxu0 %v14211_v38  ;;  %v6256_v48 = vadd.f32 %v16207_v9, %v4675_v56  ;;  %v6297_v29 = vadd.f32 %v16231_v17, %v6254_v50  ;;  %v8841_v56 = vld [vmem:[#allocation20 + $0x980] sm:$0xff] }
 0x682   :  { %11679 = vmatprep.subr.bf16.mxu0 %v14204_v11  ;;  %v16323_v11 = vld [vmem:[#allocation19] sm:$0xff]  ;;  %v6293_v44 = vadd.f32 %v16227_v26, %v6250_v21 }
 0x683   :  { %8425 = vmatpush2.bf16.msra.mxu1 %v14081_v7  ;;  %v8701_v7 = vld [vmem:[#allocation20 + $0x520] sm:$0xff]  ;;  %v8464_v46 = vrot.slane %v16323_v11, %v15829_v40  ;;  %v8460_v32 = vrot.slane %v16323_v11, %v15835_v42  ;;  %v6299_v26 = vadd.f32 %v16233_v57, %v6256_v48 }
 0x684   :  { %8426 = vmatprep.subr.bf16.mxu1 %v14074_v20  ;;  %v14299_v20 = vcombine.low %v8705_v36, %v8709_v51  ;;  %v14292_v9 = vcombine.high %v8697_v37, %v8701_v7  ;;  %v14291_v59 = vcombine.low %v8697_v37, %v8701_v7  ;;  %v8685_v36 = vld [vmem:[#allocation20 + $0x4a0] sm:$0xff]  ;;  %v16341_v37 = vld [vmem:[#allocation20 + $0x1e8] sm:$0xff] }
 0x685   :  { %11680 = vmatpush2.bf16.msra.mxu0 %v14203_v6  ;;  %v8833_v48 = vld [vmem:[#allocation20 + $0x940] sm:$0xff] }
 0x686   :  { %11681 = vmatprep.subr.bf16.mxu0 %v14196_v12 }
 0x687   :  { %8427 = vmatpush2.bf16.msra.mxu1 %v14073_v34  ;;  %v8689_v34 = vld [vmem:[#allocation20 + $0x4c0] sm:$0xff] }
 0x688   :  { %11694 = vmatprep.subr.bf16.mxu1 %v14316_v0 }
 0x689   :  { %11682 = vmatpush2.bf16.msra.mxu0 %v14195_v1 }
 0x68a   :  { %v8172_v61 = vpop.f32.mrf.mxu1  ;;  %8429 = vmatmul.mubr.bf16.vlgmr.msra.gmra.mxu1 %v16129_v22  ;;  %11737 = vmatprep.subr.bf16.mxu0 %v14444_v63  ;;  %v6295_v22 = vadd.f32 %v16229_v54, %v6252_v27  ;;  %v8135_v54 = vpop.f32.mrf.mxu0  ;;  %v8845_v27 = vld [vmem:[#allocation20 + $0x9a0] sm:$0xff] }
 0x68b   :  { %11695 = vmatpush1.bf16.msra.mxu1 %v14315_v4  ;;  %v8173_v38 = vadd.f32 %v8172_v61, %v8129_v45  ;;  %v8693_v45 = vld [vmem:[#allocation20 + $0x4e0] sm:$0xff] }
 0x68c   :  { %v8174_v18 = vpop.f32.mrf.mxu1  ;;  %11696 = vmatprep.subr.bf16.mxu1 %v14308_v47  ;;  %v14284_v4 = vcombine.high %v8689_v34, %v8693_v45  ;;  %v8681_v47 = vld [vmem:[#allocation20 + $0x480] sm:$0xff]  ;;  %v14283_v57 = vcombine.low %v8689_v34, %v8693_v45 }
 0x68d   :  { %v8175_v10 = vadd.f32 %v8174_v18, %v8131_v53  ;;  %v8439_v6 = vadd.f32 %v8173_v38, %v6293_v44  ;;  %v14276_v21 = vcombine.high %v8681_v47, %v8685_v36  ;;  %v8677_v38 = vld [vmem:[#allocation20 + $0x460] sm:$0xff]  ;;  %v14443_v18 = vcombine.low %v16306_v28, %v16308_v2 }
 0x68e   :  { %v8176_v23 = vpop.f32.mrf.mxu1  ;;  %v14275_v7 = vcombine.low %v8681_v47, %v8685_v36  ;;  %v8837_v44 = vld [vmem:[#allocation20 + $0x960] sm:$0xff] }
 0x68f   :  { %v8440_v62 = vadd.f32 %v8175_v10, %v6295_v22  ;;  %v8177_v52 = vadd.f32 %v8176_v23, %v8133_v31  ;;  %11697 = vmatpush1.bf16.msra.mxu1 %v14307_v8  ;;  %v8497_v63 = vadd.f32 %v8460_v32, %v8439_v6  ;;  %v8673_v31 = vld [vmem:[#allocation20 + $0x440] sm:$0xff]  ;;  %v14436_v10 = vcombine.high %v8841_v56, %v8845_v27 }
 0x690   :  { %v8178_v13 = vpop.f32.mrf.mxu1  ;;  %11698 = vmatprep.subr.bf16.mxu1 %v14300_v55  ;;  %v16337_v55 = vld [vmem:[#allocation20 + $0x1c8] sm:$0xff]  ;;  %v14268_v28 = vcombine.high %v8673_v31, %v8677_v38  ;;  %v8665_v2 = vld [vmem:[#allocation20 + $0x400] sm:$0xff] }
 0x691   :  { %v8447_v12 = vadd.f32 %v8177_v52, %v6297_v29  ;;  %v8179_v17 = vadd.f32 %v8178_v13, %v8135_v54  ;;  %v8498_v0 = vadd.f32 %v8464_v46, %v8440_v62  ;;  %v8513_v8 = vmax.f32 %v8497_v63, 0.0  ;;  %v8669_v23 = vld [vmem:[#allocation20 + $0x420] sm:$0xff] }
 0x692   :  { %v14189_v29 = vcombine.low %v16337_v55, %v16341_v37  ;;  %v14435_v62 = vcombine.low %v8841_v56, %v8845_v27  ;;  %v14267_v52 = vcombine.low %v8673_v31, %v8677_v38  ;;  %v8829_v54 = vld [vmem:[#allocation20 + $0x920] sm:$0xff]  ;;  %v14260_v6 = vcombine.high %v8665_v2, %v8669_v23 }
 0x693   :  { %v8505_v1 = vadd.f32 %v8460_v32, %v8447_v12  ;;  %v8448_v19 = vadd.f32 %v8179_v17, %v6299_v26  ;;  %11699 = vmatpush1.bf16.msra.mxu1 %v14299_v20  ;;  %v8514_v5 = vmax.f32 %v8498_v0, 0.0  ;;  %v8825_v20 = vld [vmem:[#allocation20 + $0x900] sm:$0xff]  ;;  %v14259_v12 = vcombine.low %v8665_v2, %v8669_v23 }
 0x694   :  { %11700 = vmatprep.subr.bf16.mxu1 %v14292_v9  ;;  %v8785_v32 = vld [vmem:[#allocation20 + $0x7c0] sm:$0xff]  ;;  %v14427_v9 = vcombine.low %v8833_v48, %v8837_v44  ;;  %v14420_v26 = vcombine.high %v8825_v20, %v8829_v54 }
 0x695   :  { %v8506_v53 = vadd.f32 %v8464_v46, %v8448_v19  ;;  %v8521_v51 = vmax.f32 %v8505_v1, 0.0  ;;  %v14428_v46 = vcombine.high %v8833_v48, %v8837_v44  ;;  %v8789_v13 = vld [vmem:[#allocation20 + $0x7e0] sm:$0xff]  ;;  %v14419_v19 = vcombine.low %v8825_v20, %v8829_v54 }
 0x696   :  { %v8817_v17 = vld [vmem:[#allocation20 + $0x8c0] sm:$0xff]  ;;  %v14380_v45 = vcombine.high %v8785_v32, %v8789_v13  ;;  %v14379_v63 = vcombine.low %v8785_v32, %v8789_v13 }
 0x697   :  { %v8522_v61 = vmax.f32 %v8506_v53, 0.0  ;;  %11701 = vmatpush1.bf16.msra.mxu1 %v14291_v59  ;;  %v16339_v22 = vpack.c.bf16 %v8521_v51, %v8513_v8  ;;  %v8821_v34 = vld [vmem:[#allocation20 + $0x8e0] sm:$0xff] }
 0x698   :  { %11702 = vmatprep.subr.bf16.mxu1 %v14284_v4  ;;  %v8777_v0 = vld [vmem:[#allocation20 + $0x780] sm:$0xff]  ;;  %v14412_v59 = vcombine.high %v8817_v17, %v8821_v34 }
 0x699   :  { %v16333_v50 = vpack.c.bf16 %v8522_v61, %v8514_v5  ;;  %v8781_v1 = vld [vmem:[#allocation20 + $0x7a0] sm:$0xff]  ;;  %v14411_v5 = vcombine.low %v8817_v17, %v8821_v34 }
 0x69a   :  { %v8809_v4 = vld [vmem:[#allocation20 + $0x880] sm:$0xff]  ;;  %v14372_v47 = vcombine.high %v8777_v0, %v8781_v1 }
 0x69b   :  { %11683 = vmatprep.mubr.bf16.mxu0 %v16333_v50  ;;  %11703 = vmatpush1.bf16.msra.mxu1 %v14283_v57  ;;  %v8813_v53 = vld [vmem:[#allocation20 + $0x8a0] sm:$0xff]  ;;  %v14371_v57 = vcombine.low %v8777_v0, %v8781_v1 }
 0x69c   :  { %11684 = vmatmul.mubr.bf16.vlgmr.msra.gmra.mxu0 %v16339_v22  ;;  %11704 = vmatprep.subr.bf16.mxu1 %v14276_v21  ;;  %v8769_v36 = vld [vmem:[#allocation20 + $0x740] sm:$0xff]  ;;  %v14404_v61 = vcombine.high %v8809_v4, %v8813_v53  ;;  %v14403_v38 = vcombine.low %v8809_v4, %v8813_v53 }
 0x69d   :  { %11738 = vmatpush1.bf16.msra.mxu0 %v14443_v18  ;;  %v8773_v51 = vld [vmem:[#allocation20 + $0x760] sm:$0xff] }
 0x69e   :  { %11739 = vmatprep.subr.bf16.mxu0 %v14436_v10  ;;  %v8801_v56 = vld [vmem:[#allocation20 + $0x840] sm:$0xff]  ;;  %v14364_v8 = vcombine.high %v8769_v36, %v8773_v51  ;;  %v14363_v10 = vcombine.low %v8769_v36, %v8773_v51 }
 0x69f   :  { %11705 = vmatpush1.bf16.msra.mxu1 %v14275_v7  ;;  %v8805_v27 = vld [vmem:[#allocation20 + $0x860] sm:$0xff] }
 0x6a0   :  { %11706 = vmatprep.subr.bf16.mxu1 %v14268_v28  ;;  %v8761_v21 = vld [vmem:[#allocation20 + $0x700] sm:$0xff]  ;;  %v14396_v18 = vcombine.high %v8801_v56, %v8805_v27  ;;  %v14395_v23 = vcombine.low %v8801_v56, %v8805_v27 }
 0x6a1   :  { %11740 = vmatpush1.bf16.msra.mxu0 %v14435_v62  ;;  %v8765_v31 = vld [vmem:[#allocation20 + $0x720] sm:$0xff] }
 0x6a2   :  { %11741 = vmatprep.subr.bf16.mxu0 %v14428_v46  ;;  %v8793_v7 = vld [vmem:[#allocation20 + $0x800] sm:$0xff]  ;;  %v14356_v44 = vcombine.high %v8761_v21, %v8765_v31  ;;  %v14355_v46 = vcombine.low %v8761_v21, %v8765_v31 }
 0x6a3   :  { %11707 = vmatpush1.bf16.msra.mxu1 %v14267_v52  ;;  %v8797_v48 = vld [vmem:[#allocation20 + $0x820] sm:$0xff] }
 0x6a4   :  { %11708 = vmatprep.subr.bf16.mxu1 %v14260_v6  ;;  %v8753_v28 = vld [vmem:[#allocation20 + $0x6c0] sm:$0xff]  ;;  %v14388_v62 = vcombine.high %v8793_v7, %v8797_v48  ;;  %v14387_v13 = vcombine.low %v8793_v7, %v8797_v48  ;;  %v8215_v48 = vpop.f32.mrf.mxu0 }
 0x6a5   :  { %11742 = vmatpush1.bf16.msra.mxu0 %v14427_v9  ;;  %v8757_v2 = vld [vmem:[#allocation20 + $0x6e0] sm:$0xff] }
 0x6a6   :  { %11743 = vmatprep.subr.bf16.mxu0 %v14420_v26  ;;  %v8913_v52 = vld [vmem:[#allocation20 + $0xbc0] sm:$0xff]  ;;  %v14348_v54 = vcombine.high %v8753_v28, %v8757_v2  ;;  %v14347_v26 = vcombine.low %v8753_v28, %v8757_v2 }
 0x6a7   :  { %11709 = vmatpush1.bf16.msra.mxu1 %v14259_v12  ;;  %v8917_v20 = vld [vmem:[#allocation20 + $0xbe0] sm:$0xff] }
 0x6a8   :  { %11710 = vmatprep.subr.bf16.mxu1 %v14380_v45  ;;  %v8745_v6 = vld [vmem:[#allocation20 + $0x680] sm:$0xff]  ;;  %v14508_v9 = vcombine.high %v8913_v52, %v8917_v20  ;;  %v14507_v1 = vcombine.low %v8913_v52, %v8917_v20 }
 0x6a9   :  { %11744 = vmatpush1.bf16.msra.mxu0 %v14419_v19  ;;  %v8749_v32 = vld [vmem:[#allocation20 + $0x6a0] sm:$0xff] }
 0x6aa   :  { %11745 = vmatprep.subr.bf16.mxu0 %v14412_v59  ;;  %v8905_v12 = vld [vmem:[#allocation20 + $0xb80] sm:$0xff]  ;;  %v14340_v34 = vcombine.high %v8745_v6, %v8749_v32  ;;  %v14339_v59 = vcombine.low %v8745_v6, %v8749_v32 }
 0x6ab   :  { %11711 = vmatpush2.bf16.msra.mxu1 %v14379_v63  ;;  %v8909_v17 = vld [vmem:[#allocation20 + $0xba0] sm:$0xff] }
 0x6ac   :  { %11712 = vmatprep.subr.bf16.mxu1 %v14372_v47  ;;  %v8737_v45 = vld [vmem:[#allocation20 + $0x640] sm:$0xff]  ;;  %v14500_v19 = vcombine.high %v8905_v12, %v8909_v17  ;;  %v14499_v51 = vcombine.low %v8905_v12, %v8909_v17  ;;  %v8468_v17 = vrot.slane %v16323_v11, %v15838_v43 }
 0x6ad   :  { %11746 = vmatpush1.bf16.msra.mxu0 %v14411_v5  ;;  %v8741_v0 = vld [vmem:[#allocation20 + $0x660] sm:$0xff] }
 0x6ae   :  { %11747 = vmatprep.subr.bf16.mxu0 %v14404_v61  ;;  %v8897_v63 = vld [vmem:[#allocation20 + $0xb40] sm:$0xff]  ;;  %v14332_v53 = vcombine.high %v8737_v45, %v8741_v0  ;;  %v14331_v61 = vcombine.low %v8737_v45, %v8741_v0 }
 0x6af   :  { %11713 = vmatpush2.bf16.msra.mxu1 %v14371_v57  ;;  %v8901_v4 = vld [vmem:[#allocation20 + $0xb60] sm:$0xff] }
 0x6b0   :  { %11714 = vmatprep.subr.bf16.mxu1 %v14364_v8  ;;  %v8729_v47 = vld [vmem:[#allocation20 + $0x600] sm:$0xff]  ;;  %v14492_v5 = vcombine.high %v8897_v63, %v8901_v4  ;;  %v14491_v8 = vcombine.low %v8897_v63, %v8901_v4 }
 0x6b1   :  { %11748 = vmatpush1.bf16.msra.mxu0 %v14403_v38  ;;  %v8733_v36 = vld [vmem:[#allocation20 + $0x620] sm:$0xff] }
 0x6b2   :  { %11749 = vmatprep.subr.bf16.mxu0 %v14396_v18  ;;  %v8889_v57 = vld [vmem:[#allocation20 + $0xb00] sm:$0xff]  ;;  %v14324_v27 = vcombine.high %v8729_v47, %v8733_v36  ;;  %v14323_v18 = vcombine.low %v8729_v47, %v8733_v36 }
 0x6b3   :  { %11715 = vmatpush2.bf16.msra.mxu1 %v14363_v10  ;;  %v8893_v56 = vld [vmem:[#allocation20 + $0xb20] sm:$0xff] }
 0x6b4   :  { %11716 = vmatprep.subr.bf16.mxu1 %v14356_v44  ;;  %v16347_v21 = vld [vmem:[#allocation20 + $0xdc0] sm:$0xff]  ;;  %v14484_v38 = vcombine.high %v8889_v57, %v8893_v56  ;;  %v14483_v28 = vcombine.low %v8889_v57, %v8893_v56 }
 0x6b5   :  { %11750 = vmatpush1.bf16.msra.mxu0 %v14395_v23  ;;  %v16349_v31 = vld [vmem:[#allocation20 + $0xde0] sm:$0xff] }
 0x6b6   :  { %11751 = vmatprep.subr.bf16.mxu0 %v14388_v62  ;;  %v8881_v10 = vld [vmem:[#allocation20 + $0xac0] sm:$0xff]  ;;  %v14572_v44 = vcombine.high %v16347_v21, %v16349_v31 }
 0x6b7   :  { %11717 = vmatpush2.bf16.msra.mxu1 %v14355_v46  ;;  %v8885_v7 = vld [vmem:[#allocation20 + $0xae0] sm:$0xff]  ;;  %v8217_v46 = vpop.f32.mrf.mxu0 }
 0x6b8   :  { %11718 = vmatprep.subr.bf16.mxu1 %v14348_v54  ;;  %v14476_v2 = vcombine.high %v8881_v10, %v8885_v7  ;;  %v8873_v23 = vld [vmem:[#allocation20 + $0xa80] sm:$0xff]  ;;  %v14475_v52 = vcombine.low %v8881_v10, %v8885_v7  ;;  %v14190_v7 = vcombine.high %v16337_v55, %v16341_v37  ;;  %v8558_v55 = vld [vmem:[#allocation20 + $0xa8] sm:$0xff] }
 0x6b9   :  { %11752 = vmatpush1.bf16.msra.mxu0 %v14387_v13  ;;  %v8877_v62 = vld [vmem:[#allocation20 + $0xaa0] sm:$0xff] }
 0x6ba   :  { %11753 = vmatprep.subr.bf16.mxu0 %v14508_v9  ;;  %v14468_v54 = vcombine.high %v8873_v23, %v8877_v62  ;;  %v8865_v32 = vld [vmem:[#allocation20 + $0xa40] sm:$0xff]  ;;  %v8219_v9 = vpop.f32.mrf.mxu0  ;;  %v14467_v45 = vcombine.low %v8873_v23, %v8877_v62  ;;  %v16369_v62 = vld [vmem:[#allocation20 + $0x5c8] sm:$0xff] }
 0x6bb   :  { %11719 = vmatpush2.bf16.msra.mxu1 %v14347_v26  ;;  %v8869_v13 = vld [vmem:[#allocation20 + $0xa60] sm:$0xff] }
 0x6bc   :  { %11720 = vmatprep.subr.bf16.mxu1 %v14340_v34  ;;  %v8857_v4 = vld [vmem:[#allocation20 + $0xa00] sm:$0xff]  ;;  %v8221_v47 = vpop.f32.mrf.mxu0 }
 0x6bd   :  { %11754 = vmatpush2.bf16.msra.mxu0 %v14507_v1  ;;  %v14460_v1 = vcombine.high %v8865_v32, %v8869_v13 }
 0x6be   :  { %11755 = vmatprep.subr.bf16.mxu0 %v14500_v19 }
 0x6bf   :  { %11721 = vmatpush2.bf16.msra.mxu1 %v14339_v59  ;;  %v8472_v59 = vrot.slane %v16323_v11, %v15832_v41 }
 0x6c0   :  { %11722 = vmatprep.subr.bf16.mxu1 %v14332_v53  ;;  %v8861_v53 = vld [vmem:[#allocation20 + $0xa20] sm:$0xff] }
 0x6c1   :  { %11756 = vmatpush2.bf16.msra.mxu0 %v14499_v51  ;;  %v14452_v57 = vcombine.high %v8857_v4, %v8861_v53  ;;  %v14451_v10 = vcombine.low %v8857_v4, %v8861_v53  ;;  %v8933_v4 = vld [vmem:[#allocation20 + $0xc60] sm:$0xff] }
 0x6c2   :  { %11757 = vmatprep.subr.bf16.mxu0 %v14492_v5 }
 0x6c3   :  { %11723 = vmatpush2.bf16.msra.mxu1 %v14331_v61  ;;  %v14459_v61 = vcombine.low %v8865_v32, %v8869_v13 }
 0x6c4   :  { %11724 = vmatprep.subr.bf16.mxu1 %v14324_v27 }
 0x6c5   :  { %11758 = vmatpush2.bf16.msra.mxu0 %v14491_v8 }
 0x6c6   :  { %11759 = vmatprep.subr.bf16.mxu0 %v14484_v38 }
 0x6c7   :  { %11725 = vmatpush2.bf16.msra.mxu1 %v14323_v18 }
 0x6c8   :  { %11780 = vmatprep.subr.bf16.mxu1 %v14572_v44 }
 0x6c9   :  { %11760 = vmatpush2.bf16.msra.mxu0 %v14483_v28  ;;  %v8969_v28 = vld [vmem:[#allocation20 + $0xd80] sm:$0xff] }
 0x6ca   :  { %v8258_v20 = vpop.f32.mrf.mxu1  ;;  %11761 = vmatprep.subr.bf16.mxu0 %v14476_v2  ;;  %v8973_v2 = vld [vmem:[#allocation20 + $0xda0] sm:$0xff] }
 0x6cb   :  { %v8259_v6 = vadd.f32 %v8258_v20, %v8215_v48  ;;  %v8961_v20 = vld [vmem:[#allocation20 + $0xd40] sm:$0xff]  ;;  %v14563_v32 = vcombine.low %v8969_v28, %v8973_v2 }
 0x6cc   :  { %v8260_v26 = vpop.f32.mrf.mxu1 }
 0x6cd   :  { %v8441_v12 = vadd.f32 %v8259_v6, %v16237_v25  ;;  %v8261_v34 = vadd.f32 %v8260_v26, %v8217_v46  ;;  %11762 = vmatpush2.bf16.msra.mxu0 %v14475_v52  ;;  %v16371_v46 = vld [vmem:[#allocation20 + $0x5e8] sm:$0xff]  ;;  %v14564_v52 = vcombine.high %v8969_v28, %v8973_v2  ;;  %v9017_v28 = vld [vmem:[#allocation20 + $0xf00] sm:$0xff] }
 0x6ce   :  { %v8262_v0 = vpop.f32.mrf.mxu1  ;;  %11763 = vmatprep.subr.bf16.mxu0 %v14468_v54  ;;  %v8965_v54 = vld [vmem:[#allocation20 + $0xd60] sm:$0xff]  ;;  %v14317_v6 = vcombine.low %v16369_v62, %v16371_v46 }
 0x6cf   :  { %v8442_v19 = vadd.f32 %v8261_v34, %v16245_v58  ;;  %v8263_v63 = vadd.f32 %v8262_v0, %v8219_v9  ;;  %v8499_v25 = vadd.f32 %v8468_v17, %v8441_v12  ;;  %v14556_v13 = vcombine.high %v8961_v20, %v8965_v54  ;;  %v8945_v12 = vld [vmem:[#allocation20 + $0xcc0] sm:$0xff] }
 0x6d0   :  { %v8264_v36 = vpop.f32.mrf.mxu1  ;;  %v14555_v9 = vcombine.low %v8961_v20, %v8965_v54  ;;  %v8937_v0 = vld [vmem:[#allocation20 + $0xc80] sm:$0xff] }
 0x6d1   :  { %v8449_v51 = vadd.f32 %v8263_v63, %v16252_v33  ;;  %v8265_v5 = vadd.f32 %v8264_v36, %v8221_v47  ;;  %11764 = vmatpush2.bf16.msra.mxu0 %v14467_v45  ;;  %v8500_v56 = vadd.f32 %v8472_v59, %v8442_v19  ;;  %v8515_v8 = vmax.f32 %v8499_v25, 0.0  ;;  %v8929_v63 = vld [vmem:[#allocation20 + $0xc40] sm:$0xff] }
 0x6d2   :  { %11765 = vmatprep.subr.bf16.mxu0 %v14460_v1  ;;  %v8941_v1 = vld [vmem:[#allocation20 + $0xca0] sm:$0xff]  ;;  %v14524_v47 = vcombine.high %v8929_v63, %v8933_v4 }
 0x6d3   :  { %v8507_v27 = vadd.f32 %v8468_v17, %v8449_v51  ;;  %v8450_v58 = vadd.f32 %v8265_v5, %v16258_v49  ;;  %v8516_v48 = vmax.f32 %v8500_v56, 0.0  ;;  %v14571_v49 = vcombine.low %v16347_v21, %v16349_v31  ;;  %v8953_v21 = vld [vmem:[#allocation20 + $0xd00] sm:$0xff] }
 0x6d4   :  { %v8957_v31 = vld [vmem:[#allocation20 + $0xd20] sm:$0xff]  ;;  %v14531_v53 = vcombine.low %v8937_v0, %v8941_v1  ;;  %v14523_v51 = vcombine.low %v8929_v63, %v8933_v4 }
 0x6d5   :  { %v8523_v38 = vmax.f32 %v8507_v27, 0.0  ;;  %v8508_v18 = vadd.f32 %v8472_v59, %v8450_v58  ;;  %11766 = vmatpush2.bf16.msra.mxu0 %v14459_v61  ;;  %v14548_v26 = vcombine.high %v8953_v21, %v8957_v31  ;;  %v8949_v17 = vld [vmem:[#allocation20 + $0xce0] sm:$0xff]  ;;  %v14547_v34 = vcombine.low %v8953_v21, %v8957_v31 }
 0x6d6   :  { %11767 = vmatprep.subr.bf16.mxu0 %v14452_v57  ;;  %v14540_v45 = vcombine.high %v8945_v12, %v8949_v17  ;;  %v14539_v19 = vcombine.low %v8945_v12, %v8949_v17  ;;  %v14532_v59 = vcombine.high %v8937_v0, %v8941_v1  ;;  %v8921_v36 = vld [vmem:[#allocation20 + $0xc00] sm:$0xff]  ;;  %v8475_v12 = vsub.s32 4, %v15826_v39 }
 0x6d7   :  { %v16363_v33 = vpack.c.bf16 %v8523_v38, %v8515_v8  ;;  %v8524_v44 = vmax.f32 %v8508_v18, 0.0  ;;  %v8925_v25 = vld [vmem:[#allocation20 + $0xc20] sm:$0xff]  ;;  %v8479_v1 = vsub.s32 5, %v15826_v39 }
 0x6d8   :  { %v14516_v5 = vcombine.high %v8921_v36, %v8925_v25  ;;  %v9041_v61 = vld [vmem:[#allocation20 + $0xfc0] sm:$0xff]  ;;  %v14515_v56 = vcombine.low %v8921_v36, %v8925_v25 }
 0x6d9   :  { %v16365_v23 = vpack.c.bf16 %v8524_v44, %v8516_v48  ;;  %11768 = vmatpush2.bf16.msra.mxu0 %v14451_v10  ;;  %v9045_v57 = vld [vmem:[#allocation20 + $0xfe0] sm:$0xff] }
 0x6da   :  { %11823 = vmatprep.subr.bf16.mxu0 %v14190_v7  ;;  %v14636_v27 = vcombine.high %v9041_v61, %v9045_v57  ;;  %v9033_v58 = vld [vmem:[#allocation20 + $0xf80] sm:$0xff]  ;;  %v14635_v38 = vcombine.low %v9041_v61, %v9045_v57  ;;  %v8480_v57 = vrot.slane %v16323_v11, %v8479_v1 }
 0x6db   :  { %11726 = vmatprep.mubr.bf16.mxu1 %v16365_v23  ;;  %v9037_v8 = vld [vmem:[#allocation20 + $0xfa0] sm:$0xff] }
 0x6dc   :  { %11727 = vmatmul.mubr.bf16.vlgmr.msra.gmra.mxu1 %v16363_v33  ;;  %v14628_v18 = vcombine.high %v9033_v58, %v9037_v8  ;;  %v9025_v10 = vld [vmem:[#allocation20 + $0xf40] sm:$0xff]  ;;  %v14627_v48 = vcombine.low %v9033_v58, %v9037_v8 }
 0x6dd   :  { %11781 = vmatpush1.bf16.msra.mxu1 %v14571_v49  ;;  %v9029_v7 = vld [vmem:[#allocation20 + $0xf60] sm:$0xff] }
 0x6de   :  { %11782 = vmatprep.subr.bf16.mxu1 %v14564_v52  ;;  %v14620_v44 = vcombine.high %v9025_v10, %v9029_v7  ;;  %v9021_v2 = vld [vmem:[#allocation20 + $0xf20] sm:$0xff]  ;;  %v14619_v49 = vcombine.low %v9025_v10, %v9029_v7 }
 0x6df   :  { %v14612_v52 = vcombine.high %v9017_v28, %v9021_v2  ;;  %v9009_v20 = vld [vmem:[#allocation20 + $0xec0] sm:$0xff] }
 0x6e0   :  { %v9013_v54 = vld [vmem:[#allocation20 + $0xee0] sm:$0xff] }
 0x6e1   :  { %11783 = vmatpush1.bf16.msra.mxu1 %v14563_v32  ;;  %v8301_v32 = vpop.f32.mrf.mxu0  ;;  %v14604_v21 = vcombine.high %v9009_v20, %v9013_v54  ;;  %v9001_v31 = vld [vmem:[#allocation20 + $0xe80] sm:$0xff]  ;;  %v14603_v17 = vcombine.low %v9009_v20, %v9013_v54  ;;  %v14318_v54 = vcombine.high %v16369_v62, %v16371_v46 }
 0x6e2   :  { %11784 = vmatprep.subr.bf16.mxu1 %v14556_v13  ;;  %v14611_v13 = vcombine.low %v9017_v28, %v9021_v2  ;;  %v8989_v58 = vld [vmem:[#allocation20 + $0xe20] sm:$0xff] }
 0x6e5   :  { %11785 = vmatpush1.bf16.msra.mxu1 %v14555_v9  ;;  %v9005_v9 = vld [vmem:[#allocation20 + $0xea0] sm:$0xff] }
 0x6e6   :  { %11786 = vmatprep.subr.bf16.mxu1 %v14548_v26  ;;  %v8303_v26 = vpop.f32.mrf.mxu0  ;;  %v14595_v25 = vcombine.low %v9001_v31, %v9005_v9 }
 0x6e8   :  { %v8305_v63 = vpop.f32.mrf.mxu0 }
 0x6e9   :  { %11787 = vmatpush1.bf16.msra.mxu1 %v14547_v34 }
 0x6ea   :  { %11788 = vmatprep.subr.bf16.mxu1 %v14540_v45  ;;  %v14596_v45 = vcombine.high %v9001_v31, %v9005_v9  ;;  %v8590_v31 = vld [vmem:[#allocation20 + $0x1a8] sm:$0xff] }
 0x6ed   :  { %11789 = vmatpush1.bf16.msra.mxu1 %v14539_v19  ;;  %v8993_v19 = vld [vmem:[#allocation20 + $0xe40] sm:$0xff] }
 0x6ee   :  { %11790 = vmatprep.subr.bf16.mxu1 %v14532_v59  ;;  %v8997_v59 = vld [vmem:[#allocation20 + $0xe60] sm:$0xff] }
 0x6ef   :  { %v14587_v7 = vcombine.low %v8993_v19, %v8997_v59 }
 0x6f1   :  { %11791 = vmatpush1.bf16.msra.mxu1 %v14531_v53 }
 0x6f2   :  { %11792 = vmatprep.subr.bf16.mxu1 %v14524_v47  ;;  %v8476_v47 = vrot.slane %v16323_v11, %v8475_v12 }
 0x6f5   :  { %11793 = vmatpush1.bf16.msra.mxu1 %v14523_v51 }
 0x6f6   :  { %11794 = vmatprep.subr.bf16.mxu1 %v14516_v5  ;;  %v14588_v5 = vcombine.high %v8993_v19, %v8997_v59  ;;  %v8574_v19 = vld [vmem:[#allocation20 + $0x128] sm:$0xff] }
 0x6f9   :  { %11795 = vmatpush1.bf16.msra.mxu1 %v14515_v56 }
 0x6fa   :  { %11796 = vmatprep.subr.bf16.mxu1 %v14636_v27  ;;  %v8985_v27 = vld [vmem:[#allocation20 + $0xe00] sm:$0xff] }
 0x6fb   :  { %v14579_v20 = vcombine.low %v8985_v27, %v8989_v58 }
 0x6fd   :  { %11797 = vmatpush2.bf16.msra.mxu1 %v14635_v38 }
 0x6fe   :  { %11798 = vmatprep.subr.bf16.mxu1 %v14628_v18 }
 0x701   :  { %11799 = vmatpush2.bf16.msra.mxu1 %v14627_v48  ;;  %v14580_v48 = vcombine.high %v8985_v27, %v8989_v58  ;;  %v8542_v27 = vld [vmem:[#allocation20 + $0x28] sm:$0xff] }
 0x702   :  { %11800 = vmatprep.subr.bf16.mxu1 %v14620_v44 }
 0x705   :  { %11801 = vmatpush2.bf16.msra.mxu1 %v14619_v49 }
 0x706   :  { %11802 = vmatprep.subr.bf16.mxu1 %v14612_v52 }
 0x709   :  { %11803 = vmatpush2.bf16.msra.mxu1 %v14611_v13 }
 0x70a   :  { %v8344_v34 = vpop.f32.mrf.mxu1  ;;  %11804 = vmatprep.subr.bf16.mxu1 %v14604_v21  ;;  %v8586_v21 = vld [vmem:[#allocation20 + $0x188] sm:$0xff] }
 0x70b   :  { %v8345_v0 = vadd.f32 %v8344_v34, %v8301_v32  ;;  %v14181_v34 = vcombine.low %v8586_v21, %v8590_v31 }
 0x70c   :  { %v8346_v4 = vpop.f32.mrf.mxu1 }
 0x70d   :  { %v8443_v53 = vadd.f32 %v8345_v0, %v16265_v24  ;;  %v8347_v36 = vadd.f32 %v8346_v4, %v8303_v26  ;;  %11805 = vmatpush2.bf16.msra.mxu1 %v14603_v17  ;;  %v8307_v24 = vpop.f32.mrf.mxu0  ;;  %v14182_v26 = vcombine.high %v8586_v21, %v8590_v31  ;;  %v8582_v17 = vld [vmem:[#allocation20 + $0x168] sm:$0xff] }
 0x70e   :  { %v8348_v51 = vpop.f32.mrf.mxu1  ;;  %11806 = vmatprep.subr.bf16.mxu1 %v14596_v45  ;;  %v8570_v0 = vld [vmem:[#allocation20 + $0x108] sm:$0xff] }
 0x70f   :  { %v8444_v61 = vadd.f32 %v8347_v36, %v16273_v16  ;;  %v8349_v56 = vadd.f32 %v8348_v51, %v8305_v63  ;;  %v8501_v38 = vadd.f32 %v8476_v47, %v8443_v53  ;;  %v14166_v63 = vcombine.high %v8570_v0, %v8574_v19  ;;  %v8562_v4 = vld [vmem:[#allocation20 + $0xc8] sm:$0xff] }
 0x710   :  { %v8350_v8 = vpop.f32.mrf.mxu1  ;;  %v8566_v53 = vld [vmem:[#allocation20 + $0xe8] sm:$0xff] }
 0x711   :  { %v8451_v18 = vadd.f32 %v8349_v56, %v16280_v15  ;;  %v8351_v10 = vadd.f32 %v8350_v8, %v8307_v24  ;;  %11807 = vmatpush2.bf16.msra.mxu1 %v14595_v25  ;;  %v8502_v44 = vadd.f32 %v8480_v57, %v8444_v61  ;;  %v8517_v2 = vmax.f32 %v8501_v38, 0.0  ;;  %v8554_v25 = vld [vmem:[#allocation20 + $0x88] sm:$0xff] }
 0x712   :  { %11808 = vmatprep.subr.bf16.mxu1 %v14588_v5  ;;  %v14158_v36 = vcombine.high %v8562_v4, %v8566_v53  ;;  %v14157_v37 = vcombine.low %v8562_v4, %v8566_v53  ;;  %v8546_v51 = vld [vmem:[#allocation20 + $0x48] sm:$0xff]  ;;  %v14149_v61 = vcombine.low %v8554_v25, %v8558_v55 }
 0x713   :  { %v8509_v28 = vadd.f32 %v8476_v47, %v8451_v18  ;;  %v8452_v16 = vadd.f32 %v8351_v10, %v16286_v14  ;;  %v8518_v32 = vmax.f32 %v8502_v44, 0.0  ;;  %v8578_v14 = vld [vmem:[#allocation20 + $0x148] sm:$0xff]  ;;  %v14165_v47 = vcombine.low %v8570_v0, %v8574_v19 }
 0x714   :  { %v14174_v45 = vcombine.high %v8578_v14, %v8582_v17  ;;  %v14173_v59 = vcombine.low %v8578_v14, %v8582_v17  ;;  %v8550_v5 = vld [vmem:[#allocation20 + $0x68] sm:$0xff]  ;;  %v8483_v19 = vsub.s32 6, %v15826_v39 }
 0x715   :  { %v8525_v49 = vmax.f32 %v8509_v28, 0.0  ;;  %v8510_v52 = vadd.f32 %v8480_v57, %v8452_v16  ;;  %11809 = vmatpush2.bf16.msra.mxu1 %v14587_v7  ;;  %v14142_v57 = vcombine.high %v8546_v51, %v8550_v5  ;;  %v8538_v56 = vld [vmem:[#allocation20 + $0x8] sm:$0xff]  ;;  %v14141_v58 = vcombine.low %v8546_v51, %v8550_v5 }
 0x716   :  { %11810 = vmatprep.subr.bf16.mxu1 %v14580_v48  ;;  %v14134_v24 = vcombine.high %v8538_v56, %v8542_v27  ;;  %v8658_v8 = vld [vmem:[#allocation20 + $0x3c8] sm:$0xff]  ;;  %v14133_v18 = vcombine.low %v8538_v56, %v8542_v27  ;;  %v8484_v51 = vrot.slane %v16323_v11, %v8483_v19 }
 0x717   :  { %v16391_v15 = vpack.c.bf16 %v8525_v49, %v8517_v2  ;;  %v8526_v13 = vmax.f32 %v8510_v52, 0.0  ;;  %v8662_v38 = vld [vmem:[#allocation20 + $0x3e8] sm:$0xff] }
 0x718   :  { %v14254_v10 = vcombine.high %v8658_v8, %v8662_v38  ;;  %v8650_v7 = vld [vmem:[#allocation20 + $0x388] sm:$0xff]  ;;  %v14253_v44 = vcombine.low %v8658_v8, %v8662_v38 }
 0x719   :  { %v16393_v9 = vpack.c.bf16 %v8526_v13, %v8518_v32  ;;  %11811 = vmatpush2.bf16.msra.mxu1 %v14579_v20  ;;  %v8654_v48 = vld [vmem:[#allocation20 + $0x3a8] sm:$0xff] }
 0x71a   :  { %11866 = vmatprep.subr.bf16.mxu1 %v14318_v54  ;;  %v14246_v28 = vcombine.high %v8650_v7, %v8654_v48  ;;  %v8642_v16 = vld [vmem:[#allocation20 + $0x348] sm:$0xff]  ;;  %v14245_v49 = vcombine.low %v8650_v7, %v8654_v48 }
 0x71b   :  { %11769 = vmatprep.mubr.bf16.mxu0 %v16393_v9  ;;  %v8646_v2 = vld [vmem:[#allocation20 + $0x368] sm:$0xff] }
 0x71c   :  { %11770 = vmatmul.mubr.bf16.vlgmr.msra.gmra.mxu0 %v16391_v15  ;;  %v14238_v52 = vcombine.high %v8642_v16, %v8646_v2  ;;  %v8634_v20 = vld [vmem:[#allocation20 + $0x308] sm:$0xff]  ;;  %v14237_v32 = vcombine.low %v8642_v16, %v8646_v2 }
 0x71d   :  { %11824 = vmatpush1.bf16.msra.mxu0 %v14189_v29  ;;  %11855 = vmatprep.mubr.bf16.mxu0 %v16333_v50  ;;  %v14150_v29 = vcombine.high %v8554_v25, %v8558_v55  ;;  %v8638_v54 = vld [vmem:[#allocation20 + $0x328] sm:$0xff] }
 0x71e   :  { %11825 = vmatprep.subr.bf16.mxu0 %v14182_v26  ;;  %v14230_v13 = vcombine.high %v8634_v20, %v8638_v54  ;;  %v8626_v21 = vld [vmem:[#allocation20 + $0x2c8] sm:$0xff]  ;;  %v8387_v26 = vpop.f32.mrf.mxu0  ;;  %v14229_v14 = vcombine.low %v8634_v20, %v8638_v54 }
 0x71f   :  { %v8630_v31 = vld [vmem:[#allocation20 + $0x2e8] sm:$0xff] }
 0x720   :  { %v14222_v17 = vcombine.high %v8626_v21, %v8630_v31  ;;  %v8389_v0 = vpop.f32.mrf.mxu0  ;;  %v8614_v25 = vld [vmem:[#allocation20 + $0x268] sm:$0xff] }
 0x721   :  { %11826 = vmatpush1.bf16.msra.mxu0 %v14181_v34  ;;  %v8618_v34 = vld [vmem:[#allocation20 + $0x288] sm:$0xff] }
 0x722   :  { %11827 = vmatprep.subr.bf16.mxu0 %v14174_v45  ;;  %v8622_v45 = vld [vmem:[#allocation20 + $0x2a8] sm:$0xff]  ;;  %v8391_v55 = vpop.f32.mrf.mxu0 }
 0x723   :  { %v14214_v4 = vcombine.high %v8618_v34, %v8622_v45  ;;  %v8602_v8 = vld [vmem:[#allocation20 + $0x208] sm:$0xff] }
 0x724   :  { %v8606_v38 = vld [vmem:[#allocation20 + $0x228] sm:$0xff] }
 0x725   :  { %11828 = vmatpush1.bf16.msra.mxu0 %v14173_v59  ;;  %v14221_v59 = vcombine.low %v8626_v21, %v8630_v31 }
 0x726   :  { %11829 = vmatprep.subr.bf16.mxu0 %v14166_v63 }
 0x729   :  { %11830 = vmatpush1.bf16.msra.mxu0 %v14165_v47  ;;  %v8487_v47 = vsub.s32 7, %v15826_v39 }
 0x72a   :  { %11831 = vmatprep.subr.bf16.mxu0 %v14158_v36  ;;  %v8610_v36 = vld [vmem:[#allocation20 + $0x248] sm:$0xff] }
 0x72b   :  { %v14206_v56 = vcombine.high %v8610_v36, %v8614_v25 }
 0x72d   :  { %11832 = vmatpush1.bf16.msra.mxu0 %v14157_v37 }
 0x72e   :  { %11833 = vmatprep.subr.bf16.mxu0 %v14150_v29 }
 0x731   :  { %11834 = vmatpush1.bf16.msra.mxu0 %v14149_v61  ;;  %v14213_v61 = vcombine.low %v8618_v34, %v8622_v45  ;;  %v8846_v34 = vld [vmem:[#allocation20 + $0x9a8] sm:$0xff] }
 0x732   :  { %11835 = vmatprep.subr.bf16.mxu0 %v14142_v57 }
 0x735   :  { %11836 = vmatpush1.bf16.msra.mxu0 %v14141_v58  ;;  %v8488_v58 = vrot.slane %v16323_v11, %v8487_v47 }
 0x736   :  { %11837 = vmatprep.subr.bf16.mxu0 %v14134_v24 }
 0x739   :  { %11838 = vmatpush1.bf16.msra.mxu0 %v14133_v18 }
 0x73a   :  { %11839 = vmatprep.subr.bf16.mxu0 %v14254_v10 }
 0x73d   :  { %11840 = vmatpush2.bf16.msra.mxu0 %v14253_v44  ;;  %v14205_v44 = vcombine.low %v8610_v36, %v8614_v25  ;;  %v8838_v36 = vld [vmem:[#allocation20 + $0x968] sm:$0xff] }
 0x73e   :  { %11841 = vmatprep.subr.bf16.mxu0 %v14246_v28  ;;  %v14198_v28 = vcombine.high %v8602_v8, %v8606_v38 }
 0x741   :  { %11842 = vmatpush2.bf16.msra.mxu0 %v14245_v49  ;;  %v8850_v49 = vld [vmem:[#allocation20 + $0x9c8] sm:$0xff] }
 0x742   :  { %11843 = vmatprep.subr.bf16.mxu0 %v14238_v52  ;;  %v8854_v52 = vld [vmem:[#allocation20 + $0x9e8] sm:$0xff] }
 0x745   :  { %11844 = vmatpush2.bf16.msra.mxu0 %v14237_v32  ;;  %v14197_v32 = vcombine.low %v8602_v8, %v8606_v38  ;;  %v8822_v8 = vld [vmem:[#allocation20 + $0x8e8] sm:$0xff] }
 0x746   :  { %11845 = vmatprep.subr.bf16.mxu0 %v14230_v13  ;;  %v14446_v13 = vcombine.high %v8850_v49, %v8854_v52 }
 0x749   :  { %11846 = vmatpush2.bf16.msra.mxu0 %v14229_v14  ;;  %v8718_v14 = vld [vmem:[#allocation20 + $0x5a8] sm:$0xff] }
 0x74a   :  { %v8430_v63 = vpop.f32.mrf.mxu1  ;;  %11847 = vmatprep.subr.bf16.mxu0 %v14222_v17  ;;  %v8842_v17 = vld [vmem:[#allocation20 + $0x988] sm:$0xff] }
 0x74b   :  { %v8431_v53 = vadd.f32 %v8430_v63, %v8387_v26  ;;  %v8714_v26 = vld [vmem:[#allocation20 + $0x588] sm:$0xff]  ;;  %v14438_v63 = vcombine.high %v8842_v17, %v8846_v34 }
 0x74c   :  { %v8432_v37 = vpop.f32.mrf.mxu1  ;;  %v14309_v25 = vcombine.low %v8714_v26, %v8718_v14 }
 0x74d   :  { %v8445_v29 = vadd.f32 %v8431_v53, %v16293_v3  ;;  %v8433_v5 = vadd.f32 %v8432_v37, %v8389_v0  ;;  %11848 = vmatpush2.bf16.msra.mxu0 %v14221_v59  ;;  %v8393_v3 = vpop.f32.mrf.mxu0  ;;  %v8706_v0 = vld [vmem:[#allocation20 + $0x548] sm:$0xff]  ;;  %v14310_v59 = vcombine.high %v8714_v26, %v8718_v14 }
 0x74e   :  { %v8434_v57 = vpop.f32.mrf.mxu1  ;;  %11849 = vmatprep.subr.bf16.mxu0 %v14214_v4  ;;  %v8710_v4 = vld [vmem:[#allocation20 + $0x568] sm:$0xff] }
 0x74f   :  { %v8446_v27 = vadd.f32 %v8433_v5, %v16298_v30  ;;  %v8435_v24 = vadd.f32 %v8434_v57, %v8391_v55  ;;  %v8503_v10 = vadd.f32 %v8484_v51, %v8445_v29  ;;  %v8834_v53 = vld [vmem:[#allocation20 + $0x948] sm:$0xff]  ;;  %v14437_v55 = vcombine.low %v8842_v17, %v8846_v34 }
 0x750   :  { %v8436_v18 = vpop.f32.mrf.mxu1  ;;  %v14302_v37 = vcombine.high %v8706_v0, %v8710_v4  ;;  %v14430_v29 = vcombine.high %v8834_v53, %v8838_v36  ;;  %v8702_v5 = vld [vmem:[#allocation20 + $0x528] sm:$0xff]  ;;  %v14429_v62 = vcombine.low %v8834_v53, %v8838_v36 }
 0x751   :  { %v8453_v7 = vadd.f32 %v8435_v24, %v16301_v35  ;;  %v8437_v48 = vadd.f32 %v8436_v18, %v8393_v3  ;;  %11850 = vmatpush2.bf16.msra.mxu0 %v14213_v61  ;;  %v8504_v16 = vadd.f32 %v8488_v58, %v8446_v27  ;;  %v8519_v11 = vmax.f32 %v8503_v10, 0.0  ;;  %v8826_v61 = vld [vmem:[#allocation20 + $0x908] sm:$0xff] }
 0x752   :  { %11851 = vmatprep.subr.bf16.mxu0 %v14206_v56  ;;  %v8830_v57 = vld [vmem:[#allocation20 + $0x928] sm:$0xff]  ;;  %v14301_v56 = vcombine.low %v8706_v0, %v8710_v4 }
 0x753   :  { %v8511_v2 = vadd.f32 %v8484_v51, %v8453_v7  ;;  %v8454_v30 = vadd.f32 %v8437_v48, %v16304_v60  ;;  %v8520_v21 = vmax.f32 %v8504_v16, 0.0  ;;  %v14445_v60 = vcombine.low %v8850_v49, %v8854_v52  ;;  %v8698_v51 = vld [vmem:[#allocation20 + $0x508] sm:$0xff] }
 0x754   :  { %v14294_v46 = vcombine.high %v8698_v51, %v8702_v5  ;;  %v8690_v27 = vld [vmem:[#allocation20 + $0x4c8] sm:$0xff]  ;;  %v14293_v38 = vcombine.low %v8698_v51, %v8702_v5  ;;  %v14421_v3 = vcombine.low %v8826_v61, %v8830_v57 }
 0x755   :  { %v8527_v20 = vmax.f32 %v8511_v2, 0.0  ;;  %v8512_v54 = vadd.f32 %v8488_v58, %v8454_v30  ;;  %11852 = vmatpush2.bf16.msra.mxu0 %v14205_v44  ;;  %v8694_v58 = vld [vmem:[#allocation20 + $0x4e8] sm:$0xff] }
 0x756   :  { %11853 = vmatprep.subr.bf16.mxu0 %v14198_v28  ;;  %v8818_v24 = vld [vmem:[#allocation20 + $0x8c8] sm:$0xff]  ;;  %v14286_v18 = vcombine.high %v8690_v27, %v8694_v58  ;;  %v14285_v16 = vcombine.low %v8690_v27, %v8694_v58 }
 0x757   :  { %v16413_v35 = vpack.c.bf16 %v8527_v20, %v8519_v11  ;;  %v8528_v31 = vmax.f32 %v8512_v54, 0.0  ;;  %v14414_v10 = vcombine.high %v8818_v24, %v8822_v8  ;;  %v8682_v7 = vld [vmem:[#allocation20 + $0x488] sm:$0xff]  ;;  %v14413_v2 = vcombine.low %v8818_v24, %v8822_v8 }
 0x758   :  { %v8686_v48 = vld [vmem:[#allocation20 + $0x4a8] sm:$0xff] }
 0x759   :  { %v16415_v45 = vpack.c.bf16 %v8528_v31, %v8520_v21  ;;  %11854 = vmatpush2.bf16.msra.mxu0 %v14197_v32  ;;  %v8810_v44 = vld [vmem:[#allocation20 + $0x888] sm:$0xff]  ;;  %v14278_v30 = vcombine.high %v8682_v7, %v8686_v48  ;;  %v14277_v32 = vcombine.low %v8682_v7, %v8686_v48 }
 0x75a   :  { %11909 = vmatprep.subr.bf16.mxu0 %v14446_v13  ;;  %v8814_v28 = vld [vmem:[#allocation20 + $0x8a8] sm:$0xff] }
 0x75b   :  { %11812 = vmatprep.mubr.bf16.mxu1 %v16415_v45  ;;  %v14406_v49 = vcombine.high %v8810_v44, %v8814_v28  ;;  %v8674_v52 = vld [vmem:[#allocation20 + $0x448] sm:$0xff]  ;;  %v14405_v13 = vcombine.low %v8810_v44, %v8814_v28 }
 0x75c   :  { %11856 = vmatmul.mubr.bf16.vlgmr.msra.gmra.mxu0 %v16339_v22  ;;  %11813 = vmatmul.mubr.bf16.vlgmr.msra.gmra.mxu1 %v16413_v35  ;;  %v8678_v11 = vld [vmem:[#allocation20 + $0x468] sm:$0xff] }
 0x75d   :  { %11867 = vmatpush1.bf16.msra.mxu1 %v14317_v6  ;;  %11910 = vmatpush1.bf16.msra.mxu0 %v14445_v60  ;;  %v14422_v6 = vcombine.high %v8826_v61, %v8830_v57  ;;  %v8802_v20 = vld [vmem:[#allocation20 + $0x848] sm:$0xff]  ;;  %v14270_v21 = vcombine.high %v8674_v52, %v8678_v11  ;;  %v14269_v60 = vcombine.low %v8674_v52, %v8678_v11 }
 0x75e   :  { %11941 = vmatprep.mubr.bf16.mxu0 %v16393_v9  ;;  %11898 = vmatprep.mubr.bf16.mxu1 %v16365_v23  ;;  %v8806_v54 = vld [vmem:[#allocation20 + $0x868] sm:$0xff] }
 0x75f   :  { %11868 = vmatprep.subr.bf16.mxu1 %v14310_v59  ;;  %11911 = vmatprep.subr.bf16.mxu0 %v14438_v63  ;;  %v14398_v31 = vcombine.high %v8802_v20, %v8806_v54  ;;  %v8666_v26 = vld [vmem:[#allocation20 + $0x408] sm:$0xff]  ;;  %v14397_v0 = vcombine.low %v8802_v20, %v8806_v54 }
 0x760   :  { %v8670_v14 = vld [vmem:[#allocation20 + $0x428] sm:$0xff] }
 0x761   :  { %11869 = vmatpush1.bf16.msra.mxu1 %v14309_v25  ;;  %11912 = vmatpush1.bf16.msra.mxu0 %v14437_v55  ;;  %v8794_v17 = vld [vmem:[#allocation20 + $0x808] sm:$0xff]  ;;  %v14262_v59 = vcombine.high %v8666_v26, %v8670_v14  ;;  %v14261_v55 = vcombine.low %v8666_v26, %v8670_v14 }
 0x762   :  { %11870 = vmatprep.subr.bf16.mxu1 %v14302_v37  ;;  %11913 = vmatprep.subr.bf16.mxu0 %v14430_v29  ;;  %v8798_v34 = vld [vmem:[#allocation20 + $0x828] sm:$0xff] }
 0x763   :  { %v14390_v63 = vcombine.high %v8794_v17, %v8798_v34  ;;  %v8786_v4 = vld [vmem:[#allocation20 + $0x7c8] sm:$0xff]  ;;  %v14389_v37 = vcombine.low %v8794_v17, %v8798_v34 }
 0x764   :  { %v8790_v53 = vld [vmem:[#allocation20 + $0x7e8] sm:$0xff] }
 0x765   :  { %11871 = vmatpush1.bf16.msra.mxu1 %v14301_v56  ;;  %11914 = vmatpush1.bf16.msra.mxu0 %v14429_v62  ;;  %v8914_v36 = vld [vmem:[#allocation20 + $0xbc8] sm:$0xff]  ;;  %v14382_v29 = vcombine.high %v8786_v4, %v8790_v53  ;;  %v14381_v62 = vcombine.low %v8786_v4, %v8790_v53 }
 0x766   :  { %11872 = vmatprep.subr.bf16.mxu1 %v14294_v46  ;;  %11915 = vmatprep.subr.bf16.mxu0 %v14422_v6  ;;  %v8918_v25 = vld [vmem:[#allocation20 + $0xbe8] sm:$0xff] }
 0x767   :  { %v14510_v51 = vcombine.high %v8914_v36, %v8918_v25  ;;  %v8778_v5 = vld [vmem:[#allocation20 + $0x788] sm:$0xff]  ;;  %v14509_v46 = vcombine.low %v8914_v36, %v8918_v25 }
 0x768   :  { %v8782_v61 = vld [vmem:[#allocation20 + $0x7a8] sm:$0xff] }
 0x769   :  { %11873 = vmatpush1.bf16.msra.mxu1 %v14293_v38  ;;  %11916 = vmatpush1.bf16.msra.mxu0 %v14421_v3  ;;  %v8906_v57 = vld [vmem:[#allocation20 + $0xb88] sm:$0xff]  ;;  %v14374_v6 = vcombine.high %v8778_v5, %v8782_v61  ;;  %v14373_v3 = vcombine.low %v8778_v5, %v8782_v61 }
 0x76a   :  { %11874 = vmatprep.subr.bf16.mxu1 %v14286_v18  ;;  %11917 = vmatprep.subr.bf16.mxu0 %v14414_v10  ;;  %v8910_v56 = vld [vmem:[#allocation20 + $0xba8] sm:$0xff] }
 0x76b   :  { %v14502_v27 = vcombine.high %v8906_v57, %v8910_v56  ;;  %v8770_v58 = vld [vmem:[#allocation20 + $0x748] sm:$0xff]  ;;  %v14501_v18 = vcombine.low %v8906_v57, %v8910_v56 }
 0x76c   :  { %v8774_v24 = vld [vmem:[#allocation20 + $0x768] sm:$0xff] }
 0x76d   :  { %11875 = vmatpush1.bf16.msra.mxu1 %v14285_v16  ;;  %11918 = vmatpush1.bf16.msra.mxu0 %v14413_v2  ;;  %v8898_v8 = vld [vmem:[#allocation20 + $0xb48] sm:$0xff]  ;;  %v14366_v10 = vcombine.high %v8770_v58, %v8774_v24  ;;  %v14365_v2 = vcombine.low %v8770_v58, %v8774_v24 }
 0x76e   :  { %11876 = vmatprep.subr.bf16.mxu1 %v14278_v30  ;;  %11919 = vmatprep.subr.bf16.mxu0 %v14406_v49  ;;  %v8902_v38 = vld [vmem:[#allocation20 + $0xb68] sm:$0xff] }
 0x76f   :  { %v14494_v7 = vcombine.high %v8898_v8, %v8902_v38  ;;  %v8762_v48 = vld [vmem:[#allocation20 + $0x708] sm:$0xff]  ;;  %v14493_v30 = vcombine.low %v8898_v8, %v8902_v38  ;;  %v8595_v38 = vld [vmem:[#allocation20 + $0x1d0] sm:$0xff] }
 0x770   :  { %v8766_v44 = vld [vmem:[#allocation20 + $0x728] sm:$0xff] }
 0x771   :  { %11877 = vmatpush1.bf16.msra.mxu1 %v14277_v32  ;;  %11920 = vmatpush1.bf16.msra.mxu0 %v14405_v13  ;;  %v8890_v28 = vld [vmem:[#allocation20 + $0xb08] sm:$0xff]  ;;  %v14358_v49 = vcombine.high %v8762_v48, %v8766_v44  ;;  %v14357_v13 = vcombine.low %v8762_v48, %v8766_v44 }
 0x772   :  { %11878 = vmatprep.subr.bf16.mxu1 %v14270_v21  ;;  %11921 = vmatprep.subr.bf16.mxu0 %v14398_v31  ;;  %v8894_v16 = vld [vmem:[#allocation20 + $0xb28] sm:$0xff] }
 0x773   :  { %v14486_v52 = vcombine.high %v8890_v28, %v8894_v16  ;;  %v8754_v11 = vld [vmem:[#allocation20 + $0x6c8] sm:$0xff]  ;;  %v14485_v21 = vcombine.low %v8890_v28, %v8894_v16  ;;  %v8587_v16 = vld [vmem:[#allocation20 + $0x190] sm:$0xff] }
 0x774   :  { %v8758_v20 = vld [vmem:[#allocation20 + $0x6e8] sm:$0xff] }
 0x775   :  { %11879 = vmatpush1.bf16.msra.mxu1 %v14269_v60  ;;  %11922 = vmatpush1.bf16.msra.mxu0 %v14397_v0  ;;  %v8882_v54 = vld [vmem:[#allocation20 + $0xac8] sm:$0xff]  ;;  %v14350_v31 = vcombine.high %v8754_v11, %v8758_v20  ;;  %v14349_v0 = vcombine.low %v8754_v11, %v8758_v20 }
 0x776   :  { %11880 = vmatprep.subr.bf16.mxu1 %v14262_v59  ;;  %11923 = vmatprep.subr.bf16.mxu0 %v14390_v63  ;;  %v8886_v32 = vld [vmem:[#allocation20 + $0xae8] sm:$0xff] }
 0x777   :  { %v14478_v26 = vcombine.high %v8882_v54, %v8886_v32  ;;  %v8746_v14 = vld [vmem:[#allocation20 + $0x688] sm:$0xff]  ;;  %v14477_v59 = vcombine.low %v8882_v54, %v8886_v32  ;;  %v8579_v32 = vld [vmem:[#allocation20 + $0x150] sm:$0xff] }
 0x778   :  { %v8750_v17 = vld [vmem:[#allocation20 + $0x6a8] sm:$0xff] }
 0x779   :  { %11881 = vmatpush1.bf16.msra.mxu1 %v14261_v55  ;;  %11924 = vmatpush1.bf16.msra.mxu0 %v14389_v37  ;;  %v8874_v34 = vld [vmem:[#allocation20 + $0xa88] sm:$0xff]  ;;  %v14342_v63 = vcombine.high %v8746_v14, %v8750_v17  ;;  %v14341_v37 = vcombine.low %v8746_v14, %v8750_v17 }
 0x77a   :  { %11882 = vmatprep.subr.bf16.mxu1 %v14382_v29  ;;  %11925 = vmatprep.subr.bf16.mxu0 %v14510_v51  ;;  %v8878_v60 = vld [vmem:[#allocation20 + $0xaa8] sm:$0xff] }
 0x77b   :  { %v14470_v4 = vcombine.high %v8874_v34, %v8878_v60  ;;  %v8738_v53 = vld [vmem:[#allocation20 + $0x648] sm:$0xff]  ;;  %v14469_v29 = vcombine.low %v8874_v34, %v8878_v60  ;;  %v8571_v60 = vld [vmem:[#allocation20 + $0x110] sm:$0xff] }
 0x77c   :  { %v8742_v36 = vld [vmem:[#allocation20 + $0x668] sm:$0xff] }
 0x77d   :  { %11883 = vmatpush2.bf16.msra.mxu1 %v14381_v62  ;;  %11926 = vmatpush2.bf16.msra.mxu0 %v14509_v46  ;;  %v8866_v25 = vld [vmem:[#allocation20 + $0xa48] sm:$0xff]  ;;  %v14334_v51 = vcombine.high %v8738_v53, %v8742_v36  ;;  %v14333_v46 = vcombine.low %v8738_v53, %v8742_v36 }
 0x77e   :  { %11884 = vmatprep.subr.bf16.mxu1 %v14374_v6  ;;  %11927 = vmatprep.subr.bf16.mxu0 %v14502_v27  ;;  %v8870_v55 = vld [vmem:[#allocation20 + $0xa68] sm:$0xff] }
 0x77f   :  { %v14462_v5 = vcombine.high %v8866_v25, %v8870_v55  ;;  %v8730_v61 = vld [vmem:[#allocation20 + $0x608] sm:$0xff]  ;;  %v14461_v6 = vcombine.low %v8866_v25, %v8870_v55  ;;  %v8563_v55 = vld [vmem:[#allocation20 + $0xd0] sm:$0xff] }
 0x780   :  { %v8734_v57 = vld [vmem:[#allocation20 + $0x628] sm:$0xff] }
 0x781   :  { %11885 = vmatpush2.bf16.msra.mxu1 %v14373_v3  ;;  %11928 = vmatpush2.bf16.msra.mxu0 %v14501_v18  ;;  %v8858_v56 = vld [vmem:[#allocation20 + $0xa08] sm:$0xff]  ;;  %v14326_v27 = vcombine.high %v8730_v61, %v8734_v57  ;;  %v8599_v3 = vld [vmem:[#allocation20 + $0x1f0] sm:$0xff]  ;;  %v14325_v18 = vcombine.low %v8730_v61, %v8734_v57 }
 0x782   :  { %11886 = vmatprep.subr.bf16.mxu1 %v14366_v10  ;;  %11929 = vmatprep.subr.bf16.mxu0 %v14494_v7  ;;  %v8862_v62 = vld [vmem:[#allocation20 + $0xa28] sm:$0xff]  ;;  %v14192_v48 = vcombine.high %v8595_v38, %v8599_v3 }
 0x783   :  { %v14454_v58 = vcombine.high %v8858_v56, %v8862_v62  ;;  %v8978_v24 = vld [vmem:[#allocation20 + $0xdc8] sm:$0xff]  ;;  %v14453_v10 = vcombine.low %v8858_v56, %v8862_v62  ;;  %v8555_v62 = vld [vmem:[#allocation20 + $0x90] sm:$0xff] }
 0x784   :  { %v8982_v8 = vld [vmem:[#allocation20 + $0xde8] sm:$0xff] }
 0x785   :  { %11887 = vmatpush2.bf16.msra.mxu1 %v14365_v2  ;;  %11930 = vmatpush2.bf16.msra.mxu0 %v14493_v30  ;;  %v14574_v7 = vcombine.high %v8978_v24, %v8982_v8  ;;  %v8970_v44 = vld [vmem:[#allocation20 + $0xd88] sm:$0xff]  ;;  %v8591_v2 = vld [vmem:[#allocation20 + $0x1b0] sm:$0xff]  ;;  %v14573_v30 = vcombine.low %v8978_v24, %v8982_v8 }
 0x786   :  { %11888 = vmatprep.subr.bf16.mxu1 %v14358_v49  ;;  %11931 = vmatprep.subr.bf16.mxu0 %v14486_v52  ;;  %v8974_v28 = vld [vmem:[#allocation20 + $0xda8] sm:$0xff]  ;;  %v14191_v49 = vcombine.low %v8595_v38, %v8599_v3  ;;  %v14184_v11 = vcombine.high %v8587_v16, %v8591_v2  ;;  %v8547_v3 = vld [vmem:[#allocation20 + $0x50] sm:$0xff] }
 0x787   :  { %v14566_v52 = vcombine.high %v8970_v44, %v8974_v28  ;;  %v8962_v20 = vld [vmem:[#allocation20 + $0xd48] sm:$0xff] }
 0x788   :  { %v8966_v54 = vld [vmem:[#allocation20 + $0xd68] sm:$0xff] }
 0x789   :  { %11889 = vmatpush2.bf16.msra.mxu1 %v14357_v13  ;;  %11932 = vmatpush2.bf16.msra.mxu0 %v14485_v21  ;;  %v8583_v13 = vld [vmem:[#allocation20 + $0x170] sm:$0xff]  ;;  %v14565_v21 = vcombine.low %v8970_v44, %v8974_v28  ;;  %v8954_v17 = vld [vmem:[#allocation20 + $0xd08] sm:$0xff] }
 0x78a   :  { %11890 = vmatprep.subr.bf16.mxu1 %v14350_v31  ;;  %11933 = vmatprep.subr.bf16.mxu0 %v14478_v26  ;;  %v14183_v31 = vcombine.low %v8587_v16, %v8591_v2  ;;  %v14558_v26 = vcombine.high %v8962_v20, %v8966_v54  ;;  %v14176_v14 = vcombine.high %v8579_v32, %v8583_v13  ;;  %v8958_v34 = vld [vmem:[#allocation20 + $0xd28] sm:$0xff]  ;;  %v8539_v2 = vld [vmem:[#allocation20 + $0x10] sm:$0xff] }
 0x78b   :  { %v8946_v36 = vld [vmem:[#allocation20 + $0xcc8] sm:$0xff] }
 0x78c   :  { %v8950_v25 = vld [vmem:[#allocation20 + $0xce8] sm:$0xff] }
 0x78d   :  { %11891 = vmatpush2.bf16.msra.mxu1 %v14349_v0  ;;  %11934 = vmatpush2.bf16.msra.mxu0 %v14477_v59  ;;  %v8575_v0 = vld [vmem:[#allocation20 + $0x130] sm:$0xff]  ;;  %v14557_v59 = vcombine.low %v8962_v20, %v8966_v54  ;;  %v8938_v57 = vld [vmem:[#allocation20 + $0xc88] sm:$0xff] }
 0x78e   :  { %11892 = vmatprep.subr.bf16.mxu1 %v14342_v63  ;;  %11935 = vmatprep.subr.bf16.mxu0 %v14470_v4  ;;  %v14175_v63 = vcombine.low %v8579_v32, %v8583_v13  ;;  %v14550_v4 = vcombine.high %v8954_v17, %v8958_v34  ;;  %v14168_v53 = vcombine.high %v8571_v60, %v8575_v0  ;;  %v8942_v56 = vld [vmem:[#allocation20 + $0xca8] sm:$0xff]  ;;  %v8659_v13 = vld [vmem:[#allocation20 + $0x3d0] sm:$0xff] }
 0x78f   :  { %v8930_v8 = vld [vmem:[#allocation20 + $0xc48] sm:$0xff] }
 0x790   :  { %v8934_v38 = vld [vmem:[#allocation20 + $0xc68] sm:$0xff] }
 0x791   :  { %11893 = vmatpush2.bf16.msra.mxu1 %v14341_v37  ;;  %11936 = vmatpush2.bf16.msra.mxu0 %v14469_v29  ;;  %v8567_v37 = vld [vmem:[#allocation20 + $0xf0] sm:$0xff]  ;;  %v14549_v29 = vcombine.low %v8954_v17, %v8958_v34  ;;  %v8922_v28 = vld [vmem:[#allocation20 + $0xc08] sm:$0xff] }
 0x792   :  { %11894 = vmatprep.subr.bf16.mxu1 %v14334_v51  ;;  %11937 = vmatprep.subr.bf16.mxu0 %v14462_v5  ;;  %v14167_v51 = vcombine.low %v8571_v60, %v8575_v0  ;;  %v14542_v5 = vcombine.high %v8946_v36, %v8950_v25  ;;  %v14160_v61 = vcombine.high %v8563_v55, %v8567_v37  ;;  %v8926_v16 = vld [vmem:[#allocation20 + $0xc28] sm:$0xff]  ;;  %v8651_v0 = vld [vmem:[#allocation20 + $0x390] sm:$0xff] }
 0x793   :  { %v9042_v54 = vld [vmem:[#allocation20 + $0xfc8] sm:$0xff] }
 0x794   :  { %v9046_v32 = vld [vmem:[#allocation20 + $0xfe8] sm:$0xff] }
 0x795   :  { %11895 = vmatpush2.bf16.msra.mxu1 %v14333_v46  ;;  %11938 = vmatpush2.bf16.msra.mxu0 %v14461_v6  ;;  %v8559_v46 = vld [vmem:[#allocation20 + $0xb0] sm:$0xff]  ;;  %v14541_v6 = vcombine.low %v8946_v36, %v8950_v25  ;;  %v9034_v34 = vld [vmem:[#allocation20 + $0xf88] sm:$0xff] }
 0x796   :  { %11896 = vmatprep.subr.bf16.mxu1 %v14326_v27  ;;  %11939 = vmatprep.subr.bf16.mxu0 %v14454_v58  ;;  %v14159_v27 = vcombine.low %v8563_v55, %v8567_v37  ;;  %v14534_v58 = vcombine.high %v8938_v57, %v8942_v56  ;;  %v14152_v24 = vcombine.high %v8555_v62, %v8559_v46  ;;  %v9038_v60 = vld [vmem:[#allocation20 + $0xfa8] sm:$0xff]  ;;  %v8643_v37 = vld [vmem:[#allocation20 + $0x350] sm:$0xff] }
 0x797   :  { %v9026_v25 = vld [vmem:[#allocation20 + $0xf48] sm:$0xff] }
 0x798   :  { %v9030_v55 = vld [vmem:[#allocation20 + $0xf68] sm:$0xff] }
 0x799   :  { %11897 = vmatpush2.bf16.msra.mxu1 %v14325_v18  ;;  %11940 = vmatpush2.bf16.msra.mxu0 %v14453_v10  ;;  %v8551_v18 = vld [vmem:[#allocation20 + $0x70] sm:$0xff]  ;;  %v14533_v10 = vcombine.low %v8938_v57, %v8942_v56  ;;  %v9018_v56 = vld [vmem:[#allocation20 + $0xf08] sm:$0xff] }
 0x79a   :  { %11952 = vmatprep.subr.bf16.mxu1 %v14574_v7  ;;  %11995 = vmatprep.subr.bf16.mxu0 %v14192_v48  ;;  %v14151_v7 = vcombine.low %v8555_v62, %v8559_v46  ;;  %v14526_v48 = vcombine.high %v8930_v8, %v8934_v38  ;;  %v14144_v44 = vcombine.high %v8547_v3, %v8551_v18  ;;  %v9022_v62 = vld [vmem:[#allocation20 + $0xf28] sm:$0xff]  ;;  %v8635_v46 = vld [vmem:[#allocation20 + $0x310] sm:$0xff] }
 0x79c   :  { %11899 = vmatmul.mubr.bf16.vlgmr.msra.gmra.mxu1 %v16363_v33  ;;  %11942 = vmatmul.mubr.bf16.vlgmr.msra.gmra.mxu0 %v16391_v15 }
 0x79d   :  { %11953 = vmatpush1.bf16.msra.mxu1 %v14573_v30  ;;  %11984 = vmatprep.mubr.bf16.mxu1 %v16415_v45  ;;  %v8543_v30 = vld [vmem:[#allocation20 + $0x30] sm:$0xff] }
 0x79e   :  { %11996 = vmatpush1.bf16.msra.mxu0 %v14191_v49  ;;  %12027 = vmatprep.mubr.bf16.mxu0 %v16333_v50  ;;  %v14525_v49 = vcombine.low %v8930_v8, %v8934_v38  ;;  %v14136_v20 = vcombine.high %v8539_v2, %v8543_v30  ;;  %v9010_v38 = vld [vmem:[#allocation20 + $0xec8] sm:$0xff] }
 0x79f   :  { %11954 = vmatprep.subr.bf16.mxu1 %v14566_v52  ;;  %11997 = vmatprep.subr.bf16.mxu0 %v14184_v11  ;;  %v14143_v52 = vcombine.low %v8547_v3, %v8551_v18  ;;  %v14518_v11 = vcombine.high %v8922_v28, %v8926_v16  ;;  %v9014_v3 = vld [vmem:[#allocation20 + $0xee8] sm:$0xff]  ;;  %v8627_v18 = vld [vmem:[#allocation20 + $0x2d0] sm:$0xff] }
 0x7a1   :  { %11955 = vmatpush1.bf16.msra.mxu1 %v14565_v21  ;;  %v8663_v21 = vld [vmem:[#allocation20 + $0x3f0] sm:$0xff] }
 0x7a2   :  { %11998 = vmatpush1.bf16.msra.mxu0 %v14183_v31  ;;  %11956 = vmatprep.subr.bf16.mxu1 %v14558_v26  ;;  %v14517_v31 = vcombine.low %v8922_v28, %v8926_v16  ;;  %v14135_v26 = vcombine.low %v8539_v2, %v8543_v30  ;;  %v14256_v17 = vcombine.high %v8659_v13, %v8663_v21  ;;  %v9002_v16 = vld [vmem:[#allocation20 + $0xe88] sm:$0xff]  ;;  %v8619_v30 = vld [vmem:[#allocation20 + $0x290] sm:$0xff] }
 0x7a3   :  { %11999 = vmatprep.subr.bf16.mxu0 %v14176_v14  ;;  %v14638_v14 = vcombine.high %v9042_v54, %v9046_v32  ;;  %v9006_v2 = vld [vmem:[#allocation20 + $0xea8] sm:$0xff] }
 0x7a5   :  { %11957 = vmatpush1.bf16.msra.mxu1 %v14557_v59  ;;  %v8655_v59 = vld [vmem:[#allocation20 + $0x3b0] sm:$0xff] }
 0x7a6   :  { %12000 = vmatpush1.bf16.msra.mxu0 %v14175_v63  ;;  %11958 = vmatprep.subr.bf16.mxu1 %v14550_v4  ;;  %v14637_v63 = vcombine.low %v9042_v54, %v9046_v32  ;;  %v14255_v4 = vcombine.low %v8659_v13, %v8663_v21  ;;  %v14248_v36 = vcombine.high %v8651_v0, %v8655_v59  ;;  %v8994_v32 = vld [vmem:[#allocation20 + $0xe48] sm:$0xff]  ;;  %v8611_v21 = vld [vmem:[#allocation20 + $0x250] sm:$0xff] }
 0x7a7   :  { %12001 = vmatprep.subr.bf16.mxu0 %v14168_v53  ;;  %v14630_v53 = vcombine.high %v9034_v34, %v9038_v60  ;;  %v8998_v13 = vld [vmem:[#allocation20 + $0xe68] sm:$0xff] }
 0x7a9   :  { %11959 = vmatpush1.bf16.msra.mxu1 %v14549_v29  ;;  %v8647_v29 = vld [vmem:[#allocation20 + $0x370] sm:$0xff] }
 0x7aa   :  { %12002 = vmatpush1.bf16.msra.mxu0 %v14167_v51  ;;  %11960 = vmatprep.subr.bf16.mxu1 %v14542_v5  ;;  %v14629_v51 = vcombine.low %v9034_v34, %v9038_v60  ;;  %v14247_v5 = vcombine.low %v8651_v0, %v8655_v59  ;;  %v14240_v57 = vcombine.high %v8643_v37, %v8647_v29  ;;  %v8986_v60 = vld [vmem:[#allocation20 + $0xe08] sm:$0xff]  ;;  %v8603_v59 = vld [vmem:[#allocation20 + $0x210] sm:$0xff] }
 0x7ab   :  { %12003 = vmatprep.subr.bf16.mxu0 %v14160_v61  ;;  %v14622_v61 = vcombine.high %v9026_v25, %v9030_v55  ;;  %v8990_v0 = vld [vmem:[#allocation20 + $0xe28] sm:$0xff] }
 0x7ad   :  { %11961 = vmatpush1.bf16.msra.mxu1 %v14541_v6  ;;  %v8639_v6 = vld [vmem:[#allocation20 + $0x330] sm:$0xff] }
 0x7ae   :  { %12004 = vmatpush1.bf16.msra.mxu0 %v14159_v27  ;;  %11962 = vmatprep.subr.bf16.mxu1 %v14534_v58  ;;  %v14621_v27 = vcombine.low %v9026_v25, %v9030_v55  ;;  %v14239_v58 = vcombine.low %v8643_v37, %v8647_v29  ;;  %v14232_v8 = vcombine.high %v8635_v46, %v8639_v6  ;;  %v8723_v55 = vld [vmem:[#allocation20 + $0x5d0] sm:$0xff] }
 0x7af   :  { %12005 = vmatprep.subr.bf16.mxu0 %v14152_v24  ;;  %v14614_v24 = vcombine.high %v9018_v56, %v9022_v62  ;;  %v8727_v37 = vld [vmem:[#allocation20 + $0x5f0] sm:$0xff] }
 0x7b0   :  { %v8851_v29 = vld [vmem:[#allocation20 + $0x9d0] sm:$0xff] }
 0x7b1   :  { %11963 = vmatpush1.bf16.msra.mxu1 %v14533_v10  ;;  %v8631_v10 = vld [vmem:[#allocation20 + $0x2f0] sm:$0xff] }
 0x7b2   :  { %12006 = vmatpush1.bf16.msra.mxu0 %v14151_v7  ;;  %11964 = vmatprep.subr.bf16.mxu1 %v14526_v48  ;;  %v14613_v7 = vcombine.low %v9018_v56, %v9022_v62  ;;  %v14231_v48 = vcombine.low %v8635_v46, %v8639_v6  ;;  %v14224_v28 = vcombine.high %v8627_v18, %v8631_v10  ;;  %v8715_v62 = vld [vmem:[#allocation20 + $0x590] sm:$0xff] }
 0x7b3   :  { %12007 = vmatprep.subr.bf16.mxu0 %v14144_v44  ;;  %v14606_v44 = vcombine.high %v9010_v38, %v9014_v3  ;;  %v8719_v46 = vld [vmem:[#allocation20 + $0x5b0] sm:$0xff]  ;;  %v14319_v6 = vcombine.low %v8723_v55, %v8727_v37 }
 0x7b5   :  { %11965 = vmatpush1.bf16.msra.mxu1 %v14525_v49  ;;  %v8623_v49 = vld [vmem:[#allocation20 + $0x2b0] sm:$0xff] }
 0x7b6   :  { %12008 = vmatpush1.bf16.msra.mxu0 %v14143_v52  ;;  %11966 = vmatprep.subr.bf16.mxu1 %v14518_v11  ;;  %v14605_v52 = vcombine.low %v9010_v38, %v9014_v3  ;;  %v14223_v11 = vcombine.low %v8627_v18, %v8631_v10  ;;  %v14216_v54 = vcombine.high %v8619_v30, %v8623_v49  ;;  %v8707_v38 = vld [vmem:[#allocation20 + $0x550] sm:$0xff] }
 0x7b7   :  { %12009 = vmatprep.subr.bf16.mxu0 %v14136_v20  ;;  %v14598_v20 = vcombine.high %v9002_v16, %v9006_v2  ;;  %v8711_v3 = vld [vmem:[#allocation20 + $0x570] sm:$0xff] }
 0x7b8   :  { %v8835_v10 = vld [vmem:[#allocation20 + $0x950] sm:$0xff] }
 0x7b9   :  { %11967 = vmatpush1.bf16.msra.mxu1 %v14517_v31  ;;  %v8615_v31 = vld [vmem:[#allocation20 + $0x270] sm:$0xff] }
 0x7ba   :  { %12010 = vmatpush1.bf16.msra.mxu0 %v14135_v26  ;;  %11968 = vmatprep.subr.bf16.mxu1 %v14638_v14  ;;  %v14597_v26 = vcombine.low %v9002_v16, %v9006_v2  ;;  %v14215_v14 = vcombine.low %v8619_v30, %v8623_v49  ;;  %v14208_v34 = vcombine.high %v8611_v21, %v8615_v31  ;;  %v8699_v2 = vld [vmem:[#allocation20 + $0x510] sm:$0xff] }
 0x7bb   :  { %12011 = vmatprep.subr.bf16.mxu0 %v14256_v17  ;;  %v14590_v17 = vcombine.high %v8994_v32, %v8998_v13  ;;  %v8703_v30 = vld [vmem:[#allocation20 + $0x530] sm:$0xff] }
 0x7bc   :  { %v8827_v49 = vld [vmem:[#allocation20 + $0x910] sm:$0xff] }
 0x7bd   :  { %11969 = vmatpush2.bf16.msra.mxu1 %v14637_v63  ;;  %v8607_v63 = vld [vmem:[#allocation20 + $0x230] sm:$0xff] }
 0x7be   :  { %12012 = vmatpush2.bf16.msra.mxu0 %v14255_v4  ;;  %11970 = vmatprep.subr.bf16.mxu1 %v14630_v53  ;;  %v14589_v4 = vcombine.low %v8994_v32, %v8998_v13  ;;  %v14207_v53 = vcombine.low %v8611_v21, %v8615_v31  ;;  %v14200_v25 = vcombine.high %v8603_v59, %v8607_v63  ;;  %v8691_v13 = vld [vmem:[#allocation20 + $0x4d0] sm:$0xff] }
 0x7bf   :  { %12013 = vmatprep.subr.bf16.mxu0 %v14248_v36  ;;  %v14582_v36 = vcombine.high %v8986_v60, %v8990_v0  ;;  %v8695_v21 = vld [vmem:[#allocation20 + $0x4f0] sm:$0xff] }
 0x7c0   :  { %v8819_v31 = vld [vmem:[#allocation20 + $0x8d0] sm:$0xff] }
 0x7c1   :  { %11971 = vmatpush2.bf16.msra.mxu1 %v14629_v51  ;;  %v8855_v51 = vld [vmem:[#allocation20 + $0x9f0] sm:$0xff] }
 0x7c2   :  { %12014 = vmatpush2.bf16.msra.mxu0 %v14247_v5  ;;  %11972 = vmatprep.subr.bf16.mxu1 %v14622_v61  ;;  %v14581_v5 = vcombine.low %v8986_v60, %v8990_v0  ;;  %v14199_v61 = vcombine.low %v8603_v59, %v8607_v63  ;;  %v14448_v56 = vcombine.high %v8851_v29, %v8855_v51  ;;  %v8683_v0 = vld [vmem:[#allocation20 + $0x490] sm:$0xff] }
 0x7c3   :  { %12015 = vmatprep.subr.bf16.mxu0 %v14240_v57  ;;  %v14320_v57 = vcombine.high %v8723_v55, %v8727_v37  ;;  %v8687_v59 = vld [vmem:[#allocation20 + $0x4b0] sm:$0xff] }
 0x7c4   :  { %v8811_v63 = vld [vmem:[#allocation20 + $0x890] sm:$0xff] }
 0x7c5   :  { %11973 = vmatpush2.bf16.msra.mxu1 %v14621_v27  ;;  %v8843_v27 = vld [vmem:[#allocation20 + $0x990] sm:$0xff] }
 0x7c6   :  { %12016 = vmatpush2.bf16.msra.mxu0 %v14239_v58  ;;  %11974 = vmatprep.subr.bf16.mxu1 %v14614_v24  ;;  %v8847_v58 = vld [vmem:[#allocation20 + $0x9b0] sm:$0xff]  ;;  %v14447_v24 = vcombine.low %v8851_v29, %v8855_v51 }
 0x7c7   :  { %12017 = vmatprep.subr.bf16.mxu0 %v14232_v8  ;;  %v14312_v8 = vcombine.high %v8715_v62, %v8719_v46  ;;  %v14440_v18 = vcombine.high %v8843_v27, %v8847_v58  ;;  %v8675_v37 = vld [vmem:[#allocation20 + $0x450] sm:$0xff] }
 0x7c8   :  { %v8679_v29 = vld [vmem:[#allocation20 + $0x470] sm:$0xff] }
 0x7c9   :  { %11975 = vmatpush2.bf16.msra.mxu1 %v14613_v7  ;;  %v8839_v7 = vld [vmem:[#allocation20 + $0x970] sm:$0xff] }
 0x7ca   :  { %12018 = vmatpush2.bf16.msra.mxu0 %v14231_v48  ;;  %11976 = vmatprep.subr.bf16.mxu1 %v14606_v44  ;;  %v14311_v48 = vcombine.low %v8715_v62, %v8719_v46  ;;  %v14439_v44 = vcombine.low %v8843_v27, %v8847_v58  ;;  %v14432_v16 = vcombine.high %v8835_v10, %v8839_v7  ;;  %v8803_v51 = vld [vmem:[#allocation20 + $0x850] sm:$0xff] }
 0x7cb   :  { %12019 = vmatprep.subr.bf16.mxu0 %v14224_v28  ;;  %v14304_v28 = vcombine.high %v8707_v38, %v8711_v3  ;;  %v8667_v46 = vld [vmem:[#allocation20 + $0x410] sm:$0xff] }
 0x7cc   :  { %v8795_v27 = vld [vmem:[#allocation20 + $0x810] sm:$0xff] }
 0x7cd   :  { %11977 = vmatpush2.bf16.msra.mxu1 %v14605_v52  ;;  %v8831_v52 = vld [vmem:[#allocation20 + $0x930] sm:$0xff] }
 0x7ce   :  { %12020 = vmatpush2.bf16.msra.mxu0 %v14223_v11  ;;  %11978 = vmatprep.subr.bf16.mxu1 %v14598_v20  ;;  %v14303_v11 = vcombine.low %v8707_v38, %v8711_v3  ;;  %v14431_v20 = vcombine.low %v8835_v10, %v8839_v7  ;;  %v14424_v32 = vcombine.high %v8827_v49, %v8831_v52  ;;  %v8799_v58 = vld [vmem:[#allocation20 + $0x830] sm:$0xff] }
 0x7cf   :  { %12021 = vmatprep.subr.bf16.mxu0 %v14216_v54  ;;  %v14296_v54 = vcombine.high %v8699_v2, %v8703_v30  ;;  %v14392_v3 = vcombine.high %v8795_v27, %v8799_v58  ;;  %v8791_v10 = vld [vmem:[#allocation20 + $0x7f0] sm:$0xff] }
 0x7d0   :  { %v8915_v7 = vld [vmem:[#allocation20 + $0xbd0] sm:$0xff] }
 0x7d1   :  { %11979 = vmatpush2.bf16.msra.mxu1 %v14597_v26  ;;  %v8823_v26 = vld [vmem:[#allocation20 + $0x8f0] sm:$0xff] }
 0x7d2   :  { %12022 = vmatpush2.bf16.msra.mxu0 %v14215_v14  ;;  %11980 = vmatprep.subr.bf16.mxu1 %v14590_v17  ;;  %v14295_v14 = vcombine.low %v8699_v2, %v8703_v30  ;;  %v14423_v17 = vcombine.low %v8827_v49, %v8831_v52  ;;  %v14416_v60 = vcombine.high %v8819_v31, %v8823_v26  ;;  %v8779_v30 = vld [vmem:[#allocation20 + $0x790] sm:$0xff] }
 0x7d3   :  { %12023 = vmatprep.subr.bf16.mxu0 %v14208_v34  ;;  %v14288_v34 = vcombine.high %v8691_v13, %v8695_v21  ;;  %v8783_v49 = vld [vmem:[#allocation20 + $0x7b0] sm:$0xff] }
 0x7d4   :  { %v8907_v52 = vld [vmem:[#allocation20 + $0xb90] sm:$0xff] }
 0x7d5   :  { %11981 = vmatpush2.bf16.msra.mxu1 %v14589_v4  ;;  %v8815_v4 = vld [vmem:[#allocation20 + $0x8b0] sm:$0xff] }
 0x7d6   :  { %12024 = vmatpush2.bf16.msra.mxu0 %v14207_v53  ;;  %11982 = vmatprep.subr.bf16.mxu1 %v14582_v36  ;;  %v14287_v53 = vcombine.low %v8691_v13, %v8695_v21  ;;  %v14415_v36 = vcombine.low %v8819_v31, %v8823_v26  ;;  %v14408_v55 = vcombine.high %v8811_v63, %v8815_v4  ;;  %v8771_v21 = vld [vmem:[#allocation20 + $0x750] sm:$0xff] }
 0x7d7   :  { %12025 = vmatprep.subr.bf16.mxu0 %v14200_v25  ;;  %v14280_v25 = vcombine.high %v8683_v0, %v8687_v59  ;;  %v8775_v31 = vld [vmem:[#allocation20 + $0x770] sm:$0xff] }
 0x7d8   :  { %v8899_v26 = vld [vmem:[#allocation20 + $0xb50] sm:$0xff] }
 0x7d9   :  { %11983 = vmatpush2.bf16.msra.mxu1 %v14581_v5  ;;  %v8807_v5 = vld [vmem:[#allocation20 + $0x870] sm:$0xff] }
 0x7da   :  { %12026 = vmatpush2.bf16.msra.mxu0 %v14199_v61  ;;  %12038 = vmatprep.subr.bf16.mxu1 %v14320_v57  ;;  %v14279_v61 = vcombine.low %v8683_v0, %v8687_v59  ;;  %v14407_v57 = vcombine.low %v8811_v63, %v8815_v4  ;;  %v14400_v62 = vcombine.high %v8803_v51, %v8807_v5  ;;  %v8763_v59 = vld [vmem:[#allocation20 + $0x710] sm:$0xff] }
 0x7db   :  { %12081 = vmatprep.subr.bf16.mxu0 %v14448_v56  ;;  %v14272_v56 = vcombine.high %v8675_v37, %v8679_v29  ;;  %v8767_v63 = vld [vmem:[#allocation20 + $0x730] sm:$0xff] }
 0x7dc   :  { %11985 = vmatmul.mubr.bf16.vlgmr.msra.gmra.mxu1 %v16413_v35  ;;  %v8891_v4 = vld [vmem:[#allocation20 + $0xb10] sm:$0xff] }
 0x7dd   :  { %12028 = vmatmul.mubr.bf16.vlgmr.msra.gmra.mxu0 %v16339_v22  ;;  %12039 = vmatpush1.bf16.msra.mxu1 %v14319_v6  ;;  %v8671_v6 = vld [vmem:[#allocation20 + $0x430] sm:$0xff] }
 0x7de   :  { %12070 = vmatprep.mubr.bf16.mxu1 %v16365_v23  ;;  %12082 = vmatpush1.bf16.msra.mxu0 %v14447_v24  ;;  %v14271_v24 = vcombine.low %v8675_v37, %v8679_v29  ;;  %v14264_v38 = vcombine.high %v8667_v46, %v8671_v6  ;;  %v8755_v29 = vld [vmem:[#allocation20 + $0x6d0] sm:$0xff] }
 0x7df   :  { %12113 = vmatprep.mubr.bf16.mxu0 %v16393_v9  ;;  %12040 = vmatprep.subr.bf16.mxu1 %v14312_v8  ;;  %v14399_v8 = vcombine.low %v8803_v51, %v8807_v5  ;;  %v8759_v51 = vld [vmem:[#allocation20 + $0x6f0] sm:$0xff] }
 0x7e0   :  { %12083 = vmatprep.subr.bf16.mxu0 %v14440_v18  ;;  %v8787_v18 = vld [vmem:[#allocation20 + $0x7d0] sm:$0xff] }
 0x7e1   :  { %12041 = vmatpush1.bf16.msra.mxu1 %v14311_v48  ;;  %v8919_v48 = vld [vmem:[#allocation20 + $0xbf0] sm:$0xff] }
 0x7e2   :  { %12084 = vmatpush1.bf16.msra.mxu0 %v14439_v44  ;;  %12042 = vmatprep.subr.bf16.mxu1 %v14304_v28  ;;  %v14263_v44 = vcombine.low %v8667_v46, %v8671_v6  ;;  %v14391_v28 = vcombine.low %v8795_v27, %v8799_v58  ;;  %v14512_v2 = vcombine.high %v8915_v7, %v8919_v48  ;;  %v8883_v5 = vld [vmem:[#allocation20 + $0xad0] sm:$0xff] }
 0x7e3   :  { %12085 = vmatprep.subr.bf16.mxu0 %v14432_v16  ;;  %v14384_v16 = vcombine.high %v8787_v18, %v8791_v10  ;;  %v8747_v6 = vld [vmem:[#allocation20 + $0x690] sm:$0xff] }
 0x7e4   :  { %v8751_v27 = vld [vmem:[#allocation20 + $0x6b0] sm:$0xff] }
 0x7e5   :  { %12043 = vmatpush1.bf16.msra.mxu1 %v14303_v11  ;;  %v8911_v11 = vld [vmem:[#allocation20 + $0xbb0] sm:$0xff] }
 0x7e6   :  { %12086 = vmatpush1.bf16.msra.mxu0 %v14431_v20  ;;  %12044 = vmatprep.subr.bf16.mxu1 %v14296_v54  ;;  %v14383_v20 = vcombine.low %v8787_v18, %v8791_v10  ;;  %v14511_v54 = vcombine.low %v8915_v7, %v8919_v48  ;;  %v14504_v13 = vcombine.high %v8907_v52, %v8911_v11  ;;  %v8875_v58 = vld [vmem:[#allocation20 + $0xa90] sm:$0xff] }
 0x7e7   :  { %12087 = vmatprep.subr.bf16.mxu0 %v14424_v32  ;;  %v14376_v32 = vcombine.high %v8779_v30, %v8783_v49  ;;  %v8739_v10 = vld [vmem:[#allocation20 + $0x650] sm:$0xff] }
 0x7e8   :  { %v8743_v7 = vld [vmem:[#allocation20 + $0x670] sm:$0xff] }
 0x7e9   :  { %12045 = vmatpush1.bf16.msra.mxu1 %v14295_v14  ;;  %v8903_v14 = vld [vmem:[#allocation20 + $0xb70] sm:$0xff] }
 0x7ea   :  { %12088 = vmatpush1.bf16.msra.mxu0 %v14423_v17  ;;  %12046 = vmatprep.subr.bf16.mxu1 %v14288_v34  ;;  %v14375_v17 = vcombine.low %v8779_v30, %v8783_v49  ;;  %v14503_v34 = vcombine.low %v8907_v52, %v8911_v11  ;;  %v14496_v0 = vcombine.high %v8899_v26, %v8903_v14  ;;  %v8867_v48 = vld [vmem:[#allocation20 + $0xa50] sm:$0xff] }
 0x7eb   :  { %12089 = vmatprep.subr.bf16.mxu0 %v14416_v60  ;;  %v14368_v60 = vcombine.high %v8771_v21, %v8775_v31  ;;  %v8731_v49 = vld [vmem:[#allocation20 + $0x610] sm:$0xff] }
 0x7ec   :  { %v8735_v52 = vld [vmem:[#allocation20 + $0x630] sm:$0xff] }
 0x7ed   :  { %12047 = vmatpush1.bf16.msra.mxu1 %v14287_v53  ;;  %v8895_v53 = vld [vmem:[#allocation20 + $0xb30] sm:$0xff] }
 0x7ee   :  { %12090 = vmatpush1.bf16.msra.mxu0 %v14415_v36  ;;  %12048 = vmatprep.subr.bf16.mxu1 %v14280_v25  ;;  %v14367_v36 = vcombine.low %v8771_v21, %v8775_v31  ;;  %v14495_v25 = vcombine.low %v8899_v26, %v8903_v14  ;;  %v14488_v37 = vcombine.high %v8891_v4, %v8895_v53  ;;  %v8859_v11 = vld [vmem:[#allocation20 + $0xa10] sm:$0xff]  ;;  %v8596_v14 = vld [vmem:[#allocation20 + $0x1d8] sm:$0xff] }
 0x7ef   :  { %12091 = vmatprep.subr.bf16.mxu0 %v14408_v55  ;;  %v14360_v55 = vcombine.high %v8763_v59, %v8767_v63  ;;  %v8979_v31 = vld [vmem:[#allocation20 + $0xdd0] sm:$0xff] }
 0x7f0   :  { %v8983_v26 = vld [vmem:[#allocation20 + $0xdf0] sm:$0xff] }
 0x7f1   :  { %12049 = vmatpush1.bf16.msra.mxu1 %v14279_v61  ;;  %v8887_v61 = vld [vmem:[#allocation20 + $0xaf0] sm:$0xff] }
 0x7f2   :  { %12092 = vmatpush1.bf16.msra.mxu0 %v14407_v57  ;;  %12050 = vmatprep.subr.bf16.mxu1 %v14272_v56  ;;  %v14359_v57 = vcombine.low %v8763_v59, %v8767_v63  ;;  %v14487_v56 = vcombine.low %v8891_v4, %v8895_v53  ;;  %v14480_v46 = vcombine.high %v8883_v5, %v8887_v61  ;;  %v8971_v63 = vld [vmem:[#allocation20 + $0xd90] sm:$0xff] }
 0x7f3   :  { %12093 = vmatprep.subr.bf16.mxu0 %v14400_v62  ;;  %v14352_v62 = vcombine.high %v8755_v29, %v8759_v51  ;;  %v8975_v4 = vld [vmem:[#allocation20 + $0xdb0] sm:$0xff]  ;;  %v14575_v53 = vcombine.low %v8979_v31, %v8983_v26 }
 0x7f5   :  { %12051 = vmatpush1.bf16.msra.mxu1 %v14271_v24  ;;  %v8879_v24 = vld [vmem:[#allocation20 + $0xab0] sm:$0xff] }
 0x7f6   :  { %12094 = vmatpush1.bf16.msra.mxu0 %v14399_v8  ;;  %12052 = vmatprep.subr.bf16.mxu1 %v14264_v38  ;;  %v14351_v8 = vcombine.low %v8755_v29, %v8759_v51  ;;  %v14479_v38 = vcombine.low %v8883_v5, %v8887_v61  ;;  %v14472_v18 = vcombine.high %v8875_v58, %v8879_v24  ;;  %v8963_v29 = vld [vmem:[#allocation20 + $0xd50] sm:$0xff]  ;;  %v8580_v61 = vld [vmem:[#allocation20 + $0x158] sm:$0xff] }
 0x7f7   :  { %12095 = vmatprep.subr.bf16.mxu0 %v14392_v3  ;;  %v14344_v3 = vcombine.high %v8747_v6, %v8751_v27  ;;  %v8967_v51 = vld [vmem:[#allocation20 + $0xd70] sm:$0xff] }
 0x7f9   :  { %12053 = vmatpush1.bf16.msra.mxu1 %v14263_v44  ;;  %v8871_v44 = vld [vmem:[#allocation20 + $0xa70] sm:$0xff] }
 0x7fa   :  { %12096 = vmatpush1.bf16.msra.mxu0 %v14391_v28  ;;  %12054 = vmatprep.subr.bf16.mxu1 %v14384_v16  ;;  %v14343_v28 = vcombine.low %v8747_v6, %v8751_v27  ;;  %v14471_v16 = vcombine.low %v8875_v58, %v8879_v24  ;;  %v14464_v30 = vcombine.high %v8867_v48, %v8871_v44  ;;  %v8955_v27 = vld [vmem:[#allocation20 + $0xd10] sm:$0xff]  ;;  %v8572_v24 = vld [vmem:[#allocation20 + $0x118] sm:$0xff] }
 0x7fb   :  { %12097 = vmatprep.subr.bf16.mxu0 %v14512_v2  ;;  %v14336_v2 = vcombine.high %v8739_v10, %v8743_v7  ;;  %v8959_v58 = vld [vmem:[#allocation20 + $0xd30] sm:$0xff] }
 0x7fd   :  { %12055 = vmatpush2.bf16.msra.mxu1 %v14383_v20  ;;  %v8863_v20 = vld [vmem:[#allocation20 + $0xa30] sm:$0xff] }
 0x7fe   :  { %12098 = vmatpush2.bf16.msra.mxu0 %v14511_v54  ;;  %12056 = vmatprep.subr.bf16.mxu1 %v14376_v32  ;;  %v14335_v54 = vcombine.low %v8739_v10, %v8743_v7  ;;  %v14463_v32 = vcombine.low %v8867_v48, %v8871_v44  ;;  %v14456_v21 = vcombine.high %v8859_v11, %v8863_v20  ;;  %v8947_v7 = vld [vmem:[#allocation20 + $0xcd0] sm:$0xff]  ;;  %v8564_v44 = vld [vmem:[#allocation20 + $0xd8] sm:$0xff] }
 0x7ff   :  { %12099 = vmatprep.subr.bf16.mxu0 %v14504_v13  ;;  %v14328_v13 = vcombine.high %v8731_v49, %v8735_v52  ;;  %v8951_v48 = vld [vmem:[#allocation20 + $0xcf0] sm:$0xff] }
 0x801   :  { %12057 = vmatpush2.bf16.msra.mxu1 %v14375_v17  ;;  %v8600_v17 = vld [vmem:[#allocation20 + $0x1f8] sm:$0xff] }
 0x802   :  { %12100 = vmatpush2.bf16.msra.mxu0 %v14503_v34  ;;  %12058 = vmatprep.subr.bf16.mxu1 %v14368_v60  ;;  %v14327_v34 = vcombine.low %v8731_v49, %v8735_v52  ;;  %v14455_v60 = vcombine.low %v8859_v11, %v8863_v20  ;;  %v14194_v59 = vcombine.high %v8596_v14, %v8600_v17  ;;  %v8939_v49 = vld [vmem:[#allocation20 + $0xc90] sm:$0xff]  ;;  %v8556_v11 = vld [vmem:[#allocation20 + $0x98] sm:$0xff] }
 0x803   :  { %12101 = vmatprep.subr.bf16.mxu0 %v14496_v0  ;;  %v14576_v0 = vcombine.high %v8979_v31, %v8983_v26  ;;  %v8943_v52 = vld [vmem:[#allocation20 + $0xcb0] sm:$0xff]  ;;  %v8560_v20 = vld [vmem:[#allocation20 + $0xb8] sm:$0xff] }
 0x804   :  { %v8931_v31 = vld [vmem:[#allocation20 + $0xc50] sm:$0xff] }
 0x805   :  { %12059 = vmatpush2.bf16.msra.mxu1 %v14367_v36  ;;  %v8588_v36 = vld [vmem:[#allocation20 + $0x198] sm:$0xff]  ;;  %v8935_v26 = vld [vmem:[#allocation20 + $0xc70] sm:$0xff] }
 0x806   :  { %12102 = vmatpush2.bf16.msra.mxu0 %v14495_v25  ;;  %12060 = vmatprep.subr.bf16.mxu1 %v14360_v55  ;;  %v8592_v25 = vld [vmem:[#allocation20 + $0x1b8] sm:$0xff]  ;;  %v14193_v55 = vcombine.low %v8596_v14, %v8600_v17 }
 0x807   :  { %12103 = vmatprep.subr.bf16.mxu0 %v14488_v37  ;;  %v14568_v37 = vcombine.high %v8971_v63, %v8975_v4  ;;  %v14186_v5 = vcombine.high %v8588_v36, %v8592_v25  ;;  %v8548_v14 = vld [vmem:[#allocation20 + $0x58] sm:$0xff] }
 0x808   :  { %v8552_v17 = vld [vmem:[#allocation20 + $0x78] sm:$0xff] }
 0x809   :  { %12061 = vmatpush2.bf16.msra.mxu1 %v14359_v57  ;;  %v8584_v57 = vld [vmem:[#allocation20 + $0x178] sm:$0xff] }
 0x80a   :  { %12104 = vmatpush2.bf16.msra.mxu0 %v14487_v56  ;;  %12062 = vmatprep.subr.bf16.mxu1 %v14352_v62  ;;  %v14567_v56 = vcombine.low %v8971_v63, %v8975_v4  ;;  %v14185_v62 = vcombine.low %v8588_v36, %v8592_v25  ;;  %v14178_v6 = vcombine.high %v8580_v61, %v8584_v57  ;;  %v8923_v63 = vld [vmem:[#allocation20 + $0xc10] sm:$0xff]  ;;  %v8544_v36 = vld [vmem:[#allocation20 + $0x38] sm:$0xff] }
 0x80b   :  { %12105 = vmatprep.subr.bf16.mxu0 %v14480_v46  ;;  %v14560_v46 = vcombine.high %v8963_v29, %v8967_v51  ;;  %v8927_v4 = vld [vmem:[#allocation20 + $0xc30] sm:$0xff]  ;;  %v14527_v25 = vcombine.low %v8931_v31, %v8935_v26 }
 0x80d   :  { %12063 = vmatpush2.bf16.msra.mxu1 %v14351_v8  ;;  %v8576_v8 = vld [vmem:[#allocation20 + $0x138] sm:$0xff] }
 0x80e   :  { %12106 = vmatpush2.bf16.msra.mxu0 %v14479_v38  ;;  %12064 = vmatprep.subr.bf16.mxu1 %v14344_v3  ;;  %v14559_v38 = vcombine.low %v8963_v29, %v8967_v51  ;;  %v14177_v3 = vcombine.low %v8580_v61, %v8584_v57  ;;  %v14170_v10 = vcombine.high %v8572_v24, %v8576_v8  ;;  %v9043_v51 = vld [vmem:[#allocation20 + $0xfd0] sm:$0xff]  ;;  %v8660_v61 = vld [vmem:[#allocation20 + $0x3d8] sm:$0xff] }
 0x80f   :  { %12107 = vmatprep.subr.bf16.mxu0 %v14472_v18  ;;  %v14552_v18 = vcombine.high %v8955_v27, %v8959_v58  ;;  %v8664_v57 = vld [vmem:[#allocation20 + $0x3f8] sm:$0xff] }
 0x811   :  { %12065 = vmatpush2.bf16.msra.mxu1 %v14343_v28  ;;  %v8568_v28 = vld [vmem:[#allocation20 + $0xf8] sm:$0xff] }
 0x812   :  { %12108 = vmatpush2.bf16.msra.mxu0 %v14471_v16  ;;  %12066 = vmatprep.subr.bf16.mxu1 %v14336_v2  ;;  %v14169_v16 = vcombine.low %v8572_v24, %v8576_v8  ;;  %v14544_v2 = vcombine.high %v8947_v7, %v8951_v48  ;;  %v8652_v24 = vld [vmem:[#allocation20 + $0x398] sm:$0xff] }
 0x813   :  { %12109 = vmatprep.subr.bf16.mxu0 %v14464_v30  ;;  %v14162_v30 = vcombine.high %v8564_v44, %v8568_v28  ;;  %v8656_v8 = vld [vmem:[#allocation20 + $0x3b8] sm:$0xff] }
 0x815   :  { %12067 = vmatpush2.bf16.msra.mxu1 %v14335_v54  ;;  %v14543_v54 = vcombine.low %v8947_v7, %v8951_v48  ;;  %v9027_v7 = vld [vmem:[#allocation20 + $0xf50] sm:$0xff] }
 0x816   :  { %12110 = vmatpush2.bf16.msra.mxu0 %v14463_v32  ;;  %12068 = vmatprep.subr.bf16.mxu1 %v14328_v13  ;;  %v14161_v32 = vcombine.low %v8564_v44, %v8568_v28  ;;  %v14536_v13 = vcombine.high %v8939_v49, %v8943_v52  ;;  %v9031_v48 = vld [vmem:[#allocation20 + $0xf70] sm:$0xff]  ;;  %v8644_v44 = vld [vmem:[#allocation20 + $0x358] sm:$0xff] }
 0x817   :  { %12111 = vmatprep.subr.bf16.mxu0 %v14456_v21  ;;  %v14154_v21 = vcombine.high %v8556_v11, %v8560_v20  ;;  %v8648_v28 = vld [vmem:[#allocation20 + $0x378] sm:$0xff] }
 0x819   :  { %12069 = vmatpush2.bf16.msra.mxu1 %v14327_v34  ;;  %v14535_v34 = vcombine.low %v8939_v49, %v8943_v52  ;;  %v9019_v49 = vld [vmem:[#allocation20 + $0xf10] sm:$0xff] }
 0x81a   :  { %12112 = vmatpush2.bf16.msra.mxu0 %v14455_v60  ;;  %12124 = vmatprep.subr.bf16.mxu1 %v14576_v0  ;;  %v14153_v60 = vcombine.low %v8556_v11, %v8560_v20  ;;  %v14528_v0 = vcombine.high %v8931_v31, %v8935_v26  ;;  %v9023_v52 = vld [vmem:[#allocation20 + $0xf30] sm:$0xff]  ;;  %v8636_v11 = vld [vmem:[#allocation20 + $0x318] sm:$0xff] }
 0x81b   :  { %12167 = vmatprep.subr.bf16.mxu0 %v14194_v59  ;;  %v14146_v59 = vcombine.high %v8548_v14, %v8552_v17  ;;  %v8640_v20 = vld [vmem:[#allocation20 + $0x338] sm:$0xff]  ;;  %v9011_v31 = vld [vmem:[#allocation20 + $0xed0] sm:$0xff] }
 0x81c   :  { %12071 = vmatmul.mubr.bf16.vlgmr.msra.gmra.mxu1 %v16363_v33  ;;  %v9015_v26 = vld [vmem:[#allocation20 + $0xef0] sm:$0xff] }
 0x81d   :  { %12114 = vmatmul.mubr.bf16.vlgmr.msra.gmra.mxu0 %v16391_v15  ;;  %12125 = vmatpush1.bf16.msra.mxu1 %v14575_v53  ;;  %v8540_v53 = vld [vmem:[#allocation20 + $0x18] sm:$0xff] }
 0x81e   :  { %12156 = vmatprep.mubr.bf16.mxu1 %v16415_v45  ;;  %12168 = vmatpush1.bf16.msra.mxu0 %v14193_v55  ;;  %v14145_v55 = vcombine.low %v8548_v14, %v8552_v17  ;;  %v14138_v29 = vcombine.high %v8540_v53, %v8544_v36  ;;  %v8628_v14 = vld [vmem:[#allocation20 + $0x2d8] sm:$0xff] }
 0x81f   :  { %12199 = vmatprep.mubr.bf16.mxu0 %v16333_v50  ;;  %12126 = vmatprep.subr.bf16.mxu1 %v14568_v37  ;;  %v14551_v50 = vcombine.low %v8955_v27, %v8959_v58  ;;  %v14520_v37 = vcombine.high %v8923_v63, %v8927_v4  ;;  %v9035_v27 = vld [vmem:[#allocation20 + $0xf90] sm:$0xff]  ;;  %v8632_v17 = vld [vmem:[#allocation20 + $0x2f8] sm:$0xff] }
 0x820   :  { %12169 = vmatprep.subr.bf16.mxu0 %v14186_v5  ;;  %v9047_v5 = vld [vmem:[#allocation20 + $0xff0] sm:$0xff] }
 0x821   :  { %12127 = vmatpush1.bf16.msra.mxu1 %v14567_v56  ;;  %v14519_v56 = vcombine.low %v8923_v63, %v8927_v4  ;;  %v9039_v58 = vld [vmem:[#allocation20 + $0xfb0] sm:$0xff] }
 0x822   :  { %12170 = vmatpush1.bf16.msra.mxu0 %v14185_v62  ;;  %12128 = vmatprep.subr.bf16.mxu1 %v14560_v46  ;;  %v14137_v62 = vcombine.low %v8540_v53, %v8544_v36  ;;  %v14640_v46 = vcombine.high %v9043_v51, %v9047_v5  ;;  %v9003_v63 = vld [vmem:[#allocation20 + $0xe90] sm:$0xff]  ;;  %v8620_v53 = vld [vmem:[#allocation20 + $0x298] sm:$0xff] }
 0x823   :  { %12171 = vmatprep.subr.bf16.mxu0 %v14178_v6  ;;  %v14258_v6 = vcombine.high %v8660_v61, %v8664_v57  ;;  %v9007_v4 = vld [vmem:[#allocation20 + $0xeb0] sm:$0xff]  ;;  %v8624_v36 = vld [vmem:[#allocation20 + $0x2b8] sm:$0xff] }
 0x825   :  { %12129 = vmatpush1.bf16.msra.mxu1 %v14559_v38  ;;  %v14639_v38 = vcombine.low %v9043_v51, %v9047_v5  ;;  %v8995_v51 = vld [vmem:[#allocation20 + $0xe50] sm:$0xff] }
 0x826   :  { %12172 = vmatpush1.bf16.msra.mxu0 %v14177_v3  ;;  %12130 = vmatprep.subr.bf16.mxu1 %v14552_v18  ;;  %v14257_v3 = vcombine.low %v8660_v61, %v8664_v57  ;;  %v14632_v18 = vcombine.high %v9035_v27, %v9039_v58  ;;  %v8999_v5 = vld [vmem:[#allocation20 + $0xe70] sm:$0xff]  ;;  %v8612_v61 = vld [vmem:[#allocation20 + $0x258] sm:$0xff] }
 0x827   :  { %12173 = vmatprep.subr.bf16.mxu0 %v14170_v10  ;;  %v14250_v10 = vcombine.high %v8652_v24, %v8656_v8  ;;  %v8616_v57 = vld [vmem:[#allocation20 + $0x278] sm:$0xff] }
 0x829   :  { %12131 = vmatpush1.bf16.msra.mxu1 %v14551_v50  ;;  %v14631_v50 = vcombine.low %v9035_v27, %v9039_v58  ;;  %v8987_v27 = vld [vmem:[#allocation20 + $0xe10] sm:$0xff] }
 0x82a   :  { %12174 = vmatpush1.bf16.msra.mxu0 %v14169_v16  ;;  %12132 = vmatprep.subr.bf16.mxu1 %v14544_v2  ;;  %v14249_v16 = vcombine.low %v8652_v24, %v8656_v8  ;;  %v14624_v2 = vcombine.high %v9027_v7, %v9031_v48  ;;  %v8991_v58 = vld [vmem:[#allocation20 + $0xe30] sm:$0xff]  ;;  %v8604_v24 = vld [vmem:[#allocation20 + $0x218] sm:$0xff] }
 0x82b   :  { %12175 = vmatprep.subr.bf16.mxu0 %v14162_v30  ;;  %v14242_v30 = vcombine.high %v8644_v44, %v8648_v28  ;;  %v8608_v8 = vld [vmem:[#allocation20 + $0x238] sm:$0xff] }
 0x82d   :  { %12133 = vmatpush1.bf16.msra.mxu1 %v14543_v54  ;;  %v14623_v54 = vcombine.low %v9027_v7, %v9031_v48  ;;  %v8724_v7 = vld [vmem:[#allocation20 + $0x5d8] sm:$0xff] }
 0x82e   :  { %12176 = vmatpush1.bf16.msra.mxu0 %v14161_v32  ;;  %12134 = vmatprep.subr.bf16.mxu1 %v14536_v13  ;;  %v14241_v32 = vcombine.low %v8644_v44, %v8648_v28  ;;  %v14616_v13 = vcombine.high %v9019_v49, %v9023_v52  ;;  %v8728_v48 = vld [vmem:[#allocation20 + $0x5f8] sm:$0xff] }
 0x82f   :  { %12177 = vmatprep.subr.bf16.mxu0 %v14154_v21  ;;  %v14234_v21 = vcombine.high %v8636_v11, %v8640_v20  ;;  %v8852_v44 = vld [vmem:[#allocation20 + $0x9d8] sm:$0xff] }
 0x830   :  { %v8856_v28 = vld [vmem:[#allocation20 + $0x9f8] sm:$0xff] }
 0x831   :  { %12135 = vmatpush1.bf16.msra.mxu1 %v14535_v34  ;;  %v14615_v34 = vcombine.low %v9019_v49, %v9023_v52  ;;  %v8716_v49 = vld [vmem:[#allocation20 + $0x598] sm:$0xff] }
 0x832   :  { %12178 = vmatpush1.bf16.msra.mxu0 %v14153_v60  ;;  %12136 = vmatprep.subr.bf16.mxu1 %v14528_v0  ;;  %v14233_v60 = vcombine.low %v8636_v11, %v8640_v20  ;;  %v14608_v0 = vcombine.high %v9011_v31, %v9015_v26  ;;  %v8720_v52 = vld [vmem:[#allocation20 + $0x5b8] sm:$0xff]  ;;  %v14321_v11 = vcombine.low %v8724_v7, %v8728_v48 }
 0x833   :  { %12179 = vmatprep.subr.bf16.mxu0 %v14146_v59  ;;  %v14226_v59 = vcombine.high %v8628_v14, %v8632_v17  ;;  %v8844_v20 = vld [vmem:[#allocation20 + $0x998] sm:$0xff] }
 0x835   :  { %12137 = vmatpush1.bf16.msra.mxu1 %v14527_v25  ;;  %v14607_v25 = vcombine.low %v9011_v31, %v9015_v26  ;;  %v8712_v31 = vld [vmem:[#allocation20 + $0x578] sm:$0xff] }
 0x836   :  { %12180 = vmatpush1.bf16.msra.mxu0 %v14145_v55  ;;  %12138 = vmatprep.subr.bf16.mxu1 %v14520_v37  ;;  %v14225_v55 = vcombine.low %v8628_v14, %v8632_v17  ;;  %v14600_v37 = vcombine.high %v9003_v63, %v9007_v4  ;;  %v8836_v14 = vld [vmem:[#allocation20 + $0x958] sm:$0xff] }
 0x837   :  { %12181 = vmatprep.subr.bf16.mxu0 %v14138_v29  ;;  %v14218_v29 = vcombine.high %v8620_v53, %v8624_v36  ;;  %v8840_v17 = vld [vmem:[#allocation20 + $0x978] sm:$0xff] }
 0x839   :  { %12139 = vmatpush1.bf16.msra.mxu1 %v14519_v56  ;;  %v14599_v56 = vcombine.low %v9003_v63, %v9007_v4  ;;  %v8700_v63 = vld [vmem:[#allocation20 + $0x518] sm:$0xff] }
 0x83a   :  { %12182 = vmatpush1.bf16.msra.mxu0 %v14137_v62  ;;  %12140 = vmatprep.subr.bf16.mxu1 %v14640_v46  ;;  %v14217_v62 = vcombine.low %v8620_v53, %v8624_v36  ;;  %v14592_v46 = vcombine.high %v8995_v51, %v8999_v5  ;;  %v8704_v4 = vld [vmem:[#allocation20 + $0x538] sm:$0xff] }
 0x83b   :  { %12183 = vmatprep.subr.bf16.mxu0 %v14258_v6  ;;  %v14210_v6 = vcombine.high %v8612_v61, %v8616_v57  ;;  %v8828_v53 = vld [vmem:[#allocation20 + $0x918] sm:$0xff] }
 0x83c   :  { %v8832_v36 = vld [vmem:[#allocation20 + $0x938] sm:$0xff] }
 0x83d   :  { %12141 = vmatpush2.bf16.msra.mxu1 %v14639_v38  ;;  %v14591_v38 = vcombine.low %v8995_v51, %v8999_v5  ;;  %v8820_v51 = vld [vmem:[#allocation20 + $0x8d8] sm:$0xff] }
 0x83e   :  { %12184 = vmatpush2.bf16.msra.mxu0 %v14257_v3  ;;  %12142 = vmatprep.subr.bf16.mxu1 %v14632_v18  ;;  %v14209_v3 = vcombine.low %v8612_v61, %v8616_v57  ;;  %v14584_v18 = vcombine.high %v8987_v27, %v8991_v58  ;;  %v8824_v5 = vld [vmem:[#allocation20 + $0x8f8] sm:$0xff]  ;;  %v14425_v61 = vcombine.low %v8828_v53, %v8832_v36 }
 0x83f   :  { %12185 = vmatprep.subr.bf16.mxu0 %v14250_v10  ;;  %v14202_v10 = vcombine.high %v8604_v24, %v8608_v8 }
 0x841   :  { %12143 = vmatpush2.bf16.msra.mxu1 %v14631_v50  ;;  %v14583_v50 = vcombine.low %v8987_v27, %v8991_v58  ;;  %v8816_v27 = vld [vmem:[#allocation20 + $0x8b8] sm:$0xff] }
 0x842   :  { %12186 = vmatpush2.bf16.msra.mxu0 %v14249_v16  ;;  %12144 = vmatprep.subr.bf16.mxu1 %v14624_v2  ;;  %v14201_v16 = vcombine.low %v8604_v24, %v8608_v8  ;;  %v14322_v2 = vcombine.high %v8724_v7, %v8728_v48  ;;  %v14417_v24 = vcombine.low %v8820_v51, %v8824_v5  ;;  %v8808_v7 = vld [vmem:[#allocation20 + $0x878] sm:$0xff] }
 0x843   :  { %12187 = vmatprep.subr.bf16.mxu0 %v14242_v30  ;;  %v14450_v30 = vcombine.high %v8852_v44, %v8856_v28 }
 0x845   :  { %12145 = vmatpush2.bf16.msra.mxu1 %v14623_v54  ;;  %v8848_v54 = vld [vmem:[#allocation20 + $0x9b8] sm:$0xff] }
 0x846   :  { %12188 = vmatpush2.bf16.msra.mxu0 %v14241_v32  ;;  %12146 = vmatprep.subr.bf16.mxu1 %v14616_v13  ;;  %v14449_v32 = vcombine.low %v8852_v44, %v8856_v28  ;;  %v14314_v13 = vcombine.high %v8716_v49, %v8720_v52  ;;  %v14442_v26 = vcombine.high %v8844_v20, %v8848_v54 }
 0x847   :  { %12189 = vmatprep.subr.bf16.mxu0 %v14234_v21  ;;  %v8708_v21 = vld [vmem:[#allocation20 + $0x558] sm:$0xff] }
 0x849   :  { %12147 = vmatpush2.bf16.msra.mxu1 %v14615_v34  ;;  %v14313_v34 = vcombine.low %v8716_v49, %v8720_v52  ;;  %v8800_v49 = vld [vmem:[#allocation20 + $0x838] sm:$0xff] }
 0x84a   :  { %12190 = vmatpush2.bf16.msra.mxu0 %v14233_v60  ;;  %12148 = vmatprep.subr.bf16.mxu1 %v14608_v0  ;;  %v14441_v60 = vcombine.low %v8844_v20, %v8848_v54  ;;  %v14306_v0 = vcombine.high %v8708_v21, %v8712_v31 }
 0x84b   :  { %12191 = vmatprep.subr.bf16.mxu0 %v14226_v59  ;;  %v14434_v59 = vcombine.high %v8836_v14, %v8840_v17 }
 0x84d   :  { %12149 = vmatpush2.bf16.msra.mxu1 %v14607_v25  ;;  %v14305_v25 = vcombine.low %v8708_v21, %v8712_v31  ;;  %v8916_v21 = vld [vmem:[#allocation20 + $0xbd8] sm:$0xff] }
 0x84e   :  { %12192 = vmatpush2.bf16.msra.mxu0 %v14225_v55  ;;  %12150 = vmatprep.subr.bf16.mxu1 %v14600_v37  ;;  %v14298_v55 = vcombine.high %v8700_v63, %v8704_v4  ;;  %v8692_v37 = vld [vmem:[#allocation20 + $0x4d8] sm:$0xff] }
 0x84f   :  { %12193 = vmatprep.subr.bf16.mxu0 %v14218_v29  ;;  %v8696_v29 = vld [vmem:[#allocation20 + $0x4f8] sm:$0xff] }
 0x850   :  { %v14290_v57 = vcombine.high %v8692_v37, %v8696_v29  ;;  %v14289_v58 = vcombine.low %v8692_v37, %v8696_v29  ;;  %v8920_v31 = vld [vmem:[#allocation20 + $0xbf8] sm:$0xff] }
 0x851   :  { %12151 = vmatpush2.bf16.msra.mxu1 %v14599_v56  ;;  %v14418_v56 = vcombine.high %v8820_v51, %v8824_v5  ;;  %v8772_v37 = vld [vmem:[#allocation20 + $0x758] sm:$0xff] }
 0x852   :  { %12194 = vmatpush2.bf16.msra.mxu0 %v14217_v62  ;;  %12152 = vmatprep.subr.bf16.mxu1 %v14592_v46  ;;  %v8684_v62 = vld [vmem:[#allocation20 + $0x498] sm:$0xff] }
 0x853   :  { %12195 = vmatprep.subr.bf16.mxu0 %v14210_v6  ;;  %v8688_v46 = vld [vmem:[#allocation20 + $0x4b8] sm:$0xff] }
 0x854   :  { %v8812_v6 = vld [vmem:[#allocation20 + $0x898] sm:$0xff]  ;;  %v14282_v8 = vcombine.high %v8684_v62, %v8688_v46  ;;  %v14281_v48 = vcombine.low %v8684_v62, %v8688_v46 }
 0x855   :  { %12153 = vmatpush2.bf16.msra.mxu1 %v14591_v38  ;;  %v14410_v38 = vcombine.high %v8812_v6, %v8816_v27  ;;  %v14409_v44 = vcombine.low %v8812_v6, %v8816_v27  ;;  %v8776_v29 = vld [vmem:[#allocation20 + $0x778] sm:$0xff] }
 0x856   :  { %12196 = vmatpush2.bf16.msra.mxu0 %v14209_v3  ;;  %12154 = vmatprep.subr.bf16.mxu1 %v14584_v18  ;;  %v8676_v3 = vld [vmem:[#allocation20 + $0x458] sm:$0xff]  ;;  %v14370_v62 = vcombine.high %v8772_v37, %v8776_v29 }
 0x857   :  { %12197 = vmatprep.subr.bf16.mxu0 %v14202_v10  ;;  %v8680_v18 = vld [vmem:[#allocation20 + $0x478] sm:$0xff] }
 0x858   :  { %v8804_v10 = vld [vmem:[#allocation20 + $0x858] sm:$0xff]  ;;  %v14274_v28 = vcombine.high %v8676_v3, %v8680_v18  ;;  %v14273_v52 = vcombine.low %v8676_v3, %v8680_v18 }
 0x859   :  { %12155 = vmatpush2.bf16.msra.mxu1 %v14583_v50  ;;  %v14402_v50 = vcombine.high %v8804_v10, %v8808_v7  ;;  %v8900_v5 = vld [vmem:[#allocation20 + $0xb58] sm:$0xff] }
 0x85a   :  { %12198 = vmatpush2.bf16.msra.mxu0 %v14201_v16  ;;  %12210 = vmatprep.subr.bf16.mxu1 %v14322_v2  ;;  %v8668_v16 = vld [vmem:[#allocation20 + $0x418] sm:$0xff] }
 0x85b   :  { %12253 = vmatprep.subr.bf16.mxu0 %v14450_v30  ;;  %v8672_v2 = vld [vmem:[#allocation20 + $0x438] sm:$0xff] }
 0x85c   :  { %12157 = vmatmul.mubr.bf16.vlgmr.msra.gmra.mxu1 %v16413_v35  ;;  %v8796_v30 = vld [vmem:[#allocation20 + $0x818] sm:$0xff]  ;;  %v14266_v20 = vcombine.high %v8668_v16, %v8672_v2 }
 0x85d   :  { %12200 = vmatmul.mubr.bf16.vlgmr.msra.gmra.mxu0 %v16339_v22  ;;  %12211 = vmatpush1.bf16.msra.mxu1 %v14321_v11  ;;  %v14433_v22 = vcombine.low %v8836_v14, %v8840_v17  ;;  %v14401_v11 = vcombine.low %v8804_v10, %v8808_v7  ;;  %v14394_v54 = vcombine.high %v8796_v30, %v8800_v49  ;;  %v16441_v14 = vpop.f32.mrf.mxu0  ;;  %v8764_v6 = vld [vmem:[#allocation20 + $0x718] sm:$0xff] }
 0x85e   :  { %12242 = vmatprep.mubr.bf16.mxu1 %v16365_v23  ;;  %12254 = vmatpush1.bf16.msra.mxu0 %v14449_v32  ;;  %v14426_v23 = vcombine.high %v8828_v53, %v8832_v36  ;;  %v8788_v32 = vld [vmem:[#allocation20 + $0x7d8] sm:$0xff]  ;;  %v14393_v17 = vcombine.low %v8796_v30, %v8800_v49 }
 0x85f   :  { %12285 = vmatprep.mubr.bf16.mxu0 %v16393_v9  ;;  %12212 = vmatprep.subr.bf16.mxu1 %v14314_v13  ;;  %v14297_v9 = vcombine.low %v8700_v63, %v8704_v4  ;;  %v8792_v13 = vld [vmem:[#allocation20 + $0x7f8] sm:$0xff]  ;;  %v16443_v63 = vpop.f32.mrf.mxu1 }
 0x860   :  { %12255 = vmatprep.subr.bf16.mxu0 %v14442_v26  ;;  %v14265_v26 = vcombine.low %v8668_v16, %v8672_v2  ;;  %v8908_v4 = vld [vmem:[#allocation20 + $0xb98] sm:$0xff]  ;;  %v14385_v36 = vcombine.low %v8788_v32, %v8792_v13 }
 0x861   :  { %12213 = vmatpush1.bf16.msra.mxu1 %v14313_v34  ;;  %v14386_v34 = vcombine.high %v8788_v32, %v8792_v13  ;;  %v8912_v53 = vld [vmem:[#allocation20 + $0xbb8] sm:$0xff]  ;;  %v16447_v51 = vpop.f32.mrf.mxu1 }
 0x862   :  { %12256 = vmatpush1.bf16.msra.mxu0 %v14441_v60  ;;  %12214 = vmatprep.subr.bf16.mxu1 %v14306_v0  ;;  %v14514_v60 = vcombine.high %v8916_v21, %v8920_v31  ;;  %v8780_v0 = vld [vmem:[#allocation20 + $0x798] sm:$0xff] }
 0x863   :  { %12257 = vmatprep.subr.bf16.mxu0 %v14434_v59  ;;  %v8784_v59 = vld [vmem:[#allocation20 + $0x7b8] sm:$0xff] }
 0x864   :  { %v8768_v27 = vld [vmem:[#allocation20 + $0x738] sm:$0xff] }
 0x865   :  { %12215 = vmatpush1.bf16.msra.mxu1 %v14305_v25  ;;  %v16445_v25 = vpop.f32.mrf.mxu0  ;;  %v14362_v10 = vcombine.high %v8764_v6, %v8768_v27  ;;  %v8884_v16 = vld [vmem:[#allocation20 + $0xad8] sm:$0xff]  ;;  %v14361_v30 = vcombine.low %v8764_v6, %v8768_v27 }
 0x866   :  { %12258 = vmatpush1.bf16.msra.mxu0 %v14433_v22  ;;  %12216 = vmatprep.subr.bf16.mxu1 %v14298_v55  ;;  %v14513_v22 = vcombine.low %v8916_v21, %v8920_v31  ;;  %v14378_v55 = vcombine.high %v8780_v0, %v8784_v59  ;;  %v8888_v2 = vld [vmem:[#allocation20 + $0xaf8] sm:$0xff] }
 0x867   :  { %12259 = vmatprep.subr.bf16.mxu0 %v14426_v23  ;;  %v14506_v23 = vcombine.high %v8908_v4, %v8912_v53  ;;  %v8752_v32 = vld [vmem:[#allocation20 + $0x6b8] sm:$0xff] }
 0x868   :  { %v8876_v21 = vld [vmem:[#allocation20 + $0xa98] sm:$0xff] }
 0x869   :  { %12217 = vmatpush1.bf16.msra.mxu1 %v14297_v9  ;;  %v8904_v9 = vld [vmem:[#allocation20 + $0xb78] sm:$0xff] }
 0x86a   :  { %12260 = vmatpush1.bf16.msra.mxu0 %v14425_v61  ;;  %12218 = vmatprep.subr.bf16.mxu1 %v14290_v57  ;;  %v14377_v61 = vcombine.low %v8780_v0, %v8784_v59  ;;  %v16449_v57 = vpop.f32.mrf.mxu0  ;;  %v14498_v46 = vcombine.high %v8900_v5, %v8904_v9  ;;  %v14497_v18 = vcombine.low %v8900_v5, %v8904_v9  ;;  %v8880_v31 = vld [vmem:[#allocation20 + $0xab8] sm:$0xff] }
 0x86b   :  { %12261 = vmatprep.subr.bf16.mxu0 %v14418_v56  ;;  %v14505_v56 = vcombine.low %v8908_v4, %v8912_v53  ;;  %v14474_v0 = vcombine.high %v8876_v21, %v8880_v31  ;;  %v8740_v59 = vld [vmem:[#allocation20 + $0x658] sm:$0xff]  ;;  %v16457_v53 = vld [vmem:[#allocation22] sm:$0xff]  ;;  %v14473_v5 = vcombine.low %v8876_v21, %v8880_v31 }
 0x86c   :  { %v11691_v3 = vpop.f32.mrf.mxu0  ;;  %v8744_v4 = vld [vmem:[#allocation20 + $0x678] sm:$0xff] }
 0x86d   :  { %12219 = vmatpush1.bf16.msra.mxu1 %v14289_v58  ;;  %v16451_v58 = vpop.f32.mrf.mxu1  ;;  %v14338_v9 = vcombine.high %v8740_v59, %v8744_v4  ;;  %v8860_v27 = vld [vmem:[#allocation20 + $0xa18] sm:$0xff] }
 0x86e   :  { %12262 = vmatpush1.bf16.msra.mxu0 %v14417_v24  ;;  %12220 = vmatprep.subr.bf16.mxu1 %v14282_v8  ;;  %v8892_v24 = vld [vmem:[#allocation20 + $0xb18] sm:$0xff] }
 0x86f   :  { %12263 = vmatprep.subr.bf16.mxu0 %v14410_v38  ;;  %v8896_v8 = vld [vmem:[#allocation20 + $0xb38] sm:$0xff]  ;;  %v14369_v38 = vcombine.low %v8772_v37, %v8776_v29 }
 0x870   :  { %v14490_v7 = vcombine.high %v8892_v24, %v8896_v8  ;;  %v8976_v21 = vld [vmem:[#allocation20 + $0xdb8] sm:$0xff] }
 0x871   :  { %12221 = vmatpush1.bf16.msra.mxu1 %v14281_v48  ;;  %v8756_v48 = vld [vmem:[#allocation20 + $0x6d8] sm:$0xff] }
 0x872   :  { %12264 = vmatpush1.bf16.msra.mxu0 %v14409_v44  ;;  %12222 = vmatprep.subr.bf16.mxu1 %v14274_v28  ;;  %v8760_v44 = vld [vmem:[#allocation20 + $0x6f8] sm:$0xff]  ;;  %v11734_v28 = vpop.f32.mrf.mxu1 }
 0x873   :  { %12265 = vmatprep.subr.bf16.mxu0 %v14402_v50  ;;  %v16453_v50 = vpop.f32.mrf.mxu0 }
 0x874   :  { %v16455_v49 = vpop.f32.mrf.mxu1 }
 0x875   :  { %12223 = vmatpush1.bf16.msra.mxu1 %v14273_v52  ;;  %v14489_v52 = vcombine.low %v8892_v24, %v8896_v8  ;;  %v11773_v13 = vpop.f32.mrf.mxu0  ;;  %v8864_v24 = vld [vmem:[#allocation20 + $0xa38] sm:$0xff] }
 0x876   :  { %12266 = vmatpush1.bf16.msra.mxu0 %v14401_v11  ;;  %12224 = vmatprep.subr.bf16.mxu1 %v14266_v20  ;;  %v14354_v11 = vcombine.high %v8756_v48, %v8760_v44  ;;  %v14482_v20 = vcombine.high %v8884_v16, %v8888_v2 }
 0x877   :  { %12267 = vmatprep.subr.bf16.mxu0 %v14394_v54  ;;  %v8748_v54 = vld [vmem:[#allocation20 + $0x698] sm:$0xff] }
 0x878   :  { %v14345_v37 = vcombine.low %v8748_v54, %v8752_v32 }
 0x879   :  { %12225 = vmatpush1.bf16.msra.mxu1 %v14265_v26  ;;  %v14353_v26 = vcombine.low %v8756_v48, %v8760_v44  ;;  %v14458_v44 = vcombine.high %v8860_v27, %v8864_v24 }
 0x87a   :  { %12268 = vmatpush1.bf16.msra.mxu0 %v14393_v17  ;;  %12226 = vmatprep.subr.bf16.mxu1 %v14386_v34  ;;  %v11816_v17 = vpop.f32.mrf.mxu1  ;;  %v14481_v34 = vcombine.low %v8884_v16, %v8888_v2  ;;  %v8980_v16 = vld [vmem:[#allocation20 + $0xdd8] sm:$0xff] }
 0x87b   :  { %12269 = vmatprep.subr.bf16.mxu0 %v14514_v60  ;;  %v14346_v60 = vcombine.high %v8748_v54, %v8752_v32  ;;  %v8984_v2 = vld [vmem:[#allocation20 + $0xdf8] sm:$0xff]  ;;  %v15256_v54 = vld [vmem:[#allocation23 + $0x78] sm:$0xff]  }
 0x87c   :  { %v16463_v29 = vpop.f32.mrf.mxu1  ;;  %v8972_v32 = vld [vmem:[#allocation20 + $0xd98] sm:$0xff] }
 0x87d   :  { %12227 = vmatpush2.bf16.msra.mxu1 %v14385_v36  ;;  %v16459_v36 = vpop.f32.mrf.mxu0 }
 0x87e   :  { %12270 = vmatpush2.bf16.msra.mxu0 %v14513_v22  ;;  %12228 = vmatprep.subr.bf16.mxu1 %v14378_v55  ;;  %v8868_v22 = vld [vmem:[#allocation20 + $0xa58] sm:$0xff] }
 0x87f   :  { %12271 = vmatprep.subr.bf16.mxu0 %v14506_v23  ;;  %v8872_v55 = vld [vmem:[#allocation20 + $0xa78] sm:$0xff]  ;;  %v9058_v23 = vrot.slane %v16457_v53, %v15829_v40  ;;  %v11777_v6 = vpop.f32.mrf.mxu0  ;;  %v14337_v40 = vcombine.low %v8740_v59, %v8744_v4 }
 0x880   :  { %v15258_v59 = vld [vmem:[#allocation23 + $0x70] sm:$0xff]  }
 0x881   :  { %12229 = vmatpush2.bf16.msra.mxu1 %v14377_v61  ;;  %v11692_v61 = vadd.f32 %v11691_v3, %v9058_v23  ;;  %v11688_v8 = vadd.f32 %v16445_v25, %v9058_v23  ;;  %v14457_v25 = vcombine.low %v8860_v27, %v8864_v24  ;;  %v15260_v23 = vld [vmem:[#allocation23 + $0x68] sm:$0xff]   ;;  %v15264_v27 = vld [vmem:[#allocation23 + $0x58] sm:$0xff]   ;;  %v8940_v24 = vld [vmem:[#allocation20 + $0xc98] sm:$0xff] }
 0x882   :  { %12272 = vmatpush2.bf16.msra.mxu0 %v14505_v56  ;;  %12230 = vmatprep.subr.bf16.mxu1 %v14370_v62  ;;  %v14466_v56 = vcombine.high %v8868_v22, %v8872_v55  ;;  %v8732_v62 = vld [vmem:[#allocation20 + $0x618] sm:$0xff] }
 0x883   :  { %12273 = vmatprep.subr.bf16.mxu0 %v14498_v46  ;;  %v8736_v46 = vld [vmem:[#allocation20 + $0x638] sm:$0xff]  ;;  %v11731_v48 = vadd.f32 %v16447_v51, %v11688_v8  ;;  %v14577_v51 = vcombine.low %v8980_v16, %v8984_v2 }
 0x884   :  { %v8944_v8 = vld [vmem:[#allocation20 + $0xcb8] sm:$0xff] }
 0x885   :  { %12231 = vmatpush2.bf16.msra.mxu1 %v14369_v38  ;;  %v11735_v38 = vadd.f32 %v11734_v28, %v11692_v61  ;;  %v14578_v28 = vcombine.high %v8980_v16, %v8984_v2  ;;  %v14537_v16 = vcombine.low %v8940_v24, %v8944_v8  ;;  %v15267_v2 = vld [vmem:[#allocation23 + $0x10] sm:$0xff]  }
 0x886   :  { %12274 = vmatpush2.bf16.msra.mxu0 %v14497_v18  ;;  %12232 = vmatprep.subr.bf16.mxu1 %v14362_v10  ;;  %v11820_v18 = vpop.f32.mrf.mxu1  ;;  %v14465_v10 = vcombine.low %v8868_v22, %v8872_v55  ;;  %v15259_v22 = vld [vmem:[#allocation23 + $0x30] sm:$0xff]  }
 0x887   :  { %12275 = vmatprep.subr.bf16.mxu0 %v14490_v7  ;;  %v14330_v7 = vcombine.high %v8732_v62, %v8736_v46  ;;  %v11778_v3 = vadd.f32 %v11777_v6, %v11735_v38 }
 0x889   :  { %12233 = vmatpush2.bf16.msra.mxu1 %v14361_v30  ;;  %v11774_v30 = vadd.f32 %v11773_v13, %v11731_v48  ;;  %v14570_v13 = vcombine.high %v8972_v32, %v8976_v21  ;;  %v8932_v48 = vld [vmem:[#allocation20 + $0xc58] sm:$0xff] }
 0x88a   :  { %12276 = vmatpush2.bf16.msra.mxu0 %v14489_v52  ;;  %12234 = vmatprep.subr.bf16.mxu1 %v14354_v11  ;;  %v11821_v52 = vadd.f32 %v11820_v18, %v11778_v3  ;;  %v14329_v11 = vcombine.low %v8732_v62, %v8736_v46  ;;  %v8952_v62 = vld [vmem:[#allocation20 + $0xcf8] sm:$0xff]  ;;  %v15263_v46 = vld [vmem:[#allocation23 + $0x20] sm:$0xff]   ;;  %v14538_v18 = vcombine.high %v8940_v24, %v8944_v8  ;;  %v15292_v24 = vld [vmem:[#allocation23 + $0x168] sm:$0xff]  }
 0x88b   :  { %12277 = vmatprep.subr.bf16.mxu0 %v14482_v20  ;;  %v11817_v20 = vadd.f32 %v11816_v17, %v11774_v30  ;;  %v14569_v17 = vcombine.low %v8972_v32, %v8976_v21  ;;  %v8936_v3 = vld [vmem:[#allocation20 + $0xc78] sm:$0xff]  ;;  %v15269_v32 = vld [vmem:[#allocation23 + $0x8] sm:$0xff]  }
 0x88c   :  { %v12348_v31 = vmax.f32 %v11821_v52, 0.0  ;;  %v14530_v30 = vcombine.high %v8932_v48, %v8936_v3 }
 0x88d   :  { %12235 = vmatpush2.bf16.msra.mxu1 %v14353_v26  ;;  %v15257_v26 = vld [vmem:[#allocation23 + $0x38] sm:$0xff]  }
 0x88e   :  { %12278 = vmatpush2.bf16.msra.mxu0 %v14481_v34  ;;  %12236 = vmatprep.subr.bf16.mxu1 %v14346_v60  ;;  %v12340_v34 = vmax.f32 %v11817_v20, 0.0  ;;  %v8964_v60 = vld [vmem:[#allocation20 + $0xd58] sm:$0xff] }
 0x88f   :  { %12279 = vmatprep.subr.bf16.mxu0 %v14474_v0  ;;  %v8968_v0 = vld [vmem:[#allocation20 + $0xd78] sm:$0xff] }
 0x890   :  { %v12356_v4 = vpack.c.bf16 %v12348_v31, %v12340_v34  ;;  %v14562_v55 = vcombine.high %v8964_v60, %v8968_v0 }
 0x891   :  { %12237 = vmatpush2.bf16.msra.mxu1 %v14345_v37  ;;  %v8956_v37 = vld [vmem:[#allocation20 + $0xd18] sm:$0xff] }
 0x892   :  { %12280 = vmatpush2.bf16.msra.mxu0 %v14473_v5  ;;  %12238 = vmatprep.subr.bf16.mxu1 %v14338_v9  ;;  %v8960_v5 = vld [vmem:[#allocation20 + $0xd38] sm:$0xff]  ;;  %v14561_v9 = vcombine.low %v8964_v60, %v8968_v0  ;;  %v15271_v60 = vld [vmem:[#allocation23] sm:$0xff]  }
 0x893   :  { %12281 = vmatprep.subr.bf16.mxu0 %v14466_v56  ;;  %v14554_v61 = vcombine.high %v8956_v37, %v8960_v5  ;;  %v8948_v56 = vld [vmem:[#allocation20 + $0xcd8] sm:$0xff] }
 0x894   :  { %v14546_v6 = vcombine.high %v8948_v56, %v8952_v62  ;;  %v14545_v38 = vcombine.low %v8948_v56, %v8952_v62 }
 0x895   :  { %12239 = vmatpush2.bf16.msra.mxu1 %v14337_v40  ;;  %v15265_v40 = vld [vmem:[#allocation23 + $0x18] sm:$0xff]  }
 0x896   :  { %12282 = vmatpush2.bf16.msra.mxu0 %v14465_v10  ;;  %12240 = vmatprep.subr.bf16.mxu1 %v14330_v7  ;;  %v9054_v10 = vrot.slane %v16457_v53, %v15835_v42  ;;  %v15266_v7 = vld [vmem:[#allocation23 + $0x50] sm:$0xff]  }
 0x897   :  { %12283 = vmatprep.subr.bf16.mxu0 %v14458_v44  ;;  %v8928_v42 = vld [vmem:[#allocation20 + $0xc38] sm:$0xff] }
 0x898   :  { %v11690_v44 = vadd.f32 %v16449_v57, %v9054_v10  ;;  %v11686_v52 = vadd.f32 %v16441_v14, %v9054_v10  ;;  %v14529_v57 = vcombine.low %v8932_v48, %v8936_v3  ;;  %v15293_v10 = vld [vmem:[#allocation23 + $0x128] sm:$0xff]   ;;  %v9016_v48 = vld [vmem:[#allocation20 + $0xef8] sm:$0xff]  ;;  %v15294_v3 = vld [vmem:[#allocation23 + $0x160] sm:$0xff]  }
 0x899   :  { %12241 = vmatpush2.bf16.msra.mxu1 %v14329_v11 }
 0x89a   :  { %12284 = vmatpush2.bf16.msra.mxu0 %v14457_v25  ;;  %12296 = vmatprep.subr.bf16.mxu1 %v14578_v28  ;;  %v11733_v11 = vadd.f32 %v16451_v58, %v11690_v44  ;;  %v15268_v25 = vld [vmem:[#allocation23 + $0x48] sm:$0xff]   ;;  %v8924_v28 = vld [vmem:[#allocation20 + $0xc18] sm:$0xff]  ;;  %v11729_v20 = vadd.f32 %v16443_v63, %v11686_v52  ;;  %v15270_v58 = vld [vmem:[#allocation23 + $0x40] sm:$0xff]  }
 0x89b   :  { %14708 = vmatprep.subr.bf16.mxu0 %v15256_v54  ;;  %v14522_v21 = vcombine.high %v8924_v28, %v8928_v42  ;;  %v14521_v63 = vcombine.low %v8924_v28, %v8928_v42  ;;  %v15295_v52 = vld [vmem:[#allocation23 + $0x120] sm:$0xff]   ;;  %v15296_v28 = vld [vmem:[#allocation23 + $0x158] sm:$0xff]  }
 0x89c   :  { %12243 = vmatmul.mubr.bf16.vlgmr.msra.gmra.mxu1 %v16363_v33  ;;  %v15261_v33 = vld [vmem:[#allocation23 + $0x28] sm:$0xff]   ;;  %v11776_v54 = vadd.f32 %v16459_v36, %v11733_v11  ;;  %v11772_v31 = vadd.f32 %v16453_v50, %v11729_v20  ;;  %v16482_v36 = vpop.f32.mrf.mxu1  ;;  %v9036_v50 = vld [vmem:[#allocation20 + $0xf98] sm:$0xff] }
 0x89d   :  { %12286 = vmatmul.mubr.bf16.vlgmr.msra.gmra.mxu0 %v16391_v15  ;;  %12297 = vmatpush1.bf16.msra.mxu1 %v14577_v51  ;;  %v15262_v15 = vld [vmem:[#allocation23 + $0x60] sm:$0xff]   ;;  %v9044_v51 = vld [vmem:[#allocation20 + $0xfd8] sm:$0xff] }
 0x89e   :  { %12328 = vmatprep.mubr.bf16.mxu1 %v16415_v45  ;;  %14709 = vmatpush3.bf16.msra.mxu0 %v15257_v26  ;;  %v14553_v45 = vcombine.low %v8956_v37, %v8960_v5  ;;  %v11819_v14 = vadd.f32 %v16463_v29, %v11776_v54  ;;  %v9048_v26 = vld [vmem:[#allocation20 + $0xff8] sm:$0xff]  ;;  %v11815_v34 = vadd.f32 %v16455_v49, %v11772_v31  ;;  %v16486_v49 = vpop.f32.mrf.mxu1  ;;  %v15289_v37 = vld [vmem:[#allocation23 + $0x138] sm:$0xff]  }
 0x89f   :  { %12914 = vmatprep.mubr.bf16.mxu0 %v12356_v4  ;;  %12298 = vmatprep.subr.bf16.mxu1 %v14570_v13  ;;  %v16480_v13 = vpop.f32.mrf.mxu0  ;;  %v14642_v0 = vcombine.high %v9044_v51, %v9048_v26  ;;  %v9040_v29 = vld [vmem:[#allocation20 + $0xfb8] sm:$0xff]  ;;  %v15288_v4 = vld [vmem:[#allocation23 + $0x178] sm:$0xff]   ;;  %v9066_v54 = vrot.slane %v16457_v53, %v15832_v41 }
 0x8a0   :  { %14710 = vmatprep.subr.bf16.mxu0 %v15258_v59  ;;  %v12347_v59 = vmax.f32 %v11819_v14, 0.0  ;;  %v16490_v62 = vpop.f32.mrf.mxu1  ;;  %v9004_v11 = vld [vmem:[#allocation20 + $0xe98] sm:$0xff] }
 0x8a1   :  { %12299 = vmatpush1.bf16.msra.mxu1 %v14569_v17  ;;  %v12339_v17 = vmax.f32 %v11815_v34, 0.0  ;;  %v8996_v14 = vld [vmem:[#allocation20 + $0xe58] sm:$0xff] }
 0x8a2   :  { %14711 = vmatpush3.bf16.msra.mxu0 %v15259_v22  ;;  %12300 = vmatprep.subr.bf16.mxu1 %v14562_v55  ;;  %v14641_v22 = vcombine.low %v9044_v51, %v9048_v26  ;;  %v16484_v55 = vpop.f32.mrf.mxu0  ;;  %v15298_v51 = vld [vmem:[#allocation23 + $0x150] sm:$0xff]  }
 0x8a3   :  { %14712 = vmatprep.subr.bf16.mxu0 %v15260_v23  ;;  %v14634_v23 = vcombine.high %v9036_v50, %v9040_v29  ;;  %v12355_v5 = vpack.c.bf16 %v12347_v59, %v12339_v17  ;;  %v15299_v59 = vld [vmem:[#allocation23 + $0x110] sm:$0xff]   ;;  %v15300_v17 = vld [vmem:[#allocation23 + $0x148] sm:$0xff]  }
 0x8a4   :  { %v16488_v56 = vpop.f32.mrf.mxu0 }
 0x8a5   :  { %12301 = vmatpush1.bf16.msra.mxu1 %v14561_v9  ;;  %v9028_v9 = vld [vmem:[#allocation20 + $0xf58] sm:$0xff] }
 0x8a6   :  { %14713 = vmatpush3.bf16.msra.mxu0 %v15261_v33  ;;  %12302 = vmatprep.subr.bf16.mxu1 %v14554_v61  ;;  %v9032_v33 = vld [vmem:[#allocation20 + $0xf78] sm:$0xff] }
 0x8a7   :  { %14714 = vmatprep.subr.bf16.mxu0 %v15262_v15  ;;  %v15290_v61 = vld [vmem:[#allocation23 + $0x170] sm:$0xff]   ;;  %v14633_v15 = vcombine.low %v9036_v50, %v9040_v29  ;;  %v14625_v8 = vcombine.low %v9028_v9, %v9032_v33 }
 0x8a8   :  { %v8988_v29 = vld [vmem:[#allocation20 + $0xe18] sm:$0xff] }
 0x8a9   :  { %12303 = vmatpush1.bf16.msra.mxu1 %v14553_v45  ;;  %v14626_v45 = vcombine.high %v9028_v9, %v9032_v33  ;;  %v15301_v9 = vld [vmem:[#allocation23 + $0x108] sm:$0xff]  }
 0x8aa   :  { %14715 = vmatpush3.bf16.msra.mxu0 %v15263_v46  ;;  %12304 = vmatprep.subr.bf16.mxu1 %v14546_v6  ;;  %v15291_v46 = vld [vmem:[#allocation23 + $0x130] sm:$0xff]  }
 0x8ab   :  { %14716 = vmatprep.subr.bf16.mxu0 %v15264_v27  ;;  %v9020_v6 = vld [vmem:[#allocation20 + $0xf18] sm:$0xff] }
 0x8ac   :  { %v9024_v27 = vld [vmem:[#allocation20 + $0xf38] sm:$0xff] }
 0x8ad   :  { %12305 = vmatpush1.bf16.msra.mxu1 %v14545_v38  ;;  %v11863_v38 = vpop.f32.mrf.mxu0 }
 0x8ae   :  { %14717 = vmatpush3.bf16.msra.mxu0 %v15265_v40  ;;  %12306 = vmatprep.subr.bf16.mxu1 %v14538_v18  ;;  %v11906_v40 = vpop.f32.mrf.mxu1  ;;  %v14618_v18 = vcombine.high %v9020_v6, %v9024_v27  ;;  %v11864_v31 = vadd.f32 %v11863_v38, %v9066_v54  ;;  %v15274_v38 = vld [vmem:[#allocation23 + $0xf0] sm:$0xff]  }
 0x8af   :  { %14718 = vmatprep.subr.bf16.mxu0 %v15266_v7  ;;  %v9012_v7 = vld [vmem:[#allocation20 + $0xed8] sm:$0xff]  ;;  %v16492_v44 = vpop.f32.mrf.mxu0 }
 0x8b1   :  { %12307 = vmatpush1.bf16.msra.mxu1 %v14537_v16  ;;  %v16494_v16 = vpop.f32.mrf.mxu1  ;;  %v11945_v42 = vpop.f32.mrf.mxu0 }
 0x8b2   :  { %14719 = vmatpush3.bf16.msra.mxu0 %v15267_v2  ;;  %12308 = vmatprep.subr.bf16.mxu1 %v14530_v30  ;;  %v14617_v2 = vcombine.low %v9020_v6, %v9024_v27  ;;  %v14610_v30 = vcombine.high %v9012_v7, %v9016_v48  ;;  %v15303_v6 = vld [vmem:[#allocation23 + $0x100] sm:$0xff]  }
 0x8b3   :  { %14720 = vmatprep.subr.bf16.mxu0 %v15268_v25  ;;  %v9008_v25 = vld [vmem:[#allocation20 + $0xeb8] sm:$0xff]  ;;  %v11988_v20 = vpop.f32.mrf.mxu1  ;;  %v16498_v26 = vpop.f32.mrf.mxu0 }
 0x8b4   :  { %v14601_v41 = vcombine.low %v9004_v11, %v9008_v25 }
 0x8b5   :  { %12309 = vmatpush1.bf16.msra.mxu1 %v14529_v57  ;;  %v14609_v57 = vcombine.low %v9012_v7, %v9016_v48  ;;  %v16500_v34 = vpop.f32.mrf.mxu1  ;;  %v15277_v7 = vld [vmem:[#allocation23 + $0xa8] sm:$0xff]   ;;  %v15278_v48 = vld [vmem:[#allocation23 + $0xe0] sm:$0xff]  }
 0x8b6   :  { %14721 = vmatpush3.bf16.msra.mxu0 %v15269_v32  ;;  %12310 = vmatprep.subr.bf16.mxu1 %v14522_v21  ;;  %v14602_v32 = vcombine.high %v9004_v11, %v9008_v25  ;;  %v15297_v21 = vld [vmem:[#allocation23 + $0x118] sm:$0xff]   ;;  %v15282_v11 = vld [vmem:[#allocation23 + $0xd0] sm:$0xff]  }
 0x8b7   :  { %14722 = vmatprep.subr.bf16.mxu0 %v15270_v58  ;;  %v9000_v58 = vld [vmem:[#allocation20 + $0xe78] sm:$0xff] }
 0x8b9   :  { %12311 = vmatpush1.bf16.msra.mxu1 %v14521_v63  ;;  %v11860_v63 = vadd.f32 %v16484_v55, %v9066_v54  ;;  %v15284_v54 = vld [vmem:[#allocation23 + $0xc8] sm:$0xff]  }
 0x8ba   :  { %14723 = vmatpush3.bf16.msra.mxu0 %v15271_v60  ;;  %12312 = vmatprep.subr.bf16.mxu1 %v14642_v0  ;;  %v11907_v60 = vadd.f32 %v11906_v40, %v11864_v31  ;;  %v14594_v0 = vcombine.high %v8996_v14, %v9000_v58 }
 0x8bb   :  { %14752 = vmatprep.subr.bf16.mxu0 %v15288_v4  ;;  %v11903_v50 = vadd.f32 %v16486_v49, %v11860_v63  ;;  %v8992_v4 = vld [vmem:[#allocation20 + $0xe38] sm:$0xff] }
 0x8bc   :  { %v14586_v55 = vcombine.high %v8988_v29, %v8992_v4  ;;  %v14585_v49 = vcombine.low %v8988_v29, %v8992_v4  ;;  %v15306_v63 = vld [vmem:[#allocation23 + $0x1f0] sm:$0xff]  }
 0x8bd   :  { %12915 = vmatmul.mubr.bf16.vlgmr.msra.gmra.mxu0 %v12355_v5  ;;  %12313 = vmatpush2.bf16.msra.mxu1 %v14641_v22  ;;  %v11949_v22 = vpop.f32.mrf.mxu0  ;;  %v14593_v5 = vcombine.low %v8996_v14, %v9000_v58  ;;  %v11946_v33 = vadd.f32 %v11945_v42, %v11903_v50  ;;  %v15283_v42 = vld [vmem:[#allocation23 + $0x90] sm:$0xff]   ;;  %v15311_v50 = vld [vmem:[#allocation23 + $0x1a0] sm:$0xff]  }
 0x8be   :  { %12314 = vmatprep.subr.bf16.mxu1 %v14634_v23  ;;  %14753 = vmatpush3.bf16.msra.mxu0 %v15289_v37  ;;  %v11992_v23 = vpop.f32.mrf.mxu1  ;;  %v11950_v37 = vadd.f32 %v11949_v22, %v11907_v60  ;;  %v15308_v60 = vld [vmem:[#allocation23 + $0x1e8] sm:$0xff]  }
 0x8bf   :  { %14754 = vmatprep.subr.bf16.mxu0 %v15290_v61  ;;  %v12029_v58 = vpop.f32.mrf.mxu0 }
 0x8c0   :  { %v11993_v61 = vadd.f32 %v11992_v23, %v11950_v37  ;;  %v9074_v23 = vrot.slane %v16457_v53, %v8479_v1  ;;  %v15313_v37 = vld [vmem:[#allocation23 + $0x198] sm:$0xff]  }
 0x8c1   :  { %12315 = vmatpush2.bf16.msra.mxu1 %v14633_v15  ;;  %v15302_v15 = vld [vmem:[#allocation23 + $0x140] sm:$0xff]  }
 0x8c2   :  { %12316 = vmatprep.subr.bf16.mxu1 %v14626_v45  ;;  %14755 = vmatpush3.bf16.msra.mxu0 %v15291_v46  ;;  %v11989_v45 = vadd.f32 %v11988_v20, %v11946_v33  ;;  %v15272_v46 = vld [vmem:[#allocation23 + $0xf8] sm:$0xff]   ;;  %v12350_v27 = vmax.f32 %v11993_v61, 0.0 }
 0x8c3   :  { %14756 = vmatprep.subr.bf16.mxu0 %v15292_v24 }
 0x8c4   :  { %v12342_v24 = vmax.f32 %v11989_v45, 0.0 }
 0x8c5   :  { %12317 = vmatpush2.bf16.msra.mxu1 %v14625_v8  ;;  %v15273_v8 = vld [vmem:[#allocation23 + $0xb8] sm:$0xff]  }
 0x8c6   :  { %12318 = vmatprep.subr.bf16.mxu1 %v14618_v18  ;;  %14757 = vmatpush3.bf16.msra.mxu0 %v15293_v10  ;;  %v12358_v40 = vpack.c.bf16 %v12350_v27, %v12342_v24  ;;  %v15275_v18 = vld [vmem:[#allocation23 + $0xb0] sm:$0xff]   ;;  %v15276_v10 = vld [vmem:[#allocation23 + $0xe8] sm:$0xff]  }
 0x8c7   :  { %14758 = vmatprep.subr.bf16.mxu0 %v15294_v3  ;;  %v15279_v3 = vld [vmem:[#allocation23 + $0xa0] sm:$0xff]  }
 0x8c9   :  { %12319 = vmatpush2.bf16.msra.mxu1 %v14617_v2  ;;  %v15280_v2 = vld [vmem:[#allocation23 + $0xd8] sm:$0xff]  }
 0x8ca   :  { %12320 = vmatprep.subr.bf16.mxu1 %v14610_v30  ;;  %14759 = vmatpush3.bf16.msra.mxu0 %v15295_v52  ;;  %v9062_v30 = vrot.slane %v16457_v53, %v15838_v43  ;;  %v15281_v52 = vld [vmem:[#allocation23 + $0x98] sm:$0xff]   ;;  %v15285_v43 = vld [vmem:[#allocation23 + $0x88] sm:$0xff]  }
 0x8cb   :  { %14760 = vmatprep.subr.bf16.mxu0 %v15296_v28 }
 0x8cc   :  { %v11858_v25 = vadd.f32 %v16480_v13, %v9062_v30 }
 0x8cd   :  { %12321 = vmatpush2.bf16.msra.mxu1 %v14609_v57 }
 0x8ce   :  { %12322 = vmatprep.subr.bf16.mxu1 %v14602_v32  ;;  %14761 = vmatpush3.bf16.msra.mxu0 %v15297_v21  ;;  %v11901_v20 = vadd.f32 %v16482_v36, %v11858_v25  ;;  %v15286_v21 = vld [vmem:[#allocation23 + $0xc0] sm:$0xff]   ;;  %v15316_v25 = vld [vmem:[#allocation23 + $0x1c8] sm:$0xff]  }
 0x8cf   :  { %14762 = vmatprep.subr.bf16.mxu0 %v15298_v51  ;;  %v15304_v51 = vld [vmem:[#allocation23 + $0x1f8] sm:$0xff]  }
 0x8d0   :  { %v11944_v32 = vadd.f32 %v16492_v44, %v11901_v20  ;;  %v15307_v44 = vld [vmem:[#allocation23 + $0x1b0] sm:$0xff]  }
 0x8d1   :  { %12323 = vmatpush2.bf16.msra.mxu1 %v14601_v41 }
 0x8d2   :  { %12324 = vmatprep.subr.bf16.mxu1 %v14594_v0  ;;  %14763 = vmatpush3.bf16.msra.mxu0 %v15299_v59  ;;  %v11987_v13 = vadd.f32 %v16494_v16, %v11944_v32  ;;  %v15309_v16 = vld [vmem:[#allocation23 + $0x1a8] sm:$0xff]   ;;  %v15310_v59 = vld [vmem:[#allocation23 + $0x1e0] sm:$0xff]  }
 0x8d3   :  { %14764 = vmatprep.subr.bf16.mxu0 %v15300_v17  ;;  %v15312_v17 = vld [vmem:[#allocation23 + $0x1d8] sm:$0xff]   ;;  %v15318_v32 = vld [vmem:[#allocation23 + $0x1c0] sm:$0xff]  }
 0x8d4   :  { %v12341_v14 = vmax.f32 %v11987_v13, 0.0 }
 0x8d5   :  { %12325 = vmatpush2.bf16.msra.mxu1 %v14593_v5  ;;  %v9070_v5 = vrot.slane %v16457_v53, %v8475_v12  ;;  %v15315_v12 = vld [vmem:[#allocation23 + $0x190] sm:$0xff]  }
 0x8d6   :  { %12326 = vmatprep.subr.bf16.mxu1 %v14586_v55  ;;  %14765 = vmatpush3.bf16.msra.mxu0 %v15301_v9 }
 0x8d7   :  { %14766 = vmatprep.subr.bf16.mxu0 %v15302_v15  ;;  %v12030_v15 = vadd.f32 %v12029_v58, %v9070_v5 }
 0x8d9   :  { %12327 = vmatpush2.bf16.msra.mxu1 %v14585_v49 }
 0x8da   :  { %14730 = vmatprep.subr.bf16.mxu1 %v15272_v46  ;;  %14767 = vmatpush3.bf16.msra.mxu0 %v15303_v6 }
 0x8dc   :  { %12329 = vmatmul.mubr.bf16.vlgmr.msra.gmra.mxu1 %v16413_v35  ;;  %v11862_v35 = vadd.f32 %v16488_v56, %v9062_v30  ;;  %v12072_v0 = vpop.f32.mrf.mxu1 }
 0x8dd   :  { %14731 = vmatpush3.bf16.msra.mxu1 %v15273_v8  ;;  %12955 = vmatprep.mubr.bf16.mxu1 %v12358_v40  ;;  %v12073_v27 = vadd.f32 %v12072_v0, %v12030_v15  ;;  %v15314_v40 = vld [vmem:[#allocation23 + $0x1d0] sm:$0xff]  }
 0x8de   :  { %14732 = vmatprep.subr.bf16.mxu1 %v15274_v38  ;;  %v11905_v28 = vadd.f32 %v16490_v62, %v11862_v35  ;;  %v15287_v62 = vld [vmem:[#allocation23 + $0x80] sm:$0xff]   ;;  %v12074_v4 = vpop.f32.mrf.mxu1 }
 0x8e0   :  { %v11948_v57 = vadd.f32 %v16498_v26, %v11905_v28  ;;  %v15305_v26 = vld [vmem:[#allocation23 + $0x1b8] sm:$0xff]   ;;  %v12076_v55 = vpop.f32.mrf.mxu1 }
 0x8e1   :  { %14733 = vmatpush3.bf16.msra.mxu1 %v15275_v18 }
 0x8e2   :  { %14734 = vmatprep.subr.bf16.mxu1 %v15276_v10  ;;  %v11991_v56 = vadd.f32 %v16500_v34, %v11948_v57  ;;  %v12031_v34 = vpop.f32.mrf.mxu0  ;;  %v12078_v45 = vpop.f32.mrf.mxu1 }
 0x8e3   :  { %v12032_v33 = vadd.f32 %v12031_v34, %v9074_v23 }
 0x8e4   :  { %v12349_v31 = vmax.f32 %v11991_v56, 0.0  ;;  %v12033_v41 = vpop.f32.mrf.mxu0 }
 0x8e5   :  { %14735 = vmatpush3.bf16.msra.mxu1 %v15277_v7  ;;  %v12034_v61 = vadd.f32 %v12033_v41, %v9070_v5  ;;  %v12075_v46 = vadd.f32 %v12074_v4, %v12032_v33 }
 0x8e6   :  { %14736 = vmatprep.subr.bf16.mxu1 %v15278_v48  ;;  %v12357_v36 = vpack.c.bf16 %v12349_v31, %v12341_v14  ;;  %v12035_v29 = vpop.f32.mrf.mxu0 }
 0x8e7   :  { %v12036_v49 = vadd.f32 %v12035_v29, %v9074_v23  ;;  %v12077_v6 = vadd.f32 %v12076_v55, %v12034_v61 }
 0x8e8   :  { %v12115_v22 = vpop.f32.mrf.mxu0 }
 0x8e9   :  { %14737 = vmatpush3.bf16.msra.mxu1 %v15279_v3  ;;  %v12079_v8 = vadd.f32 %v12078_v45, %v12036_v49  ;;  %v12116_v7 = vadd.f32 %v12115_v22, %v12073_v27 }
 0x8ea   :  { %14738 = vmatprep.subr.bf16.mxu1 %v15280_v2  ;;  %v12117_v9 = vpop.f32.mrf.mxu0 }
 0x8eb   :  { %v12118_v18 = vadd.f32 %v12117_v9, %v12075_v46 }
 0x8ec   :  { %v12119_v24 = vpop.f32.mrf.mxu0 }
 0x8ed   :  { %14739 = vmatpush3.bf16.msra.mxu1 %v15281_v52  ;;  %v12120_v10 = vadd.f32 %v12119_v24, %v12077_v6 }
 0x8ee   :  { %14740 = vmatprep.subr.bf16.mxu1 %v15282_v11  ;;  %v12121_v48 = vpop.f32.mrf.mxu0 }
 0x8ef   :  { %v12122_v2 = vadd.f32 %v12121_v48, %v12079_v8 }
 0x8f1   :  { %14741 = vmatpush3.bf16.msra.mxu1 %v15283_v42  ;;  %v15317_v42 = vld [vmem:[#allocation23 + $0x188] sm:$0xff]  }
 0x8f2   :  { %14742 = vmatprep.subr.bf16.mxu1 %v15284_v54 }
 0x8f5   :  { %14743 = vmatpush3.bf16.msra.mxu1 %v15285_v43 }
 0x8f6   :  { %14744 = vmatprep.subr.bf16.mxu1 %v15286_v21  ;;  %v15319_v21 = vld [vmem:[#allocation23 + $0x180] sm:$0xff]  }
 0x8f9   :  { %14745 = vmatpush3.bf16.msra.mxu1 %v15287_v62 }
 0x8fa   :  { %14774 = vmatprep.subr.bf16.mxu1 %v15304_v51 }
 0x8fc   :  { %12956 = vmatmul.mubr.bf16.vlgmr.msra.gmra.mxu1 %v12357_v36 }
 0x8fd   :  { %14775 = vmatpush3.bf16.msra.mxu1 %v15305_v26 }
 0x8fe   :  { %14776 = vmatprep.subr.bf16.mxu1 %v15306_v63  ;;  %v9082_v63 = vrot.slane %v16457_v53, %v8487_v47 }
 0x901   :  { %14777 = vmatpush3.bf16.msra.mxu1 %v15307_v44  ;;  %v9078_v44 = vrot.slane %v16457_v53, %v8483_v19 }
 0x902   :  { %14778 = vmatprep.subr.bf16.mxu1 %v15308_v60 }
 0x905   :  { %14779 = vmatpush3.bf16.msra.mxu1 %v15309_v16 }
 0x906   :  { %14780 = vmatprep.subr.bf16.mxu1 %v15310_v59 }
 0x909   :  { %14781 = vmatpush3.bf16.msra.mxu1 %v15311_v50 }
 0x90a   :  { %14782 = vmatprep.subr.bf16.mxu1 %v15312_v17 }
 0x90d   :  { %14783 = vmatpush3.bf16.msra.mxu1 %v15313_v37 }
 0x90e   :  { %14784 = vmatprep.subr.bf16.mxu1 %v15314_v40 }
 0x911   :  { %14785 = vmatpush3.bf16.msra.mxu1 %v15315_v12 }
 0x912   :  { %14786 = vmatprep.subr.bf16.mxu1 %v15316_v25 }
 0x915   :  { %14787 = vmatpush3.bf16.msra.mxu1 %v15317_v42 }
 0x916   :  { %14788 = vmatprep.subr.bf16.mxu1 %v15318_v32 }
 0x919   :  { %14789 = vmatpush3.bf16.msra.mxu1 %v15319_v21 }
 0x91c   :  { %v12158_v1 = vpop.f32.mrf.mxu1 }
 0x91d   :  { %v12159_v35 = vadd.f32 %v12158_v1, %v12116_v7  ;;  %v12201_v62 = vpop.f32.mrf.mxu0 }
 0x91e   :  { %v12160_v38 = vpop.f32.mrf.mxu1  ;;  %v12202_v0 = vadd.f32 %v12201_v62, %v9078_v44 }
 0x91f   :  { %v12161_v30 = vadd.f32 %v12160_v38, %v12118_v18  ;;  %v12343_v43 = vmax.f32 %v12159_v35, 0.0  ;;  %v12203_v31 = vpop.f32.mrf.mxu0 }
 0x920   :  { %v12162_v3 = vpop.f32.mrf.mxu1  ;;  %v12204_v16 = vadd.f32 %v12203_v31, %v9082_v63 }
 0x921   :  { %v12163_v52 = vadd.f32 %v12162_v3, %v12120_v10  ;;  %v12344_v54 = vmax.f32 %v12161_v30, 0.0  ;;  %v12205_v14 = vpop.f32.mrf.mxu0 }
 0x922   :  { %v12164_v11 = vpop.f32.mrf.mxu1  ;;  %v12206_v41 = vadd.f32 %v12205_v14, %v9078_v44 }
 0x923   :  { %v12165_v28 = vadd.f32 %v12164_v11, %v12122_v2  ;;  %v12351_v20 = vmax.f32 %v12163_v52, 0.0  ;;  %v12207_v58 = vpop.f32.mrf.mxu0  ;;  %v14643_v52 = vld [vmem:[#allocation25] ss:$0 sm:$0xff] }
 0x924   :  { %v12208_v50 = vadd.f32 %v12207_v58, %v9082_v63 }
 0x925   :  { %v12352_v57 = vmax.f32 %v12165_v28, 0.0  ;;  %v12359_v13 = vpack.c.bf16 %v12351_v20, %v12343_v43 }
 0x927   :  { %v12360_v56 = vpack.c.bf16 %v12352_v57, %v12344_v54 }
 0x929   :  { %12996 = vmatprep.mubr.bf16.mxu0 %v12360_v56 }
 0x92a   :  { %12997 = vmatmul.mubr.bf16.vlgmr.msra.gmra.mxu0 %v12359_v13 }
 0x95c   :  { %v12244_v36 = vpop.f32.mrf.mxu1 }
 0x95d   :  { %v12287_v26 = vpop.f32.mrf.mxu0  ;;  %v12245_v17 = vadd.f32 %v12244_v36, %v12202_v0 }
 0x95e   :  { %v12246_v51 = vpop.f32.mrf.mxu1 }
 0x95f   :  { %v12289_v60 = vpop.f32.mrf.mxu0  ;;  %v12247_v29 = vadd.f32 %v12246_v51, %v12204_v16  ;;  %v12288_v9 = vadd.f32 %v12287_v26, %v12245_v17 }
 0x960   :  { %v12248_v34 = vpop.f32.mrf.mxu1 }
 0x961   :  { %v12249_v4 = vadd.f32 %v12248_v34, %v12206_v41  ;;  %v12291_v22 = vpop.f32.mrf.mxu0  ;;  %v12290_v55 = vadd.f32 %v12289_v60, %v12247_v29 }
 0x962   :  { %v12250_v59 = vpop.f32.mrf.mxu1 }
 0x963   :  { %v12251_v37 = vadd.f32 %v12250_v59, %v12208_v50  ;;  %v12292_v47 = vadd.f32 %v12291_v22, %v12249_v4  ;;  %v12293_v39 = vpop.f32.mrf.mxu0 }
 0x965   :  { %v12294_v19 = vadd.f32 %v12293_v39, %v12251_v37 }
 0x97d   :  { %v14724_v38 = vpop.f32.mrf.mxu0 }
 0x97f   :  { %v14725_v40 = vpop.f32.mrf.mxu0 }
 0x980   :  { %v14726_v30 = vadd.f32 %v14725_v40, %v14724_v38 }
 0x981   :  { %v14727_v18 = vpop.f32.mrf.mxu0 }
 0x982   :  { %v12917_v28 = vadd.f32 %v14726_v30, %v14643_v52 }
 0x983   :  { %v14728_v10 = vpop.f32.mrf.mxu0 }
 0x984   :  { %v14729_v42 = vadd.f32 %v14728_v10, %v14727_v18 }
 0x986   :  { %v12920_v21 = vadd.f32 %v14729_v42, %v14643_v52 }
 0x99c   :  { %v12330_v23 = vpop.f32.mrf.mxu1 }
 0x99d   :  { %v12331_v15 = vadd.f32 %v12330_v23, %v12288_v9 }
 0x99e   :  { %v12332_v5 = vpop.f32.mrf.mxu1 }
 0x99f   :  { %v12333_v53 = vadd.f32 %v12332_v5, %v12290_v55  ;;  %v12345_v24 = vmax.f32 %v12331_v15, 0.0 }
 0x9a0   :  { %v12334_v33 = vpop.f32.mrf.mxu1 }
 0x9a1   :  { %v12335_v61 = vadd.f32 %v12334_v33, %v12292_v47  ;;  %v12346_v6 = vmax.f32 %v12333_v53, 0.0 }
 0x9a2   :  { %v12336_v45 = vpop.f32.mrf.mxu1 }
 0x9a3   :  { %v12337_v49 = vadd.f32 %v12336_v45, %v12294_v19  ;;  %v12353_v46 = vmax.f32 %v12335_v61, 0.0 }
 0x9a5   :  { %v12354_v27 = vmax.f32 %v12337_v49, 0.0  ;;  %v12361_v8 = vpack.c.bf16 %v12353_v46, %v12345_v24 }
 0x9a7   :  { %v12362_v1 = vpack.c.bf16 %v12354_v27, %v12346_v6 }
 0x9a9   :  { %13037 = vmatprep.mubr.bf16.mxu1 %v12362_v1 }
 0x9aa   :  { %13038 = vmatmul.mubr.bf16.vlgmr.msra.gmra.mxu1 %v12361_v8 }
 0x9bc   :  { %v14746_v12 = vpop.f32.mrf.mxu1 }
 0x9be   :  { %v14747_v48 = vpop.f32.mrf.mxu1 }
 0x9bf   :  { %v14748_v11 = vadd.f32 %v14747_v48, %v14746_v12 }
 0x9c0   :  { %v14749_v2 = vpop.f32.mrf.mxu1 }
 0x9c1   :  { %v12958_v43 = vadd.f32 %v14748_v11, %v12917_v28 }
 0x9c2   :  { %v14750_v25 = vpop.f32.mrf.mxu1 }
 0x9c3   :  { %v14751_v32 = vadd.f32 %v14750_v25, %v14749_v2 }
 0x9c5   :  { %v12961_v36 = vadd.f32 %v14751_v32, %v12920_v21 }
 0x9ea   :  { %v14768_v7 = vpop.f32.mrf.mxu0 }
 0x9ec   :  { %v14769_v3 = vpop.f32.mrf.mxu0 }
 0x9ed   :  { %v14770_v20 = vadd.f32 %v14769_v3, %v14768_v7 }
 0x9ee   :  { %v14771_v35 = vpop.f32.mrf.mxu0 }
 0x9ef   :  { %v12999_v13 = vadd.f32 %v14770_v20, %v12958_v43 }
 0x9f0   :  { %v14772_v54 = vpop.f32.mrf.mxu0 }
 0x9f1   :  { %v14773_v62 = vadd.f32 %v14772_v54, %v14771_v35 }
 0x9f3   :  { %v13002_v26 = vadd.f32 %v14773_v62, %v12961_v36 }
 0xa6a   :  { %v14790_v57 = vpop.f32.mrf.mxu1 }
 0xa6c   :  { %v14791_v56 = vpop.f32.mrf.mxu1 }
 0xa6d   :  { %v14792_v31 = vadd.f32 %v14791_v56, %v14790_v57 }
 0xa6e   :  { %v14793_v14 = vpop.f32.mrf.mxu1 }
 0xa6f   :  { %v13040_v58 = vadd.f32 %v14792_v31, %v12999_v13 }
 0xa70   :  { %v14794_v51 = vpop.f32.mrf.mxu1 }
 0xa71   :  { %13046 = vst [vmem:[#allocation26] sm:$0xff] %v13040_v58  ;;  %v14795_v63 = vadd.f32 %v14794_v51, %v14793_v14 }
 0xa73   :  { %v13043_v44 = vadd.f32 %v14795_v63, %v13002_v26 }
 0xa75   :  { %13047 = vst [vmem:[#allocation26 + $0x8] sm:$0xff] %v13043_v44 }
 0xa76   :  { %15631 = shalt.err (!%p15628_p9)
}
 0xa77   :  { %s15681_s1 = smov 128   ;;  %s15682_s18 = smov 8  }
 0xa78   :  { %13059 = dma.vmem_to_hbm [thread:$0]  %s13054_s14, 256, %s16545_s15, [#allocation4], %s15681_s1, %s15681_s1, %s15682_s18  }
 0xa79   :  { %15656 = dma.done.wait [#allocation4], 256  }
 0xa7a   :  { %15657 = vsyncadd [#allocation4], 4294967040 }
 0xa7b   :  { %13063 = vsyncpa [#allocation3], 1 }
 0xa7c   :  { %13064 = vsyncpa [#allocation6], 1 }
 0xa7d   :  { %13065 = vsyncpa [#allocation9], 1 }
 0xa7e   :  { %13066 = vsyncpa [#allocation12], 1 }
 0xa7f   :  { %13067 = vsyncpa [#allocation15], 1 }
 0xa80   :  { %13068 = vsyncpa [#allocation18], 1 }
 0xa81   :  { %13069 = vsyncpa [#allocation21], 1 }
 0xa82   :  { %13070 = vsyncpa [#allocation24], 1 }
 0xa83   :  { %13071 = vsyncpa [#allocation4], 1 }

</bundles_post_ra>
